<compile_context>
chip_gen: v6e
topology: v6e:2x2x1
jax: 0.10.0
libtpu: 0.0.40
codegen_flags: <defaults>
</compile_context>

<pallas_src>
import jax
import jax.numpy as jnp
import numpy as np
from jax.experimental import pallas as pl
from jax.experimental.pallas import tpu as pltpu


def _round_up(v, m):
    return ((v + m - 1) // m) * m


# ----------------------------------------------------------------------------
# Kernel
# ----------------------------------------------------------------------------
def _basic_block_kernel(x_ref, w1_ref, s1_ref, b1_ref, w2_ref, s2_ref, b2_ref,
                        o_ref):
    # x_ref : (Bt, H, W, Cp)  f32   -- Bt images per grid step, channel-padded
    # w*_ref: (9*Cp, Cp)      bf16  -- 3x3 conv as im2col weight matrix
    # s*/b* : (1, Cp)         f32   -- folded BN scale / shift
    # o_ref : (Bt, H, W, Cp)  f32
    Bt, H, W, C = x_ref.shape

    def im2col(a_f32):
        """Build (Bt*H*W, 9*C) bf16 patches for a 3x3 / pad=1 / stride=1 conv.

        Halo handled in-register with shifted copies (zero fill) -- no padded
        VMEM scratch, no border re-zeroing per step.
        """
        a = a_f32.astype(jnp.bfloat16)
        zrow = jnp.zeros((Bt, 1, W, C), jnp.bfloat16)
        zcol = jnp.zeros((Bt, H, 1, C), jnp.bfloat16)
        taps = []
        for dy in (-1, 0, 1):                    # shift along H (leading dim)
            if dy == -1:
                ay = jnp.concatenate([zrow, a[:, :H - 1]], axis=1)
            elif dy == 1:
                ay = jnp.concatenate([a[:, 1:], zrow], axis=1)
            else:
                ay = a
            for dx in (-1, 0, 1):                # shift along W (sublane dim)
                if dx == -1:
                    t = jnp.concatenate([zcol, ay[:, :, :W - 1]], axis=2)
                elif dx == 1:
                    t = jnp.concatenate([ay[:, :, 1:], zcol], axis=2)
                else:
                    t = ay
                taps.append(t)
        # lane-dim concat of 128-aligned pieces -> (Bt, H, W, 9*C)
        return jnp.concatenate(taps, axis=-1).reshape(Bt * H * W, 9 * C)

    x = x_ref[...].astype(jnp.float32)

    # --- conv1 (3x3, pad=1, stride=1) + folded BN1 + ReLU --------------------
    y = jnp.dot(im2col(x), w1_ref[...], preferred_element_type=jnp.float32)
    y = y * s1_ref[...] + b1_ref[...]
    y = jnp.maximum(y, 0.0)

    # --- conv2 (3x3, pad=1, stride=1) + folded BN2 ---------------------------
    y = jnp.dot(im2col(y.reshape(Bt, H, W, C)), w2_ref[...],
                preferred_element_type=jnp.float32)
    y = y * s2_ref[...] + b2_ref[...]

    # --- residual add + ReLU (f32) -------------------------------------------
    y = jnp.maximum(y + x.reshape(Bt * H * W, C), 0.0)
    o_ref[...] = y.reshape(Bt, H, W, C).astype(o_ref.dtype)


# ----------------------------------------------------------------------------
# Wrappers
# ----------------------------------------------------------------------------
def basic_block_padded(xp, kparams, *, batch_tile):
    """One BasicBlock on channel-padded NHWC input xp: (N, H, W, Cp) f32."""
    w1, s1, b1, w2, s2, b2 = kparams
    N, H, W, Cp = xp.shape
    assert N % batch_tile == 0 and Cp % 128 == 0

    def _const_spec(shape):
        return pl.BlockSpec(shape, lambda n, _s=shape: tuple(0 for _ in _s))

    img_spec = pl.BlockSpec((batch_tile, H, W, Cp), lambda n: (n, 0, 0, 0))

    return pl.pallas_call(
        _basic_block_kernel,
        out_shape=jax.ShapeDtypeStruct((N, H, W, Cp), jnp.float32),
        grid_spec=pltpu.PrefetchScalarGridSpec(
            num_scalar_prefetch=0,
            grid=(N // batch_tile,),
            in_specs=[
                img_spec,
                _const_spec(w1.shape), _const_spec(s1.shape), _const_spec(b1.shape),
                _const_spec(w2.shape), _const_spec(s2.shape), _const_spec(b2.shape),
            ],
            out_specs=img_spec,
        ),
        compiler_params=pltpu.CompilerParams(
            dimension_semantics=("parallel",),
            vmem_limit_bytes=64 * 1024 * 1024,
        ),
    )(xp, w1, s1, b1, w2, s2, b2)


def resnet_basic_layer(x_nhwc, blocks, *, batch_tile=2):
    """A stack of identity BasicBlocks (stride=1, no downsample) on NHWC input.

    Channels are padded to a multiple of 128 once; the padded layout is carried
    across all blocks and sliced back only at the end.
    """
    N, H, W, C = x_nhwc.shape
    c_pad = max(128, _round_up(C, 128))
    xp = jnp.pad(x_nhwc.astype(jnp.float32),
                 ((0, 0), (0, 0), (0, 0), (0, c_pad - C)))
    for kparams in blocks:
        xp = basic_block_padded(xp, kparams, batch_tile=batch_tile)
    return xp[..., :C]


# ----------------------------------------------------------------------------
# Parameter preparation (fold BN, im2col-reshape + channel-pad the weights)
# ----------------------------------------------------------------------------
def fold_bn(gamma, beta, mean, var, eps=1e-5):
    s = gamma * jax.lax.rsqrt(var + eps)
    return s, beta - mean * s


def prep_block_params(conv1_oihw, bn1, conv2_oihw, bn2, c_pad, eps=1e-5):
    """Pack PyTorch-layout BasicBlock params for the kernel.

    conv*_oihw: (C, C, 3, 3) f32;  bn* = (gamma, beta, running_mean, running_var).
    Returns (w1, s1, b1, w2, s2, b2) with w*: (9*c_pad, c_pad) bf16,
    s*/b*: (1, c_pad) f32.
    """
    def prep_w(w_oihw):
        co, ci, kh, kw = w_oihw.shape
        w = jnp.transpose(w_oihw, (2, 3, 1, 0))                  # (3,3,Cin,Cout)
        w = jnp.pad(w, ((0, 0), (0, 0), (0, c_pad - ci), (0, c_pad - co)))
        return w.reshape(kh * kw * c_pad, c_pad).astype(jnp.bfloat16)

    def prep_sb(bn, c):
        s, b = fold_bn(*bn, eps=eps)
        s = jnp.pad(s, (0, c_pad - c)).reshape(1, c_pad).astype(jnp.float32)
        b = jnp.pad(b, (0, c_pad - c)).reshape(1, c_pad).astype(jnp.float32)
        return s, b

    c = conv1_oihw.shape[0]
    w1 = prep_w(conv1_oihw)
    s1, b1 = prep_sb(bn1, c)
    w2 = prep_w(conv2_oihw)
    s2, b2 = prep_sb(bn2, c)
    return (w1, s1, b1, w2, s2, b2)


# ----------------------------------------------------------------------------
# Pure-JAX reference (same bf16-matmul / f32-accumulate numerics as the kernel)
# ----------------------------------------------------------------------------
def _ref_conv3x3(a, w_oihw):
    w_hwio = jnp.transpose(w_oihw, (2, 3, 1, 0))
    return jax.lax.conv_general_dilated(
        a.astype(jnp.bfloat16), w_hwio.astype(jnp.bfloat16),
        window_strides=(1, 1), padding=((1, 1), (1, 1)),
        dimension_numbers=("NHWC", "HWIO", "NHWC"),
        preferred_element_type=jnp.float32)


def ref_basic_block(x, conv1, bn1, conv2, bn2, eps=1e-5):
    s1, b1 = fold_bn(*bn1, eps=eps)
    s2, b2 = fold_bn(*bn2, eps=eps)
    y = _ref_conv3x3(x, conv1) * s1 + b1
    y = jnp.maximum(y, 0.0)
    y = _ref_conv3x3(y, conv2) * s2 + b2
    return jnp.maximum(y + x, 0.0)


# ----------------------------------------------------------------------------
# Demo / correctness check
# ----------------------------------------------------------------------------
if __name__ == "__main__":
    key = jax.random.PRNGKey(0)
    kx, kp = jax.random.split(key)

    # Small demo shapes (NHWC): a "layer1"-style stack of 2 identity BasicBlocks.
    N, C, H, W = 4, 8, 16, 16
    batch_tile = 2
    num_blocks = 2
    eps = 1e-5

    x = jax.random.normal(kx, (N, H, W, C), jnp.float32)

    c_pad = max(128, _round_up(C, 128))
    raw_blocks, kernel_blocks = [], []
    for bk in jax.random.split(kp, num_blocks):
        k1, k2, k3, k4, k5, k6, k7, k8 = jax.random.split(bk, 8)
        conv1 = jax.random.normal(k1, (C, C, 3, 3), jnp.float32) * 0.1
        conv2 = jax.random.normal(k2, (C, C, 3, 3), jnp.float32) * 0.1
        bn1 = (1.0 + 0.1 * jax.random.normal(k3, (C,), jnp.float32),
               0.1 * jax.random.normal(k4, (C,), jnp.float32),
               0.05 * jax.random.normal(k5, (C,), jnp.float32),
               jnp.abs(1.0 + 0.1 * jax.random.normal(k6, (C,), jnp.float32)))
        bn2 = (1.0 + 0.1 * jax.random.normal(k7, (C,), jnp.float32),
               0.1 * jax.random.normal(k8, (C,), jnp.float32),
               jnp.zeros((C,), jnp.float32),
               jnp.ones((C,), jnp.float32))
        raw_blocks.append((conv1, bn1, conv2, bn2))
        kernel_blocks.append(
            prep_block_params(conv1, bn1, conv2, bn2, c_pad, eps=eps))

    out = resnet_basic_layer(x, kernel_blocks, batch_tile=batch_tile)
    out = jax.block_until_ready(out)

    ref = x
    for (conv1, bn1, conv2, bn2) in raw_blocks:
        ref = ref_basic_block(ref, conv1, bn1, conv2, bn2, eps=eps)
    ref = jax.block_until_ready(ref)

    np.testing.assert_allclose(np.asarray(out), np.asarray(ref),
                               rtol=5e-3, atol=5e-3)
    print("KERNEL_OK")
</pallas_src>

<mosaic_0001>
module attributes {stable_mosaic.version = 11 : i64} {
  func.func @_basic_block_kernel(%arg0: i32, %arg1: memref<2x16x16x128xf32, #tpu.memory_space<vmem>>, %arg2: memref<1152x128xbf16, #tpu.memory_space<vmem>>, %arg3: memref<1x128xf32, #tpu.memory_space<vmem>>, %arg4: memref<1x128xf32, #tpu.memory_space<vmem>>, %arg5: memref<1152x128xbf16, #tpu.memory_space<vmem>>, %arg6: memref<1x128xf32, #tpu.memory_space<vmem>>, %arg7: memref<1x128xf32, #tpu.memory_space<vmem>>, %arg8: memref<2x16x16x128xf32, #tpu.memory_space<vmem>>) attributes {dimension_semantics = [#tpu.dimension_semantics<parallel>], iteration_bounds = array<i64: 2>, scalar_prefetch = 0 : i64, scratch_operands = 0 : i64, tpu.core_type = #tpu.core_type<tc>, window_params = [{transform_indices = @transform_0, window_bounds = array<i64: 2, 16, 16, 128>}, {pipeline_mode = #tpu.pipeline_mode<synchronous>, transform_indices = @transform_1, window_bounds = array<i64: 1152, 128>}, {pipeline_mode = #tpu.pipeline_mode<synchronous>, transform_indices = @transform_2, window_bounds = array<i64: 1, 128>}, {pipeline_mode = #tpu.pipeline_mode<synchronous>, transform_indices = @transform_3, window_bounds = array<i64: 1, 128>}, {pipeline_mode = #tpu.pipeline_mode<synchronous>, transform_indices = @transform_4, window_bounds = array<i64: 1152, 128>}, {pipeline_mode = #tpu.pipeline_mode<synchronous>, transform_indices = @transform_5, window_bounds = array<i64: 1, 128>}, {pipeline_mode = #tpu.pipeline_mode<synchronous>, transform_indices = @transform_6, window_bounds = array<i64: 1, 128>}, {transform_indices = @transform_7, window_bounds = array<i64: 2, 16, 16, 128>}]} {
    %c0 = arith.constant 0 : index
    %c0_0 = arith.constant 0 : index
    %c0_1 = arith.constant 0 : index
    %c0_2 = arith.constant 0 : index
    %0 = vector.load %arg1[%c0, %c0_0, %c0_1, %c0_2] : memref<2x16x16x128xf32, #tpu.memory_space<vmem>>, vector<2x16x16x128xf32>
    %1 = arith.truncf %0 : vector<2x16x16x128xf32> to vector<2x16x16x128xbf16>
    %cst = arith.constant 0.000000e+00 : bf16
    %2 = vector.broadcast %cst : bf16 to vector<2x1x16x128xbf16>
    %cst_3 = arith.constant 0.000000e+00 : bf16
    %3 = vector.broadcast %cst_3 : bf16 to vector<2x16x1x128xbf16>
    %4 = vector.extract_strided_slice %1 {offsets = [0, 0, 0, 0], sizes = [2, 15, 16, 128], strides = [1, 1, 1, 1]} : vector<2x16x16x128xbf16> to vector<2x15x16x128xbf16>
    %5 = tpu.concatenate %2, %4 in 1 : vector<2x1x16x128xbf16>, vector<2x15x16x128xbf16> -> vector<2x16x16x128xbf16>
    %6 = vector.extract_strided_slice %5 {offsets = [0, 0, 0, 0], sizes = [2, 16, 15, 128], strides = [1, 1, 1, 1]} : vector<2x16x16x128xbf16> to vector<2x16x15x128xbf16>
    %7 = tpu.concatenate %3, %6 in 2 : vector<2x16x1x128xbf16>, vector<2x16x15x128xbf16> -> vector<2x16x16x128xbf16>
    %8 = vector.extract_strided_slice %5 {offsets = [0, 0, 1, 0], sizes = [2, 16, 15, 128], strides = [1, 1, 1, 1]} : vector<2x16x16x128xbf16> to vector<2x16x15x128xbf16>
    %9 = tpu.concatenate %8, %3 in 2 : vector<2x16x15x128xbf16>, vector<2x16x1x128xbf16> -> vector<2x16x16x128xbf16>
    %10 = vector.extract_strided_slice %1 {offsets = [0, 0, 0, 0], sizes = [2, 16, 15, 128], strides = [1, 1, 1, 1]} : vector<2x16x16x128xbf16> to vector<2x16x15x128xbf16>
    %11 = tpu.concatenate %3, %10 in 2 : vector<2x16x1x128xbf16>, vector<2x16x15x128xbf16> -> vector<2x16x16x128xbf16>
    %12 = vector.extract_strided_slice %1 {offsets = [0, 0, 1, 0], sizes = [2, 16, 15, 128], strides = [1, 1, 1, 1]} : vector<2x16x16x128xbf16> to vector<2x16x15x128xbf16>
    %13 = tpu.concatenate %12, %3 in 2 : vector<2x16x15x128xbf16>, vector<2x16x1x128xbf16> -> vector<2x16x16x128xbf16>
    %14 = vector.extract_strided_slice %1 {offsets = [0, 1, 0, 0], sizes = [2, 15, 16, 128], strides = [1, 1, 1, 1]} : vector<2x16x16x128xbf16> to vector<2x15x16x128xbf16>
    %15 = tpu.concatenate %14, %2 in 1 : vector<2x15x16x128xbf16>, vector<2x1x16x128xbf16> -> vector<2x16x16x128xbf16>
    %16 = vector.extract_strided_slice %15 {offsets = [0, 0, 0, 0], sizes = [2, 16, 15, 128], strides = [1, 1, 1, 1]} : vector<2x16x16x128xbf16> to vector<2x16x15x128xbf16>
    %17 = tpu.concatenate %3, %16 in 2 : vector<2x16x1x128xbf16>, vector<2x16x15x128xbf16> -> vector<2x16x16x128xbf16>
    %18 = vector.extract_strided_slice %15 {offsets = [0, 0, 1, 0], sizes = [2, 16, 15, 128], strides = [1, 1, 1, 1]} : vector<2x16x16x128xbf16> to vector<2x16x15x128xbf16>
    %19 = tpu.concatenate %18, %3 in 2 : vector<2x16x15x128xbf16>, vector<2x16x1x128xbf16> -> vector<2x16x16x128xbf16>
    %20 = tpu.concatenate %7, %5, %9, %11, %1, %13, %17, %15, %19 in 3 : vector<2x16x16x128xbf16>, vector<2x16x16x128xbf16>, vector<2x16x16x128xbf16>, vector<2x16x16x128xbf16>, vector<2x16x16x128xbf16>, vector<2x16x16x128xbf16>, vector<2x16x16x128xbf16>, vector<2x16x16x128xbf16>, vector<2x16x16x128xbf16> -> vector<2x16x16x1152xbf16>
    %21 = vector.shape_cast %20 : vector<2x16x16x1152xbf16> to vector<512x1152xbf16>
    %c0_4 = arith.constant 0 : index
    %c0_5 = arith.constant 0 : index
    %22 = vector.load %arg2[%c0_4, %c0_5] : memref<1152x128xbf16, #tpu.memory_space<vmem>>, vector<1152x128xbf16>
    %cst_6 = arith.constant dense<0.000000e+00> : vector<512x128xf32>
    %23 = tpu.matmul %21, %22, %cst_6 {dimension_numbers = #tpu.dot_dimension_numbers<[1], [0], [0], [1], [0, 0, 1, 1], [], []>} : vector<512x1152xbf16>, vector<1152x128xbf16>, vector<512x128xf32> -> vector<512x128xf32>
    %c0_7 = arith.constant 0 : index
    %c0_8 = arith.constant 0 : index
    %24 = vector.load %arg3[%c0_7, %c0_8] : memref<1x128xf32, #tpu.memory_space<vmem>>, vector<1x128xf32>
    %25 = vector.broadcast %24 : vector<1x128xf32> to vector<512x128xf32>
    %26 = arith.mulf %23, %25 : vector<512x128xf32>
    %c0_9 = arith.constant 0 : index
    %c0_10 = arith.constant 0 : index
    %27 = vector.load %arg4[%c0_9, %c0_10] : memref<1x128xf32, #tpu.memory_space<vmem>>, vector<1x128xf32>
    %28 = vector.broadcast %27 : vector<1x128xf32> to vector<512x128xf32>
    %29 = arith.addf %26, %28 : vector<512x128xf32>
    %cst_11 = arith.constant 0.000000e+00 : f32
    %30 = vector.broadcast %cst_11 : f32 to vector<512x128xf32>
    %31 = arith.maximumf %29, %30 : vector<512x128xf32>
    %32 = vector.shape_cast %31 : vector<512x128xf32> to vector<2x16x16x128xf32>
    %33 = arith.truncf %32 : vector<2x16x16x128xf32> to vector<2x16x16x128xbf16>
    %cst_12 = arith.constant 0.000000e+00 : bf16
    %34 = vector.broadcast %cst_12 : bf16 to vector<2x1x16x128xbf16>
    %cst_13 = arith.constant 0.000000e+00 : bf16
    %35 = vector.broadcast %cst_13 : bf16 to vector<2x16x1x128xbf16>
    %36 = vector.extract_strided_slice %33 {offsets = [0, 0, 0, 0], sizes = [2, 15, 16, 128], strides = [1, 1, 1, 1]} : vector<2x16x16x128xbf16> to vector<2x15x16x128xbf16>
    %37 = tpu.concatenate %34, %36 in 1 : vector<2x1x16x128xbf16>, vector<2x15x16x128xbf16> -> vector<2x16x16x128xbf16>
    %38 = vector.extract_strided_slice %37 {offsets = [0, 0, 0, 0], sizes = [2, 16, 15, 128], strides = [1, 1, 1, 1]} : vector<2x16x16x128xbf16> to vector<2x16x15x128xbf16>
    %39 = tpu.concatenate %35, %38 in 2 : vector<2x16x1x128xbf16>, vector<2x16x15x128xbf16> -> vector<2x16x16x128xbf16>
    %40 = vector.extract_strided_slice %37 {offsets = [0, 0, 1, 0], sizes = [2, 16, 15, 128], strides = [1, 1, 1, 1]} : vector<2x16x16x128xbf16> to vector<2x16x15x128xbf16>
    %41 = tpu.concatenate %40, %35 in 2 : vector<2x16x15x128xbf16>, vector<2x16x1x128xbf16> -> vector<2x16x16x128xbf16>
    %42 = vector.extract_strided_slice %33 {offsets = [0, 0, 0, 0], sizes = [2, 16, 15, 128], strides = [1, 1, 1, 1]} : vector<2x16x16x128xbf16> to vector<2x16x15x128xbf16>
    %43 = tpu.concatenate %35, %42 in 2 : vector<2x16x1x128xbf16>, vector<2x16x15x128xbf16> -> vector<2x16x16x128xbf16>
    %44 = vector.extract_strided_slice %33 {offsets = [0, 0, 1, 0], sizes = [2, 16, 15, 128], strides = [1, 1, 1, 1]} : vector<2x16x16x128xbf16> to vector<2x16x15x128xbf16>
    %45 = tpu.concatenate %44, %35 in 2 : vector<2x16x15x128xbf16>, vector<2x16x1x128xbf16> -> vector<2x16x16x128xbf16>
    %46 = vector.extract_strided_slice %33 {offsets = [0, 1, 0, 0], sizes = [2, 15, 16, 128], strides = [1, 1, 1, 1]} : vector<2x16x16x128xbf16> to vector<2x15x16x128xbf16>
    %47 = tpu.concatenate %46, %34 in 1 : vector<2x15x16x128xbf16>, vector<2x1x16x128xbf16> -> vector<2x16x16x128xbf16>
    %48 = vector.extract_strided_slice %47 {offsets = [0, 0, 0, 0], sizes = [2, 16, 15, 128], strides = [1, 1, 1, 1]} : vector<2x16x16x128xbf16> to vector<2x16x15x128xbf16>
    %49 = tpu.concatenate %35, %48 in 2 : vector<2x16x1x128xbf16>, vector<2x16x15x128xbf16> -> vector<2x16x16x128xbf16>
    %50 = vector.extract_strided_slice %47 {offsets = [0, 0, 1, 0], sizes = [2, 16, 15, 128], strides = [1, 1, 1, 1]} : vector<2x16x16x128xbf16> to vector<2x16x15x128xbf16>
    %51 = tpu.concatenate %50, %35 in 2 : vector<2x16x15x128xbf16>, vector<2x16x1x128xbf16> -> vector<2x16x16x128xbf16>
    %52 = tpu.concatenate %39, %37, %41, %43, %33, %45, %49, %47, %51 in 3 : vector<2x16x16x128xbf16>, vector<2x16x16x128xbf16>, vector<2x16x16x128xbf16>, vector<2x16x16x128xbf16>, vector<2x16x16x128xbf16>, vector<2x16x16x128xbf16>, vector<2x16x16x128xbf16>, vector<2x16x16x128xbf16>, vector<2x16x16x128xbf16> -> vector<2x16x16x1152xbf16>
    %53 = vector.shape_cast %52 : vector<2x16x16x1152xbf16> to vector<512x1152xbf16>
    %c0_14 = arith.constant 0 : index
    %c0_15 = arith.constant 0 : index
    %54 = vector.load %arg5[%c0_14, %c0_15] : memref<1152x128xbf16, #tpu.memory_space<vmem>>, vector<1152x128xbf16>
    %cst_16 = arith.constant dense<0.000000e+00> : vector<512x128xf32>
    %55 = tpu.matmul %53, %54, %cst_16 {dimension_numbers = #tpu.dot_dimension_numbers<[1], [0], [0], [1], [0, 0, 1, 1], [], []>} : vector<512x1152xbf16>, vector<1152x128xbf16>, vector<512x128xf32> -> vector<512x128xf32>
    %c0_17 = arith.constant 0 : index
    %c0_18 = arith.constant 0 : index
    %56 = vector.load %arg6[%c0_17, %c0_18] : memref<1x128xf32, #tpu.memory_space<vmem>>, vector<1x128xf32>
    %57 = vector.broadcast %56 : vector<1x128xf32> to vector<512x128xf32>
    %58 = arith.mulf %55, %57 : vector<512x128xf32>
    %c0_19 = arith.constant 0 : index
    %c0_20 = arith.constant 0 : index
    %59 = vector.load %arg7[%c0_19, %c0_20] : memref<1x128xf32, #tpu.memory_space<vmem>>, vector<1x128xf32>
    %60 = vector.broadcast %59 : vector<1x128xf32> to vector<512x128xf32>
    %61 = arith.addf %58, %60 : vector<512x128xf32>
    %62 = vector.shape_cast %0 : vector<2x16x16x128xf32> to vector<512x128xf32>
    %63 = arith.addf %61, %62 : vector<512x128xf32>
    %cst_21 = arith.constant 0.000000e+00 : f32
    %64 = vector.broadcast %cst_21 : f32 to vector<512x128xf32>
    %65 = arith.maximumf %63, %64 : vector<512x128xf32>
    %66 = vector.shape_cast %65 : vector<512x128xf32> to vector<2x16x16x128xf32>
    %c0_22 = arith.constant 0 : index
    %c0_23 = arith.constant 0 : index
    %c0_24 = arith.constant 0 : index
    %c0_25 = arith.constant 0 : index
    %67 = vector.load %arg8[%c0_22, %c0_23, %c0_24, %c0_25] : memref<2x16x16x128xf32, #tpu.memory_space<vmem>>, vector<2x16x16x128xf32>
    tpu.vector_store %arg8[%c0_22, %c0_23, %c0_24, %c0_25], %66 {strides = array<i32>} : memref<2x16x16x128xf32, #tpu.memory_space<vmem>>, vector<2x16x16x128xf32>,
    return
  }
  func.func @transform_0(%arg0: i32) -> (i32, i32, i32, i32) {
    %c0_i32 = arith.constant 0 : i32
    %c0_i32_0 = arith.constant 0 : i32
    %c0_i32_1 = arith.constant 0 : i32
    %c0_i32_2 = arith.constant 0 : i32
    return %arg0, %c0_i32, %c0_i32_0, %c0_i32_1 : i32, i32, i32, i32
  }
  func.func @transform_1(%arg0: i32) -> (i32, i32) {
    %c0_i32 = arith.constant 0 : i32
    %c0_i32_0 = arith.constant 0 : i32
    %c0_i32_1 = arith.constant 0 : i32
    return %c0_i32, %c0_i32_0 : i32, i32
  }
  func.func @transform_2(%arg0: i32) -> (i32, i32) {
    %c0_i32 = arith.constant 0 : i32
    %c0_i32_0 = arith.constant 0 : i32
    %c0_i32_1 = arith.constant 0 : i32
    return %c0_i32, %c0_i32_0 : i32, i32
  }
  func.func @transform_3(%arg0: i32) -> (i32, i32) {
    %c0_i32 = arith.constant 0 : i32
    %c0_i32_0 = arith.constant 0 : i32
    %c0_i32_1 = arith.constant 0 : i32
    return %c0_i32, %c0_i32_0 : i32, i32
  }
  func.func @transform_4(%arg0: i32) -> (i32, i32) {
    %c0_i32 = arith.constant 0 : i32
    %c0_i32_0 = arith.constant 0 : i32
    %c0_i32_1 = arith.constant 0 : i32
    return %c0_i32, %c0_i32_0 : i32, i32
  }
  func.func @transform_5(%arg0: i32) -> (i32, i32) {
    %c0_i32 = arith.constant 0 : i32
    %c0_i32_0 = arith.constant 0 : i32
    %c0_i32_1 = arith.constant 0 : i32
    return %c0_i32, %c0_i32_0 : i32, i32
  }
  func.func @transform_6(%arg0: i32) -> (i32, i32) {
    %c0_i32 = arith.constant 0 : i32
    %c0_i32_0 = arith.constant 0 : i32
    %c0_i32_1 = arith.constant 0 : i32
    return %c0_i32, %c0_i32_0 : i32, i32
  }
  func.func @transform_7(%arg0: i32) -> (i32, i32, i32, i32) {
    %c0_i32 = arith.constant 0 : i32
    %c0_i32_0 = arith.constant 0 : i32
    %c0_i32_1 = arith.constant 0 : i32
    %c0_i32_2 = arith.constant 0 : i32
    return %arg0, %c0_i32, %c0_i32_0, %c0_i32_1 : i32, i32, i32, i32
  }
}

</mosaic_0001>

<bundles_post_ra>
// kernel: tpu_custom_call.1
= control target key start
LH: loop header
LB: loop body
LE: loop exit
PB: predicated region body
PF: predicated region fallthrough
CT: control target
= control target key end

     0   :  { %s9949_s0 = inlined_call_operand.hbm [shape: f32[4,16,16,128], index: 0, kind: input, shape index: {}]   ;;  %s9950_s1 = inlined_call_operand.hbm [shape: bf16[1152,128], index: 1, kind: input, shape index: {}]   ;;  %s9951_s2 = inlined_call_operand.vmem [shape: f32[1,128], index: 2, kind: input, shape index: {}]   ;;  %s9952_s3 = inlined_call_operand.vmem [shape: f32[1,128], index: 3, kind: input, shape index: {}]   ;;  %s9953_s4 = inlined_call_operand.hbm [shape: bf16[1152,128], index: 4, kind: input, shape index: {}]   ;;  %s9954_s5 = inlined_call_operand.vmem [shape: f32[1,128], index: 5, kind: input, shape index: {}]   ;;  %s9955_s6 = inlined_call_operand.vmem [shape: f32[1,128], index: 6, kind: input, shape index: {}]   ;;  %s9956_s7 = inlined_call_operand.hbm [shape: f32[4,16,16,128], index: 7, kind: output, shape index: {}]  }
   0x1   :  { %10160 = sst [smem:[#allocation86_spill]] %s9950_s1 }
   0x2   :  { %12 = vsyncpa [#allocation3], 0 }
   0x3   :  { %14 = vsyncpa [#allocation3 + $0x1], 0 }
   0x4   :  { %15 = vsyncpa [#allocation6], 0 }
   0x5   :  { %16 = vsyncpa [#allocation4], 0 }
   0x6   :  { %18 = vsyncpa [#allocation4 + $0x1], 0  ;;  %s6895_s24 = smov 0   ;;  %s6897_s25 = smov 0  }
   0x7   :  { %s6899_s26 = smov 0   ;;  %s6901_s27 = smov 0  }
   0x8 LB: > { %s6916_s28 = sadd.s32 4294967295, %s6842_s27   ;;  %s5998_s29 = sadd.s32 4294967294, %s6842_s27   ;;  %s6842_s27 = sphi %s6901_s27, %s10723_s27   ;;  %s6838_s26 = sphi %s6899_s26, %s10722_s26   ;;  %s6834_s25 = sphi %s6897_s25, %s10721_s25   ;;  %s6830_s24 = sphi %s6895_s24, %s10720_s24  }
   0x9   : > { %p44_p0 = scmp.ne.s32.totalorder %s6834_s25, %s6830_s24  ;;  %p9957_p1 = scmp.eq.s32.totalorder %s6916_s28, 0 }
   0xa   : > { %p200_p3 = scmp.eq.s32.totalorder %s5998_s29, 1  ;;  %p5999_p5 = scmp.ge.s32.totalorder %s6842_s27, 1 }
   0xb   : > { %p6925_p4 = por %p9957_p1, %p44_p0  ;;  %p207_p7 = scmp.lt.s32.totalorder %s6842_s27, 3 }
   0xc   : > { %p6930_p6 = por %p200_p3, %p44_p0  ;;  %s6844_s10 = smov [#allocation5]  }
   0xd   : > { %s10161_s30 = scalar_select %p6925_p4, 1, 0 }
   0xe   : > { %s10162_s8 = scalar_select %p6930_p6, 1, 0 }
   0xf   : > { %p6935_p8 = pnand %p5999_p5, %p207_p7  ;;  %s219_s11 = sshll.u32 %s6844_s10, 4  ;;  %s220_s11 = int_to_ptr.vmem [resolvable:$true] %s219_s11 }
  0x10   : > { %s6845_s13 = smov [#allocation7]   ;;  %s6705_s15 = scalar_lea.vmem %s220_s11, 9216 }
  0x11   : > { %s10163_s9 = scalar_select %p6935_p8, 1, 0 }
  0x12   : > { %p6422_p9 = pneg %p6935_p8  ;;  %s238_s14 = sshll.u32 %s6845_s13, 4  ;;  %s239_s14 = int_to_ptr.vmem [resolvable:$true] %s238_s14 }
  0x13   : > { %p6706_p13 = scmp.ne.s32.totalorder %s220_s11, %s6705_s15  ;;  %p6713_p5 = scmp.lt.s32.totalorder %s220_s11, %s220_s11 }
  0x14   : > { %p6944_p11 = pnand %p6422_p9, %p9957_p1  ;;  %p6714_p7 = scmp.lt.s32.totalorder %s6705_s15, %s6705_s15 }
  0x16   : > { %p6696_p12 = pneg %p6944_p11  ;;  %p6715_p10 = por %p6714_p7, %p6713_p5 }
  0x18   : > { %p6708_p0 = pnand %p6706_p13, %p6696_p12 }
  0x1a   : > { %p6709_p3 = pneg %p6708_p0 }
  0x1c   : > { %p6716_p9 = pnand %p6715_p10, %p6709_p3 }
  0x1e   : > { %6719 = shalt.err (!%p6716_p9)
}
  0x1f   : > { %s6846_s16 = smov 64   ;;  %s6847_s17 = smov 4  }
  0x20   : > { %s10165_s1 = sld [smem:[#allocation86_spill]]  ;;  %s6731_s20 = scalar_lea.vmem %s239_s14, 9216 }
  0x21   : > { %p6732_p1 = scmp.ne.s32.totalorder %s239_s14, %s6731_s20  ;;  %p6739_p2 = scmp.lt.s32.totalorder %s239_s14, %s239_s14 }
  0x22   : > { %p6740_p6 = scmp.lt.s32.totalorder %s6731_s20, %s6731_s20 }
  0x23   : > { %p6734_p13 = pnand %p6732_p1, %p6696_p12 }
  0x24   : > { %p6741_p5 = por %p6740_p6, %p6739_p2 }
  0x25   : > { %p6735_p0 = pneg %p6734_p13 }
  0x26   : > { %6425 = dma.hbm_to_vmem [thread:$0]  (!%p6944_p11), %s10165_s1, 9216, %s220_s11, [#allocation6], %s6846_s16, %s6846_s16, %s6847_s17  }
  0x27   : > { %p6742_p10 = pnand %p6741_p5, %p6735_p0 }
  0x29   : > { %6745 = shalt.err (!%p6742_p10)
}
  0x2a   : > { %6428 = dma.hbm_to_vmem [thread:$0]  (!%p6944_p11), %s9953_s4, 9216, %s239_s14, [#allocation6], %s6846_s16, %s6846_s16, %s6847_s17  }
  0x2b   : > { %s6967_s23 = sadd.s32 1, %s6842_s27   ;;  %s31_s29 = sadd.s32 1, %s6838_s26 }
  0x2c   : > { %s28_s10 = ssub.s32 %s6842_s27, %s6967_s23  ;;  %p38_p1 = scmp.ne.s32.totalorder %s6838_s26, %s6834_s25 }
  0x2d   : > { %p29_p2 = scmp.eq.s32.totalorder %s28_s10, 0  ;;  %p39_p6 = scmp.eq.s32.totalorder %s6842_s27, 0 }
  0x2e   : > { %p10166_p12 = scmp.eq.s32.totalorder %s6916_s28, 1  ;;  %p6439_p7 = scmp.lt.s32.totalorder %s6842_s27, 2 }
  0x2f   : > { %s6983_s12 = scalar_select %p29_p2, %s6838_s26, %s31_s29  }
  0x30   : > { %p6977_p3 = por %p10166_p12, %p38_p1  ;;  %p40_p9 = por %p39_p6, %p38_p1 }
  0x31   : > { %s258_s13 = sand.u32 1, %s6838_s26   ;;  %s6167_s14 = sshll.u32 %s6842_s27, 13 }
  0x32   : > { %s10167_s11 = scalar_select %p6977_p3, 1, 0 }
  0x33   : > { %s6003_s15 = sshll.u32 %s258_s13, 9  ;;  %s6990_s18 = scalar_lea.hbm %s9949_s0, %s6167_s14 }
  0x34   : > { %s262_s19 = scalar_lea.vmem [#allocation2], %s6003_s15  ;;  %p6994_p11 = pnand %p6439_p7, %p40_p9 }
  0x35   : > { %s270_s20 = sshll.u32 %s262_s19, 4  ;;  %s6998_s22 = scalar_lea.sflag [#allocation3], %s258_s13  ;;  %s6992_s20 = int_to_ptr.vmem [resolvable:$true] %s270_s20 }
  0x36   : > { %s6746_s29 = scalar_lea.hbm %s6990_s18, 8192  ;;  %p6748_p0 = pneg %p6994_p11 }
  0x37   : > { %p6747_p13 = scmp.ne.s32.totalorder %s6990_s18, %s6746_s29  ;;  %s6751_s15 = scalar_lea.hbm %s9949_s0, 16384 }
  0x38   : > { %p6752_p1 = scmp.lt.s32.totalorder %s6990_s18, %s9949_s0  ;;  %p6753_p2 = scmp.lt.s32.totalorder %s6751_s15, %s6746_s29 }
  0x39   : > { %p6749_p5 = pnand %p6748_p0, %p6747_p13 }
  0x3a   : > { %p6754_p6 = por %p6753_p2, %p6752_p1 }
  0x3b   : > { %p6750_p10 = pneg %p6749_p5 }
  0x3d   : > { %p6755_p12 = pnand %p6754_p6, %p6750_p10 }
  0x3f   : > { %6758 = shalt.err (!%p6755_p12)
}
  0x40   : > { %s6759_s13 = scalar_lea.vmem %s6992_s20, 8192  ;;  %s6848_s19 = smov [#allocation2]  }
  0x41   : > { %p6760_p7 = scmp.ne.s32.totalorder %s6992_s20, %s6759_s13  ;;  %s6764_s1 = sshll.u32 %s6848_s19, 4  ;;  %s6765_s1 = int_to_ptr.vmem [resolvable:$false] %s6764_s1 }
  0x42   : > { %s6766_s10 = scalar_lea.vmem %s6765_s1, 16384  ;;  %p6767_p5 = scmp.lt.s32.totalorder %s6992_s20, %s6765_s1 }
  0x43   : > { %p6762_p9 = pnand %p6760_p7, %p6748_p0  ;;  %p6768_p3 = scmp.lt.s32.totalorder %s6766_s10, %s6759_s13 }
  0x45   : > { %p6763_p13 = pneg %p6762_p9  ;;  %p6769_p4 = por %p6768_p3, %p6767_p5 }
  0x47   : > { %p6770_p8 = pnand %p6769_p4, %p6763_p13 }
  0x49   : > { %6773 = shalt.err (!%p6770_p8)
}
  0x4a   : > { %s6849_s29 = smov 128   ;;  %s6850_s14 = smov 8  }
  0x4b   : > { %6432 = dma.hbm_to_vmem [thread:$0]  (!%p6994_p11), %s6990_s18, 8192, %s6992_s20, %s6998_s22, %s6849_s29, %s6849_s29, %s6850_s14  }
  0x4c   : > { %p10169_p0 = scmp.ne.s32.totalorder %s10163_s9, 0 }
  0x4e   : > { %282 = sbr.rel (%p10169_p0) target bundleno = 1731 (0x6c3), region = 48 }
  0x53   : > { %s7022_s15 = sand.u32 1, %s6834_s25   ;;  %p10170_p4 = scmp.ne.s32.totalorder %s10161_s30, 0 }
  0x54   : > { %s6008_s1 = sshll.u32 %s7022_s15, 9  ;;  %s285_s16 = scalar_lea.sflag [#allocation3], %s7022_s15 }
  0x55   : > { %s7028_s17 = scalar_lea.vmem [#allocation2], %s6008_s1 }
  0x56   : > { %6817 = dma.done.wait (%p10170_p4), %s285_s16, 8192  }
  0x57   : > { %6819 = vsyncadd (%p10170_p4), %s285_s16, 4294959104  ;;  %p10171_p8 = scmp.eq.s32.totalorder %s6916_s28, 0 }
  0x59   : > { %6821 = dma.done.wait (%p10171_p8), [#allocation6], 18432   ;;  %p10172_p3 = pmov %p10171_p8 }
  0x5a   : > { %v9976_v0 = vmov 0   ;;  %v6484_v1 = vld [vmem:[#allocation5 + $0x38] sm:$0xff]   ;;  %v6486_v3 = vld [vmem:[#allocation5 + $0x30] sm:$0xff]   ;;  %v6488_v5 = vld [vmem:[#allocation5 + $0x28] sm:$0xff]   ;;  %vm674_vm0 = vcmask 1040384   ;;  %v10173_v27 = vmov 0 }
  0x5b   : > { %6823 = vsyncadd (%p10172_p3), [#allocation6], 4294948864  ;;  %1437 = vmatprep.subr.bf16.mxu0 %v9976_v0  ;;  %1726 = vmatprep.subr.bf16.mxu1 %v9976_v0  ;;  %v6485_v2 = vld [vmem:[#allocation5 + $0xb8] sm:$0xff]   ;;  %v6487_v4 = vld [vmem:[#allocation5 + $0xb0] sm:$0xff]   ;;  %vm675_vm1 = vsmask.f32 256 }
  0x5c   : > { %1469 = vmatprep.mubr.bf16.mxu0 %v9976_v0  ;;  %1438 = vmatpush1.bf16.msra.mxu0 %v6484_v1  ;;  %v6489_v6 = vld [vmem:[#allocation5 + $0xa8] sm:$0xff]   ;;  %v6490_v7 = vld [vmem:[#allocation5 + $0x20] sm:$0xff]   ;;  %v6492_v9 = vld [vmem:[#allocation5 + $0x18] sm:$0xff]   ;;  %vm801_vm3 = vcmask 1047552   ;;  %vm802_vm4 = vsmask.f32 7424 }
  0x5d   : > { %1727 = vmatpush1.bf16.msra.mxu1 %v6485_v2  ;;  %1439 = vmatprep.subr.bf16.mxu0 %v9976_v0  ;;  %v6491_v8 = vld [vmem:[#allocation5 + $0xa0] sm:$0xff]   ;;  %v6493_v10 = vld [vmem:[#allocation5 + $0x98] sm:$0xff]   ;;  %v6494_v11 = vld [vmem:[#allocation5 + $0x10] sm:$0xff]   ;;  %v429_v50 = vrot.slane %v9976_v0, 7  ;;  %v708_v52 = vrot.slane %v9976_v0, 1  ;;  %s9591_s30 = scalar_lea.vmem [#allocation8], %s6008_s1 }
  0x5e   : > { %1728 = vmatprep.subr.bf16.mxu1 %v9976_v0  ;;  %v6495_v12 = vld [vmem:[#allocation5 + $0x90] sm:$0xff]   ;;  %v6496_v13 = vld [vmem:[#allocation5 + $0x8] sm:$0xff]   ;;  %v6498_v15 = vld [vmem:[#allocation5] sm:$0xff]   ;;  %s6169_s1 = sshll.u32 %s6916_s28, 13  ;;  %s5906_s9 = sshll.u32 %s9591_s30, 4  ;;  %s9904_s9 = int_to_ptr.vmem [resolvable:$true] %s5906_s9 }
  0x5f   : > { %v6497_v14 = vld [vmem:[#allocation5 + $0x88] sm:$0xff]   ;;  %v6499_v16 = vld [vmem:[#allocation5 + $0x80] sm:$0xff]   ;;  %v6500_v17 = vld [vmem:[#allocation5 + $0x78] sm:$0xff]   ;;  %s9902_s21 = scalar_lea.hbm %s9956_s7, %s6169_s1  ;;  %s5892_s22 = scalar_lea.sflag [#allocation4], %s7022_s15 }
  0x60   : > { %1440 = vmatpush1.bf16.msra.mxu0 %v6486_v3  ;;  %v6501_v18 = vld [vmem:[#allocation5 + $0xf8] sm:$0xff]   ;;  %v330_v19 = vld [vmem:[%s7028_s17] sm:$0xff]  ;;  %v331_v20 = vld [vmem:[%s7028_s17 + $0x8] sm:$0xff]  ;;  %s6774_s28 = scalar_lea.vmem %s9904_s9, 8192  ;;  %p10717_p10 = scmp.ne.s32.totalorder %s10167_s11, 0 }
  0x61   : > { %1729 = vmatpush1.bf16.msra.mxu1 %v6487_v4  ;;  %1441 = vmatprep.subr.bf16.mxu0 %v9976_v0  ;;  %v7059_v21 = vpack.c.bf16 %v331_v20, %v330_v19  ;;  %v6502_v22 = vld [vmem:[#allocation5 + $0x70] sm:$0xff]   ;;  %vm7067_vm2 = vmand %vm674_vm0, %vm675_vm1  ;;  %v6504_v28 = vld [vmem:[#allocation5 + $0x68] sm:$0xff]   ;;  %p6775_p11 = scmp.ne.s32.totalorder %s9904_s9, %s6774_s28 }
  0x62   : > { %1730 = vmatprep.subr.bf16.mxu1 %v9976_v0  ;;  %v6503_v23 = vld [vmem:[#allocation5 + $0xf0] sm:$0xff]   ;;  %v10174_v27 = vsel %vm7067_vm2, 4294967295, %v10173_v27  ;;  %v6505_v29 = vld [vmem:[#allocation5 + $0xe8] sm:$0xff]   ;;  %v6506_v32 = vld [vmem:[#allocation5 + $0x60] sm:$0xff]   ;;  %v7113_v58 = vsel %vm7067_vm2, 0, %v429_v50 }
  0x63   : > { %v434_v24 = vshrl.u32 %v7059_v21, 16  ;;  %v437_v25 = vshll.u32 %v7059_v21, 16  ;;  %10175 = vst [vmem:[#allocation12_spill] sm:$0xff] %v10174_v27  ;;  %v6507_v33 = vld [vmem:[#allocation5 + $0xe0] sm:$0xff]   ;;  %v332_v34 = vld [vmem:[%s7028_s17 + $0x10] sm:$0xff]  ;;  %v333_v35 = vld [vmem:[%s7028_s17 + $0x18] sm:$0xff]  ;;  %p6776_p1 = pnand %p6775_p11, %p10717_p10 }
  0x64   : > { %1442 = vmatpush1.bf16.msra.mxu0 %v6488_v5  ;;  %v6508_v36 = vld [vmem:[#allocation5 + $0x58] sm:$0xff]   ;;  %v7086_v38 = vpack.c.bf16 %v333_v35, %v332_v34  ;;  %v6510_v39 = vld [vmem:[#allocation5 + $0x50] sm:$0xff]   ;;  %v334_v42 = vld [vmem:[%s7028_s17 + $0x20] sm:$0xff]  ;;  %10178 = vst [vmem:[#allocation13_spill] sm:$0xff] %v7113_v58 }
  0x65   : > { %1731 = vmatpush1.bf16.msra.mxu1 %v6489_v6  ;;  %1443 = vmatprep.subr.bf16.mxu0 %v9976_v0  ;;  %v436_v26 = vrot.slane %v434_v24, 7  ;;  %v6509_v37 = vld [vmem:[#allocation5 + $0xd8] sm:$0xff]   ;;  %v6511_v40 = vld [vmem:[#allocation5 + $0xd0] sm:$0xff]   ;;  %v335_v43 = vld [vmem:[%s7028_s17 + $0x28] sm:$0xff]  ;;  %v710_v61 = vrot.slane %v437_v25, 1  ;;  %p6777_p2 = pneg %p6776_p1 }
  0x66   : > { %1732 = vmatprep.subr.bf16.mxu1 %v9976_v0  ;;  %v441_v41 = vshrl.u32 %v7086_v38, 16  ;;  %v6512_v44 = vld [vmem:[#allocation5 + $0x48] sm:$0xff]   ;;  %v444_v47 = vshll.u32 %v7086_v38, 16  ;;  %v7098_v48 = vpack.c.bf16 %v335_v43, %v334_v42  ;;  %v6514_v49 = vld [vmem:[#allocation5 + $0x40] sm:$0xff]   ;;  %vm7104_vm5 = vmand %vm801_vm3, %vm802_vm4 }
  0x67   : > { %v439_v30 = vor.u32 %v437_v25, %v436_v26  ;;  %v6513_v45 = vld [vmem:[#allocation5 + $0xc8] sm:$0xff]   ;;  %v6515_v51 = vld [vmem:[#allocation5 + $0xc0] sm:$0xff]   ;;  %v336_v56 = vld [vmem:[%s7028_s17 + $0x30] sm:$0xff]  ;;  %v7117_v60 = vsel %vm7104_vm5, %v708_v52, 0  ;;  %v711_v4 = vor.u32 %v710_v61, %v434_v24 }
  0x68   : > { %1444 = vmatpush1.bf16.msra.mxu0 %v6490_v7  ;;  %v443_v46 = vrot.slane %v441_v41, 7  ;;  %v448_v55 = vshrl.u32 %v7098_v48, 16  ;;  %v337_v57 = vld [vmem:[%s7028_s17 + $0x38] sm:$0xff]  ;;  %10179 = vst [vmem:[#allocation14_spill] sm:$0xff] %v7117_v60  ;;  %v451_v1 = vshll.u32 %v7098_v48, 16  ;;  %v6517_v3 = vld [vmem:[#allocation5 + $0x130] sm:$0xff]  }
  0x69   : > { %1733 = vmatpush1.bf16.msra.mxu1 %v6491_v8  ;;  %1445 = vmatprep.subr.bf16.mxu0 %v9976_v0  ;;  %v7077_v31 = vsel %vm7067_vm2, 0, %v439_v30  ;;  %v6516_v59 = vld [vmem:[#allocation5 + $0x138] sm:$0xff]   ;;  %v7127_v2 = vpack.c.bf16 %v337_v57, %v336_v56  ;;  %v338_v7 = vld [vmem:[%s7028_s17 + $0x40] sm:$0xff]  ;;  %v339_v8 = vld [vmem:[%s7028_s17 + $0x48] sm:$0xff] }
  0x6a   : > { %1734 = vmatprep.subr.bf16.mxu1 %v9976_v0  ;;  %1758 = vmatprep.mubr.bf16.mxu1 %v7077_v31  ;;  %v446_v54 = vor.u32 %v444_v47, %v443_v46  ;;  %v450_v63 = vrot.slane %v448_v55, 7  ;;  %v340_v20 = vld [vmem:[%s7028_s17 + $0x50] sm:$0xff]  ;;  %v714_v24 = vrot.slane %v451_v1, 1  ;;  %v6520_v26 = vld [vmem:[#allocation5 + $0x118] sm:$0xff]   ;;  %v342_v35 = vld [vmem:[%s7028_s17 + $0x60] sm:$0xff] }
  0x6b   : > { %v455_v6 = vshrl.u32 %v7127_v2, 16  ;;  %v344_v50 = vld [vmem:[%s7028_s17 + $0x70] sm:$0xff]  ;;  %v6524_v56 = vld [vmem:[#allocation5 + $0x178] sm:$0xff]  }
  0x6c   : > { %1446 = vmatpush1.bf16.msra.mxu0 %v6492_v9  ;;  %v7124_v62 = vsel %vm7067_vm2, 0, %v446_v54  ;;  %v453_v5 = vor.u32 %v451_v1, %v450_v63  ;;  %v7142_v9 = vsel %vm7104_vm5, %v711_v4, 0  ;;  %v6525_v63 = vld [vmem:[#allocation5 + $0x170] sm:$0xff]  }
  0x6d   : > { %1735 = vmatpush1.bf16.msra.mxu1 %v6493_v10  ;;  %1447 = vmatprep.subr.bf16.mxu0 %v9976_v0  ;;  %v712_v10 = vrot.slane %v444_v47, 1 }
  0x6e   : > { %1736 = vmatprep.subr.bf16.mxu1 %v9976_v0 }
  0x70   : > { %1448 = vmatpush1.bf16.msra.mxu0 %v6494_v11  ;;  %v458_v11 = vshll.u32 %v7127_v2, 16 }
  0x71   : > { %1737 = vmatpush1.bf16.msra.mxu1 %v6495_v12  ;;  %1449 = vmatprep.subr.bf16.mxu0 %v9976_v0  ;;  %v6518_v12 = vld [vmem:[#allocation5 + $0x128] sm:$0xff]  }
  0x72   : > { %1738 = vmatprep.subr.bf16.mxu1 %v9976_v0 }
  0x74   : > { %1450 = vmatpush1.bf16.msra.mxu0 %v6496_v13  ;;  %v7148_v13 = vsel %vm7067_vm2, 0, %v453_v5  ;;  %v346_v5 = vld [vmem:[%s7028_s17 + $0x80] sm:$0xff] }
  0x75   : > { %1739 = vmatpush1.bf16.msra.mxu1 %v6497_v14  ;;  %1451 = vmatprep.subr.bf16.mxu0 %v9976_v0  ;;  %v457_v14 = vrot.slane %v455_v6, 7 }
  0x76   : > { %1740 = vmatprep.subr.bf16.mxu1 %v9976_v0 }
  0x78   : > { %1452 = vmatpush1.bf16.msra.mxu0 %v6498_v15  ;;  %v7150_v15 = vpack.c.bf16 %v339_v8, %v338_v7 }
  0x79   : > { %1741 = vmatpush1.bf16.msra.mxu1 %v6499_v16  ;;  %1453 = vmatprep.subr.bf16.mxu0 %v9976_v0  ;;  %v713_v16 = vor.u32 %v712_v10, %v441_v41  ;;  %v6522_v41 = vld [vmem:[#allocation5 + $0x108] sm:$0xff]  }
  0x7a   : > { %1742 = vmatprep.subr.bf16.mxu1 %v9976_v0  ;;  %v462_v19 = vshrl.u32 %v7150_v15, 16  ;;  %v465_v25 = vshll.u32 %v7150_v15, 16 }
  0x7c   : > { %1454 = vmatpush2.bf16.msra.mxu0 %v6500_v17  ;;  %v6519_v17 = vld [vmem:[#allocation5 + $0x120] sm:$0xff]   ;;  %v718_v54 = vrot.slane %v465_v25, 1 }
  0x7d   : > { %1743 = vmatpush2.bf16.msra.mxu1 %v6501_v18  ;;  %1455 = vmatprep.subr.bf16.mxu0 %v9976_v0  ;;  %v460_v18 = vor.u32 %v458_v11, %v457_v14 }
  0x7e   : > { %1744 = vmatprep.subr.bf16.mxu1 %v9976_v0  ;;  %v719_v1 = vor.u32 %v718_v54, %v462_v19 }
  0x80   : > { %1456 = vmatpush2.bf16.msra.mxu0 %v6502_v22  ;;  %v341_v22 = vld [vmem:[%s7028_s17 + $0x58] sm:$0xff]  ;;  %v7224_v7 = vsel %vm7104_vm5, %v719_v1, 0 }
  0x81   : > { %1745 = vmatpush2.bf16.msra.mxu1 %v6503_v23  ;;  %1457 = vmatprep.subr.bf16.mxu0 %v9976_v0  ;;  %v7164_v23 = vsel %vm7104_vm5, %v713_v16, 0  ;;  %v7171_v30 = vpack.c.bf16 %v341_v22, %v340_v20  ;;  %v348_v20 = vld [vmem:[%s7028_s17 + $0x90] sm:$0xff]  ;;  %v349_v22 = vld [vmem:[%s7028_s17 + $0x98] sm:$0xff] }
  0x82   : > { %1746 = vmatprep.subr.bf16.mxu1 %v9976_v0 }
  0x83   : > { %v469_v34 = vshrl.u32 %v7171_v30, 16 }
  0x84   : > { %1458 = vmatpush2.bf16.msra.mxu0 %v6504_v28  ;;  %v7169_v28 = vsel %vm7067_vm2, 0, %v460_v18 }
  0x85   : > { %1747 = vmatpush2.bf16.msra.mxu1 %v6505_v29  ;;  %1459 = vmatprep.subr.bf16.mxu0 %v9976_v0  ;;  %v464_v29 = vrot.slane %v462_v19, 7  ;;  %v471_v43 = vrot.slane %v469_v34, 7 }
  0x86   : > { %1748 = vmatprep.subr.bf16.mxu1 %v9976_v0 }
  0x88   : > { %1460 = vmatpush2.bf16.msra.mxu0 %v6506_v32  ;;  %v715_v32 = vor.u32 %v714_v24, %v448_v55 }
  0x89   : > { %1749 = vmatpush2.bf16.msra.mxu1 %v6507_v33  ;;  %1461 = vmatprep.subr.bf16.mxu0 %v9976_v0  ;;  %v467_v33 = vor.u32 %v465_v25, %v464_v29 }
  0x8a   : > { %1750 = vmatprep.subr.bf16.mxu1 %v9976_v0 }
  0x8b   : > { %v7189_v42 = vsel %vm7067_vm2, 0, %v467_v33  ;;  %v6527_v33 = vld [vmem:[#allocation5 + $0x160] sm:$0xff]  }
  0x8c   : > { %1462 = vmatpush2.bf16.msra.mxu0 %v6508_v36  ;;  %v343_v36 = vld [vmem:[%s7028_s17 + $0x68] sm:$0xff] }
  0x8d   : > { %1751 = vmatpush2.bf16.msra.mxu1 %v6509_v37  ;;  %1463 = vmatprep.subr.bf16.mxu0 %v9976_v0  ;;  %v7184_v37 = vsel %vm7104_vm5, %v715_v32, 0  ;;  %v7251_v32 = vpack.c.bf16 %v349_v22, %v348_v20 }
  0x8e   : > { %1752 = vmatprep.subr.bf16.mxu1 %v9976_v0 }
  0x90   : > { %1464 = vmatpush2.bf16.msra.mxu0 %v6510_v39  ;;  %v716_v39 = vrot.slane %v458_v11, 1  ;;  %v6526_v11 = vld [vmem:[#allocation5 + $0x168] sm:$0xff]  }
  0x91   : > { %1753 = vmatpush2.bf16.msra.mxu1 %v6511_v40  ;;  %1465 = vmatprep.subr.bf16.mxu0 %v9976_v0  ;;  %v472_v40 = vshll.u32 %v7171_v30, 16 }
  0x92   : > { %1754 = vmatprep.subr.bf16.mxu1 %v9976_v0  ;;  %v717_v46 = vor.u32 %v716_v39, %v455_v6  ;;  %v347_v6 = vld [vmem:[%s7028_s17 + $0x88] sm:$0xff]  ;;  %v350_v39 = vld [vmem:[%s7028_s17 + $0xa0] sm:$0xff] }
  0x93   : > { %v474_v47 = vor.u32 %v472_v40, %v471_v43  ;;  %v720_v8 = vrot.slane %v472_v40, 1  ;;  %v7231_v16 = vpack.c.bf16 %v347_v6, %v346_v5  ;;  %v351_v40 = vld [vmem:[%s7028_s17 + $0xa8] sm:$0xff] }
  0x94   : > { %1466 = vmatpush2.bf16.msra.mxu0 %v6512_v44  ;;  %v7191_v44 = vpack.c.bf16 %v343_v36, %v342_v35  ;;  %v7204_v52 = vsel %vm7104_vm5, %v717_v46, 0  ;;  %v497_v36 = vshrl.u32 %v7251_v32, 16 }
  0x95   : > { %1755 = vmatpush2.bf16.msra.mxu1 %v6513_v45  ;;  %1467 = vmatprep.subr.bf16.mxu0 %v9976_v0  ;;  %v6523_v45 = vld [vmem:[#allocation5 + $0x100] sm:$0xff]   ;;  %v7209_v57 = vsel %vm7067_vm2, 0, %v474_v47  ;;  %v490_v19 = vshrl.u32 %v7231_v16, 16 }
  0x96   : > { %1756 = vmatprep.subr.bf16.mxu1 %v9976_v0  ;;  %v479_v55 = vshll.u32 %v7191_v44, 16  ;;  %v499_v47 = vrot.slane %v497_v36, 7 }
  0x98   : > { %1468 = vmatpush2.bf16.msra.mxu0 %v6514_v49  ;;  %v476_v49 = vshrl.u32 %v7191_v44, 16  ;;  %v722_v25 = vrot.slane %v479_v55, 1 }
  0x99   : > { %1757 = vmatpush2.bf16.msra.mxu1 %v6515_v51  ;;  %2015 = vmatprep.subr.bf16.mxu0 %v9976_v0  ;;  %v345_v51 = vld [vmem:[%s7028_s17 + $0x78] sm:$0xff] }
  0x9a   : > { %2304 = vmatprep.subr.bf16.mxu1 %v9976_v0  ;;  %v7211_v61 = vpack.c.bf16 %v345_v51, %v344_v50 }
  0x9b   : > { %1470 = vmatmul.mubr.bf16.vlgmr.msra.gmra.mxu0 %v7113_v58 }
  0x9c   : > { %1759 = vmatmul.mubr.bf16.vlgmr.msra.gmra.mxu1 %v7117_v60  ;;  %2016 = vmatpush1.bf16.msra.mxu0 %v6516_v59  ;;  %v478_v59 = vrot.slane %v476_v49, 7  ;;  %v483_v4 = vshrl.u32 %v7211_v61, 16  ;;  %v486_v10 = vshll.u32 %v7211_v61, 16 }
  0x9d   : > { %1477 = vmatprep.mubr.bf16.mxu0 %v7059_v21  ;;  %1766 = vmatprep.mubr.bf16.mxu1 %v7124_v62 }
  0x9e   : > { %2017 = vmatprep.subr.bf16.mxu0 %v9976_v0  ;;  %v485_v14 = vrot.slane %v483_v4, 7  ;;  %v724_v43 = vrot.slane %v486_v10, 1 }
  0xa0   : > { %2018 = vmatpush1.bf16.msra.mxu0 %v6517_v3  ;;  %v481_v3 = vor.u32 %v479_v55, %v478_v59  ;;  %v488_v18 = vor.u32 %v486_v10, %v485_v14  ;;  %v725_v50 = vor.u32 %v724_v43, %v483_v4  ;;  %v352_v55 = vld [vmem:[%s7028_s17 + $0xb0] sm:$0xff]  ;;  %v6529_v10 = vld [vmem:[#allocation5 + $0x1b8] sm:$0xff]  }
  0xa1   : > { %2019 = vmatprep.subr.bf16.mxu0 %v9976_v0  ;;  %2305 = vmatpush1.bf16.msra.mxu1 %v6529_v10  ;;  %v356_v43 = vld [vmem:[%s7028_s17 + $0xd0] sm:$0xff] }
  0xa2   : > { %v7249_v29 = vsel %vm7067_vm2, 0, %v488_v18  ;;  %v7281_v59 = vsel %vm7104_vm5, %v725_v50, 0  ;;  %v355_v18 = vld [vmem:[%s7028_s17 + $0xc8] sm:$0xff]  ;;  %2306 = vmatprep.subr.bf16.mxu1 %v9976_v0 }
  0xa3   : > { %1478 = vmatmul.mubr.bf16.gmra.mxu0 %v7077_v31  ;;  %v6521_v31 = vld [vmem:[#allocation5 + $0x110] sm:$0xff]  }
  0xa4   : > { %1767 = vmatmul.mubr.bf16.gmra.mxu1 %v7142_v9  ;;  %1485 = vmatprep.mubr.bf16.mxu0 %v7086_v38 }
  0xa5   : > { %1774 = vmatprep.mubr.bf16.mxu1 %v7148_v13  ;;  %2020 = vmatpush1.bf16.msra.mxu0 %v6518_v12  ;;  %v7229_v12 = vsel %vm7067_vm2, 0, %v481_v3 }
  0xa6   : > { %2021 = vmatprep.subr.bf16.mxu0 %v9976_v0 }
  0xa9   : > { %2022 = vmatpush1.bf16.msra.mxu0 %v6519_v17  ;;  %v721_v17 = vor.u32 %v720_v8, %v469_v34  ;;  %v723_v34 = vor.u32 %v722_v25, %v476_v49  ;;  %v7270_v49 = vpack.c.bf16 %v351_v40, %v350_v39  ;;  %v6528_v8 = vld [vmem:[#allocation5 + $0x158] sm:$0xff]   ;;  %v6530_v25 = vld [vmem:[#allocation5 + $0x1b0] sm:$0xff]  }
  0xaa   : > { %2023 = vmatprep.subr.bf16.mxu0 %v9976_v0  ;;  %2307 = vmatpush1.bf16.msra.mxu1 %v6530_v25  ;;  %v6535_v25 = vld [vmem:[#allocation5 + $0x190] sm:$0xff]  }
  0xab   : > { %1486 = vmatmul.mubr.bf16.gmra.mxu0 %v7124_v62  ;;  %v7244_v24 = vsel %vm7104_vm5, %v721_v17, 0  ;;  %v504_v54 = vshrl.u32 %v7270_v49, 16  ;;  %v507_v1 = vshll.u32 %v7270_v49, 16  ;;  %v354_v17 = vld [vmem:[%s7028_s17 + $0xc0] sm:$0xff]  ;;  %2308 = vmatprep.subr.bf16.mxu1 %v9976_v0 }
  0xac   : > { %1775 = vmatmul.mubr.bf16.gmra.mxu1 %v7164_v23  ;;  %1493 = vmatprep.mubr.bf16.mxu0 %v7098_v48 }
  0xad   : > { %1782 = vmatprep.mubr.bf16.mxu1 %v7169_v28  ;;  %2024 = vmatpush1.bf16.msra.mxu0 %v6520_v26  ;;  %v493_v26 = vshll.u32 %v7231_v16, 16  ;;  %v506_v5 = vrot.slane %v504_v54, 7  ;;  %v730_v50 = vrot.slane %v507_v1, 1 }
  0xae   : > { %2025 = vmatprep.subr.bf16.mxu0 %v9976_v0 }
  0xb1   : > { %2026 = vmatpush1.bf16.msra.mxu0 %v6521_v31  ;;  %v492_v31 = vrot.slane %v490_v19, 7 }
  0xb2   : > { %2027 = vmatprep.subr.bf16.mxu0 %v9976_v0 }
  0xb3   : > { %1494 = vmatmul.mubr.bf16.gmra.mxu0 %v7148_v13  ;;  %v495_v35 = vor.u32 %v493_v26, %v492_v31 }
  0xb4   : > { %1783 = vmatmul.mubr.bf16.gmra.mxu1 %v7184_v37  ;;  %1501 = vmatprep.mubr.bf16.mxu0 %v7127_v2 }
  0xb5   : > { %1790 = vmatprep.mubr.bf16.mxu1 %v7189_v42  ;;  %2028 = vmatpush1.bf16.msra.mxu0 %v6522_v41  ;;  %v7263_v41 = vsel %vm7104_vm5, %v723_v34, 0  ;;  %v7268_v46 = vsel %vm7067_vm2, 0, %v495_v35  ;;  %v6531_v35 = vld [vmem:[#allocation5 + $0x1a8] sm:$0xff]  }
  0xb6   : > { %2029 = vmatprep.subr.bf16.mxu0 %v9976_v0  ;;  %2309 = vmatpush1.bf16.msra.mxu1 %v6531_v35 }
  0xb7   : > { %2310 = vmatprep.subr.bf16.mxu1 %v9976_v0 }
  0xb9   : > { %2030 = vmatpush1.bf16.msra.mxu0 %v6523_v45  ;;  %v500_v45 = vshll.u32 %v7251_v32, 16 }
  0xba   : > { %2031 = vmatprep.subr.bf16.mxu0 %v9976_v0 }
  0xbb   : > { %1502 = vmatmul.mubr.bf16.gmra.mxu0 %v7169_v28  ;;  %v502_v51 = vor.u32 %v500_v45, %v499_v47  ;;  %v728_v22 = vrot.slane %v500_v45, 1  ;;  %v357_v45 = vld [vmem:[%s7028_s17 + $0xd8] sm:$0xff] }
  0xbc   : > { %1791 = vmatmul.mubr.bf16.gmra.mxu1 %v7204_v52  ;;  %1509 = vmatprep.mubr.bf16.mxu0 %v7150_v15 }
  0xbd   : > { %1798 = vmatprep.mubr.bf16.mxu1 %v7209_v57  ;;  %2032 = vmatpush2.bf16.msra.mxu0 %v6524_v56  ;;  %v353_v56 = vld [vmem:[%s7028_s17 + $0xb8] sm:$0xff]  ;;  %v7286_v3 = vsel %vm7067_vm2, 0, %v502_v51  ;;  %v729_v34 = vor.u32 %v728_v22, %v497_v36  ;;  %v6532_v36 = vld [vmem:[#allocation5 + $0x1a0] sm:$0xff]  }
  0xbe   : > { %2033 = vmatprep.subr.bf16.mxu0 %v9976_v0  ;;  %v7288_v4 = vpack.c.bf16 %v353_v56, %v352_v55  ;;  %2311 = vmatpush1.bf16.msra.mxu1 %v6532_v36  ;;  %v361_v36 = vld [vmem:[%s7028_s17 + $0xf8] sm:$0xff] }
  0xbf   : > { %v7323_v47 = vsel %vm7104_vm5, %v729_v34, 0  ;;  %2312 = vmatprep.subr.bf16.mxu1 %v9976_v0 }
  0xc0   : > { %v511_v14 = vshrl.u32 %v7288_v4, 16 }
  0xc1   : > { %2034 = vmatpush2.bf16.msra.mxu0 %v6525_v63  ;;  %v726_v63 = vrot.slane %v493_v26, 1 }
  0xc2   : > { %2035 = vmatprep.subr.bf16.mxu0 %v9976_v0  ;;  %v513_v31 = vrot.slane %v511_v14, 7 }
  0xc3   : > { %1510 = vmatmul.mubr.bf16.gmra.mxu0 %v7189_v42  ;;  %v727_v6 = vor.u32 %v726_v63, %v490_v19  ;;  %v514_v19 = vshll.u32 %v7288_v4, 16  ;;  %v7330_v63 = vpack.c.bf16 %v357_v45, %v356_v43 }
  0xc4   : > { %1799 = vmatmul.mubr.bf16.gmra.mxu1 %v7224_v7  ;;  %1517 = vmatprep.mubr.bf16.mxu0 %v7171_v30 }
  0xc5   : > { %1806 = vmatprep.mubr.bf16.mxu1 %v7229_v12  ;;  %2036 = vmatpush2.bf16.msra.mxu0 %v6526_v11  ;;  %v509_v11 = vor.u32 %v507_v1, %v506_v5  ;;  %v7301_v20 = vsel %vm7104_vm5, %v727_v6, 0  ;;  %v516_v39 = vor.u32 %v514_v19, %v513_v31  ;;  %10181 = vst [vmem:[#allocation16_spill] sm:$0xff] %v7330_v63  ;;  %v6533_v5 = vld [vmem:[#allocation5 + $0x150] sm:$0xff]   ;;  %v6534_v6 = vld [vmem:[#allocation5 + $0x198] sm:$0xff]   ;;  %v525_v10 = vshrl.u32 %v7330_v63, 16 }
  0xc6   : > { %2037 = vmatprep.subr.bf16.mxu0 %v9976_v0  ;;  %v731_v1 = vor.u32 %v730_v50, %v504_v54  ;;  %2313 = vmatpush1.bf16.msra.mxu1 %v6534_v6  ;;  %v732_v54 = vrot.slane %v514_v19, 1  ;;  %v528_v22 = vshll.u32 %v7330_v63, 16  ;;  %v360_v50 = vld [vmem:[%s7028_s17 + $0xf0] sm:$0xff] }
  0xc7   : > { %v7306_v26 = vsel %vm7067_vm2, 0, %v509_v11  ;;  %v7328_v55 = vsel %vm7067_vm2, 0, %v516_v39  ;;  %v358_v11 = vld [vmem:[%s7028_s17 + $0xe0] sm:$0xff]  ;;  %2314 = vmatprep.subr.bf16.mxu1 %v9976_v0  ;;  %v527_v34 = vrot.slane %v525_v10, 7  ;;  %v6536_v39 = vld [vmem:[#allocation5 + $0x188] sm:$0xff]  }
  0xc8   : > { %v733_v19 = vor.u32 %v732_v54, %v511_v14  ;;  %v6537_v14 = vld [vmem:[#allocation5 + $0x180] sm:$0xff]   ;;  %v6539_v54 = vld [vmem:[#allocation5 + $0x1f8] sm:$0xff]  }
  0xc9   : > { %2038 = vmatpush2.bf16.msra.mxu0 %v6527_v33  ;;  %v7310_v33 = vpack.c.bf16 %v355_v18, %v354_v17  ;;  %v359_v17 = vld [vmem:[%s7028_s17 + $0xe8] sm:$0xff]  ;;  %v7344_v18 = vsel %vm7104_vm5, %v731_v1, 0  ;;  %v530_v43 = vor.u32 %v528_v22, %v527_v34 }
  0xca   : > { %2039 = vmatprep.subr.bf16.mxu0 %v9976_v0  ;;  %v7353_v35 = vpack.c.bf16 %v359_v17, %v358_v11  ;;  %2315 = vmatpush1.bf16.msra.mxu1 %v6535_v25  ;;  %v7375_v11 = vpack.c.bf16 %v361_v36, %v360_v50  ;;  %v6538_v17 = vld [vmem:[#allocation5 + $0x148] sm:$0xff]   ;;  %v6540_v50 = vld [vmem:[#allocation5 + $0x1f0] sm:$0xff]  }
  0xcb   : > { %1518 = vmatmul.mubr.bf16.gmra.mxu0 %v7209_v57  ;;  %10180 = vst [vmem:[#allocation15_spill] sm:$0xff] %v7310_v33  ;;  %v518_v40 = vshrl.u32 %v7310_v33, 16  ;;  %v521_v51 = vshll.u32 %v7310_v33, 16  ;;  %2316 = vmatprep.subr.bf16.mxu1 %v9976_v0  ;;  %v7373_v6 = vsel %vm7067_vm2, 0, %v530_v43 }
  0xcc   : > { %1807 = vmatmul.mubr.bf16.gmra.mxu1 %v7244_v24  ;;  %1525 = vmatprep.mubr.bf16.mxu0 %v7191_v44  ;;  %10183 = vst [vmem:[#allocation18_spill] sm:$0xff] %v7353_v35  ;;  %v532_v45 = vshrl.u32 %v7353_v35, 16  ;;  %10185 = vst [vmem:[#allocation20_spill] sm:$0xff] %v7373_v6  ;;  %v9961_v34 = vshrl.u32 %v7375_v11, 16 }
  0xcd   : > { %1814 = vmatprep.mubr.bf16.mxu1 %v7249_v29  ;;  %2040 = vmatpush2.bf16.msra.mxu0 %v6528_v8  ;;  %v520_v56 = vrot.slane %v518_v40, 7  ;;  %v734_v1 = vrot.slane %v521_v51, 1  ;;  %10186 = vst [vmem:[#allocation21_spill] sm:$0xff] %v7375_v11 }
  0xce   : > { %2041 = vmatprep.subr.bf16.mxu0 %v9976_v0  ;;  %2317 = vmatpush1.bf16.msra.mxu1 %v6536_v39  ;;  %v363_v39 = vld [vmem:[%s7028_s17 + $0x108] sm:$0xff] }
  0xcf   : > { %v523_v8 = vor.u32 %v521_v51, %v520_v56  ;;  %2318 = vmatprep.subr.bf16.mxu1 %v9976_v0  ;;  %v7368_v56 = vsel %vm7104_vm5, %v733_v19, 0  ;;  %v735_v51 = vor.u32 %v734_v1, %v518_v40  ;;  %v362_v19 = vld [vmem:[%s7028_s17 + $0x100] sm:$0xff]  ;;  %v736_v40 = vrot.slane %v528_v22, 1 }
  0xd0   : > { %10184 = vst [vmem:[#allocation19_spill] sm:$0xff] %v7368_v56  ;;  %v838_v1 = vrot.slane %v9961_v34, 7  ;;  %v6542_v34 = vld [vmem:[#allocation5 + $0x1e0] sm:$0xff]  }
  0xd1   : > { %2042 = vmatpush2.bf16.msra.mxu0 %v6533_v5  ;;  %v7349_v31 = vsel %vm7067_vm2, 0, %v523_v8  ;;  %v535_v5 = vshll.u32 %v7353_v35, 16  ;;  %v534_v8 = vrot.slane %v532_v45, 7  ;;  %v7389_v43 = vsel %vm7104_vm5, %v735_v51, 0  ;;  %v6541_v51 = vld [vmem:[#allocation5 + $0x1e8] sm:$0xff]  }
  0xd2   : > { %2043 = vmatprep.subr.bf16.mxu0 %v9976_v0  ;;  %10182 = vst [vmem:[#allocation17_spill] sm:$0xff] %v7349_v31  ;;  %2319 = vmatpush1.bf16.msra.mxu1 %v6537_v14  ;;  %10187 = vst [vmem:[#allocation22_spill] sm:$0xff] %v7389_v43  ;;  %v9962_v14 = vshll.u32 %v7375_v11, 16  ;;  %v737_v22 = vor.u32 %v736_v40, %v525_v10 }
  0xd3   : > { %1526 = vmatmul.mubr.bf16.gmra.mxu0 %v7229_v12  ;;  %2320 = vmatprep.subr.bf16.mxu1 %v9976_v0  ;;  %v537_v25 = vor.u32 %v535_v5, %v534_v8  ;;  %v7398_v8 = vpack.c.bf16 %v363_v39, %v362_v19  ;;  %v365_v19 = vld [vmem:[%s7028_s17 + $0x118] sm:$0xff] }
  0xd4   : > { %1815 = vmatmul.mubr.bf16.gmra.mxu1 %v7263_v41  ;;  %1533 = vmatprep.mubr.bf16.mxu0 %v7211_v61  ;;  %v7415_v39 = vsel %vm7104_vm5, %v737_v22, 0  ;;  %v6543_v22 = vld [vmem:[#allocation5 + $0x140] sm:$0xff]  }
  0xd5   : > { %1822 = vmatprep.mubr.bf16.mxu1 %v7268_v46  ;;  %2044 = vmatpush2.bf16.msra.mxu0 %v6538_v17  ;;  %v7393_v36 = vsel %vm7067_vm2, 0, %v537_v25  ;;  %10189 = vst [vmem:[#allocation24_spill] sm:$0xff] %v7398_v8  ;;  %v841_v17 = vor.u32 %v9962_v14, %v838_v1  ;;  %v364_v25 = vld [vmem:[%s7028_s17 + $0x110] sm:$0xff]  ;;  %10190 = vst [vmem:[#allocation25_spill] sm:$0xff] %v7415_v39  ;;  %v542_v1 = vshll.u32 %v7398_v8, 16 }
  0xd6   : > { %2321 = vmatpush2.bf16.msra.mxu1 %v6539_v54  ;;  %2045 = vmatprep.subr.bf16.mxu0 %v9976_v0  ;;  %10188 = vst [vmem:[#allocation23_spill] sm:$0xff] %v7393_v36  ;;  %v539_v54 = vshrl.u32 %v7398_v8, 16  ;;  %v7422_v14 = vpack.c.bf16 %v365_v19, %v364_v25  ;;  %v367_v25 = vld [vmem:[%s7028_s17 + $0x128] sm:$0xff] }
  0xd7   : > { %2322 = vmatprep.subr.bf16.mxu1 %v9976_v0  ;;  %v7419_v10 = vsel %vm7067_vm2, 0, %v841_v17 }
  0xd8   : > { %10191 = vst [vmem:[#allocation26_spill] sm:$0xff] %v7419_v10  ;;  %v541_v40 = vrot.slane %v539_v54, 7  ;;  %10192 = vst [vmem:[#allocation27_spill] sm:$0xff] %v7422_v14  ;;  %v546_v11 = vshrl.u32 %v7422_v14, 16 }
  0xd9   : > { %2046 = vmatpush2.bf16.msra.mxu0 %v6543_v22 }
  0xda   : > { %2323 = vmatpush2.bf16.msra.mxu1 %v6540_v50  ;;  %v738_v50 = vrot.slane %v535_v5, 1  ;;  %v544_v17 = vor.u32 %v542_v1, %v541_v40  ;;  %v549_v40 = vshll.u32 %v7422_v14, 16 }
  0xdb   : > { %1534 = vmatmul.mubr.bf16.gmra.mxu0 %v7249_v29  ;;  %2324 = vmatprep.subr.bf16.mxu1 %v9976_v0 }
  0xdc   : > { %1823 = vmatmul.mubr.bf16.gmra.mxu1 %v7281_v59  ;;  %1541 = vmatprep.mubr.bf16.mxu0 %v7231_v16  ;;  %v739_v5 = vor.u32 %v738_v50, %v532_v45  ;;  %v6545_v45 = vld [vmem:[#allocation5 + $0x1d0] sm:$0xff]   ;;  %v693_v19 = vsel %vm7067_vm2, 0, %v544_v17  ;;  %v548_v50 = vrot.slane %v546_v11, 7 }
  0xdd   : > { %1830 = vmatprep.mubr.bf16.mxu1 %v7286_v3  ;;  %v368_v17 = vld [vmem:[%s7028_s17 + $0x130] sm:$0xff] }
  0xde   : > { %2325 = vmatpush2.bf16.msra.mxu1 %v6541_v51  ;;  %v6544_v51 = vld [vmem:[#allocation5 + $0x1d8] sm:$0xff]   ;;  %v551_v22 = vor.u32 %v549_v40, %v548_v50 }
  0xdf   : > { %2326 = vmatprep.subr.bf16.mxu1 %v9976_v0  ;;  %v7461_v50 = vld [vmem:[#allocation5 + $0x238] sm:$0xff]  }
  0xe0   : > { %6250 = vmatprep.subr.bf16.mxu0 %v7461_v50 }
  0xe2   : > { %2327 = vmatpush2.bf16.msra.mxu1 %v6542_v34  ;;  %v7435_v34 = vsel %vm7104_vm5, %v739_v5, 0  ;;  %v6546_v5 = vld [vmem:[#allocation5 + $0x1c8] sm:$0xff]  }
  0xe3   : > { %1542 = vmatmul.mubr.bf16.gmra.mxu0 %v7268_v46  ;;  %2328 = vmatprep.subr.bf16.mxu1 %v9976_v0  ;;  %10193 = vst [vmem:[#allocation28_spill] sm:$0xff] %v7435_v34 }
  0xe4   : > { %1831 = vmatmul.mubr.bf16.gmra.mxu1 %v7301_v20  ;;  %1549 = vmatprep.mubr.bf16.mxu0 %v7251_v32 }
  0xe5   : > { %1838 = vmatprep.mubr.bf16.mxu1 %v7306_v26 }
  0xe6   : > { %2329 = vmatpush2.bf16.msra.mxu1 %v6544_v51 }
  0xe7   : > { %2330 = vmatprep.subr.bf16.mxu1 %v9976_v0 }
  0xea   : > { %2331 = vmatpush2.bf16.msra.mxu1 %v6545_v45  ;;  %v7452_v45 = vsel %vm7067_vm2, 0, %v551_v22 }
  0xeb   : > { %1550 = vmatmul.mubr.bf16.gmra.mxu0 %v7286_v3  ;;  %2332 = vmatprep.subr.bf16.mxu1 %v9976_v0  ;;  %10195 = vst [vmem:[#allocation30_spill] sm:$0xff] %v7452_v45 }
  0xec   : > { %1839 = vmatmul.mubr.bf16.gmra.mxu1 %v7323_v47  ;;  %1557 = vmatprep.mubr.bf16.mxu0 %v7270_v49 }
  0xed   : > { %1846 = vmatprep.mubr.bf16.mxu1 %v7328_v55 }
  0xee   : > { %2333 = vmatpush2.bf16.msra.mxu1 %v6546_v5 }
  0xef   : > { %2334 = vmatprep.subr.bf16.mxu1 %v9976_v0 }
  0xf3   : > { %1558 = vmatmul.mubr.bf16.gmra.mxu0 %v7306_v26 }
  0xf4   : > { %1847 = vmatmul.mubr.bf16.gmra.mxu1 %v7344_v18  ;;  %1565 = vmatprep.mubr.bf16.mxu0 %v7288_v4 }
  0xf5   : > { %1854 = vmatprep.mubr.bf16.mxu1 %v7349_v31 }
  0xfb   : > { %1566 = vmatmul.mubr.bf16.gmra.mxu0 %v7328_v55 }
  0xfc   : > { %1855 = vmatmul.mubr.bf16.gmra.mxu1 %v7368_v56  ;;  %1573 = vmatprep.mubr.bf16.mxu0 %v7310_v33 }
  0xfd   : > { %1862 = vmatprep.mubr.bf16.mxu1 %v7373_v6 }
 0x103   : > { %1574 = vmatmul.mubr.bf16.gmra.mxu0 %v7349_v31  ;;  %v387_v31 = vld [vmem:[%s7028_s17 + $0x1c8] sm:$0xff] }
 0x104   : > { %1863 = vmatmul.mubr.bf16.gmra.mxu1 %v7389_v43  ;;  %1581 = vmatprep.mubr.bf16.mxu0 %v7330_v63  ;;  %v366_v63 = vld [vmem:[%s7028_s17 + $0x120] sm:$0xff] }
 0x105   : > { %1870 = vmatprep.mubr.bf16.mxu1 %v7393_v36 }
 0x10b   : > { %1582 = vmatmul.mubr.bf16.gmra.mxu0 %v7373_v6  ;;  %v370_v6 = vld [vmem:[%s7028_s17 + $0x140] sm:$0xff] }
 0x10c   : > { %1871 = vmatmul.mubr.bf16.gmra.mxu1 %v7415_v39  ;;  %1589 = vmatprep.mubr.bf16.mxu0 %v7353_v35  ;;  %v369_v35 = vld [vmem:[%s7028_s17 + $0x138] sm:$0xff] }
 0x10d   : > { %1878 = vmatprep.mubr.bf16.mxu1 %v7419_v10  ;;  %v7440_v10 = vpack.c.bf16 %v367_v25, %v366_v63  ;;  %v740_v63 = vrot.slane %v542_v1, 1  ;;  %v6547_v25 = vld [vmem:[#allocation5 + $0x1c0] sm:$0xff]   ;;  %v7455_v39 = vpack.c.bf16 %v369_v35, %v368_v17  ;;  %v371_v35 = vld [vmem:[%s7028_s17 + $0x148] sm:$0xff] }
 0x10e   : > { %2335 = vmatpush2.bf16.msra.mxu1 %v6547_v25  ;;  %v742_v25 = vrot.slane %v549_v40, 1 }
 0x10f   : > { %10194 = vst [vmem:[#allocation29_spill] sm:$0xff] %v7440_v10  ;;  %v553_v51 = vshrl.u32 %v7440_v10, 16  ;;  %10196 = vst [vmem:[#allocation31_spill] sm:$0xff] %v7455_v39  ;;  %v741_v1 = vor.u32 %v740_v63, %v539_v54  ;;  %4112 = vmatprep.subr.bf16.mxu1 %v9976_v0  ;;  %v560_v22 = vshrl.u32 %v7455_v39, 16 }
 0x111   : > { %v7470_v17 = vsel %vm7104_vm5, %v741_v1, 0  ;;  %v562_v63 = vrot.slane %v560_v22, 7 }
 0x112   : > { %10197 = vst [vmem:[#allocation32_spill] sm:$0xff] %v7470_v17 }
 0x113   : > { %1590 = vmatmul.mubr.bf16.gmra.mxu0 %v7393_v36  ;;  %v556_v36 = vshll.u32 %v7440_v10, 16 }
 0x114   : > { %1879 = vmatmul.mubr.bf16.gmra.mxu1 %v7435_v34  ;;  %1597 = vmatprep.mubr.bf16.mxu0 %v9976_v0  ;;  %v555_v34 = vrot.slane %v553_v51, 7  ;;  %v7477_v0 = vpack.c.bf16 %v371_v35, %v370_v6 }
 0x115   : > { %1886 = vmatprep.mubr.bf16.mxu1 %v693_v19  ;;  %v744_v6 = vrot.slane %v556_v36, 1 }
 0x116   : > { %v558_v5 = vor.u32 %v556_v36, %v555_v34  ;;  %v563_v34 = vshll.u32 %v7455_v39, 16  ;;  %10199 = vst [vmem:[#allocation34_spill] sm:$0xff] %v7477_v0  ;;  %v567_v40 = vshrl.u32 %v7477_v0, 16 }
 0x118   : > { %v7474_v54 = vsel %vm7067_vm2, 0, %v558_v5  ;;  %v565_v1 = vor.u32 %v563_v34, %v562_v63  ;;  %v373_v5 = vld [vmem:[%s7028_s17 + $0x158] sm:$0xff]  ;;  %v569_v35 = vrot.slane %v567_v40, 7  ;;  %v374_v63 = vld [vmem:[%s7028_s17 + $0x160] sm:$0xff] }
 0x119   : > { %10198 = vst [vmem:[#allocation33_spill] sm:$0xff] %v7474_v54 }
 0x11b   : > { %1598 = vmatmul.mubr.bf16.gmra.mxu0 %v7113_v58 }
 0x11c   : > { %1887 = vmatmul.mubr.bf16.gmra.mxu1 %v7117_v60  ;;  %1605 = vmatprep.mubr.bf16.mxu0 %v7398_v8  ;;  %v743_v60 = vor.u32 %v742_v25, %v546_v11  ;;  %v372_v8 = vld [vmem:[%s7028_s17 + $0x150] sm:$0xff] }
 0x11d   : > { %1894 = vmatprep.mubr.bf16.mxu1 %v7452_v45  ;;  %v7494_v11 = vpack.c.bf16 %v373_v5, %v372_v8  ;;  %v746_v5 = vrot.slane %v563_v34, 1 }
 0x11e   : > { %v7487_v58 = vsel %vm7104_vm5, %v743_v60, 0  ;;  %v745_v60 = vor.u32 %v744_v6, %v553_v51 }
 0x11f   : > { %10200 = vst [vmem:[#allocation35_spill] sm:$0xff] %v7487_v58  ;;  %10202 = vst [vmem:[#allocation37_spill] sm:$0xff] %v7494_v11  ;;  %v574_v36 = vshrl.u32 %v7494_v11, 16  ;;  %v747_v6 = vor.u32 %v746_v5, %v560_v22 }
 0x120   : > { %v7505_v8 = vsel %vm7104_vm5, %v745_v60, 0  ;;  %v376_v60 = vld [vmem:[%s7028_s17 + $0x170] sm:$0xff] }
 0x121   : > { %10203 = vst [vmem:[#allocation38_spill] sm:$0xff] %v7505_v8 }
 0x123   : > { %1606 = vmatmul.mubr.bf16.gmra.mxu0 %v693_v19  ;;  %v7491_v19 = vsel %vm7067_vm2, 0, %v565_v1  ;;  %v375_v1 = vld [vmem:[%s7028_s17 + $0x168] sm:$0xff] }
 0x124   : > { %1895 = vmatmul.mubr.bf16.gmra.mxu1 %v7470_v17  ;;  %1613 = vmatprep.mubr.bf16.mxu0 %v7422_v14  ;;  %10201 = vst [vmem:[#allocation36_spill] sm:$0xff] %v7491_v19  ;;  %v570_v14 = vshll.u32 %v7477_v0, 16  ;;  %v7512_v51 = vpack.c.bf16 %v375_v1, %v374_v63  ;;  %v7523_v63 = vsel %vm7104_vm5, %v747_v6, 0  ;;  %v378_v6 = vld [vmem:[%s7028_s17 + $0x180] sm:$0xff] }
 0x125   : > { %1902 = vmatprep.mubr.bf16.mxu1 %v7474_v54  ;;  %10206 = vst [vmem:[#allocation41_spill] sm:$0xff] %v7523_v63 }
 0x126   : > { %v572_v25 = vor.u32 %v570_v14, %v569_v35  ;;  %10205 = vst [vmem:[#allocation40_spill] sm:$0xff] %v7512_v51  ;;  %v581_v34 = vshrl.u32 %v7512_v51, 16  ;;  %v748_v1 = vrot.slane %v570_v14, 1 }
 0x12b   : > { %1614 = vmatmul.mubr.bf16.gmra.mxu0 %v7452_v45  ;;  %v577_v45 = vshll.u32 %v7494_v11, 16 }
 0x12c   : > { %1903 = vmatmul.mubr.bf16.gmra.mxu1 %v7487_v58  ;;  %1621 = vmatprep.mubr.bf16.mxu0 %v7440_v10  ;;  %v7509_v58 = vsel %vm7067_vm2, 0, %v572_v25  ;;  %v576_v10 = vrot.slane %v574_v36, 7  ;;  %v377_v25 = vld [vmem:[%s7028_s17 + $0x178] sm:$0xff] }
 0x12d   : > { %1910 = vmatprep.mubr.bf16.mxu1 %v7491_v19  ;;  %10204 = vst [vmem:[#allocation39_spill] sm:$0xff] %v7509_v58  ;;  %v7530_v22 = vpack.c.bf16 %v377_v25, %v376_v60  ;;  %v750_v25 = vrot.slane %v577_v45, 1 }
 0x12e   : > { %v579_v35 = vor.u32 %v577_v45, %v576_v10  ;;  %v749_v10 = vor.u32 %v748_v1, %v567_v40 }
 0x12f   : > { %10208 = vst [vmem:[#allocation43_spill] sm:$0xff] %v7530_v22  ;;  %v588_v14 = vshrl.u32 %v7530_v22, 16 }
 0x130   : > { %v7541_v60 = vsel %vm7104_vm5, %v749_v10, 0  ;;  %v380_v10 = vld [vmem:[%s7028_s17 + $0x190] sm:$0xff] }
 0x131   : > { %10209 = vst [vmem:[#allocation44_spill] sm:$0xff] %v7541_v60 }
 0x133   : > { %1622 = vmatmul.mubr.bf16.gmra.mxu0 %v7474_v54  ;;  %v584_v54 = vshll.u32 %v7512_v51, 16 }
 0x134   : > { %1911 = vmatmul.mubr.bf16.gmra.mxu1 %v7505_v8  ;;  %1629 = vmatprep.mubr.bf16.mxu0 %v7455_v39  ;;  %v7527_v8 = vsel %vm7067_vm2, 0, %v579_v35  ;;  %v583_v39 = vrot.slane %v581_v34, 7  ;;  %v379_v35 = vld [vmem:[%s7028_s17 + $0x188] sm:$0xff] }
 0x135   : > { %1918 = vmatprep.mubr.bf16.mxu1 %v7509_v58  ;;  %10207 = vst [vmem:[#allocation42_spill] sm:$0xff] %v7527_v8  ;;  %v7548_v40 = vpack.c.bf16 %v379_v35, %v378_v6  ;;  %v752_v35 = vrot.slane %v584_v54, 1 }
 0x136   : > { %v586_v5 = vor.u32 %v584_v54, %v583_v39  ;;  %v751_v39 = vor.u32 %v750_v25, %v574_v36 }
 0x137   : > { %10211 = vst [vmem:[#allocation46_spill] sm:$0xff] %v7548_v40  ;;  %v595_v45 = vshrl.u32 %v7548_v40, 16 }
 0x138   : > { %v7559_v6 = vsel %vm7104_vm5, %v751_v39, 0  ;;  %v382_v39 = vld [vmem:[%s7028_s17 + $0x1a0] sm:$0xff] }
 0x139   : > { %10212 = vst [vmem:[#allocation47_spill] sm:$0xff] %v7559_v6 }
 0x13b   : > { %1630 = vmatmul.mubr.bf16.gmra.mxu0 %v7491_v19  ;;  %v591_v19 = vshll.u32 %v7530_v22, 16 }
 0x13c   : > { %1919 = vmatmul.mubr.bf16.gmra.mxu1 %v7523_v63  ;;  %1637 = vmatprep.mubr.bf16.mxu0 %v7477_v0  ;;  %v7545_v63 = vsel %vm7067_vm2, 0, %v586_v5  ;;  %v590_v0 = vrot.slane %v588_v14, 7  ;;  %v381_v5 = vld [vmem:[%s7028_s17 + $0x198] sm:$0xff] }
 0x13d   : > { %1926 = vmatprep.mubr.bf16.mxu1 %v7527_v8  ;;  %10210 = vst [vmem:[#allocation45_spill] sm:$0xff] %v7545_v63  ;;  %v7566_v36 = vpack.c.bf16 %v381_v5, %v380_v10  ;;  %v754_v5 = vrot.slane %v591_v19, 1 }
 0x13e   : > { %v593_v1 = vor.u32 %v591_v19, %v590_v0  ;;  %v753_v0 = vor.u32 %v752_v35, %v581_v34 }
 0x13f   : > { %10214 = vst [vmem:[#allocation49_spill] sm:$0xff] %v7566_v36  ;;  %v602_v54 = vshrl.u32 %v7566_v36, 16 }
 0x140   : > { %v7577_v10 = vsel %vm7104_vm5, %v753_v0, 0  ;;  %v384_v0 = vld [vmem:[%s7028_s17 + $0x1b0] sm:$0xff] }
 0x141   : > { %10215 = vst [vmem:[#allocation50_spill] sm:$0xff] %v7577_v10 }
 0x143   : > { %1638 = vmatmul.mubr.bf16.gmra.mxu0 %v7509_v58  ;;  %v598_v58 = vshll.u32 %v7548_v40, 16 }
 0x144   : > { %1927 = vmatmul.mubr.bf16.gmra.mxu1 %v7541_v60  ;;  %1645 = vmatprep.mubr.bf16.mxu0 %v7494_v11  ;;  %v7563_v60 = vsel %vm7067_vm2, 0, %v593_v1  ;;  %v597_v11 = vrot.slane %v595_v45, 7  ;;  %v383_v1 = vld [vmem:[%s7028_s17 + $0x1a8] sm:$0xff] }
 0x145   : > { %1934 = vmatprep.mubr.bf16.mxu1 %v7545_v63  ;;  %10213 = vst [vmem:[#allocation48_spill] sm:$0xff] %v7563_v60  ;;  %v7584_v34 = vpack.c.bf16 %v383_v1, %v382_v39  ;;  %v756_v39 = vrot.slane %v598_v58, 1 }
 0x146   : > { %v600_v25 = vor.u32 %v598_v58, %v597_v11  ;;  %v755_v11 = vor.u32 %v754_v5, %v588_v14 }
 0x147   : > { %10217 = vst [vmem:[#allocation52_spill] sm:$0xff] %v7584_v34  ;;  %v10015_v19 = vshrl.u32 %v7584_v34, 16  ;;  %v612_v14 = vshll.u32 %v7584_v34, 16 }
 0x148   : > { %v7595_v17 = vsel %vm7104_vm5, %v755_v11, 0 }
 0x149   : > { %10218 = vst [vmem:[#allocation53_spill] sm:$0xff] %v7595_v17 }
 0x14b   : > { %1646 = vmatmul.mubr.bf16.gmra.mxu0 %v7527_v8  ;;  %v605_v8 = vshll.u32 %v7566_v36, 16 }
 0x14c   : > { %1935 = vmatmul.mubr.bf16.gmra.mxu1 %v7559_v6  ;;  %1653 = vmatprep.mubr.bf16.mxu0 %v7512_v51  ;;  %v7581_v6 = vsel %vm7067_vm2, 0, %v600_v25  ;;  %v604_v51 = vrot.slane %v602_v54, 7  ;;  %v385_v25 = vld [vmem:[%s7028_s17 + $0x1b8] sm:$0xff] }
 0x14d   : > { %1942 = vmatprep.mubr.bf16.mxu1 %v7563_v60  ;;  %10216 = vst [vmem:[#allocation51_spill] sm:$0xff] %v7581_v6 }
 0x14e   : > { %v607_v35 = vor.u32 %v605_v8, %v604_v51  ;;  %v7604_v51 = vpack.c.bf16 %v385_v25, %v384_v0  ;;  %v386_v25 = vld [vmem:[%s7028_s17 + $0x1c0] sm:$0xff] }
 0x150   : > { %v7599_v1 = vsel %vm7067_vm2, 0, %v607_v35  ;;  %v757_v35 = vor.u32 %v756_v39, %v595_v45  ;;  %v10027_v43 = vshrl.u32 %v7604_v51, 16 }
 0x151   : > { %10219 = vst [vmem:[#allocation54_spill] sm:$0xff] %v7599_v1 }
 0x153   : > { %1654 = vmatmul.mubr.bf16.gmra.mxu0 %v7545_v63 }
 0x154   : > { %1943 = vmatmul.mubr.bf16.gmra.mxu1 %v7577_v10  ;;  %1661 = vmatprep.mubr.bf16.mxu0 %v7530_v22  ;;  %v611_v22 = vrot.slane %v10015_v19, 7 }
 0x155   : > { %1950 = vmatprep.mubr.bf16.mxu1 %v7581_v6 }
 0x156   : > { %v614_v63 = vor.u32 %v612_v14, %v611_v22  ;;  %v618_v22 = vrot.slane %v10027_v43, 7  ;;  %v389_v43 = vld [vmem:[%s7028_s17 + $0x1d8] sm:$0xff] }
 0x158   : > { %v7623_v45 = vsel %vm7067_vm2, 0, %v614_v63 }
 0x159   : > { %10223 = vst [vmem:[#allocation58_spill] sm:$0xff] %v7623_v45 }
 0x15b   : > { %v1471_v5 = vpop.f32.mrf.mxu0  ;;  %1662 = vmatmul.mubr.bf16.gmra.mxu0 %v7563_v60 }
 0x15c   : > { %v1760_v10 = vpop.f32.mrf.mxu1  ;;  %1951 = vmatmul.mubr.bf16.gmra.mxu1 %v7595_v17  ;;  %1669 = vmatprep.mubr.bf16.mxu0 %v7548_v40  ;;  %v7619_v40 = vsel %vm7104_vm5, %v757_v35, 0 }
 0x15d   : > { %v7609_v58 = vadd.f32 %v1760_v10, %v1471_v5  ;;  %v1473_v11 = vpop.f32.mrf.mxu0  ;;  %1958 = vmatprep.mubr.bf16.mxu1 %v7599_v1  ;;  %10222 = vst [vmem:[#allocation57_spill] sm:$0xff] %v7619_v40  ;;  %v758_v10 = vrot.slane %v605_v8, 1 }
 0x15e   : > { %v1762_v19 = vpop.f32.mrf.mxu1 }
 0x15f   : > { %10220 = vst [vmem:[#allocation55_spill] sm:$0xff] %v7609_v58  ;;  %v1474_v0 = vpop.f32.mrf.mxu0  ;;  %v619_v19 = vshll.u32 %v7604_v51, 16  ;;  %v759_v11 = vor.u32 %v758_v10, %v602_v54 }
 0x160   : > { %v1763_v33 = vpop.f32.mrf.mxu1 }
 0x161   : > { %v7615_v60 = vadd.f32 %v1763_v33, %v1474_v0  ;;  %v1476_v56 = vpop.f32.mrf.mxu0  ;;  %v7628_v33 = vpack.c.bf16 %v387_v31, %v386_v25  ;;  %v621_v0 = vor.u32 %v619_v19, %v618_v22  ;;  %v388_v25 = vld [vmem:[%s7028_s17 + $0x1d0] sm:$0xff] }
 0x162   : > { %v1765_v5 = vpop.f32.mrf.mxu1 }
 0x163   : > { %10221 = vst [vmem:[#allocation56_spill] sm:$0xff] %v7615_v60  ;;  %v1479_v56 = vpop.f32.mrf.mxu0  ;;  %1670 = vmatmul.mubr.bf16.gmra.mxu0 %v7581_v6  ;;  %v10031_v5 = vshrl.u32 %v7628_v33, 16  ;;  %v7647_v54 = vsel %vm7067_vm2, 0, %v621_v0  ;;  %v626_v22 = vshll.u32 %v7628_v33, 16 }
 0x164   : > { %v1768_v39 = vpop.f32.mrf.mxu1  ;;  %1959 = vmatmul.mubr.bf16.gmra.mxu1 %v7619_v40  ;;  %1677 = vmatprep.mubr.bf16.mxu0 %v7566_v36  ;;  %v7643_v36 = vsel %vm7104_vm5, %v759_v11, 0  ;;  %10227 = vst [vmem:[#allocation62_spill] sm:$0xff] %v7647_v54 }
 0x165   : > { %v7633_v8 = vadd.f32 %v1768_v39, %v1479_v56  ;;  %v1481_v63 = vpop.f32.mrf.mxu0  ;;  %1966 = vmatprep.mubr.bf16.mxu1 %v7623_v45  ;;  %10226 = vst [vmem:[#allocation61_spill] sm:$0xff] %v7643_v36  ;;  %v760_v56 = vrot.slane %v612_v14, 1  ;;  %v625_v10 = vrot.slane %v10031_v5, 7  ;;  %v390_v5 = vld [vmem:[%s7028_s17 + $0x1e0] sm:$0xff] }
 0x166   : > { %v1770_v35 = vpop.f32.mrf.mxu1 }
 0x167   : > { %10224 = vst [vmem:[#allocation59_spill] sm:$0xff] %v7633_v8  ;;  %v1482_v31 = vpop.f32.mrf.mxu0  ;;  %v10229_v35 = vshrl.u32 %v7584_v34, 16 }
 0x168   : > { %v1771_v60 = vpop.f32.mrf.mxu1 }
 0x169   : > { %v7639_v58 = vadd.f32 %v1771_v60, %v1482_v31  ;;  %v1484_v6 = vpop.f32.mrf.mxu0  ;;  %v7652_v60 = vpack.c.bf16 %v389_v43, %v388_v25  ;;  %v761_v0 = vor.u32 %v760_v56, %v10229_v35 }
 0x16a   : > { %v1773_v39 = vpop.f32.mrf.mxu1 }
 0x16b   : > { %10225 = vst [vmem:[#allocation60_spill] sm:$0xff] %v7639_v58  ;;  %v1487_v6 = vpop.f32.mrf.mxu0  ;;  %1678 = vmatmul.mubr.bf16.gmra.mxu0 %v7599_v1  ;;  %v628_v39 = vor.u32 %v626_v22, %v625_v10  ;;  %v10035_v43 = vshrl.u32 %v7652_v60, 16  ;;  %v391_v58 = vld [vmem:[%s7028_s17 + $0x1e8] sm:$0xff]  ;;  %v633_v35 = vshll.u32 %v7652_v60, 16 }
 0x16c   : > { %v1776_v63 = vpop.f32.mrf.mxu1  ;;  %1967 = vmatmul.mubr.bf16.gmra.mxu1 %v7643_v36  ;;  %1685 = vmatprep.mubr.bf16.mxu0 %v7584_v34 }
 0x16d   : > { %v7657_v14 = vadd.f32 %v1776_v63, %v1487_v6  ;;  %v1489_v11 = vpop.f32.mrf.mxu0  ;;  %1974 = vmatprep.mubr.bf16.mxu1 %v7647_v54  ;;  %v7669_v6 = vsel %vm7104_vm5, %v761_v0, 0  ;;  %v762_v63 = vrot.slane %v619_v19, 1  ;;  %v7673_v56 = vsel %vm7067_vm2, 0, %v628_v39 }
 0x16e   : > { %v1778_v31 = vpop.f32.mrf.mxu1  ;;  %10231 = vst [vmem:[#allocation65_spill] sm:$0xff] %v7669_v6  ;;  %v632_v10 = vrot.slane %v10035_v43, 7  ;;  %v10233_v39 = vshrl.u32 %v7604_v51, 16 }
 0x16f   : > { %10228 = vst [vmem:[#allocation63_spill] sm:$0xff] %v7657_v14  ;;  %v1490_v25 = vpop.f32.mrf.mxu0  ;;  %v393_v14 = vld [vmem:[%s7028_s17 + $0x1f8] sm:$0xff] }
 0x170   : > { %v1779_v8 = vpop.f32.mrf.mxu1  ;;  %v635_v43 = vor.u32 %v633_v35, %v632_v10 }
 0x171   : > { %v7665_v1 = vadd.f32 %v1779_v8, %v1490_v25  ;;  %v1492_v36 = vpop.f32.mrf.mxu0  ;;  %v7678_v8 = vpack.c.bf16 %v391_v58, %v390_v5  ;;  %v763_v25 = vor.u32 %v762_v63, %v10233_v39 }
 0x172   : > { %v1781_v11 = vpop.f32.mrf.mxu1  ;;  %v7699_v63 = vsel %vm7067_vm2, 0, %v635_v43  ;;  %v10237_v43 = vshrl.u32 %v7628_v33, 16 }
 0x173   : > { %10230 = vst [vmem:[#allocation64_spill] sm:$0xff] %v7665_v1  ;;  %v1495_v36 = vpop.f32.mrf.mxu0  ;;  %1686 = vmatmul.mubr.bf16.gmra.mxu0 %v7623_v45  ;;  %v10041_v58 = vshrl.u32 %v7678_v8, 16  ;;  %v392_v1 = vld [vmem:[%s7028_s17 + $0x1f0] sm:$0xff]  ;;  %v640_v39 = vshll.u32 %v7678_v8, 16 }
 0x174   : > { %v1784_v0 = vpop.f32.mrf.mxu1  ;;  %1975 = vmatmul.mubr.bf16.gmra.mxu1 %v7669_v6  ;;  %1693 = vmatprep.mubr.bf16.mxu0 %v7604_v51 }
 0x175   : > { %v7683_v19 = vadd.f32 %v1784_v0, %v1495_v36  ;;  %v1497_v31 = vpop.f32.mrf.mxu0  ;;  %1982 = vmatprep.mubr.bf16.mxu1 %v7673_v56  ;;  %v7695_v36 = vsel %vm7104_vm5, %v763_v25, 0  ;;  %v764_v0 = vrot.slane %v626_v22, 1  ;;  %v639_v10 = vrot.slane %v10041_v58, 7 }
 0x176   : > { %v1786_v11 = vpop.f32.mrf.mxu1  ;;  %10235 = vst [vmem:[#allocation68_spill] sm:$0xff] %v7695_v36 }
 0x177   : > { %10232 = vst [vmem:[#allocation66_spill] sm:$0xff] %v7683_v19  ;;  %v1498_v5 = vpop.f32.mrf.mxu0  ;;  %v7704_v11 = vpack.c.bf16 %v393_v14, %v392_v1  ;;  %v642_v58 = vor.u32 %v640_v39, %v639_v10 }
 0x178   : > { %v1787_v45 = vpop.f32.mrf.mxu1 }
 0x179   : > { %v7691_v34 = vadd.f32 %v1787_v45, %v1498_v5  ;;  %v1500_v6 = vpop.f32.mrf.mxu0  ;;  %v765_v5 = vor.u32 %v764_v0, %v10237_v43  ;;  %v10045_v1 = vshrl.u32 %v7704_v11, 16  ;;  %v10048_v10 = vshll.u32 %v7704_v11, 16 }
 0x17a   : > { %v1789_v31 = vpop.f32.mrf.mxu1 }
 0x17b   : > { %10234 = vst [vmem:[#allocation67_spill] sm:$0xff] %v7691_v34  ;;  %v1503_v45 = vpop.f32.mrf.mxu0  ;;  %1694 = vmatmul.mubr.bf16.gmra.mxu0 %v7647_v54  ;;  %v845_v0 = vrot.slane %v10045_v1, 7 }
 0x17c   : > { %v1792_v6 = vpop.f32.mrf.mxu1  ;;  %1983 = vmatmul.mubr.bf16.gmra.mxu1 %v7695_v36  ;;  %1701 = vmatprep.mubr.bf16.mxu0 %v7628_v33  ;;  %v7719_v36 = vsel %vm7104_vm5, %v765_v5, 0 }
 0x17d   : > { %v7709_v22 = vadd.f32 %v1792_v6, %v1503_v45  ;;  %v1505_v25 = vpop.f32.mrf.mxu0  ;;  %1990 = vmatprep.mubr.bf16.mxu1 %v7699_v63  ;;  %10239 = vst [vmem:[#allocation71_spill] sm:$0xff] %v7719_v36  ;;  %v766_v45 = vrot.slane %v633_v35, 1 }
 0x17e   : > { %v1794_v31 = vpop.f32.mrf.mxu1  ;;  %v7723_v25 = vsel %vm7067_vm2, 0, %v642_v58  ;;  %v10240_v58 = vshrl.u32 %v7652_v60, 16 }
 0x17f   : > { %10236 = vst [vmem:[#allocation69_spill] sm:$0xff] %v7709_v22  ;;  %v1506_v14 = vpop.f32.mrf.mxu0 }
 0x180   : > { %v1795_v34 = vpop.f32.mrf.mxu1  ;;  %v767_v5 = vor.u32 %v766_v45, %v10240_v58 }
 0x181   : > { %v7715_v19 = vadd.f32 %v1795_v34, %v1506_v14  ;;  %v1508_v54 = vpop.f32.mrf.mxu0  ;;  %v848_v14 = vor.u32 %v10048_v10, %v845_v0 }
 0x182   : > { %v1797_v6 = vpop.f32.mrf.mxu1 }
 0x183   : > { %10238 = vst [vmem:[#allocation70_spill] sm:$0xff] %v7715_v19  ;;  %v1511_v43 = vpop.f32.mrf.mxu0  ;;  %1702 = vmatmul.mubr.bf16.gmra.mxu0 %v7673_v56 }
 0x184   : > { %v1800_v34 = vpop.f32.mrf.mxu1  ;;  %1991 = vmatmul.mubr.bf16.gmra.mxu1 %v7719_v36  ;;  %1709 = vmatprep.mubr.bf16.mxu0 %v7652_v60  ;;  %v7742_v36 = vsel %vm7104_vm5, %v767_v5, 0 }
 0x185   : > { %v7731_v54 = vadd.f32 %v1800_v34, %v1511_v43  ;;  %v1513_v35 = vpop.f32.mrf.mxu0  ;;  %1998 = vmatprep.mubr.bf16.mxu1 %v7723_v25  ;;  %v768_v43 = vrot.slane %v640_v39, 1  ;;  %v10242_v39 = vshrl.u32 %v7678_v8, 16 }
 0x186   : > { %v1802_v31 = vpop.f32.mrf.mxu1  ;;  %v7746_v35 = vsel %vm7067_vm2, 0, %v848_v14 }
 0x187   : > { %v1514_v6 = vpop.f32.mrf.mxu0  ;;  %v769_v0 = vor.u32 %v768_v43, %v10242_v39 }
 0x188   : > { %v1803_v1 = vpop.f32.mrf.mxu1 }
 0x189   : > { %v7738_v19 = vadd.f32 %v1803_v1, %v1514_v6  ;;  %v1516_v22 = vpop.f32.mrf.mxu0  ;;  %v7760_v10 = vsel %vm7104_vm5, %v769_v0, 0 }
 0x18a   : > { %v1805_v34 = vpop.f32.mrf.mxu1 }
 0x18b   : > { %10241 = vst [vmem:[#allocation72_spill] sm:$0xff] %v7738_v19  ;;  %v1519_v45 = vpop.f32.mrf.mxu0  ;;  %1710 = vmatmul.mubr.bf16.gmra.mxu0 %v7699_v63 }
 0x18c   : > { %v1808_v58 = vpop.f32.mrf.mxu1  ;;  %1999 = vmatmul.mubr.bf16.gmra.mxu1 %v7742_v36  ;;  %1717 = vmatprep.mubr.bf16.mxu0 %v7678_v8 }
 0x18d   : > { %v7751_v1 = vadd.f32 %v1808_v58, %v1519_v45  ;;  %v1521_v22 = vpop.f32.mrf.mxu0  ;;  %2006 = vmatprep.mubr.bf16.mxu1 %v7746_v35 }
 0x18e   : > { %v1810_v5 = vpop.f32.mrf.mxu1 }
 0x18f   : > { %v1522_v31 = vpop.f32.mrf.mxu0 }
 0x190   : > { %v1811_v14 = vpop.f32.mrf.mxu1 }
 0x191   : > { %v7756_v6 = vadd.f32 %v1811_v14, %v1522_v31  ;;  %v1524_v34 = vpop.f32.mrf.mxu0  ;;  %v6549_v14 = vld [vmem:[#allocation5 + $0x230] sm:$0xff]  }
 0x192   : > { %v1813_v27 = vpop.f32.mrf.mxu1 }
 0x193   : > { %10243 = vst [vmem:[#allocation73_spill] sm:$0xff] %v7756_v6  ;;  %v1527_v19 = vpop.f32.mrf.mxu0  ;;  %1718 = vmatmul.mubr.bf16.gmra.mxu0 %v7723_v25 }
 0x194   : > { %v1816_v45 = vpop.f32.mrf.mxu1  ;;  %2007 = vmatmul.mubr.bf16.gmra.mxu1 %v7760_v10  ;;  %2047 = vmatprep.mubr.bf16.mxu0 %v7142_v9 }
 0x195   : > { %v7765_v43 = vadd.f32 %v1816_v45, %v1527_v19  ;;  %v1529_v58 = vpop.f32.mrf.mxu0  ;;  %2336 = vmatprep.mubr.bf16.mxu1 %v7086_v38  ;;  %v6550_v45 = vld [vmem:[#allocation5 + $0x228] sm:$0xff]  }
 0x196   : > { %v1818_v22 = vpop.f32.mrf.mxu1 }
 0x197   : > { %v1530_v39 = vpop.f32.mrf.mxu0 }
 0x198   : > { %v1819_v5 = vpop.f32.mrf.mxu1 }
 0x199   : > { %v7768_v31 = vadd.f32 %v1819_v5, %v1530_v39  ;;  %v1532_v0 = vpop.f32.mrf.mxu0 }
 0x19a   : > { %v1821_v27 = vpop.f32.mrf.mxu1  ;;  %v6551_v0 = vld [vmem:[#allocation5 + $0x220] sm:$0xff]  }
 0x19b   : > { %v1535_v34 = vpop.f32.mrf.mxu0  ;;  %2048 = vmatmul.mubr.bf16.vlgmr.msra.gmra.mxu0 %v7059_v21 }
 0x19c   : > { %v1824_v6 = vpop.f32.mrf.mxu1  ;;  %6251 = vmatpush3.bf16.msra.mxu0 %v7461_v50  ;;  %2337 = vmatmul.mubr.bf16.vlgmr.msra.gmra.mxu1 %v7124_v62 }
 0x19d   : > { %v7773_v9 = vadd.f32 %v1824_v6, %v1535_v34  ;;  %v1537_v19 = vpop.f32.mrf.mxu0  ;;  %2055 = vmatprep.mubr.bf16.mxu0 %v7164_v23  ;;  %2344 = vmatprep.mubr.bf16.mxu1 %v7098_v48 }
 0x19e   : > { %v1826_v58 = vpop.f32.mrf.mxu1  ;;  %6252 = vmatprep.subr.bf16.mxu0 %v6549_v14  ;;  %v6552_v19 = vld [vmem:[#allocation5 + $0x218] sm:$0xff]  }
 0x19f   : > { %v1538_v22 = vpop.f32.mrf.mxu0 }
 0x1a0   : > { %v1827_v39 = vpop.f32.mrf.mxu1  ;;  %6253 = vmatpush3.bf16.msra.mxu0 %v6549_v14 }
 0x1a1   : > { %v7777_v5 = vadd.f32 %v1827_v39, %v1538_v22  ;;  %v1540_v21 = vpop.f32.mrf.mxu0  ;;  %6254 = vmatprep.subr.bf16.mxu0 %v6550_v45 }
 0x1a2   : > { %v1829_v50 = vpop.f32.mrf.mxu1 }
 0x1a3   : > { %v1543_v62 = vpop.f32.mrf.mxu0  ;;  %2056 = vmatmul.mubr.bf16.gmra.mxu0 %v7086_v38 }
 0x1a4   : > { %v1832_v6 = vpop.f32.mrf.mxu1  ;;  %2345 = vmatmul.mubr.bf16.gmra.mxu1 %v7148_v13  ;;  %2063 = vmatprep.mubr.bf16.mxu0 %v7184_v37 }
 0x1a5   : > { %v7782_v27 = vadd.f32 %v1832_v6, %v1543_v62  ;;  %v1545_v34 = vpop.f32.mrf.mxu0  ;;  %2352 = vmatprep.mubr.bf16.mxu1 %v7127_v2  ;;  %6255 = vmatpush3.bf16.msra.mxu0 %v6550_v45 }
 0x1a6   : > { %v1834_v14 = vpop.f32.mrf.mxu1  ;;  %6256 = vmatprep.subr.bf16.mxu0 %v6551_v0 }
 0x1a7   : > { %v1546_v58 = vpop.f32.mrf.mxu0 }
 0x1a8   : > { %v1835_v22 = vpop.f32.mrf.mxu1 }
 0x1a9   : > { %v7785_v39 = vadd.f32 %v1835_v22, %v1546_v58  ;;  %v1548_v21 = vpop.f32.mrf.mxu0  ;;  %6257 = vmatpush3.bf16.msra.mxu0 %v6551_v0 }
 0x1aa   : > { %v1837_v38 = vpop.f32.mrf.mxu1  ;;  %6258 = vmatprep.subr.bf16.mxu0 %v6552_v19 }
 0x1ab   : > { %v1551_v13 = vpop.f32.mrf.mxu0  ;;  %2064 = vmatmul.mubr.bf16.gmra.mxu0 %v7098_v48 }
 0x1ac   : > { %v1840_v50 = vpop.f32.mrf.mxu1  ;;  %2353 = vmatmul.mubr.bf16.gmra.mxu1 %v7169_v28  ;;  %2071 = vmatprep.mubr.bf16.mxu0 %v7204_v52 }
 0x1ad   : > { %v7790_v45 = vadd.f32 %v1840_v50, %v1551_v13  ;;  %v1553_v62 = vpop.f32.mrf.mxu0  ;;  %2360 = vmatprep.mubr.bf16.mxu1 %v7150_v15  ;;  %6259 = vmatpush3.bf16.msra.mxu0 %v6552_v19 }
 0x1ae   : > { %v1842_v6 = vpop.f32.mrf.mxu1 }
 0x1af   : > { %v1554_v34 = vpop.f32.mrf.mxu0 }
 0x1b0   : > { %v1843_v14 = vpop.f32.mrf.mxu1 }
 0x1b1   : > { %v7793_v0 = vadd.f32 %v1843_v14, %v1554_v34  ;;  %v1556_v58 = vpop.f32.mrf.mxu0 }
 0x1b2   : > { %v1845_v22 = vpop.f32.mrf.mxu1 }
 0x1b3   : > { %v1559_v21 = vpop.f32.mrf.mxu0  ;;  %2072 = vmatmul.mubr.bf16.gmra.mxu0 %v7127_v2  ;;  %v6553_v22 = vld [vmem:[#allocation5 + $0x210] sm:$0xff]  }
 0x1b4   : > { %v1848_v48 = vpop.f32.mrf.mxu1  ;;  %2361 = vmatmul.mubr.bf16.gmra.mxu1 %v7189_v42  ;;  %2079 = vmatprep.mubr.bf16.mxu0 %v7224_v7 }
 0x1b5   : > { %v7798_v28 = vadd.f32 %v1848_v48, %v1559_v21  ;;  %v1561_v38 = vpop.f32.mrf.mxu0  ;;  %2368 = vmatprep.mubr.bf16.mxu1 %v7171_v30  ;;  %6260 = vmatprep.subr.bf16.mxu0 %v6553_v22 }
 0x1b6   : > { %v1850_v19 = vpop.f32.mrf.mxu1  ;;  %6261 = vmatpush3.bf16.msra.mxu0 %v6553_v22 }
 0x1b7   : > { %v1562_v13 = vpop.f32.mrf.mxu0 }
 0x1b8   : > { %v1851_v50 = vpop.f32.mrf.mxu1 }
 0x1b9   : > { %v7801_v62 = vadd.f32 %v1851_v50, %v1562_v13  ;;  %v1564_v6 = vpop.f32.mrf.mxu0 }
 0x1ba   : > { %v1853_v34 = vpop.f32.mrf.mxu1 }
 0x1bb   : > { %v1567_v14 = vpop.f32.mrf.mxu0  ;;  %2080 = vmatmul.mubr.bf16.gmra.mxu0 %v7150_v15 }
 0x1bc   : > { %v1856_v2 = vpop.f32.mrf.mxu1  ;;  %2369 = vmatmul.mubr.bf16.gmra.mxu1 %v7209_v57  ;;  %2087 = vmatprep.mubr.bf16.mxu0 %v7244_v24 }
 0x1bd   : > { %v7806_v42 = vadd.f32 %v1856_v2, %v1567_v14  ;;  %v1569_v58 = vpop.f32.mrf.mxu0  ;;  %2376 = vmatprep.mubr.bf16.mxu1 %v7191_v44 }
 0x1be   : > { %v1858_v21 = vpop.f32.mrf.mxu1 }
 0x1bf   : > { %v1570_v48 = vpop.f32.mrf.mxu0 }
 0x1c0   : > { %v1859_v38 = vpop.f32.mrf.mxu1 }
 0x1c1   : > { %v7809_v19 = vadd.f32 %v1859_v38, %v1570_v48  ;;  %v1572_v13 = vpop.f32.mrf.mxu0 }
 0x1c2   : > { %v1861_v15 = vpop.f32.mrf.mxu1 }
 0x1c3   : > { %v1575_v50 = vpop.f32.mrf.mxu0  ;;  %2088 = vmatmul.mubr.bf16.gmra.mxu0 %v7171_v30 }
 0x1c4   : > { %v1864_v57 = vpop.f32.mrf.mxu1  ;;  %2377 = vmatmul.mubr.bf16.gmra.mxu1 %v7229_v12  ;;  %2095 = vmatprep.mubr.bf16.mxu0 %v7263_v41 }
 0x1c5   : > { %v7814_v6 = vadd.f32 %v1864_v57, %v1575_v50  ;;  %v1577_v34 = vpop.f32.mrf.mxu0  ;;  %2384 = vmatprep.mubr.bf16.mxu1 %v7211_v61 }
 0x1c6   : > { %v1866_v14 = vpop.f32.mrf.mxu1 }
 0x1c7   : > { %v1578_v2 = vpop.f32.mrf.mxu0 }
 0x1c8   : > { %v1867_v58 = vpop.f32.mrf.mxu1 }
 0x1c9   : > { %v7817_v22 = vadd.f32 %v1867_v58, %v1578_v2  ;;  %v1580_v21 = vpop.f32.mrf.mxu0 }
 0x1ca   : > { %v1869_v48 = vpop.f32.mrf.mxu1 }
 0x1cb   : > { %v1583_v38 = vpop.f32.mrf.mxu0  ;;  %2096 = vmatmul.mubr.bf16.gmra.mxu0 %v7191_v44 }
 0x1cc   : > { %v1872_v30 = vpop.f32.mrf.mxu1  ;;  %2385 = vmatmul.mubr.bf16.gmra.mxu1 %v7249_v29  ;;  %2103 = vmatprep.mubr.bf16.mxu0 %v7281_v59 }
 0x1cd   : > { %v7822_v12 = vadd.f32 %v1872_v30, %v1583_v38  ;;  %v1585_v13 = vpop.f32.mrf.mxu0  ;;  %2392 = vmatprep.mubr.bf16.mxu1 %v7231_v16 }
 0x1ce   : > { %v1874_v15 = vpop.f32.mrf.mxu1 }
 0x1cf   : > { %v1586_v50 = vpop.f32.mrf.mxu0 }
 0x1d0   : > { %v1875_v57 = vpop.f32.mrf.mxu1 }
 0x1d1   : > { %v7825_v34 = vadd.f32 %v1875_v57, %v1586_v50  ;;  %v1588_v14 = vpop.f32.mrf.mxu0 }
 0x1d2   : > { %v1877_v2 = vpop.f32.mrf.mxu1 }
 0x1d3   : > { %10244 = vst [vmem:[#allocation74_spill] sm:$0xff] %v7825_v34  ;;  %v1591_v58 = vpop.f32.mrf.mxu0  ;;  %2104 = vmatmul.mubr.bf16.gmra.mxu0 %v7211_v61  ;;  %v10283_v34 = vld [vmem:[#allocation30_spill] sm:$0xff] }
 0x1d4   : > { %v1880_v44 = vpop.f32.mrf.mxu1  ;;  %2393 = vmatmul.mubr.bf16.gmra.mxu1 %v7268_v46  ;;  %2111 = vmatprep.mubr.bf16.mxu0 %v7301_v20  ;;  %v6554_v46 = vld [vmem:[#allocation5 + $0x208] sm:$0xff]  }
 0x1d5   : > { %v7830_v29 = vadd.f32 %v1880_v44, %v1591_v58  ;;  %v1593_v21 = vpop.f32.mrf.mxu0  ;;  %2400 = vmatprep.mubr.bf16.mxu1 %v7251_v32  ;;  %6262 = vmatprep.subr.bf16.mxu0 %v6554_v46 }
 0x1d6   : > { %v1882_v48 = vpop.f32.mrf.mxu1  ;;  %6263 = vmatpush3.bf16.msra.mxu0 %v6554_v46 }
 0x1d7   : > { %10245 = vst [vmem:[#allocation75_spill] sm:$0xff] %v7830_v29  ;;  %v1594_v38 = vpop.f32.mrf.mxu0 }
 0x1d8   : > { %v1883_v30 = vpop.f32.mrf.mxu1 }
 0x1d9   : > { %v7833_v13 = vadd.f32 %v1883_v30, %v1594_v38  ;;  %v1596_v15 = vpop.f32.mrf.mxu0 }
 0x1da   : > { %v1885_v50 = vpop.f32.mrf.mxu1 }
 0x1db   : > { %10246 = vst [vmem:[#allocation76_spill] sm:$0xff] %v7833_v13  ;;  %v1599_v57 = vpop.f32.mrf.mxu0  ;;  %2112 = vmatmul.mubr.bf16.gmra.mxu0 %v7231_v16 }
 0x1dc   : > { %v1888_v61 = vpop.f32.mrf.mxu1  ;;  %2401 = vmatmul.mubr.bf16.gmra.mxu1 %v7286_v3  ;;  %2119 = vmatprep.mubr.bf16.mxu0 %v7323_v47 }
 0x1dd   : > { %v7838_v14 = vadd.f32 %v1888_v61, %v1599_v57  ;;  %v1601_v2 = vpop.f32.mrf.mxu0  ;;  %2408 = vmatprep.mubr.bf16.mxu1 %v7270_v49 }
 0x1de   : > { %v1890_v58 = vpop.f32.mrf.mxu1 }
 0x1df   : > { %10247 = vst [vmem:[#allocation77_spill] sm:$0xff] %v7838_v14  ;;  %v1602_v44 = vpop.f32.mrf.mxu0 }
 0x1e0   : > { %v1891_v21 = vpop.f32.mrf.mxu1 }
 0x1e1   : > { %v7841_v48 = vadd.f32 %v1891_v21, %v1602_v44  ;;  %v1604_v38 = vpop.f32.mrf.mxu0 }
 0x1e2   : > { %v1893_v16 = vpop.f32.mrf.mxu1  ;;  %v6555_v38 = vld [vmem:[#allocation7 + $0x38] sm:$0xff]  }
 0x1e3   : > { %10248 = vst [vmem:[#allocation78_spill] sm:$0xff] %v7841_v48  ;;  %v1607_v30 = vpop.f32.mrf.mxu0  ;;  %2120 = vmatmul.mubr.bf16.gmra.mxu0 %v7251_v32  ;;  %4113 = vmatpush1.bf16.msra.mxu1 %v6555_v38  ;;  %v10259_v38 = vld [vmem:[#allocation16_spill] sm:$0xff] }
 0x1e4   : > { %v1896_v3 = vpop.f32.mrf.mxu1  ;;  %2409 = vmatmul.mubr.bf16.gmra.mxu1 %v7306_v26  ;;  %2127 = vmatprep.mubr.bf16.mxu0 %v7344_v18  ;;  %v10251_v26 = vld [vmem:[#allocation19_spill] sm:$0xff] }
 0x1e5   : > { %v7846_v15 = vadd.f32 %v1896_v3, %v1607_v30  ;;  %v1609_v50 = vpop.f32.mrf.mxu0  ;;  %2416 = vmatprep.mubr.bf16.mxu1 %v7288_v4  ;;  %v10253_v3 = vld [vmem:[#allocation15_spill] sm:$0xff] }
 0x1e6   : > { %v1898_v57 = vpop.f32.mrf.mxu1 }
 0x1e7   : > { %10249 = vst [vmem:[#allocation79_spill] sm:$0xff] %v7846_v15  ;;  %v1610_v61 = vpop.f32.mrf.mxu0  ;;  %v10256_v15 = vld [vmem:[#allocation17_spill] sm:$0xff] }
 0x1e8   : > { %v1899_v46 = vpop.f32.mrf.mxu1 }
 0x1e9   : > { %v7849_v2 = vadd.f32 %v1899_v46, %v1610_v61  ;;  %v1612_v58 = vpop.f32.mrf.mxu0  ;;  %v10254_v61 = vmov 0  }
 0x1ea   : > { %v1901_v44 = vpop.f32.mrf.mxu1  ;;  %4114 = vmatprep.subr.bf16.mxu1 %v10254_v61 }
 0x1eb   : > { %10250 = vst [vmem:[#allocation80_spill] sm:$0xff] %v7849_v2  ;;  %v1615_v21 = vpop.f32.mrf.mxu0  ;;  %2128 = vmatmul.mubr.bf16.gmra.mxu0 %v7270_v49 }
 0x1ec   : > { %v1904_v32 = vpop.f32.mrf.mxu1  ;;  %2417 = vmatmul.mubr.bf16.gmra.mxu1 %v7328_v55  ;;  %2135 = vmatprep.mubr.bf16.mxu0 %v10251_v26 }
 0x1ed   : > { %v7854_v16 = vadd.f32 %v1904_v32, %v1615_v21  ;;  %v1617_v30 = vpop.f32.mrf.mxu0  ;;  %2424 = vmatprep.mubr.bf16.mxu1 %v10253_v3  ;;  %v10257_v21 = vld [vmem:[#allocation22_spill] sm:$0xff] }
 0x1ee   : > { %v1906_v50 = vpop.f32.mrf.mxu1 }
 0x1ef   : > { %10252 = vst [vmem:[#allocation19_spill] sm:$0xff] %v7854_v16  ;;  %v1618_v57 = vpop.f32.mrf.mxu0 }
 0x1f0   : > { %v1907_v46 = vpop.f32.mrf.mxu1 }
 0x1f1   : > { %v7858_v58 = vadd.f32 %v1907_v46, %v1618_v57  ;;  %v1620_v49 = vpop.f32.mrf.mxu0 }
 0x1f2   : > { %v1909_v44 = vpop.f32.mrf.mxu1 }
 0x1f3   : > { %10255 = vst [vmem:[#allocation15_spill] sm:$0xff] %v7858_v58  ;;  %v1623_v2 = vpop.f32.mrf.mxu0  ;;  %2136 = vmatmul.mubr.bf16.gmra.mxu0 %v7288_v4  ;;  %v10261_v58 = vld [vmem:[#allocation20_spill] sm:$0xff] }
 0x1f4   : > { %v1912_v55 = vpop.f32.mrf.mxu1  ;;  %2425 = vmatmul.mubr.bf16.gmra.mxu1 %v10256_v15  ;;  %2143 = vmatprep.mubr.bf16.mxu0 %v10257_v21  ;;  %v10262_v15 = vld [vmem:[#allocation25_spill] sm:$0xff] }
 0x1f5   : > { %v7863_v32 = vadd.f32 %v1912_v55, %v1623_v2  ;;  %v1625_v30 = vpop.f32.mrf.mxu0  ;;  %2432 = vmatprep.mubr.bf16.mxu1 %v10259_v38  ;;  %v6556_v2 = vld [vmem:[#allocation5 + $0x200] sm:$0xff]   ;;  %v6557_v55 = vld [vmem:[#allocation7 + $0x30] sm:$0xff]  }
 0x1f6   : > { %v1914_v50 = vpop.f32.mrf.mxu1  ;;  %6264 = vmatprep.subr.bf16.mxu0 %v6556_v2  ;;  %4115 = vmatpush1.bf16.msra.mxu1 %v6557_v55  ;;  %v10269_v55 = vld [vmem:[#allocation28_spill] sm:$0xff] }
 0x1f7   : > { %10258 = vst [vmem:[#allocation17_spill] sm:$0xff] %v7863_v32  ;;  %v1626_v16 = vpop.f32.mrf.mxu0  ;;  %v10264_v50 = vld [vmem:[#allocation18_spill] sm:$0xff]  ;;  %6265 = vmatpush3.bf16.msra.mxu0 %v6556_v2  ;;  %4116 = vmatprep.subr.bf16.mxu1 %v10254_v61 }
 0x1f8   : > { %v1915_v48 = vpop.f32.mrf.mxu1  ;;  %4401 = vmatprep.subr.bf16.mxu0 %v10254_v61 }
 0x1f9   : > { %v7866_v57 = vadd.f32 %v1915_v48, %v1626_v16  ;;  %v1628_v46 = vpop.f32.mrf.mxu0 }
 0x1fa   : > { %v1917_v49 = vpop.f32.mrf.mxu1  ;;  %v10266_v46 = vld [vmem:[#allocation21_spill] sm:$0xff] }
 0x1fb   : > { %10260 = vst [vmem:[#allocation22_spill] sm:$0xff] %v7866_v57  ;;  %v1631_v44 = vpop.f32.mrf.mxu0  ;;  %2144 = vmatmul.mubr.bf16.gmra.mxu0 %v10253_v3  ;;  %v10267_v49 = vshll.u32 %v10266_v46, 16 }
 0x1fc   : > { %v1920_v4 = vpop.f32.mrf.mxu1  ;;  %2433 = vmatmul.mubr.bf16.gmra.mxu1 %v10261_v58  ;;  %2151 = vmatprep.mubr.bf16.mxu0 %v10262_v15 }
 0x1fd   : > { %v7871_v30 = vadd.f32 %v1920_v4, %v1631_v44  ;;  %v1633_v32 = vpop.f32.mrf.mxu0  ;;  %2440 = vmatprep.mubr.bf16.mxu1 %v10264_v50  ;;  %v853_v44 = vrot.slane %v10267_v49, 1 }
 0x1fe   : > { %v1922_v14 = vpop.f32.mrf.mxu1 }
 0x1ff   : > { %10263 = vst [vmem:[#allocation16_spill] sm:$0xff] %v7871_v30  ;;  %v1634_v48 = vpop.f32.mrf.mxu0  ;;  %v10268_v30 = vld [vmem:[#allocation23_spill] sm:$0xff] }
 0x200   : > { %v1923_v16 = vpop.f32.mrf.mxu1 }
 0x201   : > { %v7876_v3 = vadd.f32 %v1923_v16, %v1634_v48  ;;  %v1636_v58 = vpop.f32.mrf.mxu0  ;;  %v10271_v48 = vshrl.u32 %v10266_v46, 16 }
 0x202   : > { %v1925_v4 = vpop.f32.mrf.mxu1 }
 0x203   : > { %10265 = vst [vmem:[#allocation20_spill] sm:$0xff] %v7876_v3  ;;  %v1639_v32 = vpop.f32.mrf.mxu0  ;;  %2152 = vmatmul.mubr.bf16.gmra.mxu0 %v10259_v38  ;;  %v854_v16 = vor.u32 %v853_v44, %v10271_v48  ;;  %v6558_v44 = vld [vmem:[#allocation7 + $0x28] sm:$0xff]  }
 0x204   : > { %v1928_v14 = vpop.f32.mrf.mxu1  ;;  %2441 = vmatmul.mubr.bf16.gmra.mxu1 %v10268_v30  ;;  %2159 = vmatprep.mubr.bf16.mxu0 %v10269_v55 }
 0x205   : > { %v7883_v2 = vadd.f32 %v1928_v14, %v1639_v32  ;;  %v1641_v57 = vpop.f32.mrf.mxu0  ;;  %2448 = vmatprep.mubr.bf16.mxu1 %v10266_v46  ;;  %v7892_v38 = vsel %vm7104_vm5, %v854_v16, 0  ;;  %v10274_v32 = vld [vmem:[#allocation26_spill] sm:$0xff]  ;;  %4117 = vmatpush1.bf16.msra.mxu1 %v6558_v44  ;;  %v10280_v44 = vld [vmem:[#allocation27_spill] sm:$0xff] }
 0x206   : > { %v1930_v58 = vpop.f32.mrf.mxu1  ;;  %10273 = vst [vmem:[#allocation21_spill] sm:$0xff] %v7892_v38  ;;  %4118 = vmatprep.subr.bf16.mxu1 %v10254_v61 }
 0x207   : > { %10270 = vst [vmem:[#allocation25_spill] sm:$0xff] %v7883_v2  ;;  %v1642_v3 = vpop.f32.mrf.mxu0 }
 0x208   : > { %v1931_v49 = vpop.f32.mrf.mxu1 }
 0x209   : > { %v7888_v4 = vadd.f32 %v1931_v49, %v1642_v3  ;;  %v1644_v13 = vpop.f32.mrf.mxu0 }
 0x20a   : > { %v1933_v30 = vpop.f32.mrf.mxu1 }
 0x20b   : > { %10272 = vst [vmem:[#allocation18_spill] sm:$0xff] %v7888_v4  ;;  %v1647_v29 = vpop.f32.mrf.mxu0  ;;  %2160 = vmatmul.mubr.bf16.gmra.mxu0 %v10264_v50  ;;  %v10277_v4 = vld [vmem:[#allocation13_spill] sm:$0xff] }
 0x20c   : > { %v1936_v57 = vpop.f32.mrf.mxu1  ;;  %2449 = vmatmul.mubr.bf16.gmra.mxu1 %v10274_v32  ;;  %2167 = vmatprep.mubr.bf16.mxu0 %v7892_v38  ;;  %v10284_v38 = vld [vmem:[#allocation35_spill] sm:$0xff] }
 0x20d   : > { %v7897_v14 = vadd.f32 %v1936_v57, %v1647_v29  ;;  %v1649_v48 = vpop.f32.mrf.mxu0  ;;  %2456 = vmatprep.mubr.bf16.mxu1 %v10254_v61  ;;  %v10278_v29 = vld [vmem:[#allocation32_spill] sm:$0xff] }
 0x20e   : > { %v1938_v13 = vpop.f32.mrf.mxu1 }
 0x20f   : > { %10275 = vst [vmem:[#allocation23_spill] sm:$0xff] %v7897_v14  ;;  %v1650_v3 = vpop.f32.mrf.mxu0 }
 0x210   : > { %v1939_v16 = vpop.f32.mrf.mxu1 }
 0x211   : > { %v7901_v58 = vadd.f32 %v1939_v16, %v1650_v3  ;;  %v1652_v50 = vpop.f32.mrf.mxu0 }
 0x212   : > { %v1941_v49 = vpop.f32.mrf.mxu1 }
 0x213   : > { %10276 = vst [vmem:[#allocation28_spill] sm:$0xff] %v7901_v58  ;;  %v1655_v30 = vpop.f32.mrf.mxu0  ;;  %2168 = vmatmul.mubr.bf16.gmra.mxu0 %v10266_v46  ;;  %v10282_v58 = vld [vmem:[#allocation24_spill] sm:$0xff] }
 0x214   : > { %v1944_v32 = vpop.f32.mrf.mxu1  ;;  %2457 = vmatmul.mubr.bf16.gmra.mxu1 %v10277_v4  ;;  %2175 = vmatprep.mubr.bf16.mxu0 %v10278_v29 }
 0x215   : > { %v7906_v57 = vadd.f32 %v1944_v32, %v1655_v30  ;;  %v1657_v48 = vpop.f32.mrf.mxu0  ;;  %2464 = vmatprep.mubr.bf16.mxu1 %v10280_v44  ;;  %v6559_v30 = vld [vmem:[#allocation7 + $0x20] sm:$0xff]  }
 0x216   : > { %v1946_v13 = vpop.f32.mrf.mxu1  ;;  %v10286_v48 = vld [vmem:[#allocation29_spill] sm:$0xff]  ;;  %4119 = vmatpush1.bf16.msra.mxu1 %v6559_v30  ;;  %v10291_v30 = vld [vmem:[#allocation31_spill] sm:$0xff] }
 0x217   : > { %10279 = vst [vmem:[#allocation26_spill] sm:$0xff] %v7906_v57  ;;  %v1658_v14 = vpop.f32.mrf.mxu0  ;;  %4120 = vmatprep.subr.bf16.mxu1 %v10254_v61  ;;  %v10288_v57 = vld [vmem:[#allocation33_spill] sm:$0xff] }
 0x218   : > { %v1947_v2 = vpop.f32.mrf.mxu1 }
 0x219   : > { %v7909_v3 = vadd.f32 %v1947_v2, %v1658_v14  ;;  %v1660_v16 = vpop.f32.mrf.mxu0 }
 0x21a   : > { %v1949_v50 = vpop.f32.mrf.mxu1 }
 0x21b   : > { %10281 = vst [vmem:[#allocation32_spill] sm:$0xff] %v7909_v3  ;;  %v1663_v49 = vpop.f32.mrf.mxu0  ;;  %2176 = vmatmul.mubr.bf16.gmra.mxu0 %v10282_v58 }
 0x21c   : > { %v1952_v46 = vpop.f32.mrf.mxu1  ;;  %2465 = vmatmul.mubr.bf16.gmra.mxu1 %v10283_v34  ;;  %2183 = vmatprep.mubr.bf16.mxu0 %v10284_v38 }
 0x21d   : > { %v7914_v32 = vadd.f32 %v1952_v46, %v1663_v49  ;;  %v1665_v29 = vpop.f32.mrf.mxu0  ;;  %2472 = vmatprep.mubr.bf16.mxu1 %v10286_v48  ;;  %v10289_v49 = vld [vmem:[#allocation38_spill] sm:$0xff] }
 0x21e   : > { %v1954_v13 = vpop.f32.mrf.mxu1 }
 0x21f   : > { %10285 = vst [vmem:[#allocation27_spill] sm:$0xff] %v7914_v32  ;;  %v1666_v2 = vpop.f32.mrf.mxu0 }
 0x220   : > { %v1955_v14 = vpop.f32.mrf.mxu1 }
 0x221   : > { %v7918_v16 = vadd.f32 %v1955_v14, %v1666_v2  ;;  %v1668_v58 = vpop.f32.mrf.mxu0 }
 0x222   : > { %v1957_v50 = vpop.f32.mrf.mxu1 }
 0x223   : > { %10287 = vst [vmem:[#allocation24_spill] sm:$0xff] %v7918_v16  ;;  %v1671_v3 = vpop.f32.mrf.mxu0  ;;  %2184 = vmatmul.mubr.bf16.gmra.mxu0 %v10280_v44  ;;  %v10293_v16 = vld [vmem:[#allocation36_spill] sm:$0xff] }
 0x224   : > { %v1960_v34 = vpop.f32.mrf.mxu1  ;;  %2473 = vmatmul.mubr.bf16.gmra.mxu1 %v10288_v57  ;;  %2191 = vmatprep.mubr.bf16.mxu0 %v10289_v49  ;;  %v10294_v57 = vld [vmem:[#allocation41_spill] sm:$0xff] }
 0x225   : > { %v7923_v46 = vadd.f32 %v1960_v34, %v1671_v3  ;;  %v1673_v29 = vpop.f32.mrf.mxu0  ;;  %2480 = vmatprep.mubr.bf16.mxu1 %v10291_v30  ;;  %v6560_v3 = vld [vmem:[#allocation7 + $0x18] sm:$0xff]  }
 0x226   : > { %v1962_v13 = vpop.f32.mrf.mxu1  ;;  %4121 = vmatpush1.bf16.msra.mxu1 %v6560_v3  ;;  %v10301_v3 = vld [vmem:[#allocation37_spill] sm:$0xff] }
 0x227   : > { %10290 = vst [vmem:[#allocation30_spill] sm:$0xff] %v7923_v46  ;;  %v1674_v32 = vpop.f32.mrf.mxu0  ;;  %v10296_v46 = vld [vmem:[#allocation34_spill] sm:$0xff]  ;;  %4122 = vmatprep.subr.bf16.mxu1 %v10254_v61 }
 0x228   : > { %v1963_v38 = vpop.f32.mrf.mxu1 }
 0x229   : > { %v7926_v2 = vadd.f32 %v1963_v38, %v1674_v32  ;;  %v1676_v14 = vpop.f32.mrf.mxu0 }
 0x22a   : > { %v1965_v58 = vpop.f32.mrf.mxu1 }
 0x22b   : > { %10292 = vst [vmem:[#allocation29_spill] sm:$0xff] %v7926_v2  ;;  %v1679_v50 = vpop.f32.mrf.mxu0  ;;  %2192 = vmatmul.mubr.bf16.gmra.mxu0 %v10286_v48 }
 0x22c   : > { %v1968_v44 = vpop.f32.mrf.mxu1  ;;  %2481 = vmatmul.mubr.bf16.gmra.mxu1 %v10293_v16  ;;  %2199 = vmatprep.mubr.bf16.mxu0 %v10294_v57  ;;  %v10298_v57 = vld [vmem:[#allocation39_spill] sm:$0xff] }
 0x22d   : > { %v7931_v34 = vadd.f32 %v1968_v44, %v1679_v50  ;;  %v1681_v29 = vpop.f32.mrf.mxu0  ;;  %2488 = vmatprep.mubr.bf16.mxu1 %v10296_v46  ;;  %v10299_v50 = vld [vmem:[#allocation44_spill] sm:$0xff] }
 0x22e   : > { %v1970_v13 = vpop.f32.mrf.mxu1 }
 0x22f   : > { %10295 = vst [vmem:[#allocation33_spill] sm:$0xff] %v7931_v34  ;;  %v1682_v38 = vpop.f32.mrf.mxu0 }
 0x230   : > { %v1971_v32 = vpop.f32.mrf.mxu1 }
 0x231   : > { %v7935_v14 = vadd.f32 %v1971_v32, %v1682_v38  ;;  %v1684_v48 = vpop.f32.mrf.mxu0 }
 0x232   : > { %v1973_v58 = vpop.f32.mrf.mxu1 }
 0x233   : > { %10297 = vst [vmem:[#allocation31_spill] sm:$0xff] %v7935_v14  ;;  %v1687_v2 = vpop.f32.mrf.mxu0  ;;  %2200 = vmatmul.mubr.bf16.gmra.mxu0 %v10291_v30  ;;  %v10303_v14 = vld [vmem:[#allocation42_spill] sm:$0xff] }
 0x234   : > { %v1976_v16 = vpop.f32.mrf.mxu1  ;;  %2489 = vmatmul.mubr.bf16.gmra.mxu1 %v10298_v57  ;;  %2207 = vmatprep.mubr.bf16.mxu0 %v10299_v50  ;;  %v10304_v57 = vld [vmem:[#allocation47_spill] sm:$0xff] }
 0x235   : > { %v7940_v44 = vadd.f32 %v1976_v16, %v1687_v2  ;;  %v1689_v29 = vpop.f32.mrf.mxu0  ;;  %2496 = vmatprep.mubr.bf16.mxu1 %v10301_v3  ;;  %v6561_v2 = vld [vmem:[#allocation7 + $0x10] sm:$0xff]  }
 0x236   : > { %v1978_v13 = vpop.f32.mrf.mxu1  ;;  %4123 = vmatpush1.bf16.msra.mxu1 %v6561_v2  ;;  %v10311_v2 = vld [vmem:[#allocation43_spill] sm:$0xff] }
 0x237   : > { %10300 = vst [vmem:[#allocation36_spill] sm:$0xff] %v7940_v44  ;;  %v1690_v34 = vpop.f32.mrf.mxu0  ;;  %v10306_v44 = vld [vmem:[#allocation40_spill] sm:$0xff]  ;;  %4124 = vmatprep.subr.bf16.mxu1 %v10254_v61 }
 0x238   : > { %v1979_v49 = vpop.f32.mrf.mxu1 }
 0x239   : > { %v7943_v38 = vadd.f32 %v1979_v49, %v1690_v34  ;;  %v1692_v32 = vpop.f32.mrf.mxu0 }
 0x23a   : > { %v1981_v48 = vpop.f32.mrf.mxu1 }
 0x23b   : > { %10302 = vst [vmem:[#allocation34_spill] sm:$0xff] %v7943_v38  ;;  %v1695_v58 = vpop.f32.mrf.mxu0  ;;  %2208 = vmatmul.mubr.bf16.gmra.mxu0 %v10296_v46 }
 0x23c   : > { %v1984_v30 = vpop.f32.mrf.mxu1  ;;  %2497 = vmatmul.mubr.bf16.gmra.mxu1 %v10303_v14  ;;  %2215 = vmatprep.mubr.bf16.mxu0 %v10304_v57  ;;  %v10308_v57 = vld [vmem:[#allocation45_spill] sm:$0xff] }
 0x23d   : > { %v7948_v16 = vadd.f32 %v1984_v30, %v1695_v58  ;;  %v1697_v29 = vpop.f32.mrf.mxu0  ;;  %2504 = vmatprep.mubr.bf16.mxu1 %v10306_v44  ;;  %v10309_v58 = vld [vmem:[#allocation50_spill] sm:$0xff] }
 0x23e   : > { %v1986_v13 = vpop.f32.mrf.mxu1 }
 0x23f   : > { %10305 = vst [vmem:[#allocation39_spill] sm:$0xff] %v7948_v16  ;;  %v1698_v49 = vpop.f32.mrf.mxu0 }
 0x240   : > { %v1987_v34 = vpop.f32.mrf.mxu1 }
 0x241   : > { %v7952_v32 = vadd.f32 %v1987_v34, %v1698_v49  ;;  %v1700_v46 = vpop.f32.mrf.mxu0 }
 0x242   : > { %v1989_v48 = vpop.f32.mrf.mxu1 }
 0x243   : > { %10307 = vst [vmem:[#allocation37_spill] sm:$0xff] %v7952_v32  ;;  %v1703_v38 = vpop.f32.mrf.mxu0  ;;  %2216 = vmatmul.mubr.bf16.gmra.mxu0 %v10301_v3  ;;  %v10313_v32 = vld [vmem:[#allocation48_spill] sm:$0xff] }
 0x244   : > { %v1992_v14 = vpop.f32.mrf.mxu1  ;;  %2505 = vmatmul.mubr.bf16.gmra.mxu1 %v10308_v57  ;;  %2223 = vmatprep.mubr.bf16.mxu0 %v10309_v58 }
 0x245   : > { %v7957_v30 = vadd.f32 %v1992_v14, %v1703_v38  ;;  %v1705_v29 = vpop.f32.mrf.mxu0  ;;  %2512 = vmatprep.mubr.bf16.mxu1 %v10311_v2  ;;  %v6562_v38 = vld [vmem:[#allocation7 + $0x8] sm:$0xff]  }
 0x246   : > { %v1994_v13 = vpop.f32.mrf.mxu1  ;;  %v10315_v29 = vld [vmem:[#allocation46_spill] sm:$0xff]  ;;  %4125 = vmatpush1.bf16.msra.mxu1 %v6562_v38  ;;  %v10319_v38 = vld [vmem:[#allocation49_spill] sm:$0xff] }
 0x247   : > { %10310 = vst [vmem:[#allocation42_spill] sm:$0xff] %v7957_v30  ;;  %v1706_v16 = vpop.f32.mrf.mxu0  ;;  %4126 = vmatprep.subr.bf16.mxu1 %v10254_v61  ;;  %v10317_v30 = vld [vmem:[#allocation51_spill] sm:$0xff] }
 0x248   : > { %v1995_v50 = vpop.f32.mrf.mxu1 }
 0x249   : > { %v7960_v49 = vadd.f32 %v1995_v50, %v1706_v16  ;;  %v1708_v34 = vpop.f32.mrf.mxu0 }
 0x24a   : > { %v1997_v46 = vpop.f32.mrf.mxu1 }
 0x24b   : > { %10312 = vst [vmem:[#allocation40_spill] sm:$0xff] %v7960_v49  ;;  %v1711_v48 = vpop.f32.mrf.mxu0  ;;  %2224 = vmatmul.mubr.bf16.gmra.mxu0 %v10306_v44 }
 0x24c   : > { %v2000_v3 = vpop.f32.mrf.mxu1  ;;  %2513 = vmatmul.mubr.bf16.gmra.mxu1 %v10313_v32  ;;  %2231 = vmatprep.mubr.bf16.mxu0 %v7595_v17  ;;  %v10322_v17 = vld [vmem:[#allocation54_spill] sm:$0xff] }
 0x24d   : > { %v7965_v57 = vadd.f32 %v2000_v3, %v1711_v48  ;;  %v1713_v14 = vpop.f32.mrf.mxu0  ;;  %2520 = vmatprep.mubr.bf16.mxu1 %v10315_v29 }
 0x24e   : > { %v2002_v13 = vpop.f32.mrf.mxu1 }
 0x24f   : > { %10314 = vst [vmem:[#allocation45_spill] sm:$0xff] %v7965_v57  ;;  %v1714_v50 = vpop.f32.mrf.mxu0 }
 0x250   : > { %v2003_v16 = vpop.f32.mrf.mxu1 }
 0x251   : > { %v7969_v34 = vadd.f32 %v2003_v16, %v1714_v50  ;;  %v1716_v44 = vpop.f32.mrf.mxu0 }
 0x252   : > { %v2005_v46 = vpop.f32.mrf.mxu1 }
 0x253   : > { %10316 = vst [vmem:[#allocation50_spill] sm:$0xff] %v7969_v34  ;;  %v1719_v49 = vpop.f32.mrf.mxu0  ;;  %2232 = vmatmul.mubr.bf16.gmra.mxu0 %v10311_v2  ;;  %v10321_v2 = vld [vmem:[#allocation55_spill] sm:$0xff] }
 0x254   : > { %v2008_v32 = vpop.f32.mrf.mxu1  ;;  %2521 = vmatmul.mubr.bf16.gmra.mxu1 %v10317_v30  ;;  %2239 = vmatprep.mubr.bf16.mxu0 %v7619_v40 }
 0x255   : > { %v7974_v48 = vadd.f32 %v2008_v32, %v1719_v49  ;;  %v1721_v3 = vpop.f32.mrf.mxu0  ;;  %2528 = vmatprep.mubr.bf16.mxu1 %v10319_v38  ;;  %v10323_v49 = vld [vmem:[#allocation61_spill] sm:$0xff]  ;;  %v6563_v32 = vld [vmem:[#allocation7] sm:$0xff]  }
 0x256   : > { %v2010_v14 = vpop.f32.mrf.mxu1  ;;  %4127 = vmatpush1.bf16.msra.mxu1 %v6563_v32 }
 0x257   : > { %10318 = vst [vmem:[#allocation43_spill] sm:$0xff] %v7974_v48  ;;  %v1722_v13 = vpop.f32.mrf.mxu0  ;;  %v10324_v48 = vld [vmem:[#allocation52_spill] sm:$0xff]  ;;  %4128 = vmatprep.subr.bf16.mxu1 %v10254_v61 }
 0x258   : > { %v2011_v57 = vpop.f32.mrf.mxu1 }
 0x259   : > { %v7977_v50 = vadd.f32 %v2011_v57, %v1722_v13  ;;  %v1724_v16 = vpop.f32.mrf.mxu0 }
 0x25a   : > { %v2013_v44 = vpop.f32.mrf.mxu1  ;;  %v10326_v16 = vld [vmem:[#allocation56_spill] sm:$0xff] }
 0x25b   : > { %10320 = vst [vmem:[#allocation48_spill] sm:$0xff] %v7977_v50  ;;  %v2049_v46 = vpop.f32.mrf.mxu0  ;;  %2240 = vmatmul.mubr.bf16.gmra.mxu0 %v10315_v29 }
 0x25c   : > { %v2050_v34 = vadd.f32 %v2049_v46, %v10321_v2  ;;  %v2338_v30 = vpop.f32.mrf.mxu1  ;;  %2529 = vmatmul.mubr.bf16.gmra.mxu1 %v10322_v17  ;;  %2247 = vmatprep.mubr.bf16.mxu0 %v10323_v49 }
 0x25d   : > { %v2051_v3 = vpop.f32.mrf.mxu0  ;;  %2536 = vmatprep.mubr.bf16.mxu1 %v10324_v48 }
 0x25e   : > { %v7984_v14 = vadd.f32 %v2338_v30, %v2050_v34  ;;  %v2340_v57 = vpop.f32.mrf.mxu1  ;;  %v10328_v3 = vld [vmem:[#allocation59_spill] sm:$0xff]  ;;  %v10329_v34 = vld [vmem:[#allocation58_spill] sm:$0xff]  ;;  %v10330_v30 = vld [vmem:[#allocation65_spill] sm:$0xff] }
 0x25f   : > { %v2052_v13 = vpop.f32.mrf.mxu0 }
 0x260   : > { %10325 = vst [vmem:[#allocation46_spill] sm:$0xff] %v7984_v14  ;;  %v2053_v29 = vadd.f32 %v2052_v13, %v10326_v16  ;;  %v2341_v44 = vpop.f32.mrf.mxu1 }
 0x261   : > { %v2054_v46 = vpop.f32.mrf.mxu0 }
 0x262   : > { %v7988_v2 = vadd.f32 %v2341_v44, %v2053_v29  ;;  %v2343_v17 = vpop.f32.mrf.mxu1  ;;  %v10331_v29 = vld [vmem:[#allocation60_spill] sm:$0xff] }
 0x263   : > { %v2057_v50 = vpop.f32.mrf.mxu0  ;;  %2248 = vmatmul.mubr.bf16.gmra.mxu0 %v10319_v38 }
 0x264   : > { %10327 = vst [vmem:[#allocation51_spill] sm:$0xff] %v7988_v2  ;;  %v2058_v49 = vadd.f32 %v2057_v50, %v10328_v3  ;;  %v2346_v40 = vpop.f32.mrf.mxu1  ;;  %2537 = vmatmul.mubr.bf16.gmra.mxu1 %v10329_v34  ;;  %2255 = vmatprep.mubr.bf16.mxu0 %v10330_v30  ;;  %v10333_v3 = vld [vmem:[#allocation63_spill] sm:$0xff]  ;;  %v10335_v30 = vld [vmem:[#allocation68_spill] sm:$0xff] }
 0x265   : > { %v2059_v32 = vpop.f32.mrf.mxu0  ;;  %2544 = vmatprep.mubr.bf16.mxu1 %v7604_v51 }
 0x266   : > { %v7995_v57 = vadd.f32 %v2346_v40, %v2058_v49  ;;  %v2348_v13 = vpop.f32.mrf.mxu1  ;;  %v10334_v32 = vld [vmem:[#allocation62_spill] sm:$0xff]  ;;  %v6564_v40 = vld [vmem:[#allocation7 + $0x78] sm:$0xff]  }
 0x267   : > { %v2060_v16 = vpop.f32.mrf.mxu0  ;;  %4129 = vmatpush2.bf16.msra.mxu1 %v6564_v40 }
 0x268   : > { %v2061_v44 = vadd.f32 %v2060_v16, %v10331_v29  ;;  %v2349_v46 = vpop.f32.mrf.mxu1  ;;  %4130 = vmatprep.subr.bf16.mxu1 %v10254_v61 }
 0x269   : > { %v2062_v17 = vpop.f32.mrf.mxu0 }
 0x26a   : > { %v7998_v2 = vadd.f32 %v2349_v46, %v2061_v44  ;;  %v2351_v38 = vpop.f32.mrf.mxu1  ;;  %v10336_v44 = vld [vmem:[#allocation64_spill] sm:$0xff] }
 0x26b   : > { %v2065_v50 = vpop.f32.mrf.mxu0  ;;  %2256 = vmatmul.mubr.bf16.gmra.mxu0 %v10324_v48 }
 0x26c   : > { %10332 = vst [vmem:[#allocation49_spill] sm:$0xff] %v7998_v2  ;;  %v2066_v34 = vadd.f32 %v2065_v50, %v10333_v3  ;;  %v2354_v14 = vpop.f32.mrf.mxu1  ;;  %2545 = vmatmul.mubr.bf16.gmra.mxu1 %v10334_v32  ;;  %2263 = vmatprep.mubr.bf16.mxu0 %v10335_v30  ;;  %v10338_v32 = vld [vmem:[#allocation66_spill] sm:$0xff] }
 0x26d   : > { %v2067_v49 = vpop.f32.mrf.mxu0  ;;  %2552 = vmatprep.mubr.bf16.mxu1 %v7628_v33 }
 0x26e   : > { %v8005_v13 = vadd.f32 %v2354_v14, %v2066_v34  ;;  %v2356_v16 = vpop.f32.mrf.mxu1  ;;  %v10339_v14 = vld [vmem:[#allocation71_spill] sm:$0xff] }
 0x26f   : > { %v2068_v29 = vpop.f32.mrf.mxu0 }
 0x270   : > { %v2069_v48 = vadd.f32 %v2068_v29, %v10336_v44  ;;  %v2357_v46 = vpop.f32.mrf.mxu1  ;;  %v10340_v44 = vld [vmem:[#allocation67_spill] sm:$0xff] }
 0x271   : > { %v2070_v17 = vpop.f32.mrf.mxu0 }
 0x272   : > { %v8009_v38 = vadd.f32 %v2357_v46, %v2069_v48  ;;  %v2359_v50 = vpop.f32.mrf.mxu1 }
 0x273   : > { %v2073_v3 = vpop.f32.mrf.mxu0  ;;  %2264 = vmatmul.mubr.bf16.gmra.mxu0 %v7604_v51 }
 0x274   : > { %10337 = vst [vmem:[#allocation55_spill] sm:$0xff] %v8009_v38  ;;  %v2074_v49 = vadd.f32 %v2073_v3, %v10338_v32  ;;  %v2362_v2 = vpop.f32.mrf.mxu1  ;;  %2553 = vmatmul.mubr.bf16.gmra.mxu1 %v7673_v56  ;;  %2271 = vmatprep.mubr.bf16.mxu0 %v10339_v14  ;;  %v10341_v56 = vld [vmem:[#allocation69_spill] sm:$0xff] }
 0x275   : > { %v2075_v34 = vpop.f32.mrf.mxu0  ;;  %2560 = vmatprep.mubr.bf16.mxu1 %v7652_v60 }
 0x276   : > { %v8016_v40 = vadd.f32 %v2362_v2, %v2074_v49  ;;  %v2364_v16 = vpop.f32.mrf.mxu1  ;;  %v6565_v2 = vld [vmem:[#allocation7 + $0x70] sm:$0xff]  }
 0x277   : > { %v2076_v29 = vpop.f32.mrf.mxu0  ;;  %4131 = vmatpush2.bf16.msra.mxu1 %v6565_v2 }
 0x278   : > { %v2077_v48 = vadd.f32 %v2076_v29, %v10340_v44  ;;  %v2365_v46 = vpop.f32.mrf.mxu1  ;;  %4132 = vmatprep.subr.bf16.mxu1 %v10254_v61  ;;  %v10342_v44 = vld [vmem:[#allocation70_spill] sm:$0xff] }
 0x279   : > { %v2078_v17 = vpop.f32.mrf.mxu0 }
 0x27a   : > { %v8019_v50 = vadd.f32 %v2365_v46, %v2077_v48  ;;  %v2367_v51 = vpop.f32.mrf.mxu1  ;;  %v10343_v17 = vshll.u32 %v7704_v11, 16 }
 0x27b   : > { %v2081_v3 = vpop.f32.mrf.mxu0  ;;  %2272 = vmatmul.mubr.bf16.gmra.mxu0 %v7628_v33 }
 0x27c   : > { %v2082_v32 = vadd.f32 %v2081_v3, %v10341_v56  ;;  %v2370_v38 = vpop.f32.mrf.mxu1  ;;  %2561 = vmatmul.mubr.bf16.gmra.mxu1 %v7699_v63  ;;  %2279 = vmatprep.mubr.bf16.mxu0 %v7742_v36  ;;  %v855_v63 = vrot.slane %v10343_v17, 1 }
 0x27d   : > { %v2083_v49 = vpop.f32.mrf.mxu0  ;;  %2568 = vmatprep.mubr.bf16.mxu1 %v7678_v8 }
 0x27e   : > { %v8026_v34 = vadd.f32 %v2370_v38, %v2082_v32  ;;  %v2372_v16 = vpop.f32.mrf.mxu1  ;;  %v10344_v49 = vshrl.u32 %v7704_v11, 16 }
 0x27f   : > { %v2084_v29 = vpop.f32.mrf.mxu0 }
 0x280   : > { %v2085_v33 = vadd.f32 %v2084_v29, %v10342_v44  ;;  %v2373_v48 = vpop.f32.mrf.mxu1  ;;  %v856_v16 = vor.u32 %v855_v63, %v10344_v49 }
 0x281   : > { %v2086_v46 = vpop.f32.mrf.mxu0 }
 0x282   : > { %v8032_v51 = vadd.f32 %v2373_v48, %v2085_v33  ;;  %v2375_v3 = vpop.f32.mrf.mxu1  ;;  %v10345_v48 = vld [vmem:[#allocation72_spill] sm:$0xff] }
 0x283   : > { %v2089_v56 = vpop.f32.mrf.mxu0  ;;  %2280 = vmatmul.mubr.bf16.gmra.mxu0 %v7652_v60 }
 0x284   : > { %v2090_v38 = vadd.f32 %v2089_v56, %v7731_v54  ;;  %v2378_v32 = vpop.f32.mrf.mxu1  ;;  %2569 = vmatmul.mubr.bf16.gmra.mxu1 %v7723_v25  ;;  %2287 = vmatprep.mubr.bf16.mxu0 %v7760_v10  ;;  %v8046_v54 = vsel %vm7104_vm5, %v856_v16, 0 }
 0x285   : > { %v2091_v2 = vpop.f32.mrf.mxu0  ;;  %2576 = vmatprep.mubr.bf16.mxu1 %v7704_v11 }
 0x286   : > { %v8041_v29 = vadd.f32 %v2378_v32, %v2090_v38  ;;  %v2380_v44 = vpop.f32.mrf.mxu1  ;;  %v6566_v32 = vld [vmem:[#allocation7 + $0x68] sm:$0xff]  }
 0x287   : > { %v2092_v33 = vpop.f32.mrf.mxu0  ;;  %4133 = vmatpush2.bf16.msra.mxu1 %v6566_v32 }
 0x288   : > { %v2093_v46 = vadd.f32 %v2092_v33, %v10345_v48  ;;  %v2381_v60 = vpop.f32.mrf.mxu1  ;;  %4134 = vmatprep.subr.bf16.mxu1 %v10254_v61  ;;  %v10346_v33 = vld [vmem:[#allocation73_spill] sm:$0xff] }
 0x289   : > { %v2094_v17 = vpop.f32.mrf.mxu0 }
 0x28a   : > { %v8048_v25 = vadd.f32 %v2381_v60, %v2093_v46  ;;  %v2383_v3 = vpop.f32.mrf.mxu1 }
 0x28b   : > { %v2097_v56 = vpop.f32.mrf.mxu0  ;;  %2288 = vmatmul.mubr.bf16.gmra.mxu0 %v7678_v8 }
 0x28c   : > { %v2098_v63 = vadd.f32 %v2097_v56, %v7751_v1  ;;  %v2386_v38 = vpop.f32.mrf.mxu1  ;;  %2577 = vmatmul.mubr.bf16.gmra.mxu1 %v7746_v35  ;;  %2295 = vmatprep.mubr.bf16.mxu0 %v8046_v54 }
 0x28d   : > { %v2099_v2 = vpop.f32.mrf.mxu0  ;;  %2584 = vmatprep.mubr.bf16.mxu1 %v10254_v61 }
 0x28e   : > { %v8055_v49 = vadd.f32 %v2386_v38, %v2098_v63  ;;  %v2388_v16 = vpop.f32.mrf.mxu1 }
 0x28f   : > { %v2100_v44 = vpop.f32.mrf.mxu0 }
 0x290   : > { %v2101_v8 = vadd.f32 %v2100_v44, %v10346_v33  ;;  %v2389_v48 = vpop.f32.mrf.mxu1 }
 0x291   : > { %v2102_v1 = vpop.f32.mrf.mxu0 }
 0x292   : > { %v8059_v46 = vadd.f32 %v2389_v48, %v2101_v8  ;;  %v2391_v35 = vpop.f32.mrf.mxu1  ;;  %v6567_v48 = vld [vmem:[#allocation7 + $0x60] sm:$0xff]  }
 0x293   : > { %v2105_v60 = vpop.f32.mrf.mxu0  ;;  %2296 = vmatmul.mubr.bf16.gmra.mxu0 %v7704_v11  ;;  %4135 = vmatpush2.bf16.msra.mxu1 %v6567_v48 }
 0x294   : > { %v2106_v17 = vadd.f32 %v2105_v60, %v7765_v43  ;;  %v2394_v3 = vpop.f32.mrf.mxu1  ;;  %2585 = vmatmul.mubr.bf16.gmra.mxu1 %v10277_v4  ;;  %6266 = vmatprep.mubr.bf16.mxu0 %v7164_v23 }
 0x295   : > { %v2107_v56 = vpop.f32.mrf.mxu0  ;;  %4144 = vmatprep.mubr.bf16.mxu1 %v10254_v61  ;;  %4136 = vmatprep.subr.bf16.mxu1 %v10254_v61 }
 0x296   : > { %v8066_v63 = vadd.f32 %v2394_v3, %v2106_v17  ;;  %v2396_v38 = vpop.f32.mrf.mxu1 }
 0x297   : > { %v2108_v32 = vpop.f32.mrf.mxu0 }
 0x298   : > { %v2109_v2 = vadd.f32 %v2108_v32, %v7768_v31  ;;  %v2397_v16 = vpop.f32.mrf.mxu1 }
 0x299   : > { %v2110_v44 = vpop.f32.mrf.mxu0 }
 0x29a   : > { %v8069_v33 = vadd.f32 %v2397_v16, %v2109_v2  ;;  %v2399_v11 = vpop.f32.mrf.mxu1 }
 0x29b   : > { %v2113_v43 = vpop.f32.mrf.mxu0  ;;  %6267 = vmatmul.mubr.bf16.vlgmr.msra.gmra.mxu0 %v7184_v37 }
 0x29c   : > { %v2114_v8 = vadd.f32 %v2113_v43, %v7773_v9  ;;  %v2402_v23 = vpop.f32.mrf.mxu1  ;;  %6270 = vmatprep.mubr.bf16.mxu0 %v7204_v52 }
 0x29d   : > { %v2115_v1 = vpop.f32.mrf.mxu0 }
 0x29e   : > { %v8074_v35 = vadd.f32 %v2402_v23, %v2114_v8  ;;  %v2404_v60 = vpop.f32.mrf.mxu1 }
 0x29f   : > { %v2116_v31 = vpop.f32.mrf.mxu0 }
 0x2a0   : > { %v2117_v17 = vadd.f32 %v2116_v31, %v7777_v5  ;;  %v2405_v3 = vpop.f32.mrf.mxu1 }
 0x2a1   : > { %v2118_v56 = vpop.f32.mrf.mxu0 }
 0x2a2   : > { %v8078_v38 = vadd.f32 %v2405_v3, %v2117_v17  ;;  %v2407_v37 = vpop.f32.mrf.mxu1 }
 0x2a3   : > { %v2121_v9 = vpop.f32.mrf.mxu0  ;;  %6271 = vmatmul.mubr.bf16.gmra.mxu0 %v7224_v7 }
 0x2a4   : > { %v2122_v52 = vadd.f32 %v2121_v9, %v7782_v27  ;;  %v2410_v32 = vpop.f32.mrf.mxu1  ;;  %6274 = vmatprep.mubr.bf16.mxu0 %v7244_v24  ;;  %v6568_v24 = vld [vmem:[#allocation7 + $0x58] sm:$0xff]  }
 0x2a5   : > { %v2123_v2 = vpop.f32.mrf.mxu0  ;;  %4137 = vmatpush2.bf16.msra.mxu1 %v6568_v24  ;;  %v6572_v24 = vld [vmem:[#allocation7 + $0xa8] sm:$0xff]  }
 0x2a6   : > { %v8083_v16 = vadd.f32 %v2410_v32, %v2122_v52  ;;  %v2412_v44 = vpop.f32.mrf.mxu1  ;;  %4138 = vmatprep.subr.bf16.mxu1 %v10254_v61  ;;  %v6569_v32 = vld [vmem:[#allocation7 + $0xb8] sm:$0xff]  }
 0x2a7   : > { %v2124_v11 = vpop.f32.mrf.mxu0  ;;  %4402 = vmatpush1.bf16.msra.mxu0 %v6569_v32 }
 0x2a8   : > { %v2125_v5 = vadd.f32 %v2124_v11, %v7785_v39  ;;  %v2413_v43 = vpop.f32.mrf.mxu1  ;;  %4403 = vmatprep.subr.bf16.mxu0 %v10254_v61 }
 0x2a9   : > { %v2126_v8 = vpop.f32.mrf.mxu0 }
 0x2aa   : > { %v8086_v23 = vadd.f32 %v2413_v43, %v2125_v5  ;;  %v2415_v48 = vpop.f32.mrf.mxu1  ;;  %v6570_v8 = vld [vmem:[#allocation7 + $0xb0] sm:$0xff]  }
 0x2ab   : > { %v2129_v1 = vpop.f32.mrf.mxu0  ;;  %6275 = vmatmul.mubr.bf16.gmra.mxu0 %v7263_v41 }
 0x2ac   : > { %v2130_v7 = vadd.f32 %v2129_v1, %v7790_v45  ;;  %v2418_v27 = vpop.f32.mrf.mxu1  ;;  %6278 = vmatprep.mubr.bf16.mxu0 %v7281_v59  ;;  %4404 = vmatpush1.bf16.msra.mxu0 %v6570_v8 }
 0x2ad   : > { %v2131_v60 = vpop.f32.mrf.mxu0  ;;  %4405 = vmatprep.subr.bf16.mxu0 %v10254_v61 }
 0x2ae   : > { %v8091_v31 = vadd.f32 %v2418_v27, %v2130_v7  ;;  %v2420_v17 = vpop.f32.mrf.mxu1  ;;  %v6571_v27 = vld [vmem:[#allocation7 + $0x50] sm:$0xff]  }
 0x2af   : > { %v2132_v39 = vpop.f32.mrf.mxu0  ;;  %4139 = vmatpush2.bf16.msra.mxu1 %v6571_v27 }
 0x2b0   : > { %v2133_v3 = vadd.f32 %v2132_v39, %v7793_v0  ;;  %v2421_v56 = vpop.f32.mrf.mxu1  ;;  %4406 = vmatpush1.bf16.msra.mxu0 %v6572_v24  ;;  %4140 = vmatprep.subr.bf16.mxu1 %v10254_v61 }
 0x2b1   : > { %v2134_v37 = vpop.f32.mrf.mxu0  ;;  %4407 = vmatprep.subr.bf16.mxu0 %v10254_v61 }
 0x2b2   : > { %v8095_v9 = vadd.f32 %v2421_v56, %v2133_v3  ;;  %v2423_v41 = vpop.f32.mrf.mxu1 }
 0x2b3   : > { %v2137_v45 = vpop.f32.mrf.mxu0  ;;  %6279 = vmatmul.mubr.bf16.gmra.mxu0 %v7301_v20 }
 0x2b4   : > { %v2138_v59 = vadd.f32 %v2137_v45, %v7798_v28  ;;  %v2426_v52 = vpop.f32.mrf.mxu1  ;;  %6282 = vmatprep.mubr.bf16.mxu0 %v7323_v47 }
 0x2b5   : > { %v2139_v2 = vpop.f32.mrf.mxu0 }
 0x2b6   : > { %v8100_v44 = vadd.f32 %v2426_v52, %v2138_v59  ;;  %v2428_v11 = vpop.f32.mrf.mxu1  ;;  %v6574_v52 = vld [vmem:[#allocation7 + $0x98] sm:$0xff]  }
 0x2b7   : > { %v2140_v0 = vpop.f32.mrf.mxu0 }
 0x2b8   : > { %v2141_v5 = vadd.f32 %v2140_v0, %v7801_v62  ;;  %v2429_v43 = vpop.f32.mrf.mxu1 }
 0x2b9   : > { %v2142_v48 = vpop.f32.mrf.mxu0 }
 0x2ba   : > { %v8104_v20 = vadd.f32 %v2429_v43, %v2141_v5  ;;  %v2431_v28 = vpop.f32.mrf.mxu1 }
 0x2bb   : > { %v2145_v1 = vpop.f32.mrf.mxu0  ;;  %6283 = vmatmul.mubr.bf16.gmra.mxu0 %v7344_v18 }
 0x2bc   : > { %v2146_v47 = vadd.f32 %v2145_v1, %v7806_v42  ;;  %v2434_v7 = vpop.f32.mrf.mxu1  ;;  %6286 = vmatprep.mubr.bf16.mxu0 %v10251_v26  ;;  %v6573_v42 = vld [vmem:[#allocation7 + $0xa0] sm:$0xff]   ;;  %v10347_v1 = vld [vmem:[#allocation21_spill] sm:$0xff] }
 0x2bd   : > { %v2147_v62 = vpop.f32.mrf.mxu0  ;;  %4408 = vmatpush1.bf16.msra.mxu0 %v6573_v42 }
 0x2be   : > { %v8110_v60 = vadd.f32 %v2434_v7, %v2146_v47  ;;  %v2436_v17 = vpop.f32.mrf.mxu1  ;;  %4409 = vmatprep.subr.bf16.mxu0 %v10254_v61  ;;  %v6576_v47 = vld [vmem:[#allocation7 + $0x48] sm:$0xff]  }
 0x2bf   : > { %v2148_v39 = vpop.f32.mrf.mxu0  ;;  %v6577_v7 = vld [vmem:[#allocation7 + $0x88] sm:$0xff]   ;;  %4141 = vmatpush2.bf16.msra.mxu1 %v6576_v47 }
 0x2c0   : > { %v2149_v18 = vadd.f32 %v2148_v39, %v7809_v19  ;;  %v2437_v3 = vpop.f32.mrf.mxu1  ;;  %4142 = vmatprep.subr.bf16.mxu1 %v10254_v61 }
 0x2c1   : > { %v2150_v56 = vpop.f32.mrf.mxu0  ;;  %4410 = vmatpush1.bf16.msra.mxu0 %v6574_v52  ;;  %v10351_v52 = vld [vmem:[#allocation35_spill] sm:$0xff] }
 0x2c2   : > { %v8115_v37 = vadd.f32 %v2437_v3, %v2149_v18  ;;  %v2439_v26 = vpop.f32.mrf.mxu1  ;;  %4411 = vmatprep.subr.bf16.mxu0 %v10254_v61 }
 0x2c3   : > { %v2153_v41 = vpop.f32.mrf.mxu0  ;;  %6287 = vmatmul.mubr.bf16.gmra.mxu0 %v10257_v21  ;;  %v6575_v21 = vld [vmem:[#allocation7 + $0x90] sm:$0xff]  }
 0x2c4   : > { %v2154_v45 = vadd.f32 %v2153_v41, %v7814_v6  ;;  %v2442_v59 = vpop.f32.mrf.mxu1  ;;  %6290 = vmatprep.mubr.bf16.mxu0 %v10262_v15  ;;  %v10349_v26 = vld [vmem:[#allocation14_spill] sm:$0xff]  ;;  %v10350_v41 = vld [vmem:[#allocation75_spill] sm:$0xff] }
 0x2c5   : > { %v2155_v32 = vpop.f32.mrf.mxu0  ;;  %4412 = vmatpush1.bf16.msra.mxu0 %v6575_v21  ;;  %v10352_v21 = vld [vmem:[#allocation76_spill] sm:$0xff] }
 0x2c6   : > { %v8121_v19 = vadd.f32 %v2442_v59, %v2154_v45  ;;  %v2444_v2 = vpop.f32.mrf.mxu1  ;;  %4413 = vmatprep.subr.bf16.mxu0 %v10254_v61  ;;  %v6579_v32 = vld [vmem:[#allocation7 + $0xf8] sm:$0xff]  }
 0x2c7   : > { %v2156_v11 = vpop.f32.mrf.mxu0 }
 0x2c8   : > { %v2157_v0 = vadd.f32 %v2156_v11, %v7817_v22  ;;  %v2445_v5 = vpop.f32.mrf.mxu1 }
 0x2c9   : > { %v2158_v43 = vpop.f32.mrf.mxu0  ;;  %4414 = vmatpush1.bf16.msra.mxu0 %v6577_v7  ;;  %v10353_v7 = vld [vmem:[#allocation38_spill] sm:$0xff] }
 0x2ca   : > { %v8125_v8 = vadd.f32 %v2445_v5, %v2157_v0  ;;  %v2447_v6 = vpop.f32.mrf.mxu1  ;;  %4415 = vmatprep.subr.bf16.mxu0 %v10254_v61 }
 0x2cb   : > { %v2161_v48 = vpop.f32.mrf.mxu0  ;;  %6291 = vmatmul.mubr.bf16.gmra.mxu0 %v10269_v55  ;;  %v10348_v55 = vld [vmem:[#allocation74_spill] sm:$0xff] }
 0x2cc   : > { %v2162_v15 = vadd.f32 %v2161_v48, %v7822_v12  ;;  %v2450_v28 = vpop.f32.mrf.mxu1  ;;  %6294 = vmatprep.mubr.bf16.mxu0 %v10347_v1  ;;  %v6578_v12 = vld [vmem:[#allocation7 + $0x80] sm:$0xff]   ;;  %v6580_v48 = vld [vmem:[#allocation7 + $0xf0] sm:$0xff]  }
 0x2cd   : > { %v2163_v22 = vpop.f32.mrf.mxu0  ;;  %4416 = vmatpush1.bf16.msra.mxu0 %v6578_v12 }
 0x2ce   : > { %v8131_v27 = vadd.f32 %v2450_v28, %v2162_v15  ;;  %v2452_v24 = vpop.f32.mrf.mxu1  ;;  %4417 = vmatprep.subr.bf16.mxu0 %v10254_v61  ;;  %v10354_v22 = vld [vmem:[#allocation77_spill] sm:$0xff] }
 0x2cf   : > { %v2164_v62 = vpop.f32.mrf.mxu0 }
 0x2d0   : > { %v2165_v17 = vadd.f32 %v2164_v62, %v10348_v55  ;;  %v2453_v39 = vpop.f32.mrf.mxu1  ;;  %v10355_v55 = vld [vmem:[#allocation41_spill] sm:$0xff] }
 0x2d1   : > { %v2166_v18 = vpop.f32.mrf.mxu0  ;;  %4418 = vmatpush2.bf16.msra.mxu0 %v6579_v32  ;;  %v6581_v32 = vld [vmem:[#allocation7 + $0x40] sm:$0xff]  }
 0x2d2   : > { %v8136_v3 = vadd.f32 %v2453_v39, %v2165_v17  ;;  %v2455_v42 = vpop.f32.mrf.mxu1  ;;  %4419 = vmatprep.subr.bf16.mxu0 %v10254_v61  ;;  %v6582_v17 = vld [vmem:[#allocation7 + $0xe8] sm:$0xff]   ;;  %4143 = vmatpush2.bf16.msra.mxu1 %v6581_v32 }
 0x2d3   : > { %v2169_v56 = vpop.f32.mrf.mxu0  ;;  %6295 = vmatmul.mubr.bf16.gmra.mxu0 %v10349_v26  ;;  %4690 = vmatprep.subr.bf16.mxu1 %v10254_v61  ;;  %v10362_v32 = vld [vmem:[#allocation53_spill] sm:$0xff] }
 0x2d4   : > { %v2170_v45 = vadd.f32 %v2169_v56, %v10350_v41  ;;  %v2458_v59 = vpop.f32.mrf.mxu1  ;;  %6298 = vmatprep.mubr.bf16.mxu0 %v10351_v52  ;;  %v10356_v56 = vld [vmem:[#allocation78_spill] sm:$0xff] }
 0x2d5   : > { %v2171_v2 = vpop.f32.mrf.mxu0  ;;  %4420 = vmatpush2.bf16.msra.mxu0 %v6580_v48  ;;  %4145 = vmatmul.mubr.bf16.vlgmr.msra.gmra.mxu1 %v10277_v4 }
 0x2d6   : > { %v8142_v11 = vadd.f32 %v2458_v59, %v2170_v45  ;;  %v2460_v0 = vpop.f32.mrf.mxu1  ;;  %4421 = vmatprep.subr.bf16.mxu0 %v10254_v61  ;;  %v6583_v59 = vld [vmem:[#allocation7 + $0xe0] sm:$0xff]  }
 0x2d7   : > { %v2172_v5 = vpop.f32.mrf.mxu0 }
 0x2d8   : > { %v2173_v43 = vadd.f32 %v2172_v5, %v10352_v21  ;;  %v2461_v6 = vpop.f32.mrf.mxu1  ;;  %v10357_v21 = vld [vmem:[#allocation44_spill] sm:$0xff] }
 0x2d9   : > { %v2174_v15 = vpop.f32.mrf.mxu0  ;;  %4422 = vmatpush2.bf16.msra.mxu0 %v6582_v17 }
 0x2da   : > { %v8146_v28 = vadd.f32 %v2461_v6, %v2173_v43  ;;  %v2463_v1 = vpop.f32.mrf.mxu1  ;;  %4423 = vmatprep.subr.bf16.mxu0 %v10254_v61  ;;  %v10358_v43 = vld [vmem:[#allocation79_spill] sm:$0xff] }
 0x2db   : > { %v2177_v47 = vpop.f32.mrf.mxu0  ;;  %6299 = vmatmul.mubr.bf16.gmra.mxu0 %v10353_v7  ;;  %v10359_v15 = vld [vmem:[#allocation47_spill] sm:$0xff] }
 0x2dc   : > { %v2178_v24 = vadd.f32 %v2177_v47, %v10354_v22  ;;  %v2466_v62 = vpop.f32.mrf.mxu1  ;;  %6302 = vmatprep.mubr.bf16.mxu0 %v10355_v55  ;;  %v6584_v1 = vld [vmem:[#allocation7 + $0xd8] sm:$0xff]  }
 0x2dd   : > { %v2179_v39 = vpop.f32.mrf.mxu0  ;;  %4424 = vmatpush2.bf16.msra.mxu0 %v6583_v59 }
 0x2de   : > { %v8152_v12 = vadd.f32 %v2466_v62, %v2178_v24  ;;  %v2468_v18 = vpop.f32.mrf.mxu1  ;;  %4425 = vmatprep.subr.bf16.mxu0 %v10254_v61  ;;  %v10360_v62 = vld [vmem:[#allocation80_spill] sm:$0xff]  ;;  %v6585_v39 = vld [vmem:[#allocation7 + $0xd0] sm:$0xff]  }
 0x2df   : > { %v2180_v42 = vpop.f32.mrf.mxu0 }
 0x2e0   : > { %v2181_v41 = vadd.f32 %v2180_v42, %v10356_v56  ;;  %v2469_v45 = vpop.f32.mrf.mxu1 }
 0x2e1   : > { %v2182_v52 = vpop.f32.mrf.mxu0  ;;  %4426 = vmatpush2.bf16.msra.mxu0 %v6584_v1 }
 0x2e2   : > { %v8156_v2 = vadd.f32 %v2469_v45, %v2181_v41  ;;  %v2471_v0 = vpop.f32.mrf.mxu1  ;;  %4427 = vmatprep.subr.bf16.mxu0 %v10254_v61  ;;  %v10361_v45 = vld [vmem:[#allocation19_spill] sm:$0xff] }
 0x2e3   : > { %v2185_v5 = vpop.f32.mrf.mxu0  ;;  %6303 = vmatmul.mubr.bf16.gmra.mxu0 %v10357_v21  ;;  %v6587_v0 = vld [vmem:[#allocation7 + $0xc8] sm:$0xff]  }
 0x2e4   : > { %v2186_v6 = vadd.f32 %v2185_v5, %v10358_v43  ;;  %v2474_v48 = vpop.f32.mrf.mxu1  ;;  %6306 = vmatprep.mubr.bf16.mxu0 %v10359_v15 }
 0x2e5   : > { %v2187_v47 = vpop.f32.mrf.mxu0  ;;  %4428 = vmatpush2.bf16.msra.mxu0 %v6585_v39  ;;  %v10365_v39 = vld [vmem:[#allocation17_spill] sm:$0xff] }
 0x2e6   : > { %v8163_v7 = vadd.f32 %v2474_v48, %v2186_v6  ;;  %v2476_v22 = vpop.f32.mrf.mxu1  ;;  %4429 = vmatprep.subr.bf16.mxu0 %v10254_v61  ;;  %v10363_v48 = vld [vmem:[#allocation15_spill] sm:$0xff] }
 0x2e7   : > { %v2188_v24 = vpop.f32.mrf.mxu0 }
 0x2e8   : > { %v2189_v55 = vadd.f32 %v2188_v24, %v10360_v62  ;;  %v2477_v17 = vpop.f32.mrf.mxu1  ;;  %v6586_v62 = vld [vmem:[#allocation7 + $0x138] sm:$0xff]  }
 0x2e9   : > { %v2190_v18 = vpop.f32.mrf.mxu0  ;;  %4430 = vmatpush2.bf16.msra.mxu0 %v6587_v0  ;;  %4691 = vmatpush1.bf16.msra.mxu1 %v6586_v62  ;;  %v10367_v0 = vld [vmem:[#allocation22_spill] sm:$0xff] }
 0x2ea   : > { %v8168_v42 = vadd.f32 %v2477_v17, %v2189_v55  ;;  %v2479_v56 = vpop.f32.mrf.mxu1  ;;  %4431 = vmatprep.subr.bf16.mxu0 %v10254_v61  ;;  %v10364_v17 = vld [vmem:[#allocation57_spill] sm:$0xff]  ;;  %4692 = vmatprep.subr.bf16.mxu1 %v10254_v61 }
 0x2eb   : > { %v2193_v41 = vpop.f32.mrf.mxu0  ;;  %6307 = vmatmul.mubr.bf16.gmra.mxu0 %v10309_v58  ;;  %v6588_v58 = vld [vmem:[#allocation7 + $0xc0] sm:$0xff]  }
 0x2ec   : > { %v2194_v59 = vadd.f32 %v2193_v41, %v10361_v45  ;;  %v2482_v52 = vpop.f32.mrf.mxu1  ;;  %6310 = vmatprep.mubr.bf16.mxu0 %v10362_v32  ;;  %v10366_v41 = vld [vmem:[#allocation61_spill] sm:$0xff] }
 0x2ed   : > { %v2195_v5 = vpop.f32.mrf.mxu0  ;;  %4432 = vmatpush2.bf16.msra.mxu0 %v6588_v58  ;;  %v10368_v58 = vld [vmem:[#allocation65_spill] sm:$0xff] }
 0x2ee   : > { %v8174_v21 = vadd.f32 %v2482_v52, %v2194_v59  ;;  %v2484_v43 = vpop.f32.mrf.mxu1  ;;  %4979 = vmatprep.subr.bf16.mxu0 %v10254_v61 }
 0x2ef   : > { %v2196_v6 = vpop.f32.mrf.mxu0 }
 0x2f0   : > { %v2197_v15 = vadd.f32 %v2196_v6, %v10363_v48  ;;  %v2485_v1 = vpop.f32.mrf.mxu1 }
 0x2f1   : > { %v2198_v47 = vpop.f32.mrf.mxu0 }
 0x2f2   : > { %v8178_v22 = vadd.f32 %v2485_v1, %v2197_v15  ;;  %v2487_v24 = vpop.f32.mrf.mxu1  ;;  %v10369_v47 = vld [vmem:[#allocation16_spill] sm:$0xff] }
 0x2f3   : > { %v2201_v55 = vpop.f32.mrf.mxu0  ;;  %6311 = vmatmul.mubr.bf16.gmra.mxu0 %v10364_v17 }
 0x2f4   : > { %v2202_v18 = vadd.f32 %v2201_v55, %v10365_v39  ;;  %v2490_v56 = vpop.f32.mrf.mxu1  ;;  %6314 = vmatprep.mubr.bf16.mxu0 %v10366_v41 }
 0x2f5   : > { %v2203_v45 = vpop.f32.mrf.mxu0 }
 0x2f6   : > { %v8185_v59 = vadd.f32 %v2490_v56, %v2202_v18  ;;  %v2492_v52 = vpop.f32.mrf.mxu1  ;;  %v10370_v56 = vld [vmem:[#allocation20_spill] sm:$0xff] }
 0x2f7   : > { %v2204_v32 = vpop.f32.mrf.mxu0 }
 0x2f8   : > { %v2205_v5 = vadd.f32 %v2204_v32, %v10367_v0  ;;  %v2493_v43 = vpop.f32.mrf.mxu1 }
 0x2f9   : > { %v2206_v6 = vpop.f32.mrf.mxu0 }
 0x2fa   : > { %v8188_v48 = vadd.f32 %v2493_v43, %v2205_v5  ;;  %v2495_v15 = vpop.f32.mrf.mxu1  ;;  %v6589_v5 = vld [vmem:[#allocation7 + $0x130] sm:$0xff]   ;;  %v10371_v6 = vld [vmem:[#allocation25_spill] sm:$0xff] }
 0x2fb   : > { %v2209_v1 = vpop.f32.mrf.mxu0  ;;  %6315 = vmatmul.mubr.bf16.gmra.mxu0 %v10368_v58  ;;  %4693 = vmatpush1.bf16.msra.mxu1 %v6589_v5 }
 0x2fc   : > { %v2210_v24 = vadd.f32 %v2209_v1, %v10369_v47  ;;  %v2498_v62 = vpop.f32.mrf.mxu1  ;;  %6318 = vmatprep.mubr.bf16.mxu0 %v10335_v30  ;;  %4694 = vmatprep.subr.bf16.mxu1 %v10254_v61 }
 0x2fd   : > { %v2211_v55 = vpop.f32.mrf.mxu0 }
 0x2fe   : > { %v8193_v17 = vadd.f32 %v2498_v62, %v2210_v24  ;;  %v2500_v39 = vpop.f32.mrf.mxu1  ;;  %v10372_v62 = vld [vmem:[#allocation18_spill] sm:$0xff] }
 0x2ff   : > { %v2212_v18 = vpop.f32.mrf.mxu0 }
 0x300   : > { %v2213_v41 = vadd.f32 %v2212_v18, %v10370_v56  ;;  %v2501_v45 = vpop.f32.mrf.mxu1 }
 0x301   : > { %v2214_v52 = vpop.f32.mrf.mxu0 }
 0x302   : > { %v8196_v32 = vadd.f32 %v2501_v45, %v2213_v41  ;;  %v2503_v0 = vpop.f32.mrf.mxu1  ;;  %v10373_v45 = vld [vmem:[#allocation23_spill] sm:$0xff] }
 0x303   : > { %v2217_v43 = vpop.f32.mrf.mxu0  ;;  %6319 = vmatmul.mubr.bf16.gmra.mxu0 %v10339_v14 }
 0x304   : > { %v2218_v15 = vadd.f32 %v2217_v43, %v10371_v6  ;;  %v2506_v1 = vpop.f32.mrf.mxu1  ;;  %6322 = vmatprep.mubr.bf16.mxu0 %v7742_v36 }
 0x305   : > { %v2219_v30 = vpop.f32.mrf.mxu0 }
 0x306   : > { %v8202_v58 = vadd.f32 %v2506_v1, %v2218_v15  ;;  %v2508_v47 = vpop.f32.mrf.mxu1  ;;  %v10375_v15 = vld [vmem:[#allocation28_spill] sm:$0xff] }
 0x307   : > { %v2220_v24 = vpop.f32.mrf.mxu0 }
 0x308   : > { %v2221_v55 = vadd.f32 %v2220_v24, %v10372_v62  ;;  %v2509_v39 = vpop.f32.mrf.mxu1 }
 0x309   : > { %v2222_v18 = vpop.f32.mrf.mxu0 }
 0x30a   : > { %v8205_v56 = vadd.f32 %v2509_v39, %v2221_v55  ;;  %v2511_v14 = vpop.f32.mrf.mxu1  ;;  %v10377_v39 = vld [vmem:[#allocation26_spill] sm:$0xff] }
 0x30b   : > { %v2225_v41 = vpop.f32.mrf.mxu0  ;;  %6323 = vmatmul.mubr.bf16.gmra.mxu0 %v7760_v10  ;;  %v6590_v10 = vld [vmem:[#allocation7 + $0x128] sm:$0xff]  }
 0x30c   : > { %v2226_v36 = vadd.f32 %v2225_v41, %v10373_v45  ;;  %v2514_v52 = vpop.f32.mrf.mxu1  ;;  %6326 = vmatprep.mubr.bf16.mxu0 %v8046_v54  ;;  %4695 = vmatpush1.bf16.msra.mxu1 %v6590_v10 }
 0x30d   : > { %v2227_v0 = vpop.f32.mrf.mxu0  ;;  %4696 = vmatprep.subr.bf16.mxu1 %v10254_v61 }
 0x30e   : > { %v8210_v5 = vadd.f32 %v2514_v52, %v2226_v36  ;;  %v2516_v43 = vpop.f32.mrf.mxu1  ;;  %v10379_v52 = vld [vmem:[#allocation32_spill] sm:$0xff] }
 0x30f   : > { %v2228_v6 = vpop.f32.mrf.mxu0 }
 0x310   : > { %10374 = vst [vmem:[#allocation54_spill] sm:$0xff] %v8210_v5  ;;  %v2229_v1 = vadd.f32 %v2228_v6, %v10375_v15  ;;  %v2517_v30 = vpop.f32.mrf.mxu1 }
 0x311   : > { %v2230_v47 = vpop.f32.mrf.mxu0 }
 0x312   : > { %v8213_v24 = vadd.f32 %v2517_v30, %v2229_v1  ;;  %v2519_v62 = vpop.f32.mrf.mxu1  ;;  %v10381_v47 = vld [vmem:[#allocation27_spill] sm:$0xff] }
 0x313   : > { %v2233_v55 = vpop.f32.mrf.mxu0  ;;  %6327 = vmatmul.mubr.bf16.gmra.mxu0 %v10349_v26 }
 0x314   : > { %10376 = vst [vmem:[#allocation52_spill] sm:$0xff] %v8213_v24  ;;  %v2234_v18 = vadd.f32 %v2233_v55, %v10377_v39  ;;  %v2522_v14 = vpop.f32.mrf.mxu1 }
 0x315   : > { %v2235_v54 = vpop.f32.mrf.mxu0 }
 0x316   : > { %v8217_v41 = vadd.f32 %v2522_v14, %v2234_v18  ;;  %v2524_v45 = vpop.f32.mrf.mxu1  ;;  %v10383_v14 = vld [vmem:[#allocation24_spill] sm:$0xff] }
 0x317   : > { %v2236_v36 = vpop.f32.mrf.mxu0 }
 0x318   : > { %10378 = vst [vmem:[#allocation56_spill] sm:$0xff] %v8217_v41  ;;  %v2237_v0 = vadd.f32 %v2236_v36, %v10379_v52  ;;  %v2525_v43 = vpop.f32.mrf.mxu1  ;;  %v6591_v52 = vld [vmem:[#allocation7 + $0x120] sm:$0xff]  }
 0x319   : > { %v2238_v6 = vpop.f32.mrf.mxu0  ;;  %4697 = vmatpush1.bf16.msra.mxu1 %v6591_v52 }
 0x31a   : > { %v8221_v15 = vadd.f32 %v2525_v43, %v2237_v0  ;;  %v2527_v1 = vpop.f32.mrf.mxu1  ;;  %v10385_v43 = vld [vmem:[#allocation30_spill] sm:$0xff]  ;;  %4698 = vmatprep.subr.bf16.mxu1 %v10254_v61 }
 0x31b   : > { %v2241_v30 = vpop.f32.mrf.mxu0 }
 0x31c   : > { %10380 = vst [vmem:[#allocation59_spill] sm:$0xff] %v8221_v15  ;;  %v2242_v62 = vadd.f32 %v2241_v30, %v10381_v47  ;;  %v2530_v55 = vpop.f32.mrf.mxu1 }
 0x31d   : > { %v2243_v39 = vpop.f32.mrf.mxu0 }
 0x31e   : > { %v8224_v54 = vadd.f32 %v2530_v55, %v2242_v62  ;;  %v2532_v10 = vpop.f32.mrf.mxu1  ;;  %v10387_v39 = vld [vmem:[#allocation29_spill] sm:$0xff] }
 0x31f   : > { %v2244_v18 = vpop.f32.mrf.mxu0 }
 0x320   : > { %10382 = vst [vmem:[#allocation58_spill] sm:$0xff] %v8224_v54  ;;  %v2245_v45 = vadd.f32 %v2244_v18, %v10383_v14  ;;  %v2533_v4 = vpop.f32.mrf.mxu1 }
 0x321   : > { %v2246_v24 = vpop.f32.mrf.mxu0 }
 0x322   : > { %v8227_v5 = vadd.f32 %v2533_v4, %v2245_v45  ;;  %v2535_v36 = vpop.f32.mrf.mxu1 }
 0x323   : > { %v2249_v0 = vpop.f32.mrf.mxu0  ;;  %v10389_v36 = vld [vmem:[#allocation33_spill] sm:$0xff] }
 0x324   : > { %10384 = vst [vmem:[#allocation60_spill] sm:$0xff] %v8227_v5  ;;  %v2250_v6 = vadd.f32 %v2249_v0, %v10385_v43  ;;  %v2538_v1 = vpop.f32.mrf.mxu1 }
 0x325   : > { %v2251_v30 = vpop.f32.mrf.mxu0 }
 0x326   : > { %v8231_v47 = vadd.f32 %v2538_v1, %v2250_v6  ;;  %v2540_v62 = vpop.f32.mrf.mxu1  ;;  %v10391_v6 = vld [vmem:[#allocation31_spill] sm:$0xff] }
 0x327   : > { %v2252_v55 = vpop.f32.mrf.mxu0 }
 0x328   : > { %10386 = vst [vmem:[#allocation63_spill] sm:$0xff] %v8231_v47  ;;  %v2253_v10 = vadd.f32 %v2252_v55, %v10387_v39  ;;  %v2541_v18 = vpop.f32.mrf.mxu1  ;;  %v6592_v39 = vld [vmem:[#allocation7 + $0x118] sm:$0xff]  }
 0x329   : > { %v2254_v24 = vpop.f32.mrf.mxu0  ;;  %4699 = vmatpush1.bf16.msra.mxu1 %v6592_v39 }
 0x32a   : > { %v8234_v4 = vadd.f32 %v2541_v18, %v2253_v10  ;;  %v2543_v14 = vpop.f32.mrf.mxu1  ;;  %v10393_v18 = vld [vmem:[#allocation36_spill] sm:$0xff]  ;;  %4700 = vmatprep.subr.bf16.mxu1 %v10254_v61 }
 0x32b   : > { %v2257_v45 = vpop.f32.mrf.mxu0 }
 0x32c   : > { %10388 = vst [vmem:[#allocation62_spill] sm:$0xff] %v8234_v4  ;;  %v2258_v5 = vadd.f32 %v2257_v45, %v10389_v36  ;;  %v2546_v0 = vpop.f32.mrf.mxu1 }
 0x32d   : > { %v2259_v43 = vpop.f32.mrf.mxu0 }
 0x32e   : > { %v8237_v52 = vadd.f32 %v2546_v0, %v2258_v5  ;;  %v2548_v30 = vpop.f32.mrf.mxu1  ;;  %v10395_v43 = vld [vmem:[#allocation34_spill] sm:$0xff] }
 0x32f   : > { %v2260_v54 = vpop.f32.mrf.mxu0 }
 0x330   : > { %10390 = vst [vmem:[#allocation68_spill] sm:$0xff] %v8237_v52  ;;  %v2261_v1 = vadd.f32 %v2260_v54, %v10391_v6  ;;  %v2549_v62 = vpop.f32.mrf.mxu1 }
 0x331   : > { %v2262_v47 = vpop.f32.mrf.mxu0 }
 0x332   : > { %v8240_v15 = vadd.f32 %v2549_v62, %v2261_v1  ;;  %v2551_v55 = vpop.f32.mrf.mxu1 }
 0x333   : > { %v2265_v10 = vpop.f32.mrf.mxu0  ;;  %v10397_v55 = vld [vmem:[#allocation39_spill] sm:$0xff] }
 0x334   : > { %10392 = vst [vmem:[#allocation64_spill] sm:$0xff] %v8240_v15  ;;  %v2266_v24 = vadd.f32 %v2265_v10, %v10393_v18  ;;  %v2554_v14 = vpop.f32.mrf.mxu1 }
 0x335   : > { %v2267_v45 = vpop.f32.mrf.mxu0 }
 0x336   : > { %v8244_v5 = vadd.f32 %v2554_v14, %v2266_v24  ;;  %v2556_v36 = vpop.f32.mrf.mxu1  ;;  %v10399_v24 = vld [vmem:[#allocation37_spill] sm:$0xff] }
 0x337   : > { %v2268_v0 = vpop.f32.mrf.mxu0 }
 0x338   : > { %10394 = vst [vmem:[#allocation66_spill] sm:$0xff] %v8244_v5  ;;  %v2269_v54 = vadd.f32 %v2268_v0, %v10395_v43  ;;  %v2557_v30 = vpop.f32.mrf.mxu1 }
 0x339   : > { %v2270_v47 = vpop.f32.mrf.mxu0 }
 0x33a   : > { %v8247_v6 = vadd.f32 %v2557_v30, %v2269_v54  ;;  %v2559_v1 = vpop.f32.mrf.mxu1  ;;  %v6593_v54 = vld [vmem:[#allocation7 + $0x110] sm:$0xff]  }
 0x33b   : > { %v2273_v62 = vpop.f32.mrf.mxu0  ;;  %v10401_v30 = vld [vmem:[#allocation42_spill] sm:$0xff]  ;;  %4701 = vmatpush1.bf16.msra.mxu1 %v6593_v54 }
 0x33c   : > { %10396 = vst [vmem:[#allocation71_spill] sm:$0xff] %v8247_v6  ;;  %v2274_v15 = vadd.f32 %v2273_v62, %v10397_v55  ;;  %v2562_v10 = vpop.f32.mrf.mxu1  ;;  %4702 = vmatprep.subr.bf16.mxu1 %v10254_v61 }
 0x33d   : > { %v2275_v18 = vpop.f32.mrf.mxu0 }
 0x33e   : > { %v8250_v39 = vadd.f32 %v2562_v10, %v2274_v15  ;;  %v2564_v45 = vpop.f32.mrf.mxu1  ;;  %v10403_v10 = vld [vmem:[#allocation40_spill] sm:$0xff] }
 0x33f   : > { %v2276_v52 = vpop.f32.mrf.mxu0 }
 0x340   : > { %10398 = vst [vmem:[#allocation67_spill] sm:$0xff] %v8250_v39  ;;  %v2277_v14 = vadd.f32 %v2276_v52, %v10399_v24  ;;  %v2565_v36 = vpop.f32.mrf.mxu1 }
 0x341   : > { %v2278_v5 = vpop.f32.mrf.mxu0 }
 0x342   : > { %v8253_v4 = vadd.f32 %v2565_v36, %v2277_v14  ;;  %v2567_v0 = vpop.f32.mrf.mxu1  ;;  %v10405_v36 = vld [vmem:[#allocation45_spill] sm:$0xff] }
 0x343   : > { %v2281_v43 = vpop.f32.mrf.mxu0 }
 0x344   : > { %10400 = vst [vmem:[#allocation69_spill] sm:$0xff] %v8253_v4  ;;  %v2282_v47 = vadd.f32 %v2281_v43, %v10401_v30  ;;  %v2570_v1 = vpop.f32.mrf.mxu1 }
 0x345   : > { %v2283_v6 = vpop.f32.mrf.mxu0 }
 0x346   : > { %v8256_v62 = vadd.f32 %v2570_v1, %v2282_v47  ;;  %v2572_v15 = vpop.f32.mrf.mxu1  ;;  %v10407_v1 = vld [vmem:[#allocation50_spill] sm:$0xff] }
 0x347   : > { %v2284_v55 = vpop.f32.mrf.mxu0 }
 0x348   : > { %10402 = vst [vmem:[#allocation70_spill] sm:$0xff] %v8256_v62  ;;  %v2285_v52 = vadd.f32 %v2284_v55, %v10403_v10  ;;  %v2573_v18 = vpop.f32.mrf.mxu1  ;;  %v6594_v10 = vld [vmem:[#allocation7 + $0x108] sm:$0xff]  }
 0x349   : > { %v2286_v5 = vpop.f32.mrf.mxu0  ;;  %4703 = vmatpush1.bf16.msra.mxu1 %v6594_v10 }
 0x34a   : > { %v8260_v45 = vadd.f32 %v2573_v18, %v2285_v52  ;;  %v2575_v24 = vpop.f32.mrf.mxu1  ;;  %v10409_v18 = vld [vmem:[#allocation43_spill] sm:$0xff]  ;;  %4704 = vmatprep.subr.bf16.mxu1 %v10254_v61 }
 0x34b   : > { %v2289_v14 = vpop.f32.mrf.mxu0 }
 0x34c   : > { %10404 = vst [vmem:[#allocation72_spill] sm:$0xff] %v8260_v45  ;;  %v2290_v0 = vadd.f32 %v2289_v14, %v10405_v36  ;;  %v2578_v43 = vpop.f32.mrf.mxu1 }
 0x34d   : > { %v2291_v30 = vpop.f32.mrf.mxu0 }
 0x34e   : > { %v8263_v6 = vadd.f32 %v2578_v43, %v2290_v0  ;;  %v2580_v54 = vpop.f32.mrf.mxu1  ;;  %v10411_v30 = vld [vmem:[#allocation48_spill] sm:$0xff] }
 0x34f   : > { %v2292_v47 = vpop.f32.mrf.mxu0 }
 0x350   : > { %10406 = vst [vmem:[#allocation73_spill] sm:$0xff] %v8263_v6  ;;  %v2293_v15 = vadd.f32 %v2292_v47, %v10407_v1  ;;  %v2581_v4 = vpop.f32.mrf.mxu1 }
 0x351   : > { %v2294_v39 = vpop.f32.mrf.mxu0 }
 0x352   : > { %v8266_v62 = vadd.f32 %v2581_v4, %v2293_v15  ;;  %v2583_v55 = vpop.f32.mrf.mxu1 }
 0x353   : > { %v2297_v52 = vpop.f32.mrf.mxu0  ;;  %v8278_v55 = vld [vmem:[%s9951_s2] ss:$0 sm:$0xff] }
 0x354   : > { %10408 = vst [vmem:[#allocation21_spill] sm:$0xff] %v8266_v62  ;;  %v2298_v5 = vadd.f32 %v2297_v52, %v10409_v18  ;;  %v2586_v24 = vpop.f32.mrf.mxu1 }
 0x355   : > { %v2299_v14 = vpop.f32.mrf.mxu0 }
 0x356   : > { %v8270_v36 = vadd.f32 %v2586_v24, %v2298_v5  ;;  %v2588_v0 = vpop.f32.mrf.mxu1  ;;  %v10413_v5 = vld [vmem:[#allocation46_spill] sm:$0xff]  ;;  %v8286_v14 = vld [vmem:[%s9952_s3] ss:$0 sm:$0xff] }
 0x357   : > { %v2300_v43 = vpop.f32.mrf.mxu0 }
 0x358   : > { %10410 = vst [vmem:[#allocation74_spill] sm:$0xff] %v8270_v36  ;;  %v2301_v54 = vadd.f32 %v2300_v43, %v10411_v30  ;;  %v2589_v47 = vpop.f32.mrf.mxu1  ;;  %v10414_v30 = vld [vmem:[#allocation49_spill] sm:$0xff] }
 0x359   : > { %v2302_v39 = vpop.f32.mrf.mxu0 }
 0x35a   : > { %v8273_v4 = vadd.f32 %v2589_v47, %v2301_v54  ;;  %v2591_v1 = vpop.f32.mrf.mxu1 }
 0x35b   : > { %v6268_v15 = vpop.f32.mrf.mxu0  ;;  %v10415_v1 = vld [vmem:[#allocation51_spill] sm:$0xff] }
 0x35c   : > { %10412 = vst [vmem:[#allocation75_spill] sm:$0xff] %v8273_v4  ;;  %v2636_v10 = vadd.f32 %v6268_v15, %v7995_v57 }
 0x35d   : > { %v2627_v52 = vpop.f32.mrf.mxu0 }
 0x35e   : > { %v2891_v18 = vmul.f32 %v8278_v55, %v2636_v10  ;;  %v2628_v24 = vadd.f32 %v2627_v52, %v10413_v5  ;;  %v6595_v10 = vld [vmem:[#allocation7 + $0x100] sm:$0xff]  }
 0x35f   : > { %v6269_v0 = vpop.f32.mrf.mxu0  ;;  %4705 = vmatpush1.bf16.msra.mxu1 %v6595_v10  ;;  %v10416_v10 = vld [vmem:[#allocation55_spill] sm:$0xff] }
 0x360   : > { %v2889_v43 = vmul.f32 %v8278_v55, %v2628_v24  ;;  %v2639_v54 = vadd.f32 %v6269_v0, %v10414_v30  ;;  %v2962_v39 = vadd.f32 %v8286_v14, %v2891_v18  ;;  %4706 = vmatprep.subr.bf16.mxu1 %v10254_v61 }
 0x361   : > { %v2630_v47 = vpop.f32.mrf.mxu0 }
 0x362   : > { %v2892_v57 = vmul.f32 %v8278_v55, %v2639_v54  ;;  %v2631_v15 = vadd.f32 %v2630_v47, %v10415_v1  ;;  %v2960_v52 = vadd.f32 %v8286_v14, %v2889_v43  ;;  %v3026_v0 = vmax.f32 %v2962_v39, 0.0 }
 0x363   : > { %v6272_v62 = vpop.f32.mrf.mxu0 }
 0x364   : > { %v2963_v5 = vadd.f32 %v8286_v14, %v2892_v57  ;;  %v2890_v4 = vmul.f32 %v8278_v55, %v2631_v15  ;;  %v2652_v6 = vadd.f32 %v6272_v62, %v8016_v40  ;;  %v3024_v43 = vmax.f32 %v2960_v52, 0.0 }
 0x365   : > { %v2643_v24 = vpop.f32.mrf.mxu0 }
 0x366   : > { %v3027_v18 = vmax.f32 %v2963_v5, 0.0  ;;  %v2961_v30 = vadd.f32 %v8286_v14, %v2890_v4  ;;  %v2644_v54 = vadd.f32 %v2643_v24, %v8005_v13  ;;  %v2895_v47 = vmul.f32 %v8278_v55, %v2652_v6 }
 0x367   : > { %v6273_v1 = vpop.f32.mrf.mxu0 }
 0x368   : > { %v8301_v36 = vpack.c.bf16 %v3027_v18, %v3026_v0  ;;  %v3025_v57 = vmax.f32 %v2961_v30, 0.0  ;;  %v2893_v15 = vmul.f32 %v8278_v55, %v2644_v54  ;;  %v2655_v40 = vadd.f32 %v6273_v1, %v8019_v50  ;;  %v6596_v1 = vld [vmem:[#allocation7 + $0x178] sm:$0xff]  }
 0x369   : > { %v2646_v62 = vpop.f32.mrf.mxu0  ;;  %v2966_v4 = vadd.f32 %v8286_v14, %v2895_v47  ;;  %4707 = vmatpush2.bf16.msra.mxu1 %v6596_v1  ;;  %v6597_v1 = vld [vmem:[#allocation7 + $0x1b8] sm:$0xff]  }
 0x36a   : > { %v2647_v45 = vadd.f32 %v2646_v62, %v10416_v10  ;;  %v8306_v39 = vpack.c.bf16 %v3025_v57, %v3024_v43  ;;  %v2896_v13 = vmul.f32 %v8278_v55, %v2655_v40  ;;  %v10055_v6 = vshrl.u32 %v8301_v36, 16  ;;  %4708 = vmatprep.subr.bf16.mxu1 %v10254_v61 }
 0x36b   : > { %v6276_v5 = vpop.f32.mrf.mxu0  ;;  %v2964_v52 = vadd.f32 %v8286_v14, %v2893_v15  ;;  %v10056_v47 = vshll.u32 %v8301_v36, 16  ;;  %v3030_v15 = vmax.f32 %v2966_v4, 0.0 }
 0x36c   : > { %v2894_v24 = vmul.f32 %v8278_v55, %v2647_v45  ;;  %v2668_v0 = vadd.f32 %v6276_v5, %v8041_v29  ;;  %4152 = vmatprep.mubr.bf16.mxu1 %v8306_v39  ;;  %v3121_v50 = vshrl.u32 %v8306_v39, 16  ;;  %v2967_v18 = vadd.f32 %v8286_v14, %v2896_v13 }
 0x36d   : > { %v2659_v30 = vpop.f32.mrf.mxu0  ;;  %v3130_v54 = vrot.slane %v10055_v6, 7  ;;  %v3124_v10 = vshll.u32 %v8306_v39, 16  ;;  %v3028_v13 = vmax.f32 %v2964_v52, 0.0 }
 0x36e   : > { %v2965_v43 = vadd.f32 %v8286_v14, %v2894_v24  ;;  %v2899_v57 = vmul.f32 %v8278_v55, %v2668_v0  ;;  %v2660_v45 = vadd.f32 %v2659_v30, %v8026_v34  ;;  %v3123_v29 = vrot.slane %v3121_v50, 7 }
 0x36f   : > { %v3031_v40 = vmax.f32 %v2967_v18, 0.0  ;;  %v6277_v62 = vpop.f32.mrf.mxu0  ;;  %v3133_v41 = vor.u32 %v10056_v47, %v3130_v54  ;;  %v3390_v47 = vrot.slane %v3124_v10, 1 }
 0x370   : > { %v3029_v5 = vmax.f32 %v2965_v43, 0.0  ;;  %v2671_v6 = vadd.f32 %v6277_v62, %v8048_v25  ;;  %v2970_v34 = vadd.f32 %v8286_v14, %v2899_v57  ;;  %v2897_v4 = vmul.f32 %v8278_v55, %v2660_v45 }
 0x371   : > { %v8328_v24 = vpack.c.bf16 %v3031_v40, %v3030_v15  ;;  %v2662_v0 = vpop.f32.mrf.mxu0  ;;  %v3126_v18 = vor.u32 %v3124_v10, %v3123_v29  ;;  %v8347_v10 = vsel %vm7067_vm2, 0, %v3133_v41 }
 0x372   : > { %v8332_v30 = vpack.c.bf16 %v3029_v5, %v3028_v13  ;;  %v2900_v52 = vmul.f32 %v8278_v55, %v2671_v6  ;;  %v2663_v25 = vadd.f32 %v2662_v0, %v8032_v51  ;;  %v3034_v29 = vmax.f32 %v2970_v34, 0.0 }
 0x373   : > { %v6280_v43 = vpop.f32.mrf.mxu0  ;;  %v3360_v54 = vsel %vm7067_vm2, 0, %v3126_v18  ;;  %v2968_v40 = vadd.f32 %v8286_v14, %v2897_v4  ;;  %v3391_v18 = vor.u32 %v3390_v47, %v3121_v50 }
 0x374   : > { %v2971_v15 = vadd.f32 %v8286_v14, %v2900_v52  ;;  %v2684_v57 = vadd.f32 %v6280_v43, %v8066_v63  ;;  %4153 = vmatmul.mubr.bf16.gmra.mxu1 %v3360_v54  ;;  %4433 = vmatprep.mubr.bf16.mxu0 %v3360_v54  ;;  %v10058_v45 = vshrl.u32 %v8332_v30, 16  ;;  %v2898_v6 = vmul.f32 %v8278_v55, %v2663_v25 }
 0x375   : > { %4160 = vmatprep.mubr.bf16.mxu1 %v8301_v36  ;;  %4434 = vmatmul.mubr.bf16.vlgmr.msra.gmra.mxu0 %v10349_v26  ;;  %v2675_v51 = vpop.f32.mrf.mxu0  ;;  %v3138_v52 = vshll.u32 %v8332_v30, 16  ;;  %v3032_v43 = vmax.f32 %v2968_v40, 0.0 }
 0x376   : > { %v3035_v13 = vmax.f32 %v2971_v15, 0.0  ;;  %v2903_v63 = vmul.f32 %v8278_v55, %v2684_v57  ;;  %v2676_v5 = vadd.f32 %v2675_v51, %v8055_v49  ;;  %4441 = vmatprep.mubr.bf16.mxu0 %v8347_v10  ;;  %v3137_v34 = vrot.slane %v10058_v45, 7  ;;  %4980 = vmatpush1.bf16.msra.mxu0 %v6597_v1 }
 0x377   : > { %v2969_v4 = vadd.f32 %v8286_v14, %v2898_v6  ;;  %v6281_v0 = vpop.f32.mrf.mxu0  ;;  %4981 = vmatprep.subr.bf16.mxu0 %v10254_v61  ;;  %v10057_v1 = vshrl.u32 %v8328_v24, 16 }
 0x378   : > { %v8357_v41 = vpack.c.bf16 %v3035_v13, %v3034_v29  ;;  %v2901_v25 = vmul.f32 %v8278_v55, %v2676_v5  ;;  %v2687_v49 = vadd.f32 %v6281_v0, %v8069_v33  ;;  %v3140_v57 = vor.u32 %v3138_v52, %v3137_v34 }
 0x379   : > { %v3033_v54 = vmax.f32 %v2969_v4, 0.0  ;;  %v2678_v15 = vpop.f32.mrf.mxu0  ;;  %v2974_v6 = vadd.f32 %v8286_v14, %v2903_v63  ;;  %v8369_v13 = vsel %vm7104_vm5, %v3391_v18, 0  ;;  %v10418_v33 = vshll.u32 %v8301_v36, 16 }
 0x37a   : > { %v2904_v50 = vmul.f32 %v8278_v55, %v2687_v49  ;;  %v2679_v47 = vadd.f32 %v2678_v15, %v8059_v46  ;;  %v2972_v5 = vadd.f32 %v8286_v14, %v2901_v25  ;;  %v8382_v0 = vsel %vm7067_vm2, 0, %v3140_v57  ;;  %v6598_v25 = vld [vmem:[#allocation7 + $0x170] sm:$0xff]  }
 0x37b   : > { %v8365_v51 = vpack.c.bf16 %v3033_v54, %v3032_v43  ;;  %v6284_v29 = vpop.f32.mrf.mxu0  ;;  %v3392_v40 = vrot.slane %v10418_v33, 1  ;;  %v3144_v18 = vrot.slane %v10057_v1, 7  ;;  %v6599_v49 = vld [vmem:[#allocation7 + $0x1b0] sm:$0xff]   ;;  %v3038_v43 = vmax.f32 %v2974_v6, 0.0  ;;  %4709 = vmatpush2.bf16.msra.mxu1 %v6598_v25 }
 0x37c   : > { %v2975_v34 = vadd.f32 %v8286_v14, %v2904_v50  ;;  %v2902_v63 = vmul.f32 %v8278_v55, %v2679_v47  ;;  %v2700_v4 = vadd.f32 %v6284_v29, %v8083_v16  ;;  %4161 = vmatmul.mubr.bf16.gmra.mxu1 %v8347_v10  ;;  %v10419_v29 = vshrl.u32 %v8301_v36, 16  ;;  %4982 = vmatpush1.bf16.msra.mxu0 %v6599_v49 }
 0x37d   : > { %4168 = vmatprep.mubr.bf16.mxu1 %v8332_v30  ;;  %4442 = vmatmul.mubr.bf16.gmra.mxu0 %v8369_v13  ;;  %v2691_v46 = vpop.f32.mrf.mxu0  ;;  %v3145_v33 = vshll.u32 %v8328_v24, 16  ;;  %v3036_v1 = vmax.f32 %v2972_v5, 0.0 }
 0x37e   : > { %v3039_v54 = vmax.f32 %v2975_v34, 0.0  ;;  %v2973_v16 = vadd.f32 %v8286_v14, %v2902_v63  ;;  %v2692_v15 = vadd.f32 %v2691_v46, %v8074_v35  ;;  %4449 = vmatprep.mubr.bf16.mxu0 %v8382_v0  ;;  %v2907_v50 = vmul.f32 %v8278_v55, %v2700_v4  ;;  %4710 = vmatprep.subr.bf16.mxu1 %v10254_v61 }
 0x37f   : > { %v6285_v47 = vpop.f32.mrf.mxu0  ;;  %v3393_v57 = vor.u32 %v3392_v40, %v10419_v29  ;;  %4983 = vmatprep.subr.bf16.mxu0 %v10254_v61  ;;  %v3147_v4 = vor.u32 %v3145_v33, %v3144_v18  ;;  %v10059_v40 = vshrl.u32 %v8365_v51, 16 }
 0x380   : > { %v8393_v45 = vpack.c.bf16 %v3039_v54, %v3038_v43  ;;  %v3037_v6 = vmax.f32 %v2973_v16, 0.0  ;;  %v2905_v34 = vmul.f32 %v8278_v55, %v2692_v15  ;;  %v2703_v35 = vadd.f32 %v6285_v47, %v8086_v23 }
 0x381   : > { %v2694_v63 = vpop.f32.mrf.mxu0  ;;  %v2978_v5 = vadd.f32 %v8286_v14, %v2907_v50  ;;  %v8407_v54 = vsel %vm7104_vm5, %v3393_v57, 0  ;;  %v8418_v50 = vsel %vm7067_vm2, 0, %v3147_v4  ;;  %v3151_v47 = vrot.slane %v10059_v40, 7 }
 0x382   : > { %10420 = vst [vmem:[#allocation35_spill] sm:$0xff] %v8393_v45  ;;  %v8400_v46 = vpack.c.bf16 %v3037_v6, %v3036_v1  ;;  %v2695_v25 = vadd.f32 %v2694_v63, %v8078_v38  ;;  %v2908_v49 = vmul.f32 %v8278_v55, %v2703_v35  ;;  %v2976_v16 = vadd.f32 %v8286_v14, %v2905_v34 }
 0x383   : > { %v6288_v43 = vpop.f32.mrf.mxu0  ;;  %v3394_v1 = vrot.slane %v3138_v52, 1  ;;  %v3042_v57 = vmax.f32 %v2978_v5, 0.0  ;;  %v3152_v35 = vshll.u32 %v8365_v51, 16 }
 0x384   : > { %10421 = vst [vmem:[#allocation76_spill] sm:$0xff] %v8400_v46  ;;  %v2906_v23 = vmul.f32 %v8278_v55, %v2695_v25  ;;  %v2716_v18 = vadd.f32 %v6288_v43, %v8100_v44  ;;  %4169 = vmatmul.mubr.bf16.gmra.mxu1 %v8382_v0  ;;  %v2979_v38 = vadd.f32 %v8286_v14, %v2908_v49  ;;  %v3040_v63 = vmax.f32 %v2976_v16, 0.0 }
 0x385   : > { %4176 = vmatprep.mubr.bf16.mxu1 %v8328_v24  ;;  %4450 = vmatmul.mubr.bf16.gmra.mxu0 %v8407_v54  ;;  %v2707_v15 = vpop.f32.mrf.mxu0  ;;  %v10422_v49 = vshrl.u32 %v8332_v30, 16 }
 0x386   : > { %v2977_v29 = vadd.f32 %v8286_v14, %v2906_v23  ;;  %v2911_v44 = vmul.f32 %v8278_v55, %v2716_v18  ;;  %v2708_v52 = vadd.f32 %v2707_v15, %v8091_v31  ;;  %4457 = vmatprep.mubr.bf16.mxu0 %v8418_v50  ;;  %v3043_v6 = vmax.f32 %v2979_v38, 0.0 }
 0x387   : > { %v6289_v34 = vpop.f32.mrf.mxu0  ;;  %v3395_v43 = vor.u32 %v3394_v1, %v10422_v49  ;;  %v3154_v31 = vor.u32 %v3152_v35, %v3151_v47  ;;  %v10060_v15 = vshrl.u32 %v8357_v41, 16 }
 0x388   : > { %v3041_v25 = vmax.f32 %v2977_v29, 0.0  ;;  %v2719_v4 = vadd.f32 %v6289_v34, %v8104_v20  ;;  %v8430_v40 = vpack.c.bf16 %v3043_v6, %v3042_v57  ;;  %v2909_v23 = vmul.f32 %v8278_v55, %v2708_v52  ;;  %v6600_v6 = vld [vmem:[#allocation7 + $0x168] sm:$0xff]  }
 0x389   : > { %v2710_v18 = vpop.f32.mrf.mxu0  ;;  %v2982_v38 = vadd.f32 %v8286_v14, %v2911_v44  ;;  %v3396_v34 = vrot.slane %v3145_v33, 1  ;;  %v8444_v47 = vsel %vm7104_vm5, %v3395_v43, 0  ;;  %v8452_v33 = vsel %vm7067_vm2, 0, %v3154_v31  ;;  %4711 = vmatpush2.bf16.msra.mxu1 %v6600_v6 }
 0x38a   : > { %10423 = vst [vmem:[#allocation38_spill] sm:$0xff] %v8430_v40  ;;  %v8434_v5 = vpack.c.bf16 %v3041_v25, %v3040_v63  ;;  %v2912_v16 = vmul.f32 %v8278_v55, %v2719_v4  ;;  %v2711_v29 = vadd.f32 %v2710_v18, %v8095_v9  ;;  %v2980_v52 = vadd.f32 %v8286_v14, %v2909_v23  ;;  %v6601_v63 = vld [vmem:[#allocation7 + $0x1a8] sm:$0xff]  }
 0x38b   : > { %v6292_v20 = vpop.f32.mrf.mxu0  ;;  %v3046_v25 = vmax.f32 %v2982_v38, 0.0  ;;  %4984 = vmatpush1.bf16.msra.mxu0 %v6601_v63  ;;  %4712 = vmatprep.subr.bf16.mxu1 %v10254_v61 }
 0x38c   : > { %10424 = vst [vmem:[#allocation77_spill] sm:$0xff] %v8434_v5  ;;  %v2983_v1 = vadd.f32 %v8286_v14, %v2912_v16  ;;  %v2732_v57 = vadd.f32 %v6292_v20, %v8121_v19  ;;  %4177 = vmatmul.mubr.bf16.gmra.mxu1 %v8418_v50  ;;  %v2910_v44 = vmul.f32 %v8278_v55, %v2711_v29  ;;  %v3158_v19 = vrot.slane %v10060_v15, 7 }
 0x38d   : > { %4184 = vmatprep.mubr.bf16.mxu1 %v8365_v51  ;;  %4458 = vmatmul.mubr.bf16.gmra.mxu0 %v8444_v47  ;;  %v2723_v9 = vpop.f32.mrf.mxu0  ;;  %v10425_v16 = vshrl.u32 %v8328_v24, 16  ;;  %v3159_v29 = vshll.u32 %v8357_v41, 16  ;;  %v10061_v15 = vshrl.u32 %v8400_v46, 16 }
 0x38e   : > { %v3047_v4 = vmax.f32 %v2983_v1, 0.0  ;;  %v2915_v49 = vmul.f32 %v8278_v55, %v2732_v57  ;;  %v2724_v43 = vadd.f32 %v2723_v9, %v8110_v60  ;;  %4465 = vmatprep.mubr.bf16.mxu0 %v8452_v33  ;;  %v2981_v23 = vadd.f32 %v8286_v14, %v2910_v44  ;;  %4985 = vmatprep.subr.bf16.mxu0 %v10254_v61 }
 0x38f   : > { %v6293_v18 = vpop.f32.mrf.mxu0  ;;  %v3397_v31 = vor.u32 %v3396_v34, %v10425_v16  ;;  %v3044_v60 = vmax.f32 %v2980_v52, 0.0  ;;  %v3161_v44 = vor.u32 %v3159_v29, %v3158_v19  ;;  %v3398_v52 = vrot.slane %v3152_v35, 1 }
 0x390   : > { %v8463_v20 = vpack.c.bf16 %v3047_v4, %v3046_v25  ;;  %v2913_v38 = vmul.f32 %v8278_v55, %v2724_v43  ;;  %v2735_v1 = vadd.f32 %v6293_v18, %v8125_v8  ;;  %v3045_v57 = vmax.f32 %v2981_v23, 0.0 }
 0x391   : > { %v2726_v9 = vpop.f32.mrf.mxu0  ;;  %v2986_v34 = vadd.f32 %v8286_v14, %v2915_v49  ;;  %v8477_v8 = vsel %vm7104_vm5, %v3397_v31, 0  ;;  %v8488_v18 = vsel %vm7067_vm2, 0, %v3161_v44  ;;  %v3165_v35 = vrot.slane %v10061_v15, 7 }
 0x392   : > { %10426 = vst [vmem:[#allocation41_spill] sm:$0xff] %v8463_v20  ;;  %v2916_v6 = vmul.f32 %v8278_v55, %v2735_v1  ;;  %v2727_v63 = vadd.f32 %v2726_v9, %v8115_v37  ;;  %v8473_v25 = vpack.c.bf16 %v3045_v57, %v3044_v60  ;;  %v2984_v19 = vadd.f32 %v8286_v14, %v2913_v38 }
 0x393   : > { %v6296_v4 = vpop.f32.mrf.mxu0  ;;  %10428 = vst [vmem:[#allocation44_spill] sm:$0xff] %v8488_v18  ;;  %v3050_v16 = vmax.f32 %v2986_v34, 0.0  ;;  %v10429_v57 = vshrl.u32 %v8365_v51, 16  ;;  %v3166_v44 = vshll.u32 %v8400_v46, 16 }
 0x394   : > { %10427 = vst [vmem:[#allocation78_spill] sm:$0xff] %v8473_v25  ;;  %v2987_v43 = vadd.f32 %v8286_v14, %v2916_v6  ;;  %v2914_v23 = vmul.f32 %v8278_v55, %v2727_v63  ;;  %v2748_v49 = vadd.f32 %v6296_v4, %v8142_v11  ;;  %4185 = vmatmul.mubr.bf16.gmra.mxu1 %v8452_v33  ;;  %v3048_v6 = vmax.f32 %v2984_v19, 0.0 }
 0x395   : > { %4192 = vmatprep.mubr.bf16.mxu1 %v8357_v41  ;;  %4466 = vmatmul.mubr.bf16.gmra.mxu0 %v8477_v8  ;;  %v2739_v37 = vpop.f32.mrf.mxu0  ;;  %v3399_v9 = vor.u32 %v3398_v52, %v10429_v57 }
 0x396   : > { %v3051_v31 = vmax.f32 %v2987_v43, 0.0  ;;  %v2985_v38 = vadd.f32 %v8286_v14, %v2914_v23  ;;  %v2740_v11 = vadd.f32 %v2739_v37, %v8131_v27  ;;  %4473 = vmatprep.mubr.bf16.mxu0 %v8488_v18  ;;  %v2919_v1 = vmul.f32 %v8278_v55, %v2748_v49 }
 0x397   : > { %v6297_v60 = vpop.f32.mrf.mxu0  ;;  %v3168_v27 = vor.u32 %v3166_v44, %v3165_v35  ;;  %v10062_v37 = vshrl.u32 %v8393_v45, 16 }
 0x398   : > { %v8499_v63 = vpack.c.bf16 %v3051_v31, %v3050_v16  ;;  %v3049_v4 = vmax.f32 %v2985_v38, 0.0  ;;  %v2917_v34 = vmul.f32 %v8278_v55, %v2740_v11  ;;  %v2751_v43 = vadd.f32 %v6297_v60, %v8146_v28 }
 0x399   : > { %v2742_v23 = vpop.f32.mrf.mxu0  ;;  %v2990_v52 = vadd.f32 %v8286_v14, %v2919_v1  ;;  %v8511_v16 = vsel %vm7104_vm5, %v3399_v9, 0  ;;  %v3400_v38 = vrot.slane %v3159_v29, 1  ;;  %v8522_v1 = vsel %vm7067_vm2, 0, %v3168_v27  ;;  %v6602_v9 = vld [vmem:[#allocation7 + $0x160] sm:$0xff]  }
 0x39a   : > { %v8504_v15 = vpack.c.bf16 %v3049_v4, %v3048_v6  ;;  %v2743_v49 = vadd.f32 %v2742_v23, %v8136_v3  ;;  %v2920_v57 = vmul.f32 %v8278_v55, %v2751_v43  ;;  %v2988_v31 = vadd.f32 %v8286_v14, %v2917_v34  ;;  %10431 = vst [vmem:[#allocation47_spill] sm:$0xff] %v8522_v1  ;;  %v6603_v6 = vld [vmem:[#allocation7 + $0x1a0] sm:$0xff]  }
 0x39b   : > { %v6300_v19 = vpop.f32.mrf.mxu0  ;;  %v3172_v60 = vrot.slane %v10062_v37, 7  ;;  %v3054_v4 = vmax.f32 %v2990_v52, 0.0  ;;  %4713 = vmatpush2.bf16.msra.mxu1 %v6602_v9  ;;  %4986 = vmatpush1.bf16.msra.mxu0 %v6603_v6  ;;  %v10432_v37 = vshrl.u32 %v8357_v41, 16  ;;  %v3402_v6 = vrot.slane %v3166_v44, 1 }
 0x39c   : > { %10430 = vst [vmem:[#allocation79_spill] sm:$0xff] %v8504_v15  ;;  %v2918_v28 = vmul.f32 %v8278_v55, %v2743_v49  ;;  %v2764_v35 = vadd.f32 %v6300_v19, %v8163_v7  ;;  %4193 = vmatmul.mubr.bf16.gmra.mxu1 %v8488_v18  ;;  %v2991_v3 = vadd.f32 %v8286_v14, %v2920_v57  ;;  %v3173_v49 = vshll.u32 %v8393_v45, 16 }
 0x39d   : > { %4200 = vmatprep.mubr.bf16.mxu1 %v8400_v46  ;;  %4474 = vmatmul.mubr.bf16.gmra.mxu0 %v8511_v16  ;;  %v2755_v11 = vpop.f32.mrf.mxu0  ;;  %v3052_v27 = vmax.f32 %v2988_v31, 0.0 }
 0x39e   : > { %v2989_v7 = vadd.f32 %v8286_v14, %v2918_v28  ;;  %v2923_v29 = vmul.f32 %v8278_v55, %v2764_v35  ;;  %4481 = vmatprep.mubr.bf16.mxu0 %v8522_v1  ;;  %v3055_v34 = vmax.f32 %v2991_v3, 0.0  ;;  %v2756_v43 = vadd.f32 %v2755_v11, %v8152_v12  ;;  %4714 = vmatprep.subr.bf16.mxu1 %v10254_v61 }
 0x39f   : > { %v6301_v23 = vpop.f32.mrf.mxu0  ;;  %v3401_v28 = vor.u32 %v3400_v38, %v10432_v37  ;;  %4987 = vmatprep.subr.bf16.mxu0 %v10254_v61  ;;  %v3175_v12 = vor.u32 %v3173_v49, %v3172_v60  ;;  %v10063_v3 = vshrl.u32 %v8434_v5, 16 }
 0x3a0   : > { %v3053_v57 = vmax.f32 %v2989_v7, 0.0  ;;  %v2767_v19 = vadd.f32 %v6301_v23, %v8168_v42  ;;  %v8536_v52 = vpack.c.bf16 %v3055_v34, %v3054_v4  ;;  %v2994_v31 = vadd.f32 %v8286_v14, %v2923_v29 }
 0x3a1   : > { %v2758_v35 = vpop.f32.mrf.mxu0  ;;  %v2921_v42 = vmul.f32 %v8278_v55, %v2756_v43  ;;  %v8550_v60 = vsel %vm7104_vm5, %v3401_v28, 0 }
 0x3a2   : > { %v8539_v11 = vpack.c.bf16 %v3053_v57, %v3052_v27  ;;  %v2924_v9 = vmul.f32 %v8278_v55, %v2767_v19  ;;  %v2759_v37 = vadd.f32 %v2758_v35, %v8156_v2  ;;  %v8557_v2 = vsel %vm7067_vm2, 0, %v3175_v12  ;;  %v8564_v57 = vpop.f32.mrf.mxu1 }
 0x3a3   : > { %v6304_v38 = vpop.f32.mrf.mxu0  ;;  %10433 = vst [vmem:[#allocation80_spill] sm:$0xff] %v8557_v2  ;;  %v3058_v44 = vmax.f32 %v2994_v31, 0.0  ;;  %10434 = vst [vmem:[#allocation19_spill] sm:$0xff] %v8564_v57  ;;  %v2992_v19 = vadd.f32 %v8286_v14, %v2921_v42  ;;  %v10435_v12 = vshrl.u32 %v8400_v46, 16  ;;  %v10064_v42 = vshrl.u32 %v8430_v40, 16 }
 0x3a4   : > { %v2995_v7 = vadd.f32 %v8286_v14, %v2924_v9  ;;  %v2780_v4 = vadd.f32 %v6304_v38, %v8185_v59  ;;  %4201 = vmatmul.mubr.bf16.gmra.mxu1 %v8522_v1  ;;  %v2922_v29 = vmul.f32 %v8278_v55, %v2759_v37  ;;  %v3179_v59 = vrot.slane %v10063_v3, 7 }
 0x3a5   : > { %4208 = vmatprep.mubr.bf16.mxu1 %v8393_v45  ;;  %4482 = vmatmul.mubr.bf16.gmra.mxu0 %v8550_v60  ;;  %v2771_v34 = vpop.f32.mrf.mxu0  ;;  %v3403_v9 = vor.u32 %v3402_v6, %v10435_v12  ;;  %v3180_v37 = vshll.u32 %v8434_v5, 16 }
 0x3a6   : > { %v3059_v43 = vmax.f32 %v2995_v7, 0.0  ;;  %v2927_v23 = vmul.f32 %v8278_v55, %v2780_v4  ;;  %v2772_v27 = vadd.f32 %v2771_v34, %v8174_v21  ;;  %4489 = vmatprep.mubr.bf16.mxu0 %v8557_v2  ;;  %v2993_v28 = vadd.f32 %v8286_v14, %v2922_v29  ;;  %v4148_v7 = vpop.f32.mrf.mxu1 }
 0x3a7   : > { %v6305_v35 = vpop.f32.mrf.mxu0  ;;  %v3182_v3 = vor.u32 %v3180_v37, %v3179_v59 }
 0x3a8   : > { %v8571_v31 = vpack.c.bf16 %v3059_v43, %v3058_v44  ;;  %v2925_v38 = vmul.f32 %v8278_v55, %v2772_v27  ;;  %v2783_v21 = vadd.f32 %v6305_v35, %v8188_v48  ;;  %v3057_v4 = vmax.f32 %v2993_v28, 0.0  ;;  %v8579_v12 = vpop.f32.mrf.mxu1 }
 0x3a9   : > { %v2774_v34 = vpop.f32.mrf.mxu0  ;;  %v2998_v29 = vadd.f32 %v8286_v14, %v2927_v23  ;;  %10436 = vst [vmem:[#allocation53_spill] sm:$0xff] %v8579_v12  ;;  %v3056_v44 = vmax.f32 %v2992_v19, 0.0  ;;  %v8583_v27 = vsel %vm7104_vm5, %v3403_v9, 0  ;;  %v3404_v48 = vrot.slane %v3173_v49, 1 }
 0x3aa   : > { %v2928_v57 = vmul.f32 %v8278_v55, %v2783_v21  ;;  %v2775_v6 = vadd.f32 %v2774_v34, %v8178_v22  ;;  %10437 = vst [vmem:[#allocation15_spill] sm:$0xff] %v8583_v27  ;;  %v2996_v28 = vadd.f32 %v8286_v14, %v2925_v38  ;;  %v4151_v22 = vpop.f32.mrf.mxu1  ;;  %v8594_v9 = vsel %vm7067_vm2, 0, %v3182_v3  ;;  %v6604_v38 = vld [vmem:[#allocation7 + $0x158] sm:$0xff]  }
 0x3ab   : > { %v6308_v43 = vpop.f32.mrf.mxu0  ;;  %10438 = vst [vmem:[#allocation57_spill] sm:$0xff] %v8594_v9  ;;  %v3186_v49 = vrot.slane %v10064_v42, 7  ;;  %v6605_v21 = vld [vmem:[#allocation7 + $0x198] sm:$0xff]   ;;  %v10439_v3 = vshrl.u32 %v8393_v45, 16  ;;  %v3187_v42 = vshll.u32 %v8430_v40, 16  ;;  %4715 = vmatpush2.bf16.msra.mxu1 %v6604_v38 }
 0x3ac   : > { %v2999_v59 = vadd.f32 %v8286_v14, %v2928_v57  ;;  %v2926_v35 = vmul.f32 %v8278_v55, %v2775_v6  ;;  %v2796_v23 = vadd.f32 %v6308_v43, %v8202_v58  ;;  %4209 = vmatmul.mubr.bf16.gmra.mxu1 %v8557_v2  ;;  %v8598_v57 = vpack.c.bf16 %v3057_v4, %v3056_v44 }
 0x3ad   : > { %4216 = vmatprep.mubr.bf16.mxu1 %v8434_v5  ;;  %4490 = vmatmul.mubr.bf16.gmra.mxu0 %v8583_v27  ;;  %v2787_v19 = vpop.f32.mrf.mxu0  ;;  %v3062_v58 = vmax.f32 %v2998_v29, 0.0  ;;  %v3405_v12 = vor.u32 %v3404_v48, %v10439_v3  ;;  %v3060_v4 = vmax.f32 %v2996_v28, 0.0  ;;  %v10067_v48 = vshrl.u32 %v8473_v25, 16 }
 0x3ae   : > { %v3063_v7 = vmax.f32 %v2999_v59, 0.0  ;;  %v2997_v34 = vadd.f32 %v8286_v14, %v2926_v35  ;;  %v2788_v6 = vadd.f32 %v2787_v19, %v8193_v17  ;;  %4497 = vmatprep.mubr.bf16.mxu0 %v8594_v9  ;;  %v2931_v43 = vmul.f32 %v8278_v55, %v2796_v23  ;;  %4988 = vmatpush1.bf16.msra.mxu0 %v6605_v21 }
 0x3af   : > { %v6309_v22 = vpop.f32.mrf.mxu0  ;;  %4716 = vmatprep.subr.bf16.mxu1 %v10254_v61  ;;  %4989 = vmatprep.subr.bf16.mxu0 %v10254_v61  ;;  %v3189_v23 = vor.u32 %v3187_v42, %v3186_v49  ;;  %v10443_v49 = vld [vmem:[#allocation56_spill] sm:$0xff]  ;;  %v3193_v3 = vrot.slane %v10067_v48, 7  ;;  %v10447_v2 = vshrl.u32 %v8434_v5, 16 }
 0x3b0   : > { %v8607_v44 = vpack.c.bf16 %v3063_v7, %v3062_v58  ;;  %v3061_v29 = vmax.f32 %v2997_v34, 0.0  ;;  %v2929_v59 = vmul.f32 %v8278_v55, %v2788_v6  ;;  %v2799_v17 = vadd.f32 %v6309_v22, %v8205_v56 }
 0x3b1   : > { %v2790_v35 = vpop.f32.mrf.mxu0  ;;  %v3002_v28 = vadd.f32 %v8286_v14, %v2931_v43  ;;  %v8621_v7 = vsel %vm7104_vm5, %v3405_v12, 0  ;;  %v3406_v22 = vrot.slane %v3180_v37, 1  ;;  %v8632_v12 = vsel %vm7067_vm2, 0, %v3189_v23  ;;  %v10446_v23 = vld [vmem:[#allocation59_spill] sm:$0xff] }
 0x3b2   : > { %10440 = vst [vmem:[#allocation17_spill] sm:$0xff] %v8607_v44  ;;  %v8614_v19 = vpack.c.bf16 %v3061_v29, %v3060_v4  ;;  %v2791_v38 = vadd.f32 %v2790_v35, %v8196_v32  ;;  %v2932_v21 = vmul.f32 %v8278_v55, %v2799_v17  ;;  %10442 = vst [vmem:[#allocation22_spill] sm:$0xff] %v8621_v7 }
 0x3b3   : > { %v6312_v58 = vpop.f32.mrf.mxu0  ;;  %v3000_v34 = vadd.f32 %v8286_v14, %v2929_v59  ;;  %10444 = vst [vmem:[#allocation65_spill] sm:$0xff] %v8632_v12  ;;  %v10445_v59 = vld [vmem:[#allocation54_spill] sm:$0xff]  ;;  %v3066_v17 = vmax.f32 %v3002_v28, 0.0  ;;  %v3407_v48 = vor.u32 %v3406_v22, %v10447_v2  ;;  %v10451_v22 = vld [vmem:[#allocation63_spill] sm:$0xff] }
 0x3b4   : > { %10441 = vst [vmem:[#allocation61_spill] sm:$0xff] %v8614_v19  ;;  %v2930_v56 = vmul.f32 %v8278_v55, %v2791_v38  ;;  %v2812_v6 = vadd.f32 %v6312_v58, %v10443_v49  ;;  %4217 = vmatmul.mubr.bf16.gmra.mxu1 %v8594_v9  ;;  %v3003_v32 = vadd.f32 %v8286_v14, %v2932_v21  ;;  %v3194_v21 = vshll.u32 %v8473_v25, 16 }
 0x3b5   : > { %4224 = vmatprep.mubr.bf16.mxu1 %v8430_v40  ;;  %4498 = vmatmul.mubr.bf16.gmra.mxu0 %v8621_v7  ;;  %v2803_v43 = vpop.f32.mrf.mxu0  ;;  %v3064_v58 = vmax.f32 %v3000_v34, 0.0  ;;  %v10080_v7 = vshrl.u32 %v8504_v15, 16 }
 0x3b6   : > { %v3001_v4 = vadd.f32 %v8286_v14, %v2930_v56  ;;  %v2935_v29 = vmul.f32 %v8278_v55, %v2812_v6  ;;  %v2804_v37 = vadd.f32 %v2803_v43, %v10445_v59  ;;  %4505 = vmatprep.mubr.bf16.mxu0 %v8632_v12  ;;  %v3067_v35 = vmax.f32 %v3003_v32, 0.0 }
 0x3b7   : > { %v6313_v38 = vpop.f32.mrf.mxu0  ;;  %v3196_v43 = vor.u32 %v3194_v21, %v3193_v3  ;;  %v10074_v59 = vshrl.u32 %v8463_v20, 16  ;;  %v8658_v3 = vsel %vm7104_vm5, %v3407_v48, 0 }
 0x3b8   : > { %v3065_v49 = vmax.f32 %v3001_v4, 0.0  ;;  %v2815_v9 = vadd.f32 %v6313_v38, %v10446_v23  ;;  %v8644_v45 = vpack.c.bf16 %v3067_v35, %v3066_v17  ;;  %v2933_v56 = vmul.f32 %v8278_v55, %v2804_v37  ;;  %v10450_v4 = vld [vmem:[#allocation52_spill] sm:$0xff]  ;;  %10452 = vst [vmem:[#allocation25_spill] sm:$0xff] %v8658_v3 }
 0x3b9   : > { %v2806_v6 = vpop.f32.mrf.mxu0  ;;  %v3006_v32 = vadd.f32 %v8286_v14, %v2935_v29  ;;  %v3408_v23 = vrot.slane %v3187_v42, 1  ;;  %v8666_v42 = vsel %vm7067_vm2, 0, %v3196_v43  ;;  %v3200_v35 = vrot.slane %v10074_v59, 7 }
 0x3ba   : > { %10448 = vst [vmem:[#allocation16_spill] sm:$0xff] %v8644_v45  ;;  %v8648_v28 = vpack.c.bf16 %v3065_v49, %v3064_v58  ;;  %v2936_v34 = vmul.f32 %v8278_v55, %v2815_v9  ;;  %v2807_v1 = vadd.f32 %v2806_v6, %v10450_v4  ;;  %v3004_v37 = vadd.f32 %v8286_v14, %v2933_v56  ;;  %v10454_v6 = vld [vmem:[#allocation58_spill] sm:$0xff] }
 0x3bb   : > { %v6316_v38 = vpop.f32.mrf.mxu0  ;;  %10453 = vst [vmem:[#allocation18_spill] sm:$0xff] %v8666_v42  ;;  %v3070_v58 = vmax.f32 %v3006_v32, 0.0 }
 0x3bc   : > { %10449 = vst [vmem:[#allocation20_spill] sm:$0xff] %v8648_v28  ;;  %v3007_v2 = vadd.f32 %v8286_v14, %v2936_v34  ;;  %v2828_v17 = vadd.f32 %v6316_v38, %v10451_v22  ;;  %4225 = vmatmul.mubr.bf16.gmra.mxu1 %v8632_v12  ;;  %v2934_v29 = vmul.f32 %v8278_v55, %v2807_v1  ;;  %v6606_v1 = vld [vmem:[#allocation7 + $0x150] sm:$0xff]   ;;  %v10455_v22 = vshrl.u32 %v8430_v40, 16 }
 0x3bd   : > { %4232 = vmatprep.mubr.bf16.mxu1 %v8473_v25  ;;  %4506 = vmatmul.mubr.bf16.gmra.mxu0 %v8658_v3  ;;  %v2819_v9 = vpop.f32.mrf.mxu0  ;;  %v6607_v34 = vld [vmem:[#allocation7 + $0x190] sm:$0xff]   ;;  %v3201_v12 = vshll.u32 %v8463_v20, 16 }
 0x3be   : > { %v3071_v49 = vmax.f32 %v3007_v2, 0.0  ;;  %v2939_v48 = vmul.f32 %v8278_v55, %v2828_v17  ;;  %v2820_v56 = vadd.f32 %v2819_v9, %v10454_v6  ;;  %4513 = vmatprep.mubr.bf16.mxu0 %v8666_v42  ;;  %v3005_v4 = vadd.f32 %v8286_v14, %v2934_v29  ;;  %v10457_v2 = vld [vmem:[#allocation62_spill] sm:$0xff]  ;;  %4717 = vmatpush2.bf16.msra.mxu1 %v6606_v1 }
 0x3bf   : > { %v6317_v38 = vpop.f32.mrf.mxu0  ;;  %v3409_v43 = vor.u32 %v3408_v23, %v10455_v22  ;;  %v3068_v9 = vmax.f32 %v3004_v37, 0.0  ;;  %v3203_v3 = vor.u32 %v3201_v12, %v3200_v35  ;;  %4990 = vmatpush1.bf16.msra.mxu0 %v6607_v34  ;;  %4718 = vmatprep.subr.bf16.mxu1 %v10254_v61  ;;  %v3410_v35 = vrot.slane %v3194_v21, 1 }
 0x3c0   : > { %v8677_v5 = vpack.c.bf16 %v3071_v49, %v3070_v58  ;;  %v2937_v32 = vmul.f32 %v8278_v55, %v2820_v56  ;;  %v2831_v17 = vadd.f32 %v6317_v38, %v10457_v2  ;;  %v3069_v6 = vmax.f32 %v3005_v4, 0.0  ;;  %v10458_v58 = vld [vmem:[#allocation60_spill] sm:$0xff]  ;;  %4991 = vmatprep.subr.bf16.mxu0 %v10254_v61  ;;  %v10461_v38 = vld [vmem:[#allocation66_spill] sm:$0xff] }
 0x3c1   : > { %v2822_v59 = vpop.f32.mrf.mxu0  ;;  %v3010_v23 = vadd.f32 %v8286_v14, %v2939_v48  ;;  %v8691_v37 = vsel %vm7104_vm5, %v3409_v43, 0  ;;  %v8702_v43 = vsel %vm7067_vm2, 0, %v3203_v3  ;;  %v3207_v21 = vrot.slane %v10080_v7, 7 }
 0x3c2   : > { %10456 = vst [vmem:[#allocation23_spill] sm:$0xff] %v8677_v5  ;;  %v2940_v29 = vmul.f32 %v8278_v55, %v2831_v17  ;;  %v2823_v49 = vadd.f32 %v2822_v59, %v10458_v58  ;;  %v8687_v56 = vpack.c.bf16 %v3069_v6, %v3068_v9  ;;  %10460 = vst [vmem:[#allocation26_spill] sm:$0xff] %v8691_v37  ;;  %v10463_v9 = vld [vmem:[#allocation68_spill] sm:$0xff]  ;;  %v3208_v3 = vshll.u32 %v8504_v15, 16 }
 0x3c3   : > { %v6320_v1 = vpop.f32.mrf.mxu0  ;;  %v3008_v34 = vadd.f32 %v8286_v14, %v2937_v32  ;;  %10462 = vst [vmem:[#allocation32_spill] sm:$0xff] %v8702_v43  ;;  %v3074_v32 = vmax.f32 %v3010_v23, 0.0 }
 0x3c4   : > { %10459 = vst [vmem:[#allocation28_spill] sm:$0xff] %v8687_v56  ;;  %v3011_v4 = vadd.f32 %v8286_v14, %v2940_v29  ;;  %v2938_v48 = vmul.f32 %v8278_v55, %v2823_v49  ;;  %v2844_v22 = vadd.f32 %v6320_v1, %v10461_v38  ;;  %4233 = vmatmul.mubr.bf16.gmra.mxu1 %v8666_v42  ;;  %v10464_v49 = vshrl.u32 %v8473_v25, 16  ;;  %v10473_v25 = vld [vmem:[#allocation72_spill] sm:$0xff] }
 0x3c5   : > { %4240 = vmatprep.mubr.bf16.mxu1 %v8463_v20  ;;  %4514 = vmatmul.mubr.bf16.gmra.mxu0 %v8691_v37  ;;  %v2835_v59 = vpop.f32.mrf.mxu0  ;;  %v3072_v38 = vmax.f32 %v3008_v34, 0.0 }
 0x3c6   : > { %v3075_v2 = vmax.f32 %v3011_v4, 0.0  ;;  %v3009_v17 = vadd.f32 %v8286_v14, %v2938_v48  ;;  %v2836_v6 = vadd.f32 %v2835_v59, %v10463_v9  ;;  %4521 = vmatprep.mubr.bf16.mxu0 %v8702_v43  ;;  %v2943_v29 = vmul.f32 %v8278_v55, %v2844_v22  ;;  %v10466_v4 = vld [vmem:[#allocation71_spill] sm:$0xff]  ;;  %v10468_v22 = vld [vmem:[#allocation64_spill] sm:$0xff] }
 0x3c7   : > { %v6321_v58 = vpop.f32.mrf.mxu0  ;;  %v3411_v1 = vor.u32 %v3410_v35, %v10464_v49  ;;  %v3210_v59 = vor.u32 %v3208_v3, %v3207_v21  ;;  %v10092_v9 = vshrl.u32 %v8499_v63, 16  ;;  %v10470_v21 = vld [vmem:[#allocation70_spill] sm:$0xff] }
 0x3c8   : > { %v8713_v42 = vpack.c.bf16 %v3075_v2, %v3074_v32  ;;  %v3073_v7 = vmax.f32 %v3009_v17, 0.0  ;;  %v2941_v23 = vmul.f32 %v8278_v55, %v2836_v6  ;;  %v2847_v48 = vadd.f32 %v6321_v58, %v10466_v4  ;;  %v6608_v4 = vld [vmem:[#allocation7 + $0x148] sm:$0xff]  }
 0x3c9   : > { %v2838_v40 = vpop.f32.mrf.mxu0  ;;  %v3014_v35 = vadd.f32 %v8286_v14, %v2943_v29  ;;  %v8725_v32 = vsel %vm7104_vm5, %v3411_v1, 0  ;;  %v8736_v58 = vsel %vm7067_vm2, 0, %v3210_v59  ;;  %v3214_v1 = vrot.slane %v10092_v9, 7  ;;  %4719 = vmatpush2.bf16.msra.mxu1 %v6608_v4 }
 0x3ca   : > { %10465 = vst [vmem:[#allocation27_spill] sm:$0xff] %v8713_v42  ;;  %v8718_v37 = vpack.c.bf16 %v3073_v7, %v3072_v38  ;;  %v2839_v46 = vadd.f32 %v2838_v40, %v10468_v22  ;;  %v2944_v49 = vmul.f32 %v8278_v55, %v2847_v48  ;;  %10469 = vst [vmem:[#allocation30_spill] sm:$0xff] %v8725_v32  ;;  %v3412_v7 = vrot.slane %v3201_v12, 1  ;;  %v6609_v48 = vld [vmem:[#allocation7 + $0x188] sm:$0xff]  }
 0x3cb   : > { %v6324_v34 = vpop.f32.mrf.mxu0  ;;  %v3012_v2 = vadd.f32 %v8286_v14, %v2941_v23  ;;  %10471 = vst [vmem:[#allocation29_spill] sm:$0xff] %v8736_v58  ;;  %v10472_v23 = vld [vmem:[#allocation67_spill] sm:$0xff]  ;;  %v3078_v22 = vmax.f32 %v3014_v35, 0.0  ;;  %v10474_v9 = vshrl.u32 %v8463_v20, 16  ;;  %4992 = vmatpush1.bf16.msra.mxu0 %v6609_v48  ;;  %4720 = vmatprep.subr.bf16.mxu1 %v10254_v61  ;;  %v3414_v48 = vrot.slane %v3208_v3, 1 }
 0x3cc   : > { %10467 = vst [vmem:[#allocation24_spill] sm:$0xff] %v8718_v37  ;;  %v2942_v17 = vmul.f32 %v8278_v55, %v2839_v46  ;;  %v2860_v6 = vadd.f32 %v6324_v34, %v10470_v21  ;;  %4241 = vmatmul.mubr.bf16.gmra.mxu1 %v8702_v43  ;;  %v3015_v40 = vadd.f32 %v8286_v14, %v2944_v49  ;;  %v10093_v21 = vshll.u32 %v8499_v63, 16 }
 0x3cd   : > { %4248 = vmatprep.mubr.bf16.mxu1 %v8504_v15  ;;  %4522 = vmatmul.mubr.bf16.gmra.mxu0 %v8725_v32  ;;  %v2851_v29 = vpop.f32.mrf.mxu0  ;;  %v3076_v59 = vmax.f32 %v3012_v2, 0.0  ;;  %v10095_v2 = vshrl.u32 %v8539_v11, 16 }
 0x3ce   : > { %v3013_v46 = vadd.f32 %v8286_v14, %v2942_v17  ;;  %v2947_v38 = vmul.f32 %v8278_v55, %v2860_v6  ;;  %v2852_v12 = vadd.f32 %v2851_v29, %v10472_v23  ;;  %4529 = vmatprep.mubr.bf16.mxu0 %v8736_v58  ;;  %v3079_v49 = vmax.f32 %v3015_v40, 0.0  ;;  %v6628_v17 = vld [vmem:[%s9951_s2] ss:$0 sm:$0xff]  ;;  %4993 = vmatprep.subr.bf16.mxu0 %v10254_v61  ;;  %v10477_v23 = vld [vmem:[#allocation69_spill] sm:$0xff] }
 0x3cf   : > { %v6325_v34 = vpop.f32.mrf.mxu0  ;;  %v3413_v14 = vor.u32 %v3412_v7, %v10474_v9  ;;  %v3217_v40 = vor.u32 %v10093_v21, %v3214_v1  ;;  %v6629_v9 = vld [vmem:[%s9952_s3] ss:$0 sm:$0xff] }
 0x3d0   : > { %v3077_v43 = vmax.f32 %v3013_v46, 0.0  ;;  %v2863_v32 = vadd.f32 %v6325_v34, %v10473_v25  ;;  %v8748_v55 = vpack.c.bf16 %v3079_v49, %v3078_v22  ;;  %v2945_v35 = vmul.f32 %v6628_v17, %v2852_v12  ;;  %v6610_v46 = vld [vmem:[#allocation7 + $0x180] sm:$0xff]   ;;  %v10478_v22 = vld [vmem:[#allocation74_spill] sm:$0xff] }
 0x3d1   : > { %v2854_v6 = vpop.f32.mrf.mxu0  ;;  %v3018_v7 = vadd.f32 %v6629_v9, %v2947_v38  ;;  %4994 = vmatpush1.bf16.msra.mxu0 %v6610_v46  ;;  %v8774_v3 = vsel %vm7067_vm2, 0, %v3217_v40  ;;  %v3221_v38 = vrot.slane %v10095_v2, 7  ;;  %v3222_v40 = vshll.u32 %v8539_v11, 16 }
 0x3d2   : > { %10475 = vst [vmem:[#allocation33_spill] sm:$0xff] %v8748_v55  ;;  %v8758_v25 = vpack.c.bf16 %v3077_v43, %v3076_v59  ;;  %v2948_v29 = vmul.f32 %v6628_v17, %v2863_v32  ;;  %v2855_v12 = vadd.f32 %v2854_v6, %v10477_v23  ;;  %v8768_v43 = vsel %vm7104_vm5, %v3413_v14, 0  ;;  %v10480_v14 = vld [vmem:[#allocation73_spill] sm:$0xff]  ;;  %4995 = vmatprep.subr.bf16.mxu0 %v10254_v61 }
 0x3d3   : > { %v6328_v4 = vpop.f32.mrf.mxu0  ;;  %10479 = vst [vmem:[#allocation36_spill] sm:$0xff] %v8768_v43  ;;  %v3016_v34 = vadd.f32 %v6629_v9, %v2945_v35  ;;  %v3082_v6 = vmax.f32 %v3018_v7, 0.0  ;;  %v6611_v35 = vld [vmem:[#allocation7 + $0x1f8] sm:$0xff]   ;;  %v3224_v20 = vor.u32 %v3222_v40, %v3221_v38  ;;  %v10485_v38 = vshll.u32 %v8499_v63, 16 }
 0x3d4   : > { %10476 = vst [vmem:[#allocation31_spill] sm:$0xff] %v8758_v25  ;;  %v3019_v1 = vadd.f32 %v6629_v9, %v2948_v29  ;;  %v2876_v49 = vadd.f32 %v6328_v4, %v10478_v22  ;;  %4249 = vmatmul.mubr.bf16.gmra.mxu1 %v8736_v58  ;;  %v2946_v59 = vmul.f32 %v6628_v17, %v2855_v12  ;;  %v10481_v22 = vshrl.u32 %v8504_v15, 16  ;;  %v10483_v7 = vld [vmem:[#allocation75_spill] sm:$0xff]  ;;  %v10484_v15 = vld [vmem:[#allocation21_spill] sm:$0xff] }
 0x3d5   : > { %4256 = vmatprep.mubr.bf16.mxu1 %v8499_v63  ;;  %4530 = vmatmul.mubr.bf16.gmra.mxu0 %v8768_v43  ;;  %v2867_v32 = vpop.f32.mrf.mxu0  ;;  %v3511_v43 = vshrl.u32 %v8536_v52, 16 }
 0x3d6   : > { %v3083_v29 = vmax.f32 %v3019_v1, 0.0  ;;  %v2951_v23 = vmul.f32 %v6628_v17, %v2876_v49  ;;  %v2868_v4 = vadd.f32 %v2867_v32, %v10480_v14  ;;  %4537 = vmatprep.mubr.bf16.mxu0 %v8774_v3  ;;  %v3017_v46 = vadd.f32 %v6629_v9, %v2946_v59  ;;  %4996 = vmatpush2.bf16.msra.mxu0 %v6611_v35 }
 0x3d7   : > { %v6329_v12 = vpop.f32.mrf.mxu0  ;;  %v3415_v21 = vor.u32 %v3414_v48, %v10481_v22  ;;  %v3080_v49 = vmax.f32 %v3016_v34, 0.0  ;;  %4997 = vmatprep.subr.bf16.mxu0 %v10254_v61  ;;  %v6612_v22 = vld [vmem:[#allocation7 + $0x1f0] sm:$0xff]   ;;  %v3416_v35 = vrot.slane %v10485_v38, 1  ;;  %v6616_v38 = vld [vmem:[#allocation7 + $0x1d8] sm:$0xff]  }
 0x3d8   : > { %v8784_v58 = vpack.c.bf16 %v3083_v29, %v3082_v6  ;;  %v2949_v2 = vmul.f32 %v6628_v17, %v2868_v4  ;;  %v2879_v1 = vadd.f32 %v6329_v12, %v10483_v7  ;;  %v3081_v32 = vmax.f32 %v3017_v46, 0.0 }
 0x3d9   : > { %v2870_v14 = vpop.f32.mrf.mxu0  ;;  %v3022_v59 = vadd.f32 %v6629_v9, %v2951_v23  ;;  %v8794_v6 = vsel %vm7104_vm5, %v3415_v21, 0  ;;  %v3513_v23 = vrot.slane %v3511_v43, 7  ;;  %v3514_v12 = vshll.u32 %v8536_v52, 16 }
 0x3da   : > { %10482 = vst [vmem:[#allocation34_spill] sm:$0xff] %v8784_v58  ;;  %v2952_v18 = vmul.f32 %v6628_v17, %v2879_v1  ;;  %v2871_v48 = vadd.f32 %v2870_v14, %v10484_v15  ;;  %v8790_v27 = vpack.c.bf16 %v3081_v32, %v3080_v49  ;;  %v3020_v29 = vadd.f32 %v6629_v9, %v2949_v2 }
 0x3db   : > { %4998 = vmatpush2.bf16.msra.mxu0 %v6612_v22  ;;  %v8803_v15 = vsel %vm7067_vm2, 0, %v3224_v20  ;;  %v3086_v21 = vmax.f32 %v3022_v59, 0.0  ;;  %v10486_v32 = vshrl.u32 %v8499_v63, 16  ;;  %v3516_v14 = vor.u32 %v3514_v12, %v3513_v23 }
 0x3dc   : > { %v3023_v34 = vadd.f32 %v6629_v9, %v2952_v18  ;;  %v2950_v4 = vmul.f32 %v6628_v17, %v2871_v48  ;;  %4257 = vmatmul.mubr.bf16.gmra.mxu1 %v8774_v3  ;;  %v6613_v18 = vld [vmem:[#allocation7 + $0x140] sm:$0xff]   ;;  %4999 = vmatprep.subr.bf16.mxu0 %v10254_v61  ;;  %v6614_v17 = vld [vmem:[#allocation7 + $0x1e8] sm:$0xff]   ;;  %v3084_v7 = vmax.f32 %v3020_v29, 0.0  ;;  %v3418_v29 = vrot.slane %v3222_v40, 1 }
 0x3dd   : > { %4264 = vmatprep.mubr.bf16.mxu1 %v8539_v11  ;;  %4538 = vmatmul.mubr.bf16.gmra.mxu0 %v8794_v6  ;;  %v3417_v20 = vor.u32 %v3416_v35, %v10486_v32  ;;  %v6615_v48 = vld [vmem:[#allocation7 + $0x1e0] sm:$0xff]   ;;  %v3229_v35 = vshll.u32 %v8598_v57, 16  ;;  %v10488_v40 = vshrl.u32 %v8539_v11, 16 }
 0x3de   : > { %v3087_v46 = vmax.f32 %v3023_v34, 0.0  ;;  %v3021_v2 = vadd.f32 %v6629_v9, %v2950_v4  ;;  %4545 = vmatprep.mubr.bf16.mxu0 %v8803_v15  ;;  %4721 = vmatpush2.bf16.msra.mxu1 %v6613_v18  ;;  %v3226_v9 = vshrl.u32 %v8598_v57, 16  ;;  %v8824_v34 = vsel %vm7067_vm2, 0, %v3516_v14  ;;  %v10490_v14 = vld [vmem:[#allocation13_spill] sm:$0xff] }
 0x3df   : > { %5000 = vmatpush2.bf16.msra.mxu0 %v6614_v17  ;;  %v8819_v22 = vsel %vm7104_vm5, %v3417_v20, 0  ;;  %v3528_v17 = vrot.slane %v3514_v12, 1 }
 0x3e0   : > { %v8808_v1 = vpack.c.bf16 %v3087_v46, %v3086_v21  ;;  %v3085_v49 = vmax.f32 %v3021_v2, 0.0  ;;  %5001 = vmatprep.subr.bf16.mxu0 %v10254_v61  ;;  %v3228_v4 = vrot.slane %v3226_v9, 7  ;;  %v3419_v21 = vor.u32 %v3418_v29, %v10488_v40  ;;  %v8849_v29 = vld [vmem:[#allocation7 + $0x238] sm:$0xff]  }
 0x3e1   : > { %v3233_v46 = vshrl.u32 %v8571_v31, 16  ;;  %v8838_v32 = vor.u32 %v3528_v17, %v3511_v43  ;;  %6330 = vmatprep.subr.bf16.mxu1 %v8849_v29  ;;  %v6620_v17 = vld [vmem:[#allocation7 + $0x1c0] sm:$0xff]  }
 0x3e2   : > { %v8814_v59 = vpack.c.bf16 %v3085_v49, %v3084_v7  ;;  %v10105_v23 = vshll.u32 %v8808_v1, 16  ;;  %v3231_v2 = vor.u32 %v3229_v35, %v3228_v4  ;;  %v10106_v18 = vshrl.u32 %v8808_v1, 16  ;;  %v6617_v49 = vld [vmem:[#allocation7 + $0x1d0] sm:$0xff]   ;;  %v6619_v4 = vld [vmem:[#allocation7 + $0x1c8] sm:$0xff]  }
 0x3e3   : > { %5002 = vmatpush2.bf16.msra.mxu0 %v6615_v48  ;;  %v8847_v48 = vsel %vm7104_vm5, %v3419_v21, 0  ;;  %v3235_v12 = vrot.slane %v3233_v46, 7  ;;  %v3240_v21 = vshrl.u32 %v8614_v19, 16 }
 0x3e4   : > { %10487 = vst [vmem:[#allocation39_spill] sm:$0xff] %v8814_v59  ;;  %4265 = vmatmul.mubr.bf16.gmra.mxu1 %v8803_v15  ;;  %5003 = vmatprep.subr.bf16.mxu0 %v10254_v61  ;;  %v3530_v7 = vrot.slane %v10105_v23, 1  ;;  %v3375_v43 = vsel %vm7067_vm2, 0, %v3231_v2 }
 0x3e5   : > { %4546 = vmatmul.mubr.bf16.gmra.mxu0 %v8819_v22  ;;  %4272 = vmatprep.mubr.bf16.mxu1 %v10254_v61 }
 0x3e6   : > { %4553 = vmatprep.mubr.bf16.mxu0 %v8824_v34  ;;  %v8842_v20 = vor.u32 %v3530_v7, %v10106_v18  ;;  %v3420_v7 = vrot.slane %v3229_v35, 1  ;;  %v3247_v18 = vshrl.u32 %v8607_v44, 16 }
 0x3e7   : > { %5004 = vmatpush2.bf16.msra.mxu0 %v6616_v38  ;;  %v3236_v38 = vshll.u32 %v8571_v31, 16 }
 0x3e8   : > { %5005 = vmatprep.subr.bf16.mxu0 %v10254_v61  ;;  %10489 = vst [vmem:[#allocation37_spill] sm:$0xff] %v8842_v20 }
 0x3e9   : > { %v3238_v40 = vor.u32 %v3236_v38, %v3235_v12  ;;  %v3243_v12 = vshll.u32 %v8614_v19, 16 }
 0x3eb   : > { %5006 = vmatpush2.bf16.msra.mxu0 %v6617_v49  ;;  %v8864_v2 = vsel %vm7067_vm2, 0, %v3238_v40  ;;  %v3242_v49 = vrot.slane %v3240_v21, 7 }
 0x3ec   : > { %4273 = vmatmul.mubr.bf16.gmra.mxu1 %v10490_v14  ;;  %5007 = vmatprep.subr.bf16.mxu0 %v10254_v61  ;;  %10491 = vst [vmem:[#allocation42_spill] sm:$0xff] %v8864_v2 }
 0x3ed   : > { %4280 = vmatprep.mubr.bf16.mxu1 %v8598_v57  ;;  %4554 = vmatmul.mubr.bf16.gmra.mxu0 %v8847_v48  ;;  %v3245_v23 = vor.u32 %v3243_v12, %v3242_v49 }
 0x3ee   : > { %4561 = vmatprep.mubr.bf16.mxu0 %v3375_v43 }
 0x3ef   : > { %5008 = vmatpush2.bf16.msra.mxu0 %v6619_v4  ;;  %v3421_v4 = vor.u32 %v3420_v7, %v3226_v9  ;;  %v8878_v40 = vsel %vm7067_vm2, 0, %v3245_v23  ;;  %v3250_v9 = vshll.u32 %v8607_v44, 16 }
 0x3f0   : > { %5009 = vmatprep.subr.bf16.mxu0 %v10254_v61  ;;  %10492 = vst [vmem:[#allocation40_spill] sm:$0xff] %v8878_v40 }
 0x3f1   : > { %v8872_v35 = vsel %vm7104_vm5, %v3421_v4, 0  ;;  %v3424_v4 = vrot.slane %v3243_v12, 1 }
 0x3f3   : > { %5010 = vmatpush2.bf16.msra.mxu0 %v6620_v17  ;;  %v3249_v17 = vrot.slane %v3247_v18, 7 }
 0x3f4   : > { %4281 = vmatmul.mubr.bf16.gmra.mxu1 %v3375_v43  ;;  %v3422_v43 = vrot.slane %v3236_v38, 1 }
 0x3f5   : > { %4288 = vmatprep.mubr.bf16.mxu1 %v8571_v31  ;;  %4562 = vmatmul.mubr.bf16.gmra.mxu0 %v10349_v26  ;;  %v3252_v49 = vor.u32 %v3250_v9, %v3249_v17  ;;  %v3254_v26 = vshrl.u32 %v8648_v28, 16 }
 0x3f6   : > { %4569 = vmatprep.mubr.bf16.mxu0 %v8864_v2  ;;  %v3423_v7 = vor.u32 %v3422_v43, %v3233_v46  ;;  %v3257_v46 = vshll.u32 %v8648_v28, 16  ;;  %v3425_v43 = vor.u32 %v3424_v4, %v3240_v21 }
 0x3f7   : > { %v8892_v23 = vsel %vm7067_vm2, 0, %v3252_v49  ;;  %v3256_v20 = vrot.slane %v3254_v26, 7 }
 0x3f8   : > { %v8886_v38 = vsel %vm7104_vm5, %v3423_v7, 0  ;;  %10493 = vst [vmem:[#allocation45_spill] sm:$0xff] %v8892_v23  ;;  %v8900_v12 = vsel %vm7104_vm5, %v3425_v43, 0  ;;  %v3426_v7 = vrot.slane %v3250_v9, 1  ;;  %v3428_v43 = vrot.slane %v3257_v46, 1 }
 0x3f9   : > { %v3259_v17 = vor.u32 %v3257_v46, %v3256_v20  ;;  %10494 = vst [vmem:[#allocation50_spill] sm:$0xff] %v8900_v12  ;;  %v3264_v20 = vshll.u32 %v8644_v45, 16 }
 0x3fa   : > { %v3427_v21 = vor.u32 %v3426_v7, %v3247_v18  ;;  %v3429_v18 = vor.u32 %v3428_v43, %v3254_v26  ;;  %v3278_v26 = vshll.u32 %v8677_v5, 16 }
 0x3fb   : > { %v8906_v49 = vsel %vm7067_vm2, 0, %v3259_v17 }
 0x3fc   : > { %4289 = vmatmul.mubr.bf16.gmra.mxu1 %v8864_v2  ;;  %10495 = vst [vmem:[#allocation43_spill] sm:$0xff] %v8906_v49  ;;  %v8914_v9 = vsel %vm7104_vm5, %v3427_v21, 0  ;;  %v8928_v46 = vsel %vm7104_vm5, %v3429_v18, 0  ;;  %v3430_v21 = vrot.slane %v3264_v20, 1 }
 0x3fd   : > { %4296 = vmatprep.mubr.bf16.mxu1 %v8614_v19  ;;  %4570 = vmatmul.mubr.bf16.gmra.mxu0 %v8872_v35  ;;  %10496 = vst [vmem:[#allocation48_spill] sm:$0xff] %v8914_v9  ;;  %10498 = vst [vmem:[#allocation49_spill] sm:$0xff] %v8928_v46  ;;  %v10152_v19 = vshrl.u32 %v8790_v27, 16 }
 0x3fe   : > { %4577 = vmatprep.mubr.bf16.mxu0 %v8878_v40 }
 0x404   : > { %4297 = vmatmul.mubr.bf16.gmra.mxu1 %v8878_v40  ;;  %v3261_v40 = vshrl.u32 %v8644_v45, 16 }
 0x405   : > { %4304 = vmatprep.mubr.bf16.mxu1 %v8607_v44  ;;  %4578 = vmatmul.mubr.bf16.gmra.mxu0 %v8886_v38 }
 0x406   : > { %4585 = vmatprep.mubr.bf16.mxu0 %v8892_v23  ;;  %v3263_v44 = vrot.slane %v3261_v40, 7 }
 0x408   : > { %v3266_v4 = vor.u32 %v3264_v20, %v3263_v44  ;;  %v3271_v44 = vshll.u32 %v8687_v56, 16 }
 0x40a   : > { %v8920_v17 = vsel %vm7067_vm2, 0, %v3266_v4  ;;  %v3432_v18 = vrot.slane %v3271_v44, 1 }
 0x40b   : > { %10497 = vst [vmem:[#allocation46_spill] sm:$0xff] %v8920_v17 }
 0x40c   : > { %4305 = vmatmul.mubr.bf16.gmra.mxu1 %v8892_v23  ;;  %v3268_v23 = vshrl.u32 %v8687_v56, 16 }
 0x40d   : > { %4312 = vmatprep.mubr.bf16.mxu1 %v8648_v28  ;;  %4586 = vmatmul.mubr.bf16.gmra.mxu0 %v8900_v12 }
 0x40e   : > { %4593 = vmatprep.mubr.bf16.mxu0 %v8906_v49  ;;  %v3270_v28 = vrot.slane %v3268_v23, 7 }
 0x410   : > { %v3273_v7 = vor.u32 %v3271_v44, %v3270_v28  ;;  %v3431_v28 = vor.u32 %v3430_v21, %v3261_v40  ;;  %v3433_v40 = vor.u32 %v3432_v18, %v3268_v23 }
 0x412   : > { %v8934_v4 = vsel %vm7067_vm2, 0, %v3273_v7  ;;  %v8942_v20 = vsel %vm7104_vm5, %v3431_v28, 0  ;;  %v8956_v44 = vsel %vm7104_vm5, %v3433_v40, 0  ;;  %v3434_v28 = vrot.slane %v3278_v26, 1 }
 0x413   : > { %10499 = vst [vmem:[#allocation51_spill] sm:$0xff] %v8934_v4  ;;  %10500 = vst [vmem:[#allocation55_spill] sm:$0xff] %v8942_v20 }
 0x414   : > { %4313 = vmatmul.mubr.bf16.gmra.mxu1 %v8906_v49  ;;  %v3275_v49 = vshrl.u32 %v8677_v5, 16  ;;  %10502 = vst [vmem:[#allocation56_spill] sm:$0xff] %v8956_v44 }
 0x415   : > { %4320 = vmatprep.mubr.bf16.mxu1 %v8644_v45  ;;  %4594 = vmatmul.mubr.bf16.gmra.mxu0 %v8914_v9 }
 0x416   : > { %4601 = vmatprep.mubr.bf16.mxu0 %v8920_v17  ;;  %v3277_v45 = vrot.slane %v3275_v49, 7  ;;  %v3435_v23 = vor.u32 %v3434_v28, %v3275_v49 }
 0x418   : > { %v3280_v43 = vor.u32 %v3278_v26, %v3277_v45  ;;  %v3285_v45 = vshll.u32 %v8718_v37, 16  ;;  %v8970_v26 = vsel %vm7104_vm5, %v3435_v23, 0 }
 0x419   : > { %10504 = vst [vmem:[#allocation59_spill] sm:$0xff] %v8970_v26 }
 0x41a   : > { %v8948_v7 = vsel %vm7067_vm2, 0, %v3280_v43 }
 0x41b   : > { %10501 = vst [vmem:[#allocation12_spill] sm:$0xff] %v8948_v7 }
 0x41c   : > { %4321 = vmatmul.mubr.bf16.gmra.mxu1 %v8920_v17  ;;  %v3282_v17 = vshrl.u32 %v8718_v37, 16 }
 0x41d   : > { %4328 = vmatprep.mubr.bf16.mxu1 %v8687_v56  ;;  %4602 = vmatmul.mubr.bf16.gmra.mxu0 %v8928_v46 }
 0x41e   : > { %4609 = vmatprep.mubr.bf16.mxu0 %v8934_v4  ;;  %v3284_v56 = vrot.slane %v3282_v17, 7 }
 0x420   : > { %v3287_v21 = vor.u32 %v3285_v45, %v3284_v56  ;;  %v3292_v56 = vshll.u32 %v8713_v42, 16 }
 0x422   : > { %v8962_v43 = vsel %vm7067_vm2, 0, %v3287_v21 }
 0x423   : > { %10503 = vst [vmem:[#allocation54_spill] sm:$0xff] %v8962_v43 }
 0x424   : > { %4329 = vmatmul.mubr.bf16.gmra.mxu1 %v8934_v4  ;;  %v3289_v4 = vshrl.u32 %v8713_v42, 16 }
 0x425   : > { %4336 = vmatprep.mubr.bf16.mxu1 %v8677_v5  ;;  %4610 = vmatmul.mubr.bf16.gmra.mxu0 %v8942_v20 }
 0x426   : > { %4617 = vmatprep.mubr.bf16.mxu0 %v8948_v7  ;;  %v3291_v5 = vrot.slane %v3289_v4, 7 }
 0x428   : > { %v3294_v18 = vor.u32 %v3292_v56, %v3291_v5 }
 0x42a   : > { %v8978_v49 = vsel %vm7067_vm2, 0, %v3294_v18 }
 0x42b   : > { %10506 = vst [vmem:[#allocation63_spill] sm:$0xff] %v8978_v49 }
 0x42c   : > { %4337 = vmatmul.mubr.bf16.gmra.mxu1 %v8948_v7  ;;  %v3296_v7 = vshrl.u32 %v8758_v25, 16 }
 0x42d   : > { %4344 = vmatprep.mubr.bf16.mxu1 %v8718_v37  ;;  %4618 = vmatmul.mubr.bf16.gmra.mxu0 %v8956_v44  ;;  %v3436_v37 = vrot.slane %v3285_v45, 1  ;;  %v3299_v44 = vshll.u32 %v8758_v25, 16 }
 0x42e   : > { %4625 = vmatprep.mubr.bf16.mxu0 %v8962_v43  ;;  %v3298_v5 = vrot.slane %v3296_v7, 7 }
 0x42f   : > { %v3437_v20 = vor.u32 %v3436_v37, %v3282_v17 }
 0x431   : > { %v8988_v18 = vsel %vm7104_vm5, %v3437_v20, 0  ;;  %v3306_v20 = vshll.u32 %v8748_v55, 16 }
 0x432   : > { %10508 = vst [vmem:[#allocation62_spill] sm:$0xff] %v8988_v18 }
 0x434   : > { %v4154_v40 = vpop.f32.mrf.mxu1  ;;  %4345 = vmatmul.mubr.bf16.gmra.mxu1 %v8962_v43 }
 0x435   : > { %4352 = vmatprep.mubr.bf16.mxu1 %v8713_v42  ;;  %v8973_v21 = vpop.f32.mrf.mxu0  ;;  %4626 = vmatmul.mubr.bf16.gmra.mxu0 %v8970_v26  ;;  %v3301_v42 = vor.u32 %v3299_v44, %v3298_v5 }
 0x436   : > { %10505 = vst [vmem:[#allocation52_spill] sm:$0xff] %v8973_v21  ;;  %v4156_v28 = vpop.f32.mrf.mxu1  ;;  %4633 = vmatprep.mubr.bf16.mxu0 %v8978_v49  ;;  %v3303_v21 = vshrl.u32 %v8748_v55, 16 }
 0x437   : > { %v4437_v43 = vpop.f32.mrf.mxu0  ;;  %v3438_v28 = vrot.slane %v3292_v56, 1  ;;  %v8994_v37 = vsel %vm7067_vm2, 0, %v3301_v42 }
 0x438   : > { %v4157_v23 = vpop.f32.mrf.mxu1  ;;  %10509 = vst [vmem:[#allocation60_spill] sm:$0xff] %v8994_v37  ;;  %v3305_v17 = vrot.slane %v3303_v21, 7 }
 0x439   : > { %v8982_v45 = vpop.f32.mrf.mxu0  ;;  %v3439_v56 = vor.u32 %v3438_v28, %v3289_v4 }
 0x43a   : > { %10507 = vst [vmem:[#allocation58_spill] sm:$0xff] %v8982_v45  ;;  %v4159_v46 = vpop.f32.mrf.mxu1 }
 0x43b   : > { %v4440_v26 = vpop.f32.mrf.mxu0 }
 0x43c   : > { %v4162_v9 = vpop.f32.mrf.mxu1  ;;  %4353 = vmatmul.mubr.bf16.gmra.mxu1 %v8978_v49 }
 0x43d   : > { %4360 = vmatprep.mubr.bf16.mxu1 %v8758_v25  ;;  %v4443_v43 = vpop.f32.mrf.mxu0  ;;  %4634 = vmatmul.mubr.bf16.gmra.mxu0 %v8988_v18  ;;  %v3308_v25 = vor.u32 %v3306_v20, %v3305_v17 }
 0x43e   : > { %v8996_v46 = vadd.f32 %v4443_v43, %v4154_v40  ;;  %v4164_v26 = vpop.f32.mrf.mxu1  ;;  %4641 = vmatprep.mubr.bf16.mxu0 %v8994_v37  ;;  %v9006_v40 = vsel %vm7104_vm5, %v3439_v56, 0  ;;  %v3440_v43 = vrot.slane %v3299_v44, 1  ;;  %v3313_v44 = vshll.u32 %v8790_v27, 16 }
 0x43f   : > { %v4445_v5 = vpop.f32.mrf.mxu0  ;;  %v9012_v4 = vsel %vm7067_vm2, 0, %v3308_v25 }
 0x440   : > { %10510 = vst [vmem:[#allocation66_spill] sm:$0xff] %v8996_v46  ;;  %v4165_v49 = vpop.f32.mrf.mxu1  ;;  %10512 = vst [vmem:[#allocation71_spill] sm:$0xff] %v9012_v4  ;;  %v3441_v5 = vor.u32 %v3440_v43, %v3296_v7 }
 0x441   : > { %v4446_v45 = vpop.f32.mrf.mxu0 }
 0x442   : > { %v9001_v18 = vadd.f32 %v4446_v45, %v4157_v23  ;;  %v4167_v2 = vpop.f32.mrf.mxu1 }
 0x443   : > { %v4448_v42 = vpop.f32.mrf.mxu0  ;;  %v3312_v2 = vrot.slane %v10152_v19, 7  ;;  %v3324_v19 = vshrl.u32 %v8814_v59, 16 }
 0x444   : > { %10511 = vst [vmem:[#allocation68_spill] sm:$0xff] %v9001_v18  ;;  %v4170_v12 = vpop.f32.mrf.mxu1  ;;  %4361 = vmatmul.mubr.bf16.gmra.mxu1 %v8994_v37 }
 0x445   : > { %4368 = vmatprep.mubr.bf16.mxu1 %v8748_v55  ;;  %v4451_v26 = vpop.f32.mrf.mxu0  ;;  %4642 = vmatmul.mubr.bf16.gmra.mxu0 %v9006_v40  ;;  %v3315_v42 = vor.u32 %v3313_v44, %v3312_v2  ;;  %v3317_v55 = vshrl.u32 %v8784_v58, 16 }
 0x446   : > { %v9016_v23 = vadd.f32 %v4451_v26, %v4162_v9  ;;  %v4172_v45 = vpop.f32.mrf.mxu1  ;;  %4649 = vmatprep.mubr.bf16.mxu0 %v9012_v4  ;;  %v9026_v9 = vsel %vm7104_vm5, %v3441_v5, 0  ;;  %v3442_v26 = vrot.slane %v3306_v20, 1 }
 0x447   : > { %v4453_v28 = vpop.f32.mrf.mxu0  ;;  %v9032_v7 = vsel %vm7067_vm2, 0, %v3315_v42 }
 0x448   : > { %10513 = vst [vmem:[#allocation64_spill] sm:$0xff] %v9016_v23  ;;  %v4173_v17 = vpop.f32.mrf.mxu1  ;;  %10515 = vst [vmem:[#allocation67_spill] sm:$0xff] %v9032_v7  ;;  %v3320_v28 = vshll.u32 %v8784_v58, 16  ;;  %v3443_v20 = vor.u32 %v3442_v26, %v3303_v21 }
 0x449   : > { %v4454_v56 = vpop.f32.mrf.mxu0 }
 0x44a   : > { %v9021_v37 = vadd.f32 %v4454_v56, %v4165_v49  ;;  %v4175_v25 = vpop.f32.mrf.mxu1  ;;  %v3319_v49 = vrot.slane %v3317_v55, 7 }
 0x44b   : > { %v4456_v18 = vpop.f32.mrf.mxu0 }
 0x44c   : > { %10514 = vst [vmem:[#allocation70_spill] sm:$0xff] %v9021_v37  ;;  %v4178_v46 = vpop.f32.mrf.mxu1  ;;  %4369 = vmatmul.mubr.bf16.gmra.mxu1 %v9012_v4  ;;  %v3322_v25 = vor.u32 %v3320_v28, %v3319_v49 }
 0x44d   : > { %4376 = vmatprep.mubr.bf16.mxu1 %v8790_v27  ;;  %v4459_v45 = vpop.f32.mrf.mxu0  ;;  %4650 = vmatmul.mubr.bf16.gmra.mxu0 %v9026_v9 }
 0x44e   : > { %v9034_v43 = vadd.f32 %v4459_v45, %v4170_v12  ;;  %v4180_v18 = vpop.f32.mrf.mxu1  ;;  %4657 = vmatprep.mubr.bf16.mxu0 %v9032_v7  ;;  %v9044_v12 = vsel %vm7104_vm5, %v3443_v20, 0  ;;  %v3444_v45 = vrot.slane %v3313_v44, 1  ;;  %v9050_v21 = vsel %vm7067_vm2, 0, %v3322_v25 }
 0x44f   : > { %v4461_v2 = vpop.f32.mrf.mxu0  ;;  %10518 = vst [vmem:[#allocation74_spill] sm:$0xff] %v9050_v21  ;;  %v10520_v44 = vshrl.u32 %v8790_v27, 16 }
 0x450   : > { %10516 = vst [vmem:[#allocation72_spill] sm:$0xff] %v9034_v43  ;;  %v4181_v5 = vpop.f32.mrf.mxu1  ;;  %v3327_v2 = vshll.u32 %v8814_v59, 16 }
 0x451   : > { %v4462_v56 = vpop.f32.mrf.mxu0 }
 0x452   : > { %v9039_v4 = vadd.f32 %v4462_v56, %v4173_v17  ;;  %v4183_v37 = vpop.f32.mrf.mxu1  ;;  %v3326_v17 = vrot.slane %v3324_v19, 7  ;;  %v3445_v56 = vor.u32 %v3444_v45, %v10520_v44 }
 0x453   : > { %v4464_v42 = vpop.f32.mrf.mxu0 }
 0x454   : > { %10517 = vst [vmem:[#allocation69_spill] sm:$0xff] %v9039_v4  ;;  %v4186_v23 = vpop.f32.mrf.mxu1  ;;  %4377 = vmatmul.mubr.bf16.gmra.mxu1 %v9032_v7 }
 0x455   : > { %4384 = vmatprep.mubr.bf16.mxu1 %v8784_v58  ;;  %v4467_v18 = vpop.f32.mrf.mxu0  ;;  %4658 = vmatmul.mubr.bf16.gmra.mxu0 %v9044_v12  ;;  %v3329_v58 = vor.u32 %v3327_v2, %v3326_v17 }
 0x456   : > { %v9052_v37 = vadd.f32 %v4467_v18, %v4178_v46  ;;  %v4188_v26 = vpop.f32.mrf.mxu1  ;;  %4665 = vmatprep.mubr.bf16.mxu0 %v9050_v21  ;;  %v9063_v46 = vsel %vm7104_vm5, %v3445_v56, 0  ;;  %v3446_v18 = vrot.slane %v3320_v28, 1 }
 0x457   : > { %v4469_v49 = vpop.f32.mrf.mxu0  ;;  %v9069_v45 = vsel %vm7067_vm2, 0, %v3329_v58 }
 0x458   : > { %10519 = vst [vmem:[#allocation73_spill] sm:$0xff] %v9052_v37  ;;  %v4189_v20 = vpop.f32.mrf.mxu1  ;;  %v3447_v28 = vor.u32 %v3446_v18, %v3317_v55 }
 0x459   : > { %v4470_v42 = vpop.f32.mrf.mxu0 }
 0x45a   : > { %v9058_v7 = vadd.f32 %v4470_v42, %v4181_v5  ;;  %v4191_v4 = vpop.f32.mrf.mxu1 }
 0x45b   : > { %v4472_v25 = vpop.f32.mrf.mxu0  ;;  %v10522_v4 = vshrl.u32 %v8808_v1, 16 }
 0x45c   : > { %10521 = vst [vmem:[#allocation75_spill] sm:$0xff] %v9058_v7  ;;  %v4194_v43 = vpop.f32.mrf.mxu1  ;;  %4385 = vmatmul.mubr.bf16.gmra.mxu1 %v9050_v21  ;;  %v10523_v25 = vshll.u32 %v8808_v1, 16 }
 0x45d   : > { %4392 = vmatprep.mubr.bf16.mxu1 %v8814_v59  ;;  %v4475_v26 = vpop.f32.mrf.mxu0  ;;  %4666 = vmatmul.mubr.bf16.gmra.mxu0 %v9063_v46  ;;  %v3520_v5 = vrot.slane %v10522_v4, 7 }
 0x45e   : > { %v9073_v17 = vadd.f32 %v4475_v26, %v4186_v23  ;;  %v4196_v49 = vpop.f32.mrf.mxu1  ;;  %4673 = vmatprep.mubr.bf16.mxu0 %v9069_v45  ;;  %v9083_v23 = vsel %vm7104_vm5, %v3447_v28, 0  ;;  %v3448_v26 = vrot.slane %v3327_v2, 1 }
 0x45f   : > { %v4477_v44 = vpop.f32.mrf.mxu0  ;;  %v3523_v59 = vor.u32 %v10523_v25, %v3520_v5  ;;  %v6621_v25 = vld [vmem:[#allocation7 + $0x230] sm:$0xff]  }
 0x460   : > { %v4197_v56 = vpop.f32.mrf.mxu1  ;;  %v3449_v49 = vor.u32 %v3448_v26, %v3324_v19 }
 0x461   : > { %v4478_v42 = vpop.f32.mrf.mxu0  ;;  %v9089_v55 = vsel %vm7067_vm2, 0, %v3523_v59 }
 0x462   : > { %v9078_v21 = vadd.f32 %v4478_v42, %v4189_v20  ;;  %v4199_v7 = vpop.f32.mrf.mxu1  ;;  %v9099_v62 = vsel %vm7104_vm5, %v3449_v49, 0  ;;  %v6623_v49 = vld [vmem:[#allocation7 + $0x220] sm:$0xff]  }
 0x463   : > { %v4480_v58 = vpop.f32.mrf.mxu0 }
 0x464   : > { %v4202_v37 = vpop.f32.mrf.mxu1  ;;  %4393 = vmatmul.mubr.bf16.gmra.mxu1 %v9069_v45 }
 0x465   : > { %v4483_v4 = vpop.f32.mrf.mxu0  ;;  %4674 = vmatmul.mubr.bf16.gmra.mxu0 %v9083_v23  ;;  %4722 = vmatprep.mubr.bf16.mxu1 %v8369_v13 }
 0x466   : > { %v9091_v20 = vadd.f32 %v4483_v4, %v4194_v43  ;;  %v4204_v7 = vpop.f32.mrf.mxu1  ;;  %4681 = vmatprep.mubr.bf16.mxu0 %v9089_v55 }
 0x467   : > { %v4485_v18 = vpop.f32.mrf.mxu0 }
 0x468   : > { %v4205_v5 = vpop.f32.mrf.mxu1 }
 0x469   : > { %v4486_v44 = vpop.f32.mrf.mxu0 }
 0x46a   : > { %v9094_v28 = vadd.f32 %v4486_v44, %v4197_v56  ;;  %v4207_v2 = vpop.f32.mrf.mxu1  ;;  %v6622_v56 = vld [vmem:[#allocation7 + $0x228] sm:$0xff]  }
 0x46b   : > { %v4488_v42 = vpop.f32.mrf.mxu0 }
 0x46c   : > { %v4210_v58 = vpop.f32.mrf.mxu1  ;;  %4723 = vmatmul.mubr.bf16.vlgmr.msra.gmra.mxu1 %v8306_v39  ;;  %v6624_v42 = vld [vmem:[#allocation7 + $0x218] sm:$0xff]  }
 0x46d   : > { %v4491_v13 = vpop.f32.mrf.mxu0  ;;  %4682 = vmatmul.mubr.bf16.gmra.mxu0 %v9099_v62  ;;  %4730 = vmatprep.mubr.bf16.mxu1 %v8407_v54 }
 0x46e   : > { %v9103_v59 = vadd.f32 %v4491_v13, %v4202_v37  ;;  %6331 = vmatpush3.bf16.msra.mxu1 %v8849_v29  ;;  %v4212_v19 = vpop.f32.mrf.mxu1  ;;  %5011 = vmatprep.mubr.bf16.mxu0 %v8301_v36 }
 0x46f   : > { %v4493_v43 = vpop.f32.mrf.mxu0  ;;  %6332 = vmatprep.subr.bf16.mxu1 %v6621_v25 }
 0x470   : > { %v4213_v39 = vpop.f32.mrf.mxu1 }
 0x471   : > { %v4494_v26 = vpop.f32.mrf.mxu0 }
 0x472   : > { %v9107_v4 = vadd.f32 %v4494_v26, %v4205_v5  ;;  %v4215_v7 = vpop.f32.mrf.mxu1  ;;  %6333 = vmatpush3.bf16.msra.mxu1 %v6621_v25 }
 0x473   : > { %v4496_v18 = vpop.f32.mrf.mxu0  ;;  %6334 = vmatprep.subr.bf16.mxu1 %v6622_v56 }
 0x474   : > { %v4218_v44 = vpop.f32.mrf.mxu1  ;;  %4731 = vmatmul.mubr.bf16.gmra.mxu1 %v8301_v36 }
 0x475   : > { %v4499_v37 = vpop.f32.mrf.mxu0  ;;  %4738 = vmatprep.mubr.bf16.mxu1 %v8444_v47  ;;  %5012 = vmatmul.mubr.bf16.vlgmr.msra.gmra.mxu0 %v8347_v10 }
 0x476   : > { %v9112_v29 = vadd.f32 %v4499_v37, %v4210_v58  ;;  %v4220_v2 = vpop.f32.mrf.mxu1  ;;  %5019 = vmatprep.mubr.bf16.mxu0 %v8332_v30  ;;  %6335 = vmatpush3.bf16.msra.mxu1 %v6622_v56 }
 0x477   : > { %v4501_v5 = vpop.f32.mrf.mxu0  ;;  %6336 = vmatprep.subr.bf16.mxu1 %v6623_v49 }
 0x478   : > { %v4221_v25 = vpop.f32.mrf.mxu1 }
 0x479   : > { %v4502_v13 = vpop.f32.mrf.mxu0 }
 0x47a   : > { %v9115_v19 = vadd.f32 %v4502_v13, %v4213_v39  ;;  %v4223_v43 = vpop.f32.mrf.mxu1  ;;  %6337 = vmatpush3.bf16.msra.mxu1 %v6623_v49 }
 0x47b   : > { %v4504_v36 = vpop.f32.mrf.mxu0  ;;  %6338 = vmatprep.subr.bf16.mxu1 %v6624_v42 }
 0x47c   : > { %v4226_v26 = vpop.f32.mrf.mxu1  ;;  %4739 = vmatmul.mubr.bf16.gmra.mxu1 %v8332_v30 }
 0x47d   : > { %v4507_v10 = vpop.f32.mrf.mxu0  ;;  %4746 = vmatprep.mubr.bf16.mxu1 %v8477_v8  ;;  %5020 = vmatmul.mubr.bf16.gmra.mxu0 %v8382_v0 }
 0x47e   : > { %v9120_v58 = vadd.f32 %v4507_v10, %v4218_v44  ;;  %v4228_v56 = vpop.f32.mrf.mxu1  ;;  %5027 = vmatprep.mubr.bf16.mxu0 %v8328_v24  ;;  %6339 = vmatpush3.bf16.msra.mxu1 %v6624_v42 }
 0x47f   : > { %v4509_v39 = vpop.f32.mrf.mxu0 }
 0x480   : > { %v4229_v7 = vpop.f32.mrf.mxu1 }
 0x481   : > { %v4510_v18 = vpop.f32.mrf.mxu0 }
 0x482   : > { %v9123_v49 = vadd.f32 %v4510_v18, %v4221_v25  ;;  %v4231_v37 = vpop.f32.mrf.mxu1 }
 0x483   : > { %v4512_v2 = vpop.f32.mrf.mxu0 }
 0x484   : > { %v4234_v5 = vpop.f32.mrf.mxu1  ;;  %4747 = vmatmul.mubr.bf16.gmra.mxu1 %v8328_v24  ;;  %v6625_v24 = vld [vmem:[#allocation7 + $0x210] sm:$0xff]  }
 0x485   : > { %v4515_v30 = vpop.f32.mrf.mxu0  ;;  %4754 = vmatprep.mubr.bf16.mxu1 %v8511_v16  ;;  %5028 = vmatmul.mubr.bf16.gmra.mxu0 %v8418_v50 }
 0x486   : > { %v9128_v0 = vadd.f32 %v4515_v30, %v4226_v26  ;;  %v4236_v44 = vpop.f32.mrf.mxu1  ;;  %5035 = vmatprep.mubr.bf16.mxu0 %v8365_v51  ;;  %6340 = vmatprep.subr.bf16.mxu1 %v6625_v24 }
 0x487   : > { %v4517_v42 = vpop.f32.mrf.mxu0  ;;  %6341 = vmatpush3.bf16.msra.mxu1 %v6625_v24 }
 0x488   : > { %v4237_v13 = vpop.f32.mrf.mxu1 }
 0x489   : > { %v4518_v43 = vpop.f32.mrf.mxu0 }
 0x48a   : > { %v9131_v25 = vadd.f32 %v4518_v43, %v4229_v7  ;;  %v4239_v36 = vpop.f32.mrf.mxu1  ;;  %v10526_v43 = vld [vmem:[#allocation15_spill] sm:$0xff] }
 0x48b   : > { %v4520_v10 = vpop.f32.mrf.mxu0 }
 0x48c   : > { %v4242_v56 = vpop.f32.mrf.mxu1  ;;  %4755 = vmatmul.mubr.bf16.gmra.mxu1 %v8365_v51  ;;  %v10529_v10 = vld [vmem:[#allocation76_spill] sm:$0xff] }
 0x48d   : > { %v4523_v39 = vpop.f32.mrf.mxu0  ;;  %4762 = vmatprep.mubr.bf16.mxu1 %v8550_v60  ;;  %5036 = vmatmul.mubr.bf16.gmra.mxu0 %v8452_v33  ;;  %v10527_v33 = vld [vmem:[#allocation44_spill] sm:$0xff] }
 0x48e   : > { %v9136_v50 = vadd.f32 %v4523_v39, %v4234_v5  ;;  %v4244_v26 = vpop.f32.mrf.mxu1  ;;  %5043 = vmatprep.mubr.bf16.mxu0 %v8357_v41 }
 0x48f   : > { %v4525_v18 = vpop.f32.mrf.mxu0 }
 0x490   : > { %10524 = vst [vmem:[#allocation21_spill] sm:$0xff] %v9136_v50  ;;  %v4245_v7 = vpop.f32.mrf.mxu1  ;;  %v10537_v50 = vld [vmem:[#allocation80_spill] sm:$0xff] }
 0x491   : > { %v4526_v37 = vpop.f32.mrf.mxu0 }
 0x492   : > { %v9139_v2 = vadd.f32 %v4526_v37, %v4237_v13  ;;  %v4247_v30 = vpop.f32.mrf.mxu1 }
 0x493   : > { %v4528_v51 = vpop.f32.mrf.mxu0 }
 0x494   : > { %10525 = vst [vmem:[#allocation13_spill] sm:$0xff] %v9139_v2  ;;  %v4250_v44 = vpop.f32.mrf.mxu1  ;;  %4763 = vmatmul.mubr.bf16.gmra.mxu1 %v8357_v41  ;;  %v10531_v51 = vld [vmem:[#allocation22_spill] sm:$0xff]  ;;  %v10532_v2 = vld [vmem:[#allocation47_spill] sm:$0xff] }
 0x495   : > { %v4531_v42 = vpop.f32.mrf.mxu0  ;;  %4770 = vmatprep.mubr.bf16.mxu1 %v10526_v43  ;;  %5044 = vmatmul.mubr.bf16.gmra.mxu0 %v10527_v33  ;;  %v10534_v33 = vld [vmem:[#allocation35_spill] sm:$0xff] }
 0x496   : > { %v9144_v5 = vadd.f32 %v4531_v42, %v4242_v56  ;;  %v4252_v36 = vpop.f32.mrf.mxu1  ;;  %5051 = vmatprep.mubr.bf16.mxu0 %v10529_v10 }
 0x497   : > { %v4533_v24 = vpop.f32.mrf.mxu0 }
 0x498   : > { %10528 = vst [vmem:[#allocation15_spill] sm:$0xff] %v9144_v5  ;;  %v4253_v39 = vpop.f32.mrf.mxu1 }
 0x499   : > { %v4534_v26 = vpop.f32.mrf.mxu0 }
 0x49a   : > { %v9147_v13 = vadd.f32 %v4534_v26, %v4245_v7  ;;  %v4255_v18 = vpop.f32.mrf.mxu1 }
 0x49b   : > { %v4536_v37 = vpop.f32.mrf.mxu0 }
 0x49c   : > { %10530 = vst [vmem:[#allocation44_spill] sm:$0xff] %v9147_v13  ;;  %v4258_v30 = vpop.f32.mrf.mxu1  ;;  %4771 = vmatmul.mubr.bf16.gmra.mxu1 %v10529_v10  ;;  %v10536_v13 = vld [vmem:[#allocation25_spill] sm:$0xff] }
 0x49d   : > { %v4539_v41 = vpop.f32.mrf.mxu0  ;;  %4778 = vmatprep.mubr.bf16.mxu1 %v10531_v51  ;;  %5052 = vmatmul.mubr.bf16.gmra.mxu0 %v10532_v2 }
 0x49e   : > { %v9152_v56 = vadd.f32 %v4539_v41, %v4250_v44  ;;  %v4260_v42 = vpop.f32.mrf.mxu1  ;;  %5059 = vmatprep.mubr.bf16.mxu0 %v10534_v33  ;;  %v10539_v41 = vld [vmem:[#allocation77_spill] sm:$0xff] }
 0x49f   : > { %v4541_v36 = vpop.f32.mrf.mxu0 }
 0x4a0   : > { %10533 = vst [vmem:[#allocation76_spill] sm:$0xff] %v9152_v56  ;;  %v4261_v24 = vpop.f32.mrf.mxu1 }
 0x4a1   : > { %v4542_v5 = vpop.f32.mrf.mxu0 }
 0x4a2   : > { %v9155_v7 = vadd.f32 %v4542_v5, %v4253_v39  ;;  %v4263_v26 = vpop.f32.mrf.mxu1 }
 0x4a3   : > { %v4544_v18 = vpop.f32.mrf.mxu0 }
 0x4a4   : > { %10535 = vst [vmem:[#allocation22_spill] sm:$0xff] %v9155_v7  ;;  %v4266_v37 = vpop.f32.mrf.mxu1  ;;  %4779 = vmatmul.mubr.bf16.gmra.mxu1 %v10534_v33  ;;  %v10541_v7 = vld [vmem:[#allocation26_spill] sm:$0xff] }
 0x4a5   : > { %v4547_v10 = vpop.f32.mrf.mxu0  ;;  %4786 = vmatprep.mubr.bf16.mxu1 %v10536_v13  ;;  %5060 = vmatmul.mubr.bf16.gmra.mxu0 %v10537_v50  ;;  %v10542_v13 = vld [vmem:[#allocation57_spill] sm:$0xff] }
 0x4a6   : > { %v9160_v2 = vadd.f32 %v4547_v10, %v4258_v30  ;;  %v4268_v44 = vpop.f32.mrf.mxu1  ;;  %5067 = vmatprep.mubr.bf16.mxu0 %v10539_v41  ;;  %v6626_v50 = vld [vmem:[#allocation7 + $0x208] sm:$0xff]  }
 0x4a7   : > { %v4549_v42 = vpop.f32.mrf.mxu0  ;;  %v10544_v44 = vld [vmem:[#allocation38_spill] sm:$0xff]  ;;  %6342 = vmatprep.subr.bf16.mxu1 %v6626_v50 }
 0x4a8   : > { %10538 = vst [vmem:[#allocation47_spill] sm:$0xff] %v9160_v2  ;;  %v4269_v36 = vpop.f32.mrf.mxu1  ;;  %6343 = vmatpush3.bf16.msra.mxu1 %v6626_v50 }
 0x4a9   : > { %v4550_v56 = vpop.f32.mrf.mxu0 }
 0x4aa   : > { %v9163_v5 = vadd.f32 %v4550_v56, %v4261_v24  ;;  %v4271_v39 = vpop.f32.mrf.mxu1 }
 0x4ab   : > { %v4552_v26 = vpop.f32.mrf.mxu0 }
 0x4ac   : > { %10540 = vst [vmem:[#allocation35_spill] sm:$0xff] %v9163_v5  ;;  %v4274_v18 = vpop.f32.mrf.mxu1  ;;  %4787 = vmatmul.mubr.bf16.gmra.mxu1 %v10539_v41 }
 0x4ad   : > { %v4555_v33 = vpop.f32.mrf.mxu0  ;;  %4794 = vmatprep.mubr.bf16.mxu1 %v10541_v7  ;;  %5068 = vmatmul.mubr.bf16.gmra.mxu0 %v10542_v13  ;;  %v10546_v13 = vld [vmem:[#allocation30_spill] sm:$0xff] }
 0x4ae   : > { %v9168_v30 = vadd.f32 %v4555_v33, %v4266_v37  ;;  %v4276_v10 = vpop.f32.mrf.mxu1  ;;  %5075 = vmatprep.mubr.bf16.mxu0 %v10544_v44  ;;  %v10547_v37 = vld [vmem:[#allocation65_spill] sm:$0xff] }
 0x4af   : > { %v4557_v42 = vpop.f32.mrf.mxu0 }
 0x4b0   : > { %10543 = vst [vmem:[#allocation80_spill] sm:$0xff] %v9168_v30  ;;  %v4277_v56 = vpop.f32.mrf.mxu1  ;;  %v10549_v42 = vld [vmem:[#allocation78_spill] sm:$0xff] }
 0x4b1   : > { %v4558_v24 = vpop.f32.mrf.mxu0 }
 0x4b2   : > { %v9171_v39 = vadd.f32 %v4558_v24, %v4269_v36  ;;  %v4279_v26 = vpop.f32.mrf.mxu1 }
 0x4b3   : > { %v4560_v41 = vpop.f32.mrf.mxu0 }
 0x4b4   : > { %10545 = vst [vmem:[#allocation77_spill] sm:$0xff] %v9171_v39  ;;  %v4282_v5 = vpop.f32.mrf.mxu1  ;;  %4795 = vmatmul.mubr.bf16.gmra.mxu1 %v10544_v44  ;;  %v10551_v39 = vld [vmem:[#allocation36_spill] sm:$0xff] }
 0x4b5   : > { %v4563_v2 = vpop.f32.mrf.mxu0  ;;  %4802 = vmatprep.mubr.bf16.mxu1 %v10546_v13  ;;  %5076 = vmatmul.mubr.bf16.gmra.mxu0 %v10547_v37  ;;  %v10552_v13 = vld [vmem:[#allocation18_spill] sm:$0xff]  ;;  %v10554_v37 = vld [vmem:[#allocation41_spill] sm:$0xff] }
 0x4b6   : > { %v9176_v33 = vadd.f32 %v4563_v2, %v4274_v18  ;;  %v4284_v10 = vpop.f32.mrf.mxu1  ;;  %5083 = vmatprep.mubr.bf16.mxu0 %v10549_v42 }
 0x4b7   : > { %v4565_v30 = vpop.f32.mrf.mxu0 }
 0x4b8   : > { %10548 = vst [vmem:[#allocation57_spill] sm:$0xff] %v9176_v33  ;;  %v4285_v50 = vpop.f32.mrf.mxu1 }
 0x4b9   : > { %v4566_v7 = vpop.f32.mrf.mxu0 }
 0x4ba   : > { %v9179_v36 = vadd.f32 %v4566_v7, %v4277_v56  ;;  %v4287_v24 = vpop.f32.mrf.mxu1 }
 0x4bb   : > { %v4568_v26 = vpop.f32.mrf.mxu0 }
 0x4bc   : > { %10550 = vst [vmem:[#allocation38_spill] sm:$0xff] %v9179_v36  ;;  %v4290_v41 = vpop.f32.mrf.mxu1  ;;  %4803 = vmatmul.mubr.bf16.gmra.mxu1 %v10549_v42  ;;  %v10556_v36 = vld [vmem:[#allocation32_spill] sm:$0xff] }
 0x4bd   : > { %v4571_v44 = vpop.f32.mrf.mxu0  ;;  %4810 = vmatprep.mubr.bf16.mxu1 %v10551_v39  ;;  %5084 = vmatmul.mubr.bf16.gmra.mxu0 %v10552_v13 }
 0x4be   : > { %v9184_v2 = vadd.f32 %v4571_v44, %v4282_v5  ;;  %v4292_v18 = vpop.f32.mrf.mxu1  ;;  %5091 = vmatprep.mubr.bf16.mxu0 %v10554_v37  ;;  %v10557_v44 = vld [vmem:[#allocation79_spill] sm:$0xff] }
 0x4bf   : > { %v4573_v30 = vpop.f32.mrf.mxu0 }
 0x4c0   : > { %10553 = vst [vmem:[#allocation65_spill] sm:$0xff] %v9184_v2  ;;  %v4293_v10 = vpop.f32.mrf.mxu1 }
 0x4c1   : > { %v4574_v33 = vpop.f32.mrf.mxu0 }
 0x4c2   : > { %v9187_v7 = vadd.f32 %v4574_v33, %v4285_v50  ;;  %v4295_v56 = vpop.f32.mrf.mxu1 }
 0x4c3   : > { %v4576_v24 = vpop.f32.mrf.mxu0 }
 0x4c4   : > { %10555 = vst [vmem:[#allocation78_spill] sm:$0xff] %v9187_v7  ;;  %v4298_v26 = vpop.f32.mrf.mxu1  ;;  %4811 = vmatmul.mubr.bf16.gmra.mxu1 %v10554_v37  ;;  %v10559_v7 = vld [vmem:[#allocation29_spill] sm:$0xff] }
 0x4c5   : > { %v4579_v42 = vpop.f32.mrf.mxu0  ;;  %4818 = vmatprep.mubr.bf16.mxu1 %v8794_v6  ;;  %5092 = vmatmul.mubr.bf16.gmra.mxu0 %v10556_v36  ;;  %v6627_v36 = vld [vmem:[#allocation7 + $0x200] sm:$0xff]  }
 0x4c6   : > { %v9192_v5 = vadd.f32 %v4579_v42, %v4290_v41  ;;  %v4300_v13 = vpop.f32.mrf.mxu1  ;;  %5099 = vmatprep.mubr.bf16.mxu0 %v10557_v44  ;;  %6344 = vmatprep.subr.bf16.mxu1 %v6627_v36 }
 0x4c7   : > { %v4581_v18 = vpop.f32.mrf.mxu0  ;;  %6345 = vmatpush3.bf16.msra.mxu1 %v6627_v36 }
 0x4c8   : > { %v4301_v30 = vpop.f32.mrf.mxu1 }
 0x4c9   : > { %v4582_v2 = vpop.f32.mrf.mxu0 }
 0x4ca   : > { %v9195_v33 = vadd.f32 %v4582_v2, %v4293_v10  ;;  %v4303_v50 = vpop.f32.mrf.mxu1 }
 0x4cb   : > { %v4584_v56 = vpop.f32.mrf.mxu0 }
 0x4cc   : > { %10558 = vst [vmem:[#allocation36_spill] sm:$0xff] %v9195_v33  ;;  %v4306_v24 = vpop.f32.mrf.mxu1  ;;  %4819 = vmatmul.mubr.bf16.gmra.mxu1 %v10557_v44 }
 0x4cd   : > { %v4587_v37 = vpop.f32.mrf.mxu0  ;;  %4826 = vmatprep.mubr.bf16.mxu1 %v8819_v22  ;;  %5100 = vmatmul.mubr.bf16.gmra.mxu0 %v10559_v7 }
 0x4ce   : > { %v9200_v41 = vadd.f32 %v4587_v37, %v4298_v26  ;;  %v4308_v42 = vpop.f32.mrf.mxu1  ;;  %5107 = vmatprep.mubr.bf16.mxu0 %v8499_v63 }
 0x4cf   : > { %v4589_v13 = vpop.f32.mrf.mxu0 }
 0x4d0   : > { %10560 = vst [vmem:[#allocation18_spill] sm:$0xff] %v9200_v41  ;;  %v4309_v2 = vpop.f32.mrf.mxu1 }
 0x4d1   : > { %v4590_v10 = vpop.f32.mrf.mxu0 }
 0x4d2   : > { %v9203_v18 = vadd.f32 %v4590_v10, %v4301_v30  ;;  %v4311_v50 = vpop.f32.mrf.mxu1 }
 0x4d3   : > { %v4592_v44 = vpop.f32.mrf.mxu0 }
 0x4d4   : > { %10561 = vst [vmem:[#allocation41_spill] sm:$0xff] %v9203_v18  ;;  %v4314_v56 = vpop.f32.mrf.mxu1  ;;  %4827 = vmatmul.mubr.bf16.gmra.mxu1 %v8499_v63  ;;  %v9217_v63 = vsel %vm7104_vm5, %v8838_v32, 0  ;;  %v10601_v18 = vld [vmem:[#allocation12_spill] sm:$0xff] }
 0x4d5   : > { %v4595_v33 = vpop.f32.mrf.mxu0  ;;  %4834 = vmatprep.mubr.bf16.mxu1 %v8847_v48  ;;  %5108 = vmatmul.mubr.bf16.gmra.mxu0 %v8774_v3 }
 0x4d6   : > { %v9208_v7 = vadd.f32 %v4595_v33, %v4306_v24  ;;  %v4316_v26 = vpop.f32.mrf.mxu1  ;;  %5115 = vmatprep.mubr.bf16.mxu0 %v8539_v11 }
 0x4d7   : > { %v4597_v37 = vpop.f32.mrf.mxu0 }
 0x4d8   : > { %10562 = vst [vmem:[#allocation32_spill] sm:$0xff] %v9208_v7  ;;  %v4317_v36 = vpop.f32.mrf.mxu1  ;;  %v10596_v7 = vld [vmem:[#allocation51_spill] sm:$0xff] }
 0x4d9   : > { %v4598_v42 = vpop.f32.mrf.mxu0 }
 0x4da   : > { %v9211_v30 = vadd.f32 %v4598_v42, %v4309_v2  ;;  %v4319_v13 = vpop.f32.mrf.mxu1 }
 0x4db   : > { %v4600_v10 = vpop.f32.mrf.mxu0 }
 0x4dc   : > { %10563 = vst [vmem:[#allocation79_spill] sm:$0xff] %v9211_v30  ;;  %v4322_v50 = vpop.f32.mrf.mxu1  ;;  %4835 = vmatmul.mubr.bf16.gmra.mxu1 %v8539_v11  ;;  %v10591_v30 = vld [vmem:[#allocation46_spill] sm:$0xff] }
 0x4dd   : > { %v4603_v3 = vpop.f32.mrf.mxu0  ;;  %4842 = vmatprep.mubr.bf16.mxu1 %v9217_v63  ;;  %5116 = vmatmul.mubr.bf16.gmra.mxu0 %v8803_v15 }
 0x4de   : > { %v9221_v33 = vadd.f32 %v4603_v3, %v4314_v56  ;;  %v4324_v24 = vpop.f32.mrf.mxu1  ;;  %5123 = vmatprep.mubr.bf16.mxu0 %v8536_v52 }
 0x4df   : > { %v4605_v2 = vpop.f32.mrf.mxu0 }
 0x4e0   : > { %10564 = vst [vmem:[#allocation29_spill] sm:$0xff] %v9221_v33  ;;  %v4325_v44 = vpop.f32.mrf.mxu1  ;;  %v10586_v33 = vld [vmem:[#allocation43_spill] sm:$0xff] }
 0x4e1   : > { %v4606_v26 = vpop.f32.mrf.mxu0 }
 0x4e2   : > { %v9224_v37 = vadd.f32 %v4606_v26, %v4317_v36  ;;  %v4327_v11 = vpop.f32.mrf.mxu1 }
 0x4e3   : > { %v4608_v42 = vpop.f32.mrf.mxu0 }
 0x4e4   : > { %10565 = vst [vmem:[#allocation81_spill] sm:$0xff] %v9224_v37  ;;  %v4330_v13 = vpop.f32.mrf.mxu1  ;;  %4843 = vmatmul.mubr.bf16.gmra.mxu1 %v8536_v52  ;;  %v10581_v37 = vld [vmem:[#allocation45_spill] sm:$0xff] }
 0x4e5   : > { %v4611_v32 = vpop.f32.mrf.mxu0  ;;  %4850 = vmatprep.mubr.bf16.mxu1 %v8872_v35  ;;  %5124 = vmatmul.mubr.bf16.gmra.mxu0 %v8824_v34 }
 0x4e6   : > { %v9229_v15 = vadd.f32 %v4611_v32, %v4322_v50  ;;  %v4332_v56 = vpop.f32.mrf.mxu1  ;;  %5131 = vmatprep.mubr.bf16.mxu0 %v10254_v61 }
 0x4e7   : > { %v4613_v10 = vpop.f32.mrf.mxu0 }
 0x4e8   : > { %10566 = vst [vmem:[#allocation82_spill] sm:$0xff] %v9229_v15  ;;  %v4333_v3 = vpop.f32.mrf.mxu1  ;;  %v10576_v15 = vld [vmem:[#allocation40_spill] sm:$0xff] }
 0x4e9   : > { %v4614_v24 = vpop.f32.mrf.mxu0 }
 0x4ea   : > { %v9232_v36 = vadd.f32 %v4614_v24, %v4325_v44  ;;  %v4335_v2 = vpop.f32.mrf.mxu1 }
 0x4eb   : > { %v4616_v26 = vpop.f32.mrf.mxu0  ;;  %v10570_v2 = vld [vmem:[#allocation50_spill] sm:$0xff] }
 0x4ec   : > { %10567 = vst [vmem:[#allocation83_spill] sm:$0xff] %v9232_v36  ;;  %v4338_v11 = vpop.f32.mrf.mxu1  ;;  %4851 = vmatmul.mubr.bf16.gmra.mxu1 %v8598_v57  ;;  %v10571_v26 = vld [vmem:[#allocation42_spill] sm:$0xff] }
 0x4ed   : > { %v4619_v52 = vpop.f32.mrf.mxu0  ;;  %4858 = vmatprep.mubr.bf16.mxu1 %v8886_v38  ;;  %5132 = vmatmul.mubr.bf16.gmra.mxu0 %v10490_v14 }
 0x4ee   : > { %v9237_v34 = vadd.f32 %v4619_v52, %v4330_v13  ;;  %v4340_v35 = vpop.f32.mrf.mxu1  ;;  %5139 = vmatprep.mubr.bf16.mxu0 %v8571_v31 }
 0x4ef   : > { %v4621_v50 = vpop.f32.mrf.mxu0  ;;  %v10573_v35 = vld [vmem:[#allocation61_spill] sm:$0xff] }
 0x4f0   : > { %10568 = vst [vmem:[#allocation84_spill] sm:$0xff] %v9237_v34  ;;  %v4341_v42 = vpop.f32.mrf.mxu1 }
 0x4f1   : > { %v4622_v32 = vpop.f32.mrf.mxu0 }
 0x4f2   : > { %v9240_v44 = vadd.f32 %v4622_v32, %v4333_v3  ;;  %v4343_v56 = vpop.f32.mrf.mxu1 }
 0x4f3   : > { %v4624_v10 = vpop.f32.mrf.mxu0 }
 0x4f4   : > { %10569 = vst [vmem:[#allocation85_spill] sm:$0xff] %v9240_v44  ;;  %v4346_v24 = vpop.f32.mrf.mxu1  ;;  %4859 = vmatmul.mubr.bf16.gmra.mxu1 %v8571_v31  ;;  %v10575_v44 = vld [vmem:[#allocation48_spill] sm:$0xff] }
 0x4f5   : > { %v4627_v57 = vpop.f32.mrf.mxu0  ;;  %4866 = vmatprep.mubr.bf16.mxu1 %v10570_v2  ;;  %5140 = vmatmul.mubr.bf16.gmra.mxu0 %v10571_v26  ;;  %v10578_v26 = vld [vmem:[#allocation17_spill] sm:$0xff] }
 0x4f6   : > { %v9245_v13 = vadd.f32 %v4627_v57, %v4338_v11  ;;  %v4348_v52 = vpop.f32.mrf.mxu1  ;;  %5147 = vmatprep.mubr.bf16.mxu0 %v10573_v35 }
 0x4f7   : > { %v4629_v50 = vpop.f32.mrf.mxu0 }
 0x4f8   : > { %10572 = vst [vmem:[#allocation50_spill] sm:$0xff] %v9245_v13  ;;  %v4349_v34 = vpop.f32.mrf.mxu1 }
 0x4f9   : > { %v4630_v36 = vpop.f32.mrf.mxu0 }
 0x4fa   : > { %v9248_v3 = vadd.f32 %v4630_v36, %v4341_v42  ;;  %v4351_v32 = vpop.f32.mrf.mxu1 }
 0x4fb   : > { %v4632_v56 = vpop.f32.mrf.mxu0 }
 0x4fc   : > { %10574 = vst [vmem:[#allocation42_spill] sm:$0xff] %v9248_v3  ;;  %v4354_v10 = vpop.f32.mrf.mxu1  ;;  %4867 = vmatmul.mubr.bf16.gmra.mxu1 %v10573_v35  ;;  %v10580_v3 = vld [vmem:[#allocation49_spill] sm:$0xff] }
 0x4fd   : > { %v4635_v31 = vpop.f32.mrf.mxu0  ;;  %4874 = vmatprep.mubr.bf16.mxu1 %v10575_v44  ;;  %5148 = vmatmul.mubr.bf16.gmra.mxu0 %v10576_v15 }
 0x4fe   : > { %v9253_v11 = vadd.f32 %v4635_v31, %v4346_v24  ;;  %v4356_v57 = vpop.f32.mrf.mxu1  ;;  %5155 = vmatprep.mubr.bf16.mxu0 %v10578_v26  ;;  %v10583_v31 = vld [vmem:[#allocation20_spill] sm:$0xff] }
 0x4ff   : > { %v4637_v52 = vpop.f32.mrf.mxu0 }
 0x500   : > { %10577 = vst [vmem:[#allocation61_spill] sm:$0xff] %v9253_v11  ;;  %v4357_v50 = vpop.f32.mrf.mxu1 }
 0x501   : > { %v4638_v13 = vpop.f32.mrf.mxu0 }
 0x502   : > { %v9256_v36 = vadd.f32 %v4638_v13, %v4349_v34  ;;  %v4359_v42 = vpop.f32.mrf.mxu1 }
 0x503   : > { %v4640_v32 = vpop.f32.mrf.mxu0 }
 0x504   : > { %10579 = vst [vmem:[#allocation48_spill] sm:$0xff] %v9256_v36  ;;  %v4362_v56 = vpop.f32.mrf.mxu1  ;;  %4875 = vmatmul.mubr.bf16.gmra.mxu1 %v10578_v26  ;;  %v10585_v36 = vld [vmem:[#allocation55_spill] sm:$0xff] }
 0x505   : > { %v4643_v35 = vpop.f32.mrf.mxu0  ;;  %4882 = vmatprep.mubr.bf16.mxu1 %v10580_v3  ;;  %5156 = vmatmul.mubr.bf16.gmra.mxu0 %v10581_v37 }
 0x506   : > { %v9261_v15 = vadd.f32 %v4643_v35, %v4354_v10  ;;  %v4364_v24 = vpop.f32.mrf.mxu1  ;;  %5163 = vmatprep.mubr.bf16.mxu0 %v10583_v31  ;;  %v10588_v35 = vld [vmem:[#allocation16_spill] sm:$0xff] }
 0x507   : > { %v4645_v57 = vpop.f32.mrf.mxu0 }
 0x508   : > { %10582 = vst [vmem:[#allocation40_spill] sm:$0xff] %v9261_v15  ;;  %v4365_v52 = vpop.f32.mrf.mxu1 }
 0x509   : > { %v4646_v11 = vpop.f32.mrf.mxu0 }
 0x50a   : > { %v9264_v34 = vadd.f32 %v4646_v11, %v4357_v50  ;;  %v4367_v13 = vpop.f32.mrf.mxu1 }
 0x50b   : > { %v4648_v42 = vpop.f32.mrf.mxu0 }
 0x50c   : > { %10584 = vst [vmem:[#allocation17_spill] sm:$0xff] %v9264_v34  ;;  %v4370_v32 = vpop.f32.mrf.mxu1  ;;  %4883 = vmatmul.mubr.bf16.gmra.mxu1 %v10583_v31  ;;  %v10590_v34 = vld [vmem:[#allocation56_spill] sm:$0xff] }
 0x50d   : > { %v4651_v26 = vpop.f32.mrf.mxu0  ;;  %4890 = vmatprep.mubr.bf16.mxu1 %v10585_v36  ;;  %5164 = vmatmul.mubr.bf16.gmra.mxu0 %v10586_v33 }
 0x50e   : > { %v9269_v37 = vadd.f32 %v4651_v26, %v4362_v56  ;;  %v4372_v10 = vpop.f32.mrf.mxu1  ;;  %5171 = vmatprep.mubr.bf16.mxu0 %v10588_v35  ;;  %v10593_v26 = vld [vmem:[#allocation28_spill] sm:$0xff] }
 0x50f   : > { %v4653_v24 = vpop.f32.mrf.mxu0 }
 0x510   : > { %10587 = vst [vmem:[#allocation49_spill] sm:$0xff] %v9269_v37  ;;  %v4373_v57 = vpop.f32.mrf.mxu1 }
 0x511   : > { %v4654_v15 = vpop.f32.mrf.mxu0 }
 0x512   : > { %v9272_v11 = vadd.f32 %v4654_v15, %v4365_v52  ;;  %v4375_v50 = vpop.f32.mrf.mxu1 }
 0x513   : > { %v4656_v13 = vpop.f32.mrf.mxu0 }
 0x514   : > { %10589 = vst [vmem:[#allocation45_spill] sm:$0xff] %v9272_v11  ;;  %v4378_v42 = vpop.f32.mrf.mxu1  ;;  %4891 = vmatmul.mubr.bf16.gmra.mxu1 %v10588_v35  ;;  %v10595_v11 = vld [vmem:[#allocation59_spill] sm:$0xff] }
 0x515   : > { %v4659_v31 = vpop.f32.mrf.mxu0  ;;  %4898 = vmatprep.mubr.bf16.mxu1 %v10590_v34  ;;  %5172 = vmatmul.mubr.bf16.gmra.mxu0 %v10591_v30 }
 0x516   : > { %v9277_v33 = vadd.f32 %v4659_v31, %v4370_v32  ;;  %v4380_v56 = vpop.f32.mrf.mxu1  ;;  %5179 = vmatprep.mubr.bf16.mxu0 %v10593_v26  ;;  %v10598_v31 = vld [vmem:[#allocation23_spill] sm:$0xff] }
 0x517   : > { %v4661_v10 = vpop.f32.mrf.mxu0 }
 0x518   : > { %10592 = vst [vmem:[#allocation20_spill] sm:$0xff] %v9277_v33  ;;  %v4381_v24 = vpop.f32.mrf.mxu1 }
 0x519   : > { %v4662_v37 = vpop.f32.mrf.mxu0 }
 0x51a   : > { %v9280_v15 = vadd.f32 %v4662_v37, %v4373_v57  ;;  %v4383_v52 = vpop.f32.mrf.mxu1 }
 0x51b   : > { %v4664_v50 = vpop.f32.mrf.mxu0 }
 0x51c   : > { %10594 = vst [vmem:[#allocation55_spill] sm:$0xff] %v9280_v15  ;;  %v4386_v13 = vpop.f32.mrf.mxu1  ;;  %4899 = vmatmul.mubr.bf16.gmra.mxu1 %v10593_v26  ;;  %v10600_v15 = vld [vmem:[#allocation62_spill] sm:$0xff] }
 0x51d   : > { %v4667_v35 = vpop.f32.mrf.mxu0  ;;  %4906 = vmatprep.mubr.bf16.mxu1 %v10595_v11  ;;  %5180 = vmatmul.mubr.bf16.gmra.mxu0 %v10596_v7 }
 0x51e   : > { %v9285_v30 = vadd.f32 %v4667_v35, %v4378_v42  ;;  %v4388_v32 = vpop.f32.mrf.mxu1  ;;  %5187 = vmatprep.mubr.bf16.mxu0 %v10598_v31  ;;  %v10603_v35 = vld [vmem:[#allocation24_spill] sm:$0xff] }
 0x51f   : > { %v4669_v56 = vpop.f32.mrf.mxu0 }
 0x520   : > { %10597 = vst [vmem:[#allocation43_spill] sm:$0xff] %v9285_v30  ;;  %v4389_v10 = vpop.f32.mrf.mxu1 }
 0x521   : > { %v4670_v33 = vpop.f32.mrf.mxu0 }
 0x522   : > { %v9288_v37 = vadd.f32 %v4670_v33, %v4381_v24  ;;  %v4391_v57 = vpop.f32.mrf.mxu1 }
 0x523   : > { %v4672_v52 = vpop.f32.mrf.mxu0  ;;  %v10605_v57 = vld [vmem:[#allocation19_spill] sm:$0xff] }
 0x524   : > { %10599 = vst [vmem:[#allocation16_spill] sm:$0xff] %v9288_v37  ;;  %v4394_v50 = vpop.f32.mrf.mxu1  ;;  %4907 = vmatmul.mubr.bf16.gmra.mxu1 %v10598_v31  ;;  %v10606_v52 = vld [vmem:[#allocation52_spill] sm:$0xff] }
 0x525   : > { %v4675_v26 = vpop.f32.mrf.mxu0  ;;  %4914 = vmatprep.mubr.bf16.mxu1 %v10600_v15  ;;  %5188 = vmatmul.mubr.bf16.gmra.mxu0 %v10601_v18  ;;  %v4436_v37 = vadd.f32 %v10606_v52, %v10605_v57 }
 0x526   : > { %v9293_v7 = vadd.f32 %v4675_v26, %v4386_v13  ;;  %v4396_v42 = vpop.f32.mrf.mxu1  ;;  %5195 = vmatprep.mubr.bf16.mxu0 %v10603_v35  ;;  %v10607_v13 = vld [vmem:[#allocation54_spill] sm:$0xff] }
 0x527   : > { %v4677_v32 = vpop.f32.mrf.mxu0 }
 0x528   : > { %10602 = vst [vmem:[#allocation56_spill] sm:$0xff] %v9293_v7  ;;  %v4397_v56 = vpop.f32.mrf.mxu1  ;;  %v10609_v32 = vld [vmem:[#allocation27_spill] sm:$0xff] }
 0x529   : > { %v4678_v30 = vpop.f32.mrf.mxu0 }
 0x52a   : > { %v9296_v33 = vadd.f32 %v4678_v30, %v4389_v10  ;;  %v4399_v24 = vpop.f32.mrf.mxu1  ;;  %v10610_v30 = vld [vmem:[#allocation53_spill] sm:$0xff]  ;;  %v10611_v10 = vld [vmem:[#allocation58_spill] sm:$0xff] }
 0x52b   : > { %v4680_v31 = vpop.f32.mrf.mxu0  ;;  %v4439_v24 = vadd.f32 %v10611_v10, %v10610_v30  ;;  %v10616_v30 = vld [vmem:[#allocation31_spill] sm:$0xff] }
 0x52c   : > { %10604 = vst [vmem:[#allocation46_spill] sm:$0xff] %v9296_v33  ;;  %v4724_v41 = vpop.f32.mrf.mxu1  ;;  %4915 = vmatmul.mubr.bf16.gmra.mxu1 %v10603_v35 }
 0x52d   : > { %v4725_v15 = vadd.f32 %v4724_v41, %v4436_v37  ;;  %v4683_v18 = vpop.f32.mrf.mxu0  ;;  %4922 = vmatprep.mubr.bf16.mxu1 %v9006_v40  ;;  %5196 = vmatmul.mubr.bf16.gmra.mxu0 %v10607_v13  ;;  %v10613_v13 = vld [vmem:[#allocation66_spill] sm:$0xff] }
 0x52e   : > { %v9303_v26 = vadd.f32 %v4683_v18, %v4394_v50  ;;  %v4726_v42 = vpop.f32.mrf.mxu1  ;;  %5203 = vmatprep.mubr.bf16.mxu0 %v10609_v32 }
 0x52f   : > { %v4685_v33 = vpop.f32.mrf.mxu0  ;;  %v10614_v42 = vld [vmem:[#allocation63_spill] sm:$0xff] }
 0x530   : > { %10608 = vst [vmem:[#allocation28_spill] sm:$0xff] %v9303_v26  ;;  %v4727_v57 = vpop.f32.mrf.mxu1 }
 0x531   : > { %v4728_v52 = vadd.f32 %v4727_v57, %v4439_v24  ;;  %v4686_v31 = vpop.f32.mrf.mxu0  ;;  %v10617_v24 = vld [vmem:[#allocation68_spill] sm:$0xff] }
 0x532   : > { %v9308_v7 = vadd.f32 %v4686_v31, %v4397_v56  ;;  %v4729_v41 = vpop.f32.mrf.mxu1 }
 0x533   : > { %v4688_v37 = vpop.f32.mrf.mxu0 }
 0x534   : > { %10612 = vst [vmem:[#allocation59_spill] sm:$0xff] %v9308_v7  ;;  %v4732_v35 = vpop.f32.mrf.mxu1  ;;  %4923 = vmatmul.mubr.bf16.gmra.mxu1 %v10609_v32 }
 0x535   : > { %v4733_v50 = vadd.f32 %v4732_v35, %v10613_v13  ;;  %4930 = vmatprep.mubr.bf16.mxu1 %v9026_v9  ;;  %v5013_v18 = vpop.f32.mrf.mxu0  ;;  %5204 = vmatmul.mubr.bf16.gmra.mxu0 %v10614_v42  ;;  %v10619_v13 = vld [vmem:[#allocation64_spill] sm:$0xff] }
 0x536   : > { %v9314_v26 = vadd.f32 %v5013_v18, %v4725_v15  ;;  %v4734_v33 = vpop.f32.mrf.mxu1  ;;  %5211 = vmatprep.mubr.bf16.mxu0 %v10616_v30  ;;  %v10620_v18 = vld [vmem:[#allocation60_spill] sm:$0xff] }
 0x537   : > { %v5015_v10 = vpop.f32.mrf.mxu0 }
 0x538   : > { %10615 = vst [vmem:[#allocation51_spill] sm:$0xff] %v9314_v26  ;;  %v4735_v56 = vpop.f32.mrf.mxu1  ;;  %v10621_v10 = vld [vmem:[#allocation33_spill] sm:$0xff] }
 0x539   : > { %v4736_v57 = vadd.f32 %v4735_v56, %v10617_v24  ;;  %v5016_v31 = vpop.f32.mrf.mxu0  ;;  %v10622_v24 = vld [vmem:[#allocation70_spill] sm:$0xff] }
 0x53a   : > { %v9318_v41 = vadd.f32 %v5016_v31, %v4728_v52  ;;  %v4737_v32 = vpop.f32.mrf.mxu1 }
 0x53b   : > { %v5018_v37 = vpop.f32.mrf.mxu0 }
 0x53c   : > { %10618 = vst [vmem:[#allocation23_spill] sm:$0xff] %v9318_v41  ;;  %v4740_v35 = vpop.f32.mrf.mxu1  ;;  %4931 = vmatmul.mubr.bf16.gmra.mxu1 %v10616_v30 }
 0x53d   : > { %v4741_v7 = vadd.f32 %v4740_v35, %v10619_v13  ;;  %4938 = vmatprep.mubr.bf16.mxu1 %v9044_v12  ;;  %v5021_v15 = vpop.f32.mrf.mxu0  ;;  %5212 = vmatmul.mubr.bf16.gmra.mxu0 %v10620_v18  ;;  %v10624_v13 = vld [vmem:[#allocation72_spill] sm:$0xff] }
 0x53e   : > { %v9324_v42 = vadd.f32 %v5021_v15, %v4733_v50  ;;  %v4742_v33 = vpop.f32.mrf.mxu1  ;;  %5219 = vmatprep.mubr.bf16.mxu0 %v10621_v10  ;;  %v10625_v15 = vld [vmem:[#allocation71_spill] sm:$0xff] }
 0x53f   : > { %v5023_v56 = vpop.f32.mrf.mxu0 }
 0x540   : > { %v4743_v52 = vpop.f32.mrf.mxu1 }
 0x541   : > { %v4744_v31 = vadd.f32 %v4743_v52, %v10622_v24  ;;  %v5024_v32 = vpop.f32.mrf.mxu0  ;;  %v10626_v52 = vld [vmem:[#allocation69_spill] sm:$0xff] }
 0x542   : > { %v9328_v37 = vadd.f32 %v5024_v32, %v4736_v57  ;;  %v4745_v30 = vpop.f32.mrf.mxu1 }
 0x543   : > { %v5026_v41 = vpop.f32.mrf.mxu0 }
 0x544   : > { %10623 = vst [vmem:[#allocation12_spill] sm:$0xff] %v9328_v37  ;;  %v4748_v35 = vpop.f32.mrf.mxu1  ;;  %4939 = vmatmul.mubr.bf16.gmra.mxu1 %v10621_v10 }
 0x545   : > { %v4749_v26 = vadd.f32 %v4748_v35, %v10624_v13  ;;  %4946 = vmatprep.mubr.bf16.mxu1 %v9063_v46  ;;  %v5029_v50 = vpop.f32.mrf.mxu0  ;;  %5220 = vmatmul.mubr.bf16.gmra.mxu0 %v10625_v15  ;;  %v10628_v13 = vld [vmem:[#allocation73_spill] sm:$0xff] }
 0x546   : > { %v9334_v18 = vadd.f32 %v5029_v50, %v4741_v7  ;;  %v4750_v33 = vpop.f32.mrf.mxu1  ;;  %5227 = vmatprep.mubr.bf16.mxu0 %v8790_v27  ;;  %v10629_v50 = vld [vmem:[#allocation67_spill] sm:$0xff] }
 0x547   : > { %v5031_v56 = vpop.f32.mrf.mxu0 }
 0x548   : > { %v4751_v57 = vpop.f32.mrf.mxu1  ;;  %v10630_v56 = vld [vmem:[#allocation34_spill] sm:$0xff] }
 0x549   : > { %v4752_v24 = vadd.f32 %v4751_v57, %v10626_v52  ;;  %v5032_v41 = vpop.f32.mrf.mxu0  ;;  %v10631_v52 = vld [vmem:[#allocation75_spill] sm:$0xff] }
 0x54a   : > { %v9338_v32 = vadd.f32 %v5032_v41, %v4744_v31  ;;  %v4753_v10 = vpop.f32.mrf.mxu1 }
 0x54b   : > { %v5034_v30 = vpop.f32.mrf.mxu0 }
 0x54c   : > { %10627 = vst [vmem:[#allocation24_spill] sm:$0xff] %v9338_v32  ;;  %v4756_v35 = vpop.f32.mrf.mxu1  ;;  %4947 = vmatmul.mubr.bf16.gmra.mxu1 %v8790_v27 }
 0x54d   : > { %v4757_v37 = vadd.f32 %v4756_v35, %v10628_v13  ;;  %4954 = vmatprep.mubr.bf16.mxu1 %v9083_v23  ;;  %v5037_v7 = vpop.f32.mrf.mxu0  ;;  %5228 = vmatmul.mubr.bf16.gmra.mxu0 %v10629_v50 }
 0x54e   : > { %v9344_v15 = vadd.f32 %v5037_v7, %v4749_v26  ;;  %v4758_v33 = vpop.f32.mrf.mxu1  ;;  %5235 = vmatprep.mubr.bf16.mxu0 %v10630_v56  ;;  %v10632_v7 = vld [vmem:[#allocation74_spill] sm:$0xff] }
 0x54f   : > { %v5039_v57 = vpop.f32.mrf.mxu0 }
 0x550   : > { %v4759_v31 = vpop.f32.mrf.mxu1  ;;  %v10633_v57 = vld [vmem:[#allocation39_spill] sm:$0xff] }
 0x551   : > { %v4760_v41 = vadd.f32 %v4759_v31, %v10631_v52  ;;  %v5040_v10 = vpop.f32.mrf.mxu0 }
 0x552   : > { %v9348_v30 = vadd.f32 %v5040_v10, %v4752_v24  ;;  %v4761_v27 = vpop.f32.mrf.mxu1 }
 0x553   : > { %v5042_v32 = vpop.f32.mrf.mxu0 }
 0x554   : > { %v4764_v35 = vpop.f32.mrf.mxu1  ;;  %4955 = vmatmul.mubr.bf16.gmra.mxu1 %v10630_v56 }
 0x555   : > { %v4765_v13 = vadd.f32 %v4764_v35, %v9073_v17  ;;  %4962 = vmatprep.mubr.bf16.mxu1 %v9099_v62  ;;  %v5045_v26 = vpop.f32.mrf.mxu0  ;;  %5236 = vmatmul.mubr.bf16.gmra.mxu0 %v10632_v7  ;;  %v10634_v35 = vld [vmem:[#allocation37_spill] sm:$0xff] }
 0x556   : > { %v9354_v50 = vadd.f32 %v5045_v26, %v4757_v37  ;;  %v4766_v33 = vpop.f32.mrf.mxu1  ;;  %5243 = vmatprep.mubr.bf16.mxu0 %v10633_v57  ;;  %v9364_v37 = vsel %vm7104_vm5, %v10634_v35, 0 }
 0x557   : > { %v5047_v31 = vpop.f32.mrf.mxu0 }
 0x558   : > { %v4767_v24 = vpop.f32.mrf.mxu1 }
 0x559   : > { %v4768_v52 = vadd.f32 %v4767_v24, %v9078_v21  ;;  %v5048_v32 = vpop.f32.mrf.mxu0 }
 0x55a   : > { %v9358_v10 = vadd.f32 %v5048_v32, %v4760_v41  ;;  %v4769_v56 = vpop.f32.mrf.mxu1 }
 0x55b   : > { %v5050_v27 = vpop.f32.mrf.mxu0 }
 0x55c   : > { %v4772_v17 = vpop.f32.mrf.mxu1  ;;  %4963 = vmatmul.mubr.bf16.gmra.mxu1 %v10633_v57 }
 0x55d   : > { %v4773_v26 = vadd.f32 %v4772_v17, %v9091_v20  ;;  %4970 = vmatprep.mubr.bf16.mxu1 %v9364_v37  ;;  %v5053_v7 = vpop.f32.mrf.mxu0  ;;  %5244 = vmatmul.mubr.bf16.gmra.mxu0 %v9069_v45 }
 0x55e   : > { %v9369_v21 = vadd.f32 %v5053_v7, %v4765_v13  ;;  %v4774_v41 = vpop.f32.mrf.mxu1  ;;  %5251 = vmatprep.mubr.bf16.mxu0 %v8808_v1 }
 0x55f   : > { %v5055_v33 = vpop.f32.mrf.mxu0 }
 0x560   : > { %v4775_v31 = vpop.f32.mrf.mxu1 }
 0x561   : > { %v4776_v57 = vadd.f32 %v4775_v31, %v9094_v28  ;;  %v5056_v24 = vpop.f32.mrf.mxu0 }
 0x562   : > { %v9373_v53 = vadd.f32 %v5056_v24, %v4768_v52  ;;  %v4777_v32 = vpop.f32.mrf.mxu1 }
 0x563   : > { %v5058_v56 = vpop.f32.mrf.mxu0 }
 0x564   : > { %v4780_v20 = vpop.f32.mrf.mxu1  ;;  %4971 = vmatmul.mubr.bf16.gmra.mxu1 %v8808_v1 }
 0x565   : > { %v4781_v27 = vadd.f32 %v4780_v20, %v9103_v59  ;;  %v5061_v45 = vpop.f32.mrf.mxu0  ;;  %5252 = vmatmul.mubr.bf16.gmra.mxu0 %v9089_v55  ;;  %6346 = vmatprep.mubr.bf16.mxu1 %v8407_v54 }
 0x566   : > { %v9379_v13 = vadd.f32 %v5061_v45, %v4773_v26  ;;  %v4782_v17 = vpop.f32.mrf.mxu1  ;;  %5259 = vmatprep.mubr.bf16.mxu0 %v10254_v61 }
 0x567   : > { %v5063_v28 = vpop.f32.mrf.mxu0 }
 0x568   : > { %v4783_v52 = vpop.f32.mrf.mxu1 }
 0x569   : > { %v4784_v35 = vadd.f32 %v4783_v52, %v9107_v4  ;;  %v5064_v7 = vpop.f32.mrf.mxu0 }
 0x56a   : > { %v9383_v41 = vadd.f32 %v5064_v7, %v4776_v57  ;;  %v4785_v1 = vpop.f32.mrf.mxu1 }
 0x56b   : > { %v5066_v33 = vpop.f32.mrf.mxu0 }
 0x56c   : > { %v4788_v59 = vpop.f32.mrf.mxu1  ;;  %6347 = vmatmul.mubr.bf16.vlgmr.msra.gmra.mxu1 %v8444_v47 }
 0x56d   : > { %v4789_v55 = vadd.f32 %v4788_v59, %v9112_v29  ;;  %v5069_v54 = vpop.f32.mrf.mxu0  ;;  %5260 = vmatmul.mubr.bf16.gmra.mxu0 %v10490_v14  ;;  %6350 = vmatprep.mubr.bf16.mxu1 %v8477_v8 }
 0x56e   : > { %v9389_v61 = vadd.f32 %v5069_v54, %v4781_v27  ;;  %v4790_v26 = vpop.f32.mrf.mxu1 }
 0x56f   : > { %v5071_v31 = vpop.f32.mrf.mxu0 }
 0x570   : > { %v4791_v4 = vpop.f32.mrf.mxu1 }
 0x571   : > { %v4792_v57 = vadd.f32 %v4791_v4, %v9115_v19  ;;  %v5072_v24 = vpop.f32.mrf.mxu0 }
 0x572   : > { %v9392_v32 = vadd.f32 %v5072_v24, %v4784_v35  ;;  %v4793_v56 = vpop.f32.mrf.mxu1  ;;  %v10635_v24 = vld [vmem:[#allocation25_spill] sm:$0xff] }
 0x573   : > { %v5074_v20 = vpop.f32.mrf.mxu0 }
 0x574   : > { %v4796_v47 = vpop.f32.mrf.mxu1  ;;  %6351 = vmatmul.mubr.bf16.gmra.mxu1 %v8511_v16  ;;  %v10637_v20 = vld [vmem:[#allocation26_spill] sm:$0xff] }
 0x575   : > { %v4797_v29 = vadd.f32 %v4796_v47, %v9120_v58  ;;  %v5077_v14 = vpop.f32.mrf.mxu0  ;;  %6354 = vmatprep.mubr.bf16.mxu1 %v8550_v60 }
 0x576   : > { %v9397_v8 = vadd.f32 %v5077_v14, %v4789_v55  ;;  %v4798_v27 = vpop.f32.mrf.mxu1 }
 0x577   : > { %v5079_v45 = vpop.f32.mrf.mxu0  ;;  %v10638_v27 = vld [vmem:[#allocation13_spill] sm:$0xff] }
 0x578   : > { %v4799_v17 = vpop.f32.mrf.mxu1 }
 0x579   : > { %v4800_v19 = vadd.f32 %v4799_v17, %v9123_v49  ;;  %v5080_v28 = vpop.f32.mrf.mxu0 }
 0x57a   : > { %v9400_v52 = vadd.f32 %v5080_v28, %v4792_v57  ;;  %v4801_v35 = vpop.f32.mrf.mxu1 }
 0x57b   : > { %v5082_v7 = vpop.f32.mrf.mxu0 }
 0x57c   : > { %v4804_v1 = vpop.f32.mrf.mxu1  ;;  %6355 = vmatmul.mubr.bf16.gmra.mxu1 %v10526_v43  ;;  %v10636_v43 = vld [vmem:[#allocation21_spill] sm:$0xff]  ;;  %v10639_v7 = vld [vmem:[#allocation30_spill] sm:$0xff] }
 0x57d   : > { %v4805_v16 = vadd.f32 %v4804_v1, %v9128_v0  ;;  %v5085_v58 = vpop.f32.mrf.mxu0  ;;  %6358 = vmatprep.mubr.bf16.mxu1 %v10531_v51  ;;  %v10640_v1 = vld [vmem:[#allocation15_spill] sm:$0xff] }
 0x57e   : > { %v9405_v60 = vadd.f32 %v5085_v58, %v4797_v29  ;;  %v4806_v33 = vpop.f32.mrf.mxu1 }
 0x57f   : > { %v5087_v59 = vpop.f32.mrf.mxu0 }
 0x580   : > { %v4807_v55 = vpop.f32.mrf.mxu1 }
 0x581   : > { %v4808_v49 = vadd.f32 %v4807_v55, %v9131_v25  ;;  %v5088_v54 = vpop.f32.mrf.mxu0 }
 0x582   : > { %v9408_v26 = vadd.f32 %v5088_v54, %v4800_v19  ;;  %v4809_v31 = vpop.f32.mrf.mxu1 }
 0x583   : > { %v5090_v4 = vpop.f32.mrf.mxu0  ;;  %v10641_v31 = vld [vmem:[#allocation44_spill] sm:$0xff] }
 0x584   : > { %v4812_v57 = vpop.f32.mrf.mxu1  ;;  %6359 = vmatmul.mubr.bf16.gmra.mxu1 %v10635_v24 }
 0x585   : > { %v4813_v0 = vadd.f32 %v4812_v57, %v10636_v43  ;;  %v5093_v56 = vpop.f32.mrf.mxu0  ;;  %6362 = vmatprep.mubr.bf16.mxu1 %v10637_v20  ;;  %v10642_v20 = vld [vmem:[#allocation76_spill] sm:$0xff] }
 0x586   : > { %v9413_v51 = vadd.f32 %v5093_v56, %v4805_v16  ;;  %v4814_v47 = vpop.f32.mrf.mxu1 }
 0x587   : > { %v5095_v29 = vpop.f32.mrf.mxu0 }
 0x588   : > { %v4815_v14 = vpop.f32.mrf.mxu1 }
 0x589   : > { %v4816_v25 = vadd.f32 %v4815_v14, %v10638_v27  ;;  %v5096_v45 = vpop.f32.mrf.mxu0 }
 0x58a   : > { %v9416_v17 = vadd.f32 %v5096_v45, %v4808_v49  ;;  %v4817_v19 = vpop.f32.mrf.mxu1  ;;  %v10643_v45 = vld [vmem:[#allocation22_spill] sm:$0xff] }
 0x58b   : > { %v5098_v28 = vpop.f32.mrf.mxu0 }
 0x58c   : > { %v4820_v35 = vpop.f32.mrf.mxu1  ;;  %6363 = vmatmul.mubr.bf16.gmra.mxu1 %v10639_v7 }
 0x58d   : > { %v4821_v58 = vadd.f32 %v4820_v35, %v10640_v1  ;;  %v5101_v33 = vpop.f32.mrf.mxu0  ;;  %6366 = vmatprep.mubr.bf16.mxu1 %v10551_v39 }
 0x58e   : > { %v9421_v16 = vadd.f32 %v5101_v33, %v4813_v0  ;;  %v4822_v59 = vpop.f32.mrf.mxu1 }
 0x58f   : > { %v5103_v55 = vpop.f32.mrf.mxu0 }
 0x590   : > { %v4823_v54 = vpop.f32.mrf.mxu1 }
 0x591   : > { %v4824_v4 = vadd.f32 %v4823_v54, %v10641_v31  ;;  %v5104_v57 = vpop.f32.mrf.mxu0  ;;  %v10645_v31 = vld [vmem:[#allocation35_spill] sm:$0xff] }
 0x592   : > { %v9424_v49 = vadd.f32 %v5104_v57, %v4816_v25  ;;  %v4825_v24 = vpop.f32.mrf.mxu1 }
 0x593   : > { %v5106_v43 = vpop.f32.mrf.mxu0 }
 0x594   : > { %v4828_v56 = vpop.f32.mrf.mxu1  ;;  %6367 = vmatmul.mubr.bf16.gmra.mxu1 %v8794_v6  ;;  %v10644_v6 = vld [vmem:[#allocation47_spill] sm:$0xff] }
 0x595   : > { %v4829_v47 = vadd.f32 %v4828_v56, %v10642_v20  ;;  %v5109_v29 = vpop.f32.mrf.mxu0  ;;  %6370 = vmatprep.mubr.bf16.mxu1 %v8819_v22 }
 0x596   : > { %v9429_v39 = vadd.f32 %v5109_v29, %v4821_v58  ;;  %v4830_v0 = vpop.f32.mrf.mxu1  ;;  %v10646_v29 = vld [vmem:[#allocation14_spill] sm:$0xff] }
 0x597   : > { %v5111_v14 = vpop.f32.mrf.mxu0 }
 0x598   : > { %v4831_v27 = vpop.f32.mrf.mxu1 }
 0x599   : > { %v4832_v19 = vadd.f32 %v4831_v27, %v10643_v45  ;;  %v5112_v28 = vpop.f32.mrf.mxu0 }
 0x59a   : > { %v9432_v25 = vadd.f32 %v5112_v28, %v4824_v4  ;;  %v4833_v35 = vpop.f32.mrf.mxu1  ;;  %v10648_v28 = vld [vmem:[#allocation77_spill] sm:$0xff] }
 0x59b   : > { %v5114_v7 = vpop.f32.mrf.mxu0 }
 0x59c   : > { %v4836_v1 = vpop.f32.mrf.mxu1  ;;  %6371 = vmatmul.mubr.bf16.gmra.mxu1 %v8847_v48  ;;  %v10647_v48 = vld [vmem:[#allocation80_spill] sm:$0xff] }
 0x59d   : > { %v4837_v33 = vadd.f32 %v4836_v1, %v10644_v6  ;;  %v5117_v59 = vpop.f32.mrf.mxu0  ;;  %6374 = vmatprep.mubr.bf16.mxu1 %v9217_v63 }
 0x59e   : > { %v9437_v22 = vadd.f32 %v5117_v59, %v4829_v47  ;;  %v4838_v58 = vpop.f32.mrf.mxu1 }
 0x59f   : > { %v5119_v55 = vpop.f32.mrf.mxu0  ;;  %v10649_v58 = vld [vmem:[#allocation57_spill] sm:$0xff] }
 0x5a0   : > { %v4839_v54 = vpop.f32.mrf.mxu1 }
 0x5a1   : > { %v4840_v57 = vadd.f32 %v4839_v54, %v10645_v31  ;;  %v5120_v24 = vpop.f32.mrf.mxu0 }
 0x5a2   : > { %v9440_v4 = vadd.f32 %v5120_v24, %v4832_v19  ;;  %v4841_v43 = vpop.f32.mrf.mxu1 }
 0x5a3   : > { %v5122_v56 = vpop.f32.mrf.mxu0  ;;  %v10650_v43 = vld [vmem:[#allocation38_spill] sm:$0xff] }
 0x5a4   : > { %v4844_v20 = vpop.f32.mrf.mxu1  ;;  %6375 = vmatmul.mubr.bf16.gmra.mxu1 %v10646_v29 }
 0x5a5   : > { %v4845_v0 = vadd.f32 %v4844_v20, %v10647_v48  ;;  %v5125_v14 = vpop.f32.mrf.mxu0  ;;  %6378 = vmatprep.mubr.bf16.mxu1 %v8886_v38 }
 0x5a6   : > { %v9445_v63 = vadd.f32 %v5125_v14, %v4837_v33  ;;  %v4846_v47 = vpop.f32.mrf.mxu1 }
 0x5a7   : > { %v5127_v27 = vpop.f32.mrf.mxu0 }
 0x5a8   : > { %v4847_v45 = vpop.f32.mrf.mxu1 }
 0x5a9   : > { %v4848_v35 = vadd.f32 %v4847_v45, %v10648_v28  ;;  %v5128_v7 = vpop.f32.mrf.mxu0 }
 0x5aa   : > { %v9448_v19 = vadd.f32 %v5128_v7, %v4840_v57  ;;  %v4849_v1 = vpop.f32.mrf.mxu1 }
 0x5ab   : > { %v5130_v6 = vpop.f32.mrf.mxu0  ;;  %v10652_v1 = vld [vmem:[#allocation78_spill] sm:$0xff] }
 0x5ac   : > { %v4852_v59 = vpop.f32.mrf.mxu1  ;;  %6379 = vmatmul.mubr.bf16.gmra.mxu1 %v10570_v2  ;;  %v10651_v2 = vld [vmem:[#allocation65_spill] sm:$0xff] }
 0x5ad   : > { %v4853_v55 = vadd.f32 %v4852_v59, %v10649_v58  ;;  %v5133_v54 = vpop.f32.mrf.mxu0  ;;  %6382 = vmatprep.mubr.bf16.mxu1 %v10575_v44 }
 0x5ae   : > { %v9453_v38 = vadd.f32 %v5133_v54, %v4845_v0  ;;  %v4854_v33 = vpop.f32.mrf.mxu1 }
 0x5af   : > { %v5135_v31 = vpop.f32.mrf.mxu0 }
 0x5b0   : > { %v4855_v24 = vpop.f32.mrf.mxu1 }
 0x5b1   : > { %v4856_v56 = vadd.f32 %v4855_v24, %v10650_v43  ;;  %v5136_v20 = vpop.f32.mrf.mxu0 }
 0x5b2   : > { %v9456_v57 = vadd.f32 %v5136_v20, %v4848_v35  ;;  %v4857_v48 = vpop.f32.mrf.mxu1  ;;  %v10653_v20 = vld [vmem:[#allocation36_spill] sm:$0xff] }
 0x5b3   : > { %v5138_v14 = vpop.f32.mrf.mxu0 }
 0x5b4   : > { %v4860_v47 = vpop.f32.mrf.mxu1  ;;  %6383 = vmatmul.mubr.bf16.gmra.mxu1 %v10580_v3 }
 0x5b5   : > { %v4861_v27 = vadd.f32 %v4860_v47, %v10651_v2  ;;  %v5141_v45 = vpop.f32.mrf.mxu0  ;;  %6386 = vmatprep.mubr.bf16.mxu1 %v10585_v36 }
 0x5b6   : > { %v9461_v44 = vadd.f32 %v5141_v45, %v4853_v55  ;;  %v4862_v0 = vpop.f32.mrf.mxu1 }
 0x5b7   : > { %v5143_v28 = vpop.f32.mrf.mxu0  ;;  %v10654_v0 = vld [vmem:[#allocation62_spill] sm:$0xff] }
 0x5b8   : > { %v4863_v7 = vpop.f32.mrf.mxu1 }
 0x5b9   : > { %v4864_v6 = vadd.f32 %v4863_v7, %v10652_v1  ;;  %v5144_v59 = vpop.f32.mrf.mxu0 }
 0x5ba   : > { %v9464_v35 = vadd.f32 %v5144_v59, %v4856_v56  ;;  %v4865_v58 = vpop.f32.mrf.mxu1  ;;  %v10656_v59 = vld [vmem:[#allocation41_spill] sm:$0xff] }
 0x5bb   : > { %v5146_v54 = vpop.f32.mrf.mxu0 }
 0x5bc   : > { %v4868_v33 = vpop.f32.mrf.mxu1  ;;  %6387 = vmatmul.mubr.bf16.gmra.mxu1 %v10590_v34  ;;  %v10655_v34 = vld [vmem:[#allocation18_spill] sm:$0xff] }
 0x5bd   : > { %v4869_v3 = vadd.f32 %v4868_v33, %v9192_v5  ;;  %v5149_v31 = vpop.f32.mrf.mxu0  ;;  %6390 = vmatprep.mubr.bf16.mxu1 %v10595_v11 }
 0x5be   : > { %v9469_v36 = vadd.f32 %v5149_v31, %v4861_v27  ;;  %v4870_v55 = vpop.f32.mrf.mxu1 }
 0x5bf   : > { %v5151_v24 = vpop.f32.mrf.mxu0 }
 0x5c0   : > { %v4871_v43 = vpop.f32.mrf.mxu1  ;;  %v10657_v24 = vld [vmem:[#allocation32_spill] sm:$0xff] }
 0x5c1   : > { %v4872_v48 = vadd.f32 %v4871_v43, %v10653_v20  ;;  %v5152_v14 = vpop.f32.mrf.mxu0 }
 0x5c2   : > { %v9472_v56 = vadd.f32 %v5152_v14, %v4864_v6  ;;  %v4873_v47 = vpop.f32.mrf.mxu1 }
 0x5c3   : > { %v5154_v2 = vpop.f32.mrf.mxu0 }
 0x5c4   : > { %v4876_v45 = vpop.f32.mrf.mxu1  ;;  %6391 = vmatmul.mubr.bf16.gmra.mxu1 %v10654_v0  ;;  %v10658_v2 = vld [vmem:[#allocation79_spill] sm:$0xff] }
 0x5c5   : > { %v4877_v5 = vadd.f32 %v4876_v45, %v10655_v34  ;;  %v5157_v28 = vpop.f32.mrf.mxu0  ;;  %6394 = vmatprep.mubr.bf16.mxu1 %v9006_v40 }
 0x5c6   : > { %v9477_v11 = vadd.f32 %v5157_v28, %v4869_v3  ;;  %v4878_v27 = vpop.f32.mrf.mxu1 }
 0x5c7   : > { %v5159_v7 = vpop.f32.mrf.mxu0 }
 0x5c8   : > { %v4879_v1 = vpop.f32.mrf.mxu1 }
 0x5c9   : > { %v4880_v58 = vadd.f32 %v4879_v1, %v10656_v59  ;;  %v5160_v54 = vpop.f32.mrf.mxu0 }
 0x5ca   : > { %v9480_v6 = vadd.f32 %v5160_v54, %v4872_v48  ;;  %v4881_v33 = vpop.f32.mrf.mxu1 }
 0x5cb   : > { %v5162_v31 = vpop.f32.mrf.mxu0  ;;  %v10660_v33 = vld [vmem:[#allocation81_spill] sm:$0xff] }
 0x5cc   : > { %v4884_v55 = vpop.f32.mrf.mxu1  ;;  %6395 = vmatmul.mubr.bf16.gmra.mxu1 %v9026_v9  ;;  %v10659_v9 = vld [vmem:[#allocation29_spill] sm:$0xff] }
 0x5cd   : > { %v4885_v43 = vadd.f32 %v4884_v55, %v10657_v24  ;;  %v5165_v20 = vpop.f32.mrf.mxu0  ;;  %6398 = vmatprep.mubr.bf16.mxu1 %v9044_v12 }
 0x5ce   : > { %v9485_v40 = vadd.f32 %v5165_v20, %v4877_v5  ;;  %v4886_v3 = vpop.f32.mrf.mxu1 }
 0x5cf   : > { %v5167_v14 = vpop.f32.mrf.mxu0 }
 0x5d0   : > { %v4887_v47 = vpop.f32.mrf.mxu1 }
 0x5d1   : > { %v4888_v45 = vadd.f32 %v4887_v47, %v10658_v2  ;;  %v5168_v0 = vpop.f32.mrf.mxu0 }
 0x5d2   : > { %v9488_v48 = vadd.f32 %v5168_v0, %v4880_v58  ;;  %v4889_v34 = vpop.f32.mrf.mxu1 }
 0x5d3   : > { %v5170_v28 = vpop.f32.mrf.mxu0  ;;  %v10662_v34 = vld [vmem:[#allocation83_spill] sm:$0xff] }
 0x5d4   : > { %v4892_v27 = vpop.f32.mrf.mxu1  ;;  %6399 = vmatmul.mubr.bf16.gmra.mxu1 %v9063_v46  ;;  %v10661_v46 = vld [vmem:[#allocation82_spill] sm:$0xff] }
 0x5d5   : > { %v4893_v7 = vadd.f32 %v4892_v27, %v10659_v9  ;;  %v5173_v1 = vpop.f32.mrf.mxu0  ;;  %6402 = vmatprep.mubr.bf16.mxu1 %v9083_v23 }
 0x5d6   : > { %v9493_v12 = vadd.f32 %v5173_v1, %v4885_v43  ;;  %v4894_v5 = vpop.f32.mrf.mxu1 }
 0x5d7   : > { %v5175_v59 = vpop.f32.mrf.mxu0 }
 0x5d8   : > { %v4895_v54 = vpop.f32.mrf.mxu1 }
 0x5d9   : > { %v4896_v31 = vadd.f32 %v4895_v54, %v10660_v33  ;;  %v5176_v55 = vpop.f32.mrf.mxu0 }
 0x5da   : > { %v9496_v58 = vadd.f32 %v5176_v55, %v4888_v45  ;;  %v4897_v24 = vpop.f32.mrf.mxu1 }
 0x5db   : > { %v5178_v20 = vpop.f32.mrf.mxu0  ;;  %v10664_v24 = vld [vmem:[#allocation85_spill] sm:$0xff] }
 0x5dc   : > { %v4900_v3 = vpop.f32.mrf.mxu1  ;;  %6403 = vmatmul.mubr.bf16.gmra.mxu1 %v9099_v62  ;;  %v10663_v62 = vld [vmem:[#allocation84_spill] sm:$0xff] }
 0x5dd   : > { %v4901_v14 = vadd.f32 %v4900_v3, %v10661_v46  ;;  %v5181_v47 = vpop.f32.mrf.mxu0  ;;  %6406 = vmatprep.mubr.bf16.mxu1 %v9364_v37 }
 0x5de   : > { %v9501_v23 = vadd.f32 %v5181_v47, %v4893_v7  ;;  %v4902_v43 = vpop.f32.mrf.mxu1 }
 0x5df   : > { %v5183_v2 = vpop.f32.mrf.mxu0 }
 0x5e0   : > { %v4903_v0 = vpop.f32.mrf.mxu1  ;;  %v10666_v2 = vld [vmem:[#allocation50_spill] sm:$0xff] }
 0x5e1   : > { %v4904_v28 = vadd.f32 %v4903_v0, %v10662_v34  ;;  %v5184_v27 = vpop.f32.mrf.mxu0 }
 0x5e2   : > { %v9504_v45 = vadd.f32 %v5184_v27, %v4896_v31  ;;  %v4905_v9 = vpop.f32.mrf.mxu1 }
 0x5e3   : > { %v5186_v1 = vpop.f32.mrf.mxu0 }
 0x5e4   : > { %v4908_v5 = vpop.f32.mrf.mxu1  ;;  %6407 = vmatmul.mubr.bf16.gmra.mxu1 %v10646_v29  ;;  %v10667_v1 = vld [vmem:[#allocation42_spill] sm:$0xff] }
 0x5e5   : > { %v4909_v59 = vadd.f32 %v4908_v5, %v10663_v62  ;;  %v5189_v54 = vpop.f32.mrf.mxu0 }
 0x5e6   : > { %v9508_v33 = vadd.f32 %v5189_v54, %v4901_v14  ;;  %v4910_v37 = vpop.f32.mrf.mxu1 }
 0x5e7   : > { %v5191_v7 = vpop.f32.mrf.mxu0 }
 0x5e8   : > { %v4911_v55 = vpop.f32.mrf.mxu1 }
 0x5e9   : > { %v4912_v20 = vadd.f32 %v4911_v55, %v10664_v24  ;;  %v5192_v3 = vpop.f32.mrf.mxu0  ;;  %v10668_v55 = vld [vmem:[#allocation61_spill] sm:$0xff] }
 0x5ea   : > { %v9511_v46 = vadd.f32 %v5192_v3, %v4904_v28  ;;  %v4913_v31 = vpop.f32.mrf.mxu1 }
 0x5eb   : > { %v5194_v47 = vpop.f32.mrf.mxu0 }
 0x5ec   : > { %10665 = vst [vmem:[#allocation19_spill] sm:$0xff] %v9511_v46  ;;  %v4916_v43 = vpop.f32.mrf.mxu1 }
 0x5ed   : > { %v4917_v0 = vadd.f32 %v4916_v43, %v10666_v2  ;;  %v5197_v34 = vpop.f32.mrf.mxu0  ;;  %v10670_v2 = vld [vmem:[#allocation48_spill] sm:$0xff] }
 0x5ee   : > { %v9514_v29 = vadd.f32 %v5197_v34, %v4909_v59  ;;  %v4918_v27 = vpop.f32.mrf.mxu1 }
 0x5ef   : > { %v5199_v9 = vpop.f32.mrf.mxu0 }
 0x5f0   : > { %v4919_v14 = vpop.f32.mrf.mxu1 }
 0x5f1   : > { %v4920_v5 = vadd.f32 %v4919_v14, %v10667_v1  ;;  %v5200_v62 = vpop.f32.mrf.mxu0 }
 0x5f2   : > { %v9517_v54 = vadd.f32 %v5200_v62, %v4912_v20  ;;  %v4921_v37 = vpop.f32.mrf.mxu1  ;;  %v10672_v62 = vld [vmem:[#allocation40_spill] sm:$0xff] }
 0x5f3   : > { %v5202_v7 = vpop.f32.mrf.mxu0 }
 0x5f4   : > { %v4924_v28 = vpop.f32.mrf.mxu1 }
 0x5f5   : > { %v4925_v24 = vadd.f32 %v4924_v28, %v10668_v55  ;;  %v5205_v3 = vpop.f32.mrf.mxu0 }
 0x5f6   : > { %v9520_v31 = vadd.f32 %v5205_v3, %v4917_v0  ;;  %v4926_v47 = vpop.f32.mrf.mxu1  ;;  %v10674_v3 = vld [vmem:[#allocation17_spill] sm:$0xff] }
 0x5f7   : > { %v5207_v43 = vpop.f32.mrf.mxu0 }
 0x5f8   : > { %10669 = vst [vmem:[#allocation52_spill] sm:$0xff] %v9520_v31  ;;  %v4927_v59 = vpop.f32.mrf.mxu1 }
 0x5f9   : > { %v4928_v34 = vadd.f32 %v4927_v59, %v10670_v2  ;;  %v5208_v27 = vpop.f32.mrf.mxu0 }
 0x5fa   : > { %v9523_v9 = vadd.f32 %v5208_v27, %v4920_v5  ;;  %v4929_v14 = vpop.f32.mrf.mxu1  ;;  %v10676_v27 = vld [vmem:[#allocation49_spill] sm:$0xff] }
 0x5fb   : > { %v5210_v1 = vpop.f32.mrf.mxu0 }
 0x5fc   : > { %10671 = vst [vmem:[#allocation54_spill] sm:$0xff] %v9523_v9  ;;  %v4932_v20 = vpop.f32.mrf.mxu1 }
 0x5fd   : > { %v4933_v37 = vadd.f32 %v4932_v20, %v10672_v62  ;;  %v5213_v7 = vpop.f32.mrf.mxu0 }
 0x5fe   : > { %v9526_v46 = vadd.f32 %v5213_v7, %v4925_v24  ;;  %v4934_v28 = vpop.f32.mrf.mxu1  ;;  %v10678_v7 = vld [vmem:[#allocation45_spill] sm:$0xff] }
 0x5ff   : > { %v5215_v55 = vpop.f32.mrf.mxu0 }
 0x600   : > { %10673 = vst [vmem:[#allocation27_spill] sm:$0xff] %v9526_v46  ;;  %v4935_v0 = vpop.f32.mrf.mxu1 }
 0x601   : > { %v4936_v47 = vadd.f32 %v4935_v0, %v10674_v3  ;;  %v5216_v43 = vpop.f32.mrf.mxu0 }
 0x602   : > { %v9529_v31 = vadd.f32 %v5216_v43, %v4928_v34  ;;  %v4937_v59 = vpop.f32.mrf.mxu1  ;;  %v10680_v43 = vld [vmem:[#allocation20_spill] sm:$0xff] }
 0x603   : > { %v5218_v2 = vpop.f32.mrf.mxu0 }
 0x604   : > { %10675 = vst [vmem:[#allocation53_spill] sm:$0xff] %v9529_v31  ;;  %v4940_v5 = vpop.f32.mrf.mxu1 }
 0x605   : > { %v4941_v14 = vadd.f32 %v4940_v5, %v10676_v27  ;;  %v5221_v1 = vpop.f32.mrf.mxu0 }
 0x606   : > { %v9532_v9 = vadd.f32 %v5221_v1, %v4933_v37  ;;  %v4942_v20 = vpop.f32.mrf.mxu1  ;;  %v10682_v1 = vld [vmem:[#allocation55_spill] sm:$0xff] }
 0x607   : > { %v5223_v62 = vpop.f32.mrf.mxu0 }
 0x608   : > { %10677 = vst [vmem:[#allocation58_spill] sm:$0xff] %v9532_v9  ;;  %v4943_v24 = vpop.f32.mrf.mxu1 }
 0x609   : > { %v4944_v28 = vadd.f32 %v4943_v24, %v10678_v7  ;;  %v5224_v55 = vpop.f32.mrf.mxu0 }
 0x60a   : > { %v9535_v46 = vadd.f32 %v5224_v55, %v4936_v47  ;;  %v4945_v0 = vpop.f32.mrf.mxu1  ;;  %v10684_v55 = vld [vmem:[#allocation43_spill] sm:$0xff] }
 0x60b   : > { %v5226_v3 = vpop.f32.mrf.mxu0 }
 0x60c   : > { %10679 = vst [vmem:[#allocation66_spill] sm:$0xff] %v9535_v46  ;;  %v4948_v34 = vpop.f32.mrf.mxu1 }
 0x60d   : > { %v4949_v59 = vadd.f32 %v4948_v34, %v10680_v43  ;;  %v5229_v2 = vpop.f32.mrf.mxu0 }
 0x60e   : > { %v9538_v31 = vadd.f32 %v5229_v2, %v4941_v14  ;;  %v4950_v5 = vpop.f32.mrf.mxu1  ;;  %v10686_v2 = vld [vmem:[#allocation16_spill] sm:$0xff] }
 0x60f   : > { %v5231_v27 = vpop.f32.mrf.mxu0 }
 0x610   : > { %10681 = vst [vmem:[#allocation63_spill] sm:$0xff] %v9538_v31  ;;  %v4951_v37 = vpop.f32.mrf.mxu1 }
 0x611   : > { %v4952_v20 = vadd.f32 %v4951_v37, %v10682_v1  ;;  %v5232_v62 = vpop.f32.mrf.mxu0 }
 0x612   : > { %v9541_v9 = vadd.f32 %v5232_v62, %v4944_v28  ;;  %v4953_v24 = vpop.f32.mrf.mxu1  ;;  %v10688_v62 = vld [vmem:[#allocation56_spill] sm:$0xff] }
 0x613   : > { %v5234_v7 = vpop.f32.mrf.mxu0 }
 0x614   : > { %10683 = vst [vmem:[#allocation31_spill] sm:$0xff] %v9541_v9  ;;  %v4956_v47 = vpop.f32.mrf.mxu1 }
 0x615   : > { %v4957_v0 = vadd.f32 %v4956_v47, %v10684_v55  ;;  %v5237_v3 = vpop.f32.mrf.mxu0 }
 0x616   : > { %v9544_v46 = vadd.f32 %v5237_v3, %v4949_v59  ;;  %v4958_v34 = vpop.f32.mrf.mxu1  ;;  %v10690_v3 = vld [vmem:[#allocation46_spill] sm:$0xff] }
 0x617   : > { %v5239_v43 = vpop.f32.mrf.mxu0 }
 0x618   : > { %10685 = vst [vmem:[#allocation68_spill] sm:$0xff] %v9544_v46  ;;  %v4959_v14 = vpop.f32.mrf.mxu1 }
 0x619   : > { %v4960_v5 = vadd.f32 %v4959_v14, %v10686_v2  ;;  %v5240_v27 = vpop.f32.mrf.mxu0 }
 0x61a   : > { %v9547_v31 = vadd.f32 %v5240_v27, %v4952_v20  ;;  %v4961_v37 = vpop.f32.mrf.mxu1  ;;  %v10692_v27 = vld [vmem:[#allocation28_spill] sm:$0xff] }
 0x61b   : > { %v5242_v1 = vpop.f32.mrf.mxu0 }
 0x61c   : > { %10687 = vst [vmem:[#allocation64_spill] sm:$0xff] %v9547_v31  ;;  %v4964_v28 = vpop.f32.mrf.mxu1 }
 0x61d   : > { %v4965_v24 = vadd.f32 %v4964_v28, %v10688_v62  ;;  %v5245_v7 = vpop.f32.mrf.mxu0 }
 0x61e   : > { %v9550_v9 = vadd.f32 %v5245_v7, %v4957_v0  ;;  %v4966_v47 = vpop.f32.mrf.mxu1  ;;  %v10694_v7 = vld [vmem:[#allocation59_spill] sm:$0xff] }
 0x61f   : > { %v5247_v55 = vpop.f32.mrf.mxu0 }
 0x620   : > { %10689 = vst [vmem:[#allocation60_spill] sm:$0xff] %v9550_v9  ;;  %v4967_v59 = vpop.f32.mrf.mxu1 }
 0x621   : > { %v4968_v34 = vadd.f32 %v4967_v59, %v10690_v3  ;;  %v5248_v43 = vpop.f32.mrf.mxu0 }
 0x622   : > { %v9553_v46 = vadd.f32 %v5248_v43, %v4960_v5  ;;  %v4969_v14 = vpop.f32.mrf.mxu1  ;;  %v9564_v43 = vld [vmem:[%s9954_s5] ss:$0 sm:$0xff] }
 0x623   : > { %v5250_v2 = vpop.f32.mrf.mxu0 }
 0x624   : > { %10691 = vst [vmem:[#allocation33_spill] sm:$0xff] %v9553_v46  ;;  %v4972_v20 = vpop.f32.mrf.mxu1  ;;  %v9570_v2 = vld [vmem:[%s9955_s6] ss:$0 sm:$0xff] }
 0x625   : > { %v4973_v37 = vadd.f32 %v4972_v20, %v10692_v27  ;;  %v5253_v1 = vpop.f32.mrf.mxu0 }
 0x626   : > { %v9556_v31 = vadd.f32 %v5253_v1, %v4965_v24  ;;  %v4974_v28 = vpop.f32.mrf.mxu1  ;;  %v10697_v1 = vld [vmem:[#allocation51_spill] sm:$0xff] }
 0x627   : > { %v5255_v62 = vpop.f32.mrf.mxu0 }
 0x628   : > { %10693 = vst [vmem:[#allocation70_spill] sm:$0xff] %v9556_v31  ;;  %v4975_v0 = vpop.f32.mrf.mxu1 }
 0x629   : > { %v4976_v47 = vadd.f32 %v4975_v0, %v10694_v7  ;;  %v5256_v55 = vpop.f32.mrf.mxu0 }
 0x62a   : > { %v9559_v9 = vadd.f32 %v5256_v55, %v4968_v34  ;;  %v4977_v59 = vpop.f32.mrf.mxu1  ;;  %v10698_v55 = vld [vmem:[#allocation12_spill] sm:$0xff] }
 0x62b   : > { %v5258_v3 = vpop.f32.mrf.mxu0 }
 0x62c   : > { %10695 = vst [vmem:[#allocation72_spill] sm:$0xff] %v9559_v9  ;;  %v6348_v5 = vpop.f32.mrf.mxu1 }
 0x62d   : > { %v5311_v24 = vadd.f32 %v6348_v5, %v9324_v42  ;;  %v5261_v14 = vpop.f32.mrf.mxu0 }
 0x62e   : > { %v9572_v20 = vadd.f32 %v5261_v14, %v4973_v37  ;;  %v5302_v34 = vpop.f32.mrf.mxu1  ;;  %v6630_v14 = vld [vmem:[%s7028_s17 + $0x10] sm:$0xff] }
 0x62f   : > { %v5566_v27 = vmul.f32 %v9564_v43, %v5311_v24  ;;  %v5303_v28 = vadd.f32 %v5302_v34, %v10697_v1  ;;  %v5263_v62 = vpop.f32.mrf.mxu0  ;;  %v10699_v1 = vld [vmem:[#allocation23_spill] sm:$0xff] }
 0x630   : > { %10696 = vst [vmem:[#allocation71_spill] sm:$0xff] %v9572_v20  ;;  %v6349_v0 = vpop.f32.mrf.mxu1 }
 0x631   : > { %v5637_v7 = vadd.f32 %v9570_v2, %v5566_v27  ;;  %v5564_v42 = vmul.f32 %v9564_v43, %v5303_v28  ;;  %v5314_v59 = vadd.f32 %v6349_v0, %v10698_v55  ;;  %v5264_v3 = vpop.f32.mrf.mxu0  ;;  %v6631_v28 = vld [vmem:[%s7028_s17] sm:$0xff] }
 0x632   : > { %v9579_v5 = vadd.f32 %v5264_v3, %v4976_v47  ;;  %v5305_v37 = vpop.f32.mrf.mxu1 }
 0x633   : > { %v5701_v9 = vadd.f32 %v6630_v14, %v5637_v7  ;;  %v5635_v24 = vadd.f32 %v9570_v2, %v5564_v42  ;;  %v5567_v34 = vmul.f32 %v9564_v43, %v5314_v59  ;;  %v5306_v62 = vadd.f32 %v5305_v37, %v10699_v1  ;;  %v5266_v31 = vpop.f32.mrf.mxu0  ;;  %v6632_v42 = vld [vmem:[%s7028_s17 + $0x18] sm:$0xff] }
 0x634   : > { %v6352_v27 = vpop.f32.mrf.mxu1 }
 0x635   : > { %v5765_v20 = vmax.f32 %v5701_v9, 0.0  ;;  %v5699_v46 = vadd.f32 %v6631_v28, %v5635_v24  ;;  %v5638_v47 = vadd.f32 %v9570_v2, %v5567_v34  ;;  %v5565_v0 = vmul.f32 %v9564_v43, %v5306_v62  ;;  %v6633_v24 = vld [vmem:[%s7028_s17 + $0x8] sm:$0xff] }
 0x636   : > { %v5327_v55 = vadd.f32 %v6352_v27, %v9344_v15  ;;  %v5318_v7 = vpop.f32.mrf.mxu1 }
 0x637   : > { %5829 = vst [vmem:[%s9591_s30 + $0x10] sm:$0xff] %v5765_v20  ;;  %v5763_v31 = vmax.f32 %v5699_v46, 0.0  ;;  %v5702_v9 = vadd.f32 %v6632_v42, %v5638_v47  ;;  %v5636_v59 = vadd.f32 %v9570_v2, %v5565_v0  ;;  %v5319_v3 = vadd.f32 %v5318_v7, %v9334_v18  ;;  %v10700_v47 = vld [vmem:[#allocation24_spill] sm:$0xff] }
 0x638   : > { %v5570_v37 = vmul.f32 %v9564_v43, %v5327_v55  ;;  %v6353_v14 = vpop.f32.mrf.mxu1  ;;  %v6634_v55 = vld [vmem:[%s7028_s17 + $0x30] sm:$0xff]  ;;  %v6635_v42 = vld [vmem:[%s7028_s17 + $0x20] sm:$0xff] }
 0x639   : > { %5827 = vst [vmem:[%s9591_s30] sm:$0xff] %v5763_v31  ;;  %v5766_v15 = vmax.f32 %v5702_v9, 0.0  ;;  %v5700_v34 = vadd.f32 %v6633_v24, %v5636_v59  ;;  %v5568_v20 = vmul.f32 %v9564_v43, %v5319_v3  ;;  %v5330_v46 = vadd.f32 %v6353_v14, %v9348_v30  ;;  %v6636_v24 = vld [vmem:[%s7028_s17 + $0x38] sm:$0xff] }
 0x63a   : > { %v5641_v1 = vadd.f32 %v9570_v2, %v5570_v37  ;;  %v5321_v62 = vpop.f32.mrf.mxu1 }
 0x63b   : > { %5830 = vst [vmem:[%s9591_s30 + $0x18] sm:$0xff] %v5766_v15  ;;  %v5764_v27 = vmax.f32 %v5700_v34, 0.0  ;;  %v5639_v18 = vadd.f32 %v9570_v2, %v5568_v20  ;;  %v5571_v28 = vmul.f32 %v9564_v43, %v5330_v46  ;;  %v5322_v0 = vadd.f32 %v5321_v62, %v10700_v47 }
 0x63c   : > { %v5705_v7 = vadd.f32 %v6634_v55, %v5641_v1  ;;  %v6356_v31 = vpop.f32.mrf.mxu1 }
 0x63d   : > { %5828 = vst [vmem:[%s9591_s30 + $0x8] sm:$0xff] %v5764_v27  ;;  %v5703_v30 = vadd.f32 %v6635_v42, %v5639_v18  ;;  %v5642_v9 = vadd.f32 %v9570_v2, %v5571_v28  ;;  %v5569_v59 = vmul.f32 %v9564_v43, %v5322_v0  ;;  %v5343_v3 = vadd.f32 %v6356_v31, %v9369_v21  ;;  %v6637_v18 = vld [vmem:[%s7028_s17 + $0x28] sm:$0xff]  ;;  %v6638_v31 = vld [vmem:[%s7028_s17 + $0x50] sm:$0xff] }
 0x63e   : > { %v5769_v37 = vmax.f32 %v5705_v7, 0.0  ;;  %v5334_v14 = vpop.f32.mrf.mxu1 }
 0x63f   : > { %v5767_v15 = vmax.f32 %v5703_v30, 0.0  ;;  %v5706_v34 = vadd.f32 %v6636_v24, %v5642_v9  ;;  %v5640_v20 = vadd.f32 %v9570_v2, %v5569_v59  ;;  %v5574_v46 = vmul.f32 %v9564_v43, %v5343_v3 }
 0x640   : > { %5833 = vst [vmem:[%s9591_s30 + $0x30] sm:$0xff] %v5769_v37  ;;  %v5335_v1 = vadd.f32 %v5334_v14, %v9354_v50  ;;  %v6357_v62 = vpop.f32.mrf.mxu1 }
 0x641   : > { %5831 = vst [vmem:[%s9591_s30 + $0x20] sm:$0xff] %v5767_v15  ;;  %v5770_v27 = vmax.f32 %v5706_v34, 0.0  ;;  %v5704_v21 = vadd.f32 %v6637_v18, %v5640_v20  ;;  %v5645_v28 = vadd.f32 %v9570_v2, %v5574_v46  ;;  %v5346_v47 = vadd.f32 %v6357_v62, %v9373_v53  ;;  %v6639_v15 = vld [vmem:[%s7028_s17 + $0x40] sm:$0xff]  ;;  %v6640_v20 = vld [vmem:[%s7028_s17 + $0x58] sm:$0xff] }
 0x642   : > { %v5572_v0 = vmul.f32 %v9564_v43, %v5335_v1  ;;  %v5337_v55 = vpop.f32.mrf.mxu1 }
 0x643   : > { %5834 = vst [vmem:[%s9591_s30 + $0x38] sm:$0xff] %v5770_v27  ;;  %v5768_v7 = vmax.f32 %v5704_v21, 0.0  ;;  %v5709_v50 = vadd.f32 %v6638_v31, %v5645_v28  ;;  %v5575_v42 = vmul.f32 %v9564_v43, %v5346_v47  ;;  %v5338_v30 = vadd.f32 %v5337_v55, %v9358_v10 }
 0x644   : > { %v5643_v9 = vadd.f32 %v9570_v2, %v5572_v0  ;;  %v6360_v59 = vpop.f32.mrf.mxu1 }
 0x645   : > { %5832 = vst [vmem:[%s9591_s30 + $0x28] sm:$0xff] %v5768_v7  ;;  %v5773_v3 = vmax.f32 %v5709_v50, 0.0  ;;  %v5646_v53 = vadd.f32 %v9570_v2, %v5575_v42  ;;  %v5573_v37 = vmul.f32 %v9564_v43, %v5338_v30  ;;  %v5359_v14 = vadd.f32 %v6360_v59, %v9389_v61  ;;  %v6641_v61 = vld [vmem:[%s7028_s17 + $0x48] sm:$0xff]  ;;  %v6642_v50 = vld [vmem:[%s7028_s17 + $0x70] sm:$0xff] }
 0x646   : > { %v5707_v24 = vadd.f32 %v6639_v15, %v5643_v9  ;;  %v5350_v34 = vpop.f32.mrf.mxu1 }
 0x647   : > { %5837 = vst [vmem:[%s9591_s30 + $0x50] sm:$0xff] %v5773_v3  ;;  %v5710_v10 = vadd.f32 %v6640_v20, %v5646_v53  ;;  %v5644_v46 = vadd.f32 %v9570_v2, %v5573_v37  ;;  %v5578_v1 = vmul.f32 %v9564_v43, %v5359_v14  ;;  %v5351_v62 = vadd.f32 %v5350_v34, %v9379_v13  ;;  %v6643_v53 = vld [vmem:[%s7028_s17 + $0x60] sm:$0xff] }
 0x648   : > { %v5771_v27 = vmax.f32 %v5707_v24, 0.0  ;;  %v6361_v18 = vpop.f32.mrf.mxu1 }
 0x649   : > { %v5774_v21 = vmax.f32 %v5710_v10, 0.0  ;;  %v5708_v28 = vadd.f32 %v6641_v61, %v5644_v46  ;;  %v5649_v47 = vadd.f32 %v9570_v2, %v5578_v1  ;;  %v5576_v0 = vmul.f32 %v9564_v43, %v5351_v62  ;;  %v6644_v46 = vld [vmem:[%s7028_s17 + $0x78] sm:$0xff] }
 0x64a   : > { %5835 = vst [vmem:[%s9591_s30 + $0x40] sm:$0xff] %v5771_v27  ;;  %v5362_v55 = vadd.f32 %v6361_v18, %v9392_v32  ;;  %v5353_v7 = vpop.f32.mrf.mxu1  ;;  %v6645_v27 = vld [vmem:[%s7028_s17 + $0x68] sm:$0xff] }
 0x64b   : > { %5838 = vst [vmem:[%s9591_s30 + $0x58] sm:$0xff] %v5774_v21  ;;  %v5772_v31 = vmax.f32 %v5708_v28, 0.0  ;;  %v5713_v13 = vadd.f32 %v6642_v50, %v5649_v47  ;;  %v5647_v42 = vadd.f32 %v9570_v2, %v5576_v0  ;;  %v5354_v30 = vadd.f32 %v5353_v7, %v9383_v41 }
 0x64c   : > { %v5579_v9 = vmul.f32 %v9564_v43, %v5362_v55  ;;  %v6364_v59 = vpop.f32.mrf.mxu1 }
 0x64d   : > { %5836 = vst [vmem:[%s9591_s30 + $0x48] sm:$0xff] %v5772_v31  ;;  %v5777_v3 = vmax.f32 %v5713_v13, 0.0  ;;  %v5711_v32 = vadd.f32 %v6643_v53, %v5647_v42  ;;  %v5577_v37 = vmul.f32 %v9564_v43, %v5354_v30  ;;  %v5375_v14 = vadd.f32 %v6364_v59, %v9405_v60  ;;  %v6647_v30 = vld [vmem:[%s7028_s17 + $0x80] sm:$0xff] }
 0x64e   : > { %v5650_v15 = vadd.f32 %v9570_v2, %v5579_v9  ;;  %v5366_v24 = vpop.f32.mrf.mxu1 }
 0x64f   : > { %5841 = vst [vmem:[%s9591_s30 + $0x70] sm:$0xff] %v5777_v3  ;;  %v5775_v34 = vmax.f32 %v5711_v32, 0.0  ;;  %v5648_v41 = vadd.f32 %v9570_v2, %v5577_v37  ;;  %v5582_v20 = vmul.f32 %v9564_v43, %v5375_v14  ;;  %v5367_v10 = vadd.f32 %v5366_v24, %v9397_v8  ;;  %v6646_v8 = vld [vmem:[%s7028_s17 + $0x90] sm:$0xff]  ;;  %v6648_v37 = vld [vmem:[%s7028_s17 + $0x98] sm:$0xff] }
 0x650   : > { %v5714_v1 = vadd.f32 %v6644_v46, %v5650_v15  ;;  %v6365_v62 = vpop.f32.mrf.mxu1  ;;  %v6649_v46 = vld [vmem:[%s7028_s17 + $0x88] sm:$0xff] }
 0x651   : > { %5839 = vst [vmem:[%s9591_s30 + $0x60] sm:$0xff] %v5775_v34  ;;  %v5712_v60 = vadd.f32 %v6645_v27, %v5648_v41  ;;  %v5653_v18 = vadd.f32 %v9570_v2, %v5582_v20  ;;  %v5580_v21 = vmul.f32 %v9564_v43, %v5367_v10  ;;  %v5378_v61 = vadd.f32 %v6365_v62, %v9408_v26  ;;  %v6650_v27 = vld [vmem:[%s7028_s17 + $0xb0] sm:$0xff] }
 0x652   : > { %v5778_v28 = vmax.f32 %v5714_v1, 0.0  ;;  %v5369_v47 = vpop.f32.mrf.mxu1 }
 0x653   : > { %v5776_v0 = vmax.f32 %v5712_v60, 0.0  ;;  %v5717_v55 = vadd.f32 %v6646_v8, %v5653_v18  ;;  %v5651_v7 = vadd.f32 %v9570_v2, %v5580_v21  ;;  %v5583_v31 = vmul.f32 %v9564_v43, %v5378_v61 }
 0x654   : > { %5842 = vst [vmem:[%s9591_s30 + $0x78] sm:$0xff] %v5778_v28  ;;  %v5370_v50 = vadd.f32 %v5369_v47, %v9400_v52  ;;  %v6368_v13 = vpop.f32.mrf.mxu1 }
 0x655   : > { %5840 = vst [vmem:[%s9591_s30 + $0x68] sm:$0xff] %v5776_v0  ;;  %v5781_v42 = vmax.f32 %v5717_v55, 0.0  ;;  %v5715_v26 = vadd.f32 %v6647_v30, %v5651_v7  ;;  %v5654_v9 = vadd.f32 %v9570_v2, %v5583_v31  ;;  %v5391_v59 = vadd.f32 %v6368_v13, %v9421_v16  ;;  %v6652_v13 = vld [vmem:[%s7028_s17 + $0xb8] sm:$0xff] }
 0x656   : > { %v5581_v3 = vmul.f32 %v9564_v43, %v5370_v50  ;;  %v5382_v53 = vpop.f32.mrf.mxu1 }
 0x657   : > { %5845 = vst [vmem:[%s9591_s30 + $0x90] sm:$0xff] %v5781_v42  ;;  %v5779_v32 = vmax.f32 %v5715_v26, 0.0  ;;  %v5718_v52 = vadd.f32 %v6648_v37, %v5654_v9  ;;  %v5586_v14 = vmul.f32 %v9564_v43, %v5391_v59  ;;  %v5383_v15 = vadd.f32 %v5382_v53, %v9413_v51 }
 0x658   : > { %v5652_v24 = vadd.f32 %v9570_v2, %v5581_v3  ;;  %v6369_v34 = vpop.f32.mrf.mxu1  ;;  %v6653_v3 = vld [vmem:[%s7028_s17 + $0xa8] sm:$0xff] }
 0x659   : > { %5843 = vst [vmem:[%s9591_s30 + $0x80] sm:$0xff] %v5779_v32  ;;  %v5782_v41 = vmax.f32 %v5718_v52, 0.0  ;;  %v5657_v16 = vadd.f32 %v9570_v2, %v5586_v14  ;;  %v5584_v20 = vmul.f32 %v9564_v43, %v5383_v15  ;;  %v5394_v10 = vadd.f32 %v6369_v34, %v9424_v49  ;;  %v6651_v49 = vld [vmem:[%s7028_s17 + $0xa0] sm:$0xff]  ;;  %v6654_v34 = vld [vmem:[%s7028_s17 + $0xd0] sm:$0xff] }
 0x65a   : > { %v5716_v1 = vadd.f32 %v6649_v46, %v5652_v24  ;;  %v5385_v62 = vpop.f32.mrf.mxu1 }
 0x65b   : > { %5846 = vst [vmem:[%s9591_s30 + $0x98] sm:$0xff] %v5782_v41  ;;  %v5721_v51 = vadd.f32 %v6650_v27, %v5657_v16  ;;  %v5655_v60 = vadd.f32 %v9570_v2, %v5584_v20  ;;  %v5587_v18 = vmul.f32 %v9564_v43, %v5394_v10  ;;  %v5386_v21 = vadd.f32 %v5385_v62, %v9416_v17  ;;  %v6655_v20 = vld [vmem:[%s7028_s17 + $0xc0] sm:$0xff] }
 0x65c   : > { %v5780_v61 = vmax.f32 %v5716_v1, 0.0  ;;  %v6372_v28 = vpop.f32.mrf.mxu1 }
 0x65d   : > { %v5785_v47 = vmax.f32 %v5721_v51, 0.0  ;;  %v5719_v0 = vadd.f32 %v6651_v49, %v5655_v60  ;;  %v5658_v8 = vadd.f32 %v9570_v2, %v5587_v18  ;;  %v5585_v55 = vmul.f32 %v9564_v43, %v5386_v21  ;;  %v6657_v49 = vld [vmem:[%s7028_s17 + $0xc8] sm:$0xff] }
 0x65e   : > { %5844 = vst [vmem:[%s9591_s30 + $0x88] sm:$0xff] %v5780_v61  ;;  %v5407_v7 = vadd.f32 %v6372_v28, %v9437_v22  ;;  %v5398_v31 = vpop.f32.mrf.mxu1 }
 0x65f   : > { %5849 = vst [vmem:[%s9591_s30 + $0xb0] sm:$0xff] %v5785_v47  ;;  %v5783_v50 = vmax.f32 %v5719_v0, 0.0  ;;  %v5722_v17 = vadd.f32 %v6652_v13, %v5658_v8  ;;  %v5656_v42 = vadd.f32 %v9570_v2, %v5585_v55  ;;  %v5399_v30 = vadd.f32 %v5398_v31, %v9429_v39 }
 0x660   : > { %v5590_v26 = vmul.f32 %v9564_v43, %v5407_v7  ;;  %v6373_v9 = vpop.f32.mrf.mxu1 }
 0x661   : > { %5847 = vst [vmem:[%s9591_s30 + $0xa0] sm:$0xff] %v5783_v50  ;;  %v5786_v59 = vmax.f32 %v5722_v17, 0.0  ;;  %v5720_v22 = vadd.f32 %v6653_v3, %v5656_v42  ;;  %v5588_v53 = vmul.f32 %v9564_v43, %v5399_v30  ;;  %v5410_v32 = vadd.f32 %v6373_v9, %v9440_v4  ;;  %v6658_v50 = vld [vmem:[%s7028_s17 + $0xf0] sm:$0xff]  ;;  %v6659_v3 = vld [vmem:[%s7028_s17 + $0xe0] sm:$0xff] }
 0x662   : > { %v5661_v37 = vadd.f32 %v9570_v2, %v5590_v26  ;;  %v5401_v52 = vpop.f32.mrf.mxu1 }
 0x663   : > { %5850 = vst [vmem:[%s9591_s30 + $0xb8] sm:$0xff] %v5786_v59  ;;  %v5784_v14 = vmax.f32 %v5720_v22, 0.0  ;;  %v5659_v39 = vadd.f32 %v9570_v2, %v5588_v53  ;;  %v5591_v15 = vmul.f32 %v9564_v43, %v5410_v32  ;;  %v5402_v24 = vadd.f32 %v5401_v52, %v9432_v25  ;;  %v6656_v25 = vld [vmem:[%s7028_s17 + $0xd8] sm:$0xff] }
 0x664   : > { %v5725_v41 = vadd.f32 %v6654_v34, %v5661_v37  ;;  %v6376_v16 = vpop.f32.mrf.mxu1  ;;  %v6660_v32 = vld [vmem:[%s7028_s17 + $0xf8] sm:$0xff] }
 0x665   : > { %5848 = vst [vmem:[%s9591_s30 + $0xa8] sm:$0xff] %v5784_v14  ;;  %v5723_v4 = vadd.f32 %v6655_v20, %v5659_v39  ;;  %v5662_v10 = vadd.f32 %v9570_v2, %v5591_v15  ;;  %v5589_v46 = vmul.f32 %v9564_v43, %v5402_v24  ;;  %v5423_v1 = vadd.f32 %v6376_v16, %v9453_v38 }
 0x666   : > { %v5789_v62 = vmax.f32 %v5725_v41, 0.0  ;;  %v5414_v27 = vpop.f32.mrf.mxu1 }
 0x667   : > { %v5787_v51 = vmax.f32 %v5723_v4, 0.0  ;;  %v5726_v60 = vadd.f32 %v6656_v25, %v5662_v10  ;;  %v5660_v18 = vadd.f32 %v9570_v2, %v5589_v46  ;;  %v5594_v21 = vmul.f32 %v9564_v43, %v5423_v1  ;;  %v6662_v46 = vld [vmem:[%s7028_s17 + $0x110] sm:$0xff] }
 0x668   : > { %5853 = vst [vmem:[%s9591_s30 + $0xd0] sm:$0xff] %v5789_v62  ;;  %v5415_v61 = vadd.f32 %v5414_v27, %v9445_v63  ;;  %v6377_v28 = vpop.f32.mrf.mxu1 }
 0x669   : > { %5851 = vst [vmem:[%s9591_s30 + $0xc0] sm:$0xff] %v5787_v51  ;;  %v5790_v47 = vmax.f32 %v5726_v60, 0.0  ;;  %v5724_v38 = vadd.f32 %v6657_v49, %v5660_v18  ;;  %v5665_v0 = vadd.f32 %v9570_v2, %v5594_v21  ;;  %v5426_v8 = vadd.f32 %v6377_v28, %v9456_v57  ;;  %v6663_v60 = vld [vmem:[%s7028_s17 + $0x100] sm:$0xff] }
 0x66a   : > { %v5592_v55 = vmul.f32 %v9564_v43, %v5415_v61  ;;  %v5417_v7 = vpop.f32.mrf.mxu1 }
 0x66b   : > { %5854 = vst [vmem:[%s9591_s30 + $0xd8] sm:$0xff] %v5790_v47  ;;  %v5788_v31 = vmax.f32 %v5724_v38, 0.0  ;;  %v5729_v63 = vadd.f32 %v6658_v50, %v5665_v0  ;;  %v5595_v13 = vmul.f32 %v9564_v43, %v5426_v8  ;;  %v5418_v17 = vadd.f32 %v5417_v7, %v9448_v19  ;;  %v6664_v0 = vld [vmem:[%s7028_s17 + $0x118] sm:$0xff]  ;;  %v6665_v7 = vld [vmem:[%s7028_s17 + $0x108] sm:$0xff] }
 0x66c   : > { %v5663_v42 = vadd.f32 %v9570_v2, %v5592_v55  ;;  %v6380_v30 = vpop.f32.mrf.mxu1 }
 0x66d   : > { %5852 = vst [vmem:[%s9591_s30 + $0xc8] sm:$0xff] %v5788_v31  ;;  %v5793_v26 = vmax.f32 %v5729_v63, 0.0  ;;  %v5666_v57 = vadd.f32 %v9570_v2, %v5595_v13  ;;  %v5593_v9 = vmul.f32 %v9564_v43, %v5418_v17  ;;  %v5439_v59 = vadd.f32 %v6380_v30, %v9469_v36  ;;  %v6661_v36 = vld [vmem:[%s7028_s17 + $0xe8] sm:$0xff] }
 0x66e   : > { %v5727_v22 = vadd.f32 %v6659_v3, %v5663_v42  ;;  %v5430_v53 = vpop.f32.mrf.mxu1 }
 0x66f   : > { %5857 = vst [vmem:[%s9591_s30 + $0xf0] sm:$0xff] %v5793_v26  ;;  %v5730_v19 = vadd.f32 %v6660_v32, %v5666_v57  ;;  %v5664_v37 = vadd.f32 %v9570_v2, %v5593_v9  ;;  %v5598_v52 = vmul.f32 %v9564_v43, %v5439_v59  ;;  %v5431_v14 = vadd.f32 %v5430_v53, %v9461_v44 }
 0x670   : > { %v5791_v39 = vmax.f32 %v5727_v22, 0.0  ;;  %v6381_v15 = vpop.f32.mrf.mxu1  ;;  %v6667_v22 = vld [vmem:[%s7028_s17 + $0x120] sm:$0xff] }
 0x671   : > { %v5794_v24 = vmax.f32 %v5730_v19, 0.0  ;;  %v5728_v34 = vadd.f32 %v6661_v36, %v5664_v37  ;;  %v5669_v41 = vadd.f32 %v9570_v2, %v5598_v52  ;;  %v5596_v16 = vmul.f32 %v9564_v43, %v5431_v14  ;;  %v6668_v14 = vld [vmem:[%s7028_s17 + $0x138] sm:$0xff] }
 0x672   : > { %5855 = vst [vmem:[%s9591_s30 + $0xe0] sm:$0xff] %v5791_v39  ;;  %v5442_v20 = vadd.f32 %v6381_v15, %v9472_v56  ;;  %v5433_v4 = vpop.f32.mrf.mxu1 }
 0x673   : > { %5858 = vst [vmem:[%s9591_s30 + $0xf8] sm:$0xff] %v5794_v24  ;;  %v5792_v10 = vmax.f32 %v5728_v34, 0.0  ;;  %v5733_v44 = vadd.f32 %v6662_v46, %v5669_v41  ;;  %v5667_v1 = vadd.f32 %v9570_v2, %v5596_v16  ;;  %v5434_v62 = vadd.f32 %v5433_v4, %v9464_v35  ;;  %v6670_v46 = vld [vmem:[%s7028_s17 + $0x150] sm:$0xff] }
 0x674   : > { %v5599_v27 = vmul.f32 %v9564_v43, %v5442_v20  ;;  %v6384_v51 = vpop.f32.mrf.mxu1  ;;  %v6669_v20 = vld [vmem:[%s7028_s17 + $0x128] sm:$0xff] }
 0x675   : > { %5856 = vst [vmem:[%s9591_s30 + $0xe8] sm:$0xff] %v5792_v10  ;;  %v5797_v25 = vmax.f32 %v5733_v44, 0.0  ;;  %v5731_v56 = vadd.f32 %v6663_v60, %v5667_v1  ;;  %v5597_v18 = vmul.f32 %v9564_v43, %v5434_v62  ;;  %v5455_v21 = vadd.f32 %v6384_v51, %v9485_v40 }
 0x676   : > { %v5670_v61 = vadd.f32 %v9570_v2, %v5599_v27  ;;  %v5446_v28 = vpop.f32.mrf.mxu1 }
 0x677   : > { %5861 = vst [vmem:[%s9591_s30 + $0x110] sm:$0xff] %v5797_v25  ;;  %v5795_v47 = vmax.f32 %v5731_v56, 0.0  ;;  %v5668_v35 = vadd.f32 %v9570_v2, %v5597_v18  ;;  %v5602_v49 = vmul.f32 %v9564_v43, %v5455_v21  ;;  %v5447_v38 = vadd.f32 %v5446_v28, %v9477_v11  ;;  %v6666_v11 = vld [vmem:[%s7028_s17 + $0x130] sm:$0xff] }
 0x678   : > { %v5734_v8 = vadd.f32 %v6664_v0, %v5670_v61  ;;  %v6385_v55 = vpop.f32.mrf.mxu1 }
 0x679   : > { %5859 = vst [vmem:[%s9591_s30 + $0x100] sm:$0xff] %v5795_v47  ;;  %v5732_v40 = vadd.f32 %v6665_v7, %v5668_v35  ;;  %v5673_v31 = vadd.f32 %v9570_v2, %v5602_v49  ;;  %v5600_v50 = vmul.f32 %v9564_v43, %v5447_v38  ;;  %v5458_v63 = vadd.f32 %v6385_v55, %v9488_v48  ;;  %v6672_v47 = vld [vmem:[%s7028_s17 + $0x158] sm:$0xff]  ;;  %v6673_v55 = vld [vmem:[%s7028_s17 + $0x148] sm:$0xff] }
 0x67a   : > { %v5798_v13 = vmax.f32 %v5734_v8, 0.0  ;;  %v5449_v17 = vpop.f32.mrf.mxu1 }
 0x67b   : > { %v5796_v42 = vmax.f32 %v5732_v40, 0.0  ;;  %v5737_v30 = vadd.f32 %v6666_v11, %v5673_v31  ;;  %v5671_v26 = vadd.f32 %v9570_v2, %v5600_v50  ;;  %v5603_v57 = vmul.f32 %v9564_v43, %v5458_v63  ;;  %v6674_v11 = vld [vmem:[%s7028_s17 + $0x170] sm:$0xff] }
 0x67c   : > { %5862 = vst [vmem:[%s9591_s30 + $0x118] sm:$0xff] %v5798_v13  ;;  %v5450_v9 = vadd.f32 %v5449_v17, %v9480_v6  ;;  %v6388_v59 = vpop.f32.mrf.mxu1  ;;  %v10701_v17 = vld [vmem:[#allocation19_spill] sm:$0xff] }
 0x67d   : > { %5860 = vst [vmem:[%s9591_s30 + $0x108] sm:$0xff] %v5796_v42  ;;  %v5801_v3 = vmax.f32 %v5737_v30, 0.0  ;;  %v5735_v48 = vadd.f32 %v6667_v22, %v5671_v26  ;;  %v5674_v53 = vadd.f32 %v9570_v2, %v5603_v57  ;;  %v5471_v32 = vadd.f32 %v6388_v59, %v9501_v23  ;;  %v6675_v57 = vld [vmem:[%s7028_s17 + $0x160] sm:$0xff] }
 0x67e   : > { %v5601_v19 = vmul.f32 %v9564_v43, %v5450_v9  ;;  %v5462_v37 = vpop.f32.mrf.mxu1 }
 0x67f   : > { %5865 = vst [vmem:[%s9591_s30 + $0x130] sm:$0xff] %v5801_v3  ;;  %v5799_v52 = vmax.f32 %v5735_v48, 0.0  ;;  %v5738_v6 = vadd.f32 %v6668_v14, %v5674_v53  ;;  %v5606_v39 = vmul.f32 %v9564_v43, %v5471_v32  ;;  %v5463_v15 = vadd.f32 %v5462_v37, %v9493_v12  ;;  %v10702_v3 = vld [vmem:[#allocation27_spill] sm:$0xff] }
 0x680   : > { %v5672_v24 = vadd.f32 %v9570_v2, %v5601_v19  ;;  %v6389_v36 = vpop.f32.mrf.mxu1  ;;  %v6676_v19 = vld [vmem:[%s7028_s17 + $0x178] sm:$0xff] }
 0x681   : > { %5863 = vst [vmem:[%s9591_s30 + $0x120] sm:$0xff] %v5799_v52  ;;  %v5802_v34 = vmax.f32 %v5738_v6, 0.0  ;;  %v5677_v23 = vadd.f32 %v9570_v2, %v5606_v39  ;;  %v5604_v41 = vmul.f32 %v9564_v43, %v5463_v15  ;;  %v5474_v16 = vadd.f32 %v6389_v36, %v9504_v45  ;;  %v6671_v45 = vld [vmem:[%s7028_s17 + $0x140] sm:$0xff]  ;;  %v6677_v36 = vld [vmem:[%s7028_s17 + $0x168] sm:$0xff] }
 0x682   : > { %v5736_v4 = vadd.f32 %v6669_v20, %v5672_v24  ;;  %v5465_v10 = vpop.f32.mrf.mxu1  ;;  %v10703_v6 = vld [vmem:[#allocation52_spill] sm:$0xff] }
 0x683   : > { %5866 = vst [vmem:[%s9591_s30 + $0x138] sm:$0xff] %v5802_v34  ;;  %v5741_v12 = vadd.f32 %v6670_v46, %v5677_v23  ;;  %v5675_v44 = vadd.f32 %v9570_v2, %v5604_v41  ;;  %v5607_v1 = vmul.f32 %v9564_v43, %v5474_v16  ;;  %v5466_v62 = vadd.f32 %v5465_v10, %v9496_v58  ;;  %v10704_v41 = vld [vmem:[#allocation53_spill] sm:$0xff]  ;;  %v6678_v46 = vld [vmem:[%s7028_s17 + $0x190] sm:$0xff] }
 0x684   : > { %v5800_v27 = vmax.f32 %v5736_v4, 0.0  ;;  %v6392_v51 = vpop.f32.mrf.mxu1 }
 0x685   : > { %v5805_v25 = vmax.f32 %v5741_v12, 0.0  ;;  %v5739_v60 = vadd.f32 %v6671_v45, %v5675_v44  ;;  %v5678_v56 = vadd.f32 %v9570_v2, %v5607_v1  ;;  %v5605_v18 = vmul.f32 %v9564_v43, %v5466_v62  ;;  %v10705_v1 = vld [vmem:[#allocation54_spill] sm:$0xff] }
 0x686   : > { %5864 = vst [vmem:[%s9591_s30 + $0x128] sm:$0xff] %v5800_v27  ;;  %v5487_v21 = vadd.f32 %v6392_v51, %v9514_v29  ;;  %v5478_v61 = vpop.f32.mrf.mxu1 }
 0x687   : > { %5869 = vst [vmem:[%s9591_s30 + $0x150] sm:$0xff] %v5805_v25  ;;  %v5803_v28 = vmax.f32 %v5739_v60, 0.0  ;;  %v5742_v58 = vadd.f32 %v6672_v47, %v5678_v56  ;;  %v5676_v35 = vadd.f32 %v9570_v2, %v5605_v18  ;;  %v5479_v49 = vadd.f32 %v5478_v61, %v9508_v33  ;;  %v10706_v56 = vld [vmem:[#allocation63_spill] sm:$0xff] }
 0x688   : > { %v5610_v38 = vmul.f32 %v9564_v43, %v5487_v21  ;;  %v6393_v0 = vpop.f32.mrf.mxu1  ;;  %v6679_v21 = vld [vmem:[%s7028_s17 + $0x180] sm:$0xff]  ;;  %v6680_v47 = vld [vmem:[%s7028_s17 + $0x198] sm:$0xff] }
 0x689   : > { %5867 = vst [vmem:[%s9591_s30 + $0x140] sm:$0xff] %v5803_v28  ;;  %v5806_v8 = vmax.f32 %v5742_v58, 0.0  ;;  %v5740_v29 = vadd.f32 %v6673_v55, %v5676_v35  ;;  %v5608_v7 = vmul.f32 %v9564_v43, %v5479_v49  ;;  %v5490_v40 = vadd.f32 %v6393_v0, %v9517_v54 }
 0x68a   : > { %v5681_v31 = vadd.f32 %v9570_v2, %v5610_v38  ;;  %v5481_v50 = vpop.f32.mrf.mxu1  ;;  %v10707_v38 = vld [vmem:[#allocation58_spill] sm:$0xff] }
 0x68b   : > { %5870 = vst [vmem:[%s9591_s30 + $0x158] sm:$0xff] %v5806_v8  ;;  %v5804_v63 = vmax.f32 %v5740_v29, 0.0  ;;  %v5679_v33 = vadd.f32 %v9570_v2, %v5608_v7  ;;  %v5611_v13 = vmul.f32 %v9564_v43, %v5490_v40  ;;  %v5482_v42 = vadd.f32 %v5481_v50, %v10701_v17  ;;  %v6681_v7 = vld [vmem:[%s7028_s17 + $0x188] sm:$0xff] }
 0x68c   : > { %v5745_v30 = vadd.f32 %v6674_v11, %v5681_v31  ;;  %v6396_v26 = vpop.f32.mrf.mxu1 }
 0x68d   : > { %5868 = vst [vmem:[%s9591_s30 + $0x148] sm:$0xff] %v5804_v63  ;;  %v5743_v54 = vadd.f32 %v6675_v57, %v5679_v33  ;;  %v5682_v9 = vadd.f32 %v9570_v2, %v5611_v13  ;;  %v5609_v59 = vmul.f32 %v9564_v43, %v5482_v42  ;;  %v5503_v22 = vadd.f32 %v6396_v26, %v10702_v3  ;;  %v10708_v63 = vld [vmem:[#allocation31_spill] sm:$0xff]  ;;  %v6682_v42 = vld [vmem:[%s7028_s17 + $0x1b0] sm:$0xff]  ;;  %v6683_v3 = vld [vmem:[%s7028_s17 + $0x1a0] sm:$0xff] }
 0x68e   : > { %v5809_v48 = vmax.f32 %v5745_v30, 0.0  ;;  %v5494_v53 = vpop.f32.mrf.mxu1  ;;  %v10709_v26 = vld [vmem:[#allocation66_spill] sm:$0xff] }
 0x68f   : > { %v5807_v32 = vmax.f32 %v5743_v54, 0.0  ;;  %v5746_v37 = vadd.f32 %v6676_v19, %v5682_v9  ;;  %v5680_v52 = vadd.f32 %v9570_v2, %v5609_v59  ;;  %v5614_v14 = vmul.f32 %v9564_v43, %v5503_v22 }
 0x690   : > { %5873 = vst [vmem:[%s9591_s30 + $0x170] sm:$0xff] %v5809_v48  ;;  %v5495_v39 = vadd.f32 %v5494_v53, %v10703_v6  ;;  %v6397_v15 = vpop.f32.mrf.mxu1  ;;  %v10710_v53 = vld [vmem:[#allocation60_spill] sm:$0xff] }
 0x691   : > { %5871 = vst [vmem:[%s9591_s30 + $0x160] sm:$0xff] %v5807_v32  ;;  %v5810_v24 = vmax.f32 %v5746_v37, 0.0  ;;  %v5744_v34 = vadd.f32 %v6677_v36, %v5680_v52  ;;  %v5685_v23 = vadd.f32 %v9570_v2, %v5614_v14  ;;  %v5506_v16 = vadd.f32 %v6397_v15, %v10704_v41 }
 0x692   : > { %v5612_v20 = vmul.f32 %v9564_v43, %v5495_v39  ;;  %v5497_v4 = vpop.f32.mrf.mxu1  ;;  %v10711_v39 = vld [vmem:[#allocation68_spill] sm:$0xff] }
 0x693   : > { %5874 = vst [vmem:[%s9591_s30 + $0x178] sm:$0xff] %v5810_v24  ;;  %v5808_v10 = vmax.f32 %v5744_v34, 0.0  ;;  %v5749_v12 = vadd.f32 %v6678_v46, %v5685_v23  ;;  %v5615_v44 = vmul.f32 %v9564_v43, %v5506_v16  ;;  %v5498_v62 = vadd.f32 %v5497_v4, %v10705_v1  ;;  %v6684_v24 = vld [vmem:[%s7028_s17 + $0x1b8] sm:$0xff]  ;;  %v6685_v23 = vld [vmem:[%s7028_s17 + $0x1a8] sm:$0xff]  ;;  %v6686_v1 = vld [vmem:[%s7028_s17 + $0x1d0] sm:$0xff] }
 0x694   : > { %v5683_v27 = vadd.f32 %v9570_v2, %v5612_v20  ;;  %v6400_v51 = vpop.f32.mrf.mxu1  ;;  %v10712_v4 = vld [vmem:[#allocation33_spill] sm:$0xff] }
 0x695   : > { %5872 = vst [vmem:[%s9591_s30 + $0x168] sm:$0xff] %v5808_v10  ;;  %v5813_v25 = vmax.f32 %v5749_v12, 0.0  ;;  %v5686_v45 = vadd.f32 %v9570_v2, %v5615_v44  ;;  %v5613_v60 = vmul.f32 %v9564_v43, %v5498_v62  ;;  %v5519_v18 = vadd.f32 %v6400_v51, %v10706_v56 }
 0x696   : > { %v5747_v61 = vadd.f32 %v6679_v21, %v5683_v27  ;;  %v5510_v28 = vpop.f32.mrf.mxu1 }
 0x697   : > { %5877 = vst [vmem:[%s9591_s30 + $0x190] sm:$0xff] %v5813_v25  ;;  %v5750_v58 = vadd.f32 %v6680_v47, %v5686_v45  ;;  %v5684_v35 = vadd.f32 %v9570_v2, %v5613_v60  ;;  %v5618_v49 = vmul.f32 %v9564_v43, %v5519_v18  ;;  %v5511_v0 = vadd.f32 %v5510_v28, %v10707_v38  ;;  %v10713_v25 = vld [vmem:[#allocation64_spill] sm:$0xff]  ;;  %v10714_v28 = vld [vmem:[#allocation71_spill] sm:$0xff] }
 0x698   : > { %v5811_v8 = vmax.f32 %v5747_v61, 0.0  ;;  %v6401_v55 = vpop.f32.mrf.mxu1  ;;  %v6687_v18 = vld [vmem:[%s7028_s17 + $0x1c0] sm:$0xff]  ;;  %v6688_v38 = vld [vmem:[%s7028_s17 + $0x1d8] sm:$0xff] }
 0x699   : > { %v5814_v29 = vmax.f32 %v5750_v58, 0.0  ;;  %v5748_v40 = vadd.f32 %v6681_v7, %v5684_v35  ;;  %v5689_v31 = vadd.f32 %v9570_v2, %v5618_v49  ;;  %v5616_v50 = vmul.f32 %v9564_v43, %v5511_v0 }
 0x69a   : > { %5875 = vst [vmem:[%s9591_s30 + $0x180] sm:$0xff] %v5811_v8  ;;  %v5522_v33 = vadd.f32 %v6401_v55, %v10708_v63  ;;  %v5513_v13 = vpop.f32.mrf.mxu1  ;;  %v10715_v55 = vld [vmem:[#allocation70_spill] sm:$0xff] }
 0x69b   : > { %5878 = vst [vmem:[%s9591_s30 + $0x198] sm:$0xff] %v5814_v29  ;;  %v5812_v17 = vmax.f32 %v5748_v40, 0.0  ;;  %v5753_v11 = vadd.f32 %v6682_v42, %v5689_v31  ;;  %v5687_v30 = vadd.f32 %v9570_v2, %v5616_v50  ;;  %v5514_v57 = vadd.f32 %v5513_v13, %v10709_v26  ;;  %v6689_v13 = vld [vmem:[%s7028_s17 + $0x1c8] sm:$0xff] }
 0x69c   : > { %v5619_v54 = vmul.f32 %v9564_v43, %v5522_v33  ;;  %v6404_v9 = vpop.f32.mrf.mxu1 }
 0x69d   : > { %5876 = vst [vmem:[%s9591_s30 + $0x188] sm:$0xff] %v5812_v17  ;;  %v5817_v59 = vmax.f32 %v5753_v11, 0.0  ;;  %v5751_v22 = vadd.f32 %v6683_v3, %v5687_v30  ;;  %v5617_v48 = vmul.f32 %v9564_v43, %v5514_v57  ;;  %v5535_v32 = vadd.f32 %v6404_v9, %v10710_v53  ;;  %v6690_v11 = vld [vmem:[%s7028_s17 + $0x1f0] sm:$0xff]  ;;  %v6691_v3 = vld [vmem:[%s7028_s17 + $0x1e0] sm:$0xff] }
 0x69e   : > { %v5690_v19 = vadd.f32 %v9570_v2, %v5619_v54  ;;  %v5526_v37 = vpop.f32.mrf.mxu1  ;;  %v10716_v54 = vld [vmem:[#allocation72_spill] sm:$0xff] }
 0x69f   : > { %5881 = vst [vmem:[%s9591_s30 + $0x1b0] sm:$0xff] %v5817_v59  ;;  %v5815_v52 = vmax.f32 %v5751_v22, 0.0  ;;  %v5688_v14 = vadd.f32 %v9570_v2, %v5617_v48  ;;  %v5622_v6 = vmul.f32 %v9564_v43, %v5535_v32  ;;  %v5527_v15 = vadd.f32 %v5526_v37, %v10711_v39 }
 0x6a0   : > { %v5754_v36 = vadd.f32 %v6684_v24, %v5690_v19  ;;  %v6405_v34 = vpop.f32.mrf.mxu1  ;;  %v6692_v19 = vld [vmem:[%s7028_s17 + $0x1f8] sm:$0xff] }
 0x6a1   : > { %5879 = vst [vmem:[%s9591_s30 + $0x1a0] sm:$0xff] %v5815_v52  ;;  %v5752_v41 = vadd.f32 %v6685_v23, %v5688_v14  ;;  %v5693_v16 = vadd.f32 %v9570_v2, %v5622_v6  ;;  %v5620_v20 = vmul.f32 %v9564_v43, %v5527_v15  ;;  %v5538_v10 = vadd.f32 %v6405_v34, %v10712_v4  ;;  %v6693_v6 = vld [vmem:[%s7028_s17 + $0x1e8] sm:$0xff]  ;;  %s6852_s17 = smov [#allocation8]  }
 0x6a2   : > { %v5818_v46 = vmax.f32 %v5754_v36, 0.0  ;;  %v5529_v12 = vpop.f32.mrf.mxu1  ;;  %s6778_s13 = sshll.u32 %s6852_s17, 4  ;;  %s6779_s13 = int_to_ptr.vmem [resolvable:$false] %s6778_s13 }
 0x6a3   : > { %v5816_v44 = vmax.f32 %v5752_v41, 0.0  ;;  %v5757_v62 = vadd.f32 %v6686_v1, %v5693_v16  ;;  %v5691_v27 = vadd.f32 %v9570_v2, %v5620_v20  ;;  %v5623_v51 = vmul.f32 %v9564_v43, %v5538_v10  ;;  %s6780_s19 = scalar_lea.vmem %s6779_s13, 16384  ;;  %p6781_p6 = scmp.lt.s32.totalorder %s9904_s9, %s6779_s13 }
 0x6a4   : > { %5882 = vst [vmem:[%s9591_s30 + $0x1b8] sm:$0xff] %v5818_v46  ;;  %v5530_v45 = vadd.f32 %v5529_v12, %v10713_v25  ;;  %v6408_v60 = vpop.f32.mrf.mxu1  ;;  %p6782_p12 = scmp.lt.s32.totalorder %s6780_s19, %s6774_s28 }
 0x6a5   : > { %5880 = vst [vmem:[%s9591_s30 + $0x1a8] sm:$0xff] %v5816_v44  ;;  %v5821_v56 = vmax.f32 %v5757_v62, 0.0  ;;  %v5755_v21 = vadd.f32 %v6687_v18, %v5691_v27  ;;  %v5694_v61 = vadd.f32 %v9570_v2, %v5623_v51  ;;  %v5551_v47 = vadd.f32 %v6408_v60, %v10714_v28 }
 0x6a6   : > { %v5621_v58 = vmul.f32 %v9564_v43, %v5530_v45  ;;  %v5542_v35 = vpop.f32.mrf.mxu1  ;;  %p6783_p7 = por %p6782_p12, %p6781_p6 }
 0x6a7   : > { %5885 = vst [vmem:[%s9591_s30 + $0x1d0] sm:$0xff] %v5821_v56  ;;  %v5819_v49 = vmax.f32 %v5755_v21, 0.0  ;;  %v5758_v0 = vadd.f32 %v6688_v38, %v5694_v61  ;;  %v5626_v8 = vmul.f32 %v9564_v43, %v5551_v47  ;;  %v5543_v29 = vadd.f32 %v5542_v35, %v10715_v55 }
 0x6a8   : > { %v5692_v7 = vadd.f32 %v9570_v2, %v5621_v58  ;;  %v6409_v40 = vpop.f32.mrf.mxu1  ;;  %p6784_p9 = pnand %p6783_p7, %p6777_p2 }
 0x6a9   : > { %5883 = vst [vmem:[%s9591_s30 + $0x1c0] sm:$0xff] %v5819_v49  ;;  %v5822_v31 = vmax.f32 %v5758_v0, 0.0  ;;  %v5697_v50 = vadd.f32 %v9570_v2, %v5626_v8  ;;  %v5624_v63 = vmul.f32 %v9564_v43, %v5543_v29  ;;  %v5554_v33 = vadd.f32 %v6409_v40, %v9579_v5 }
 0x6aa   : > { %v5756_v17 = vadd.f32 %v6689_v13, %v5692_v7  ;;  %v5545_v42 = vpop.f32.mrf.mxu1 }
 0x6ab   : > { %5886 = vst [vmem:[%s9591_s30 + $0x1d8] sm:$0xff] %v5822_v31  ;;  %v5761_v30 = vadd.f32 %v6690_v11, %v5697_v50  ;;  %v5695_v26 = vadd.f32 %v9570_v2, %v5624_v63  ;;  %v5627_v57 = vmul.f32 %v9564_v43, %v5554_v33  ;;  %v5546_v9 = vadd.f32 %v5545_v42, %v10716_v54 }
 0x6ac   : > { %v5820_v59 = vmax.f32 %v5756_v17, 0.0 }
 0x6ad   : > { %v5825_v5 = vmax.f32 %v5761_v30, 0.0  ;;  %v5759_v22 = vadd.f32 %v6691_v3, %v5695_v26  ;;  %v5698_v48 = vadd.f32 %v9570_v2, %v5627_v57  ;;  %v5625_v53 = vmul.f32 %v9564_v43, %v5546_v9 }
 0x6ae   : > { %5884 = vst [vmem:[%s9591_s30 + $0x1c8] sm:$0xff] %v5820_v59 }
 0x6af   : > { %5889 = vst [vmem:[%s9591_s30 + $0x1f0] sm:$0xff] %v5825_v5  ;;  %v5823_v32 = vmax.f32 %v5759_v22, 0.0  ;;  %v5762_v37 = vadd.f32 %v6692_v19, %v5698_v48  ;;  %v5696_v52 = vadd.f32 %v9570_v2, %v5625_v53 }
 0x6b1   : > { %5887 = vst [vmem:[%s9591_s30 + $0x1e0] sm:$0xff] %v5823_v32  ;;  %v5826_v14 = vmax.f32 %v5762_v37, 0.0  ;;  %v5760_v39 = vadd.f32 %v6693_v6, %v5696_v52 }
 0x6b3   : > { %5890 = vst [vmem:[%s9591_s30 + $0x1f8] sm:$0xff] %v5826_v14  ;;  %v5824_v43 = vmax.f32 %v5760_v39, 0.0 }
 0x6b5   : > { %5888 = vst [vmem:[%s9591_s30 + $0x1e8] sm:$0xff] %v5824_v43 }
 0x6b6   : > { %6787 = shalt.err (!%p6784_p9)
}
 0x6b7   : > { %s6788_s10 = scalar_lea.hbm %s9902_s21, 8192  ;;  %s6792_s16 = scalar_lea.hbm %s9956_s7, 16384 }
 0x6b8   : > { %p6789_p13 = scmp.ne.s32.totalorder %s9902_s21, %s6788_s10  ;;  %p6793_p4 = scmp.lt.s32.totalorder %s9902_s21, %s9956_s7 }
 0x6b9   : > { %p6794_p8 = scmp.lt.s32.totalorder %s6792_s16, %s6788_s10 }
 0x6ba   : > { %p6790_p5 = pnand %p6789_p13, %p10717_p10 }
 0x6bb   : > { %p6795_p3 = por %p6794_p8, %p6793_p4 }
 0x6bc   : > { %p6791_p0 = pneg %p6790_p5 }
 0x6be   : > { %p6796_p11 = pnand %p6795_p3, %p6791_p0 }
 0x6c0   : > { %6799 = shalt.err (!%p6796_p11)
}
 0x6c1   : > { %s6853_s18 = smov 128   ;;  %s6854_s20 = smov 8  }
 0x6c2   : > { %6420 = dma.vmem_to_hbm [thread:$0]  (%p10717_p10), %s9904_s9, 8192, %s9902_s21, %s5892_s22, %s6853_s18, %s6853_s18, %s6854_s20  }
 0x6c3 PF: > { %s5921_s28 = sand.u32 1, %s6830_s24   ;;  %p10718_p1 = scmp.ne.s32.totalorder %s10162_s8, 0 }
 0x6c4   : > { %p10719_p2 = scmp.ge.s32.totalorder %s6842_s27, 2  ;;  %s5922_s17 = scalar_lea.sflag [#allocation4], %s5921_s28 }
 0x6c6   : > { %p6434_p6 = pnand %p10719_p2, %p10718_p1 }
 0x6c8   : > { %p6435_p12 = pneg %p6434_p6 }
 0x6ca   : > { %6825 = dma.done.wait (%p6435_p12), %s5922_s17, 8192  }
 0x6cb   : > { %6827 = vsyncadd (%p6435_p12), %s5922_s17, 4294959104  ;;  %p21_p7 = scmp.ge.s32.totalorder %s6967_s23, 4   ;;  %s10720_s24 = smov %s6834_s25 }
 0x6cc   : > { %s10721_s25 = smov %s6838_s26  ;;  %s10722_s26 = smov %s6983_s12 }
 0x6cd   : > { %s10723_s27 = smov %s6967_s23  ;;  %23 = sbr.rel (!%p21_p7) target bundleno = 8 (0x8), region = 101 }
 0x6d2   :  { %5927 = vsyncpa [#allocation3], 1 }
 0x6d3   :  { %5929 = vsyncpa [#allocation3 + $0x1], 1 }
 0x6d4   :  { %5930 = vsyncpa [#allocation6], 1 }
 0x6d5   :  { %5931 = vsyncpa [#allocation4], 1 }
 0x6d6   :  { %5933 = vsyncpa [#allocation4 + $0x1], 1 }

</bundles_post_ra>
